<compile_context>
chip_gen: v5e
topology: v5e:2x2
jax: 0.10.0
libtpu: 0.0.40
codegen_flags: <defaults>
</compile_context>

<pallas_src>
import functools
import math

import jax
import jax.numpy as jnp
from jax.experimental import pallas as pl
from jax.experimental.pallas import tpu as pltpu


def _seq_parallel_attention_kernel(xq_ref, xkv_ref, wq_ref, wkv_ref, wo_ref,
                                   bo_ref, out_ref,
                                   q_sc, m_sc, l_sc, acc_sc,
                                   *, num_heads, head_dim, mxu_dtype):
    # xq_ref : (1, tq, C)   query-tile slab of x
    # xkv_ref: (1, tk, C)   kv-tile slab of x
    # wq_ref : (C, C)       Q projection weight (scale pre-folded), mxu_dtype
    # wkv_ref: (C, 2C)      fused K|V projection weight, mxu_dtype
    # wo_ref : (C, C)       output projection weight, mxu_dtype
    # bo_ref : (1, C)       output projection bias, f32
    # out_ref: (1, tq, C)
    # q_sc   : (tq, C)      projected+scaled Q tile (mxu_dtype), resident over kv steps
    # m_sc   : (H, tq, 1)   online-softmax running max (f32)
    # l_sc   : (H, tq, 1)   online-softmax running denominator (f32)
    # acc_sc : (tq, C)      head-concat output accumulator (f32)
    ki = pl.program_id(2)
    C = num_heads * head_dim

    @pl.when(ki == 0)
    def _init():
        # Lane-dense Q projection once per (batch, q-tile): (tq,C) x (C,C).
        xq = xq_ref[0].astype(mxu_dtype)
        q_sc[...] = jnp.dot(xq, wq_ref[...],
                            preferred_element_type=jnp.float32).astype(mxu_dtype)
        m_sc[...] = jnp.full_like(m_sc, -jnp.inf)
        l_sc[...] = jnp.zeros_like(l_sc)
        acc_sc[...] = jnp.zeros_like(acc_sc)

    # Lane-dense fused K/V projection for this KV tile: (tk,C) x (C,2C).
    # (Recomputed per q-tile; for the fully fused kernel this is the accepted
    # tradeoff vs. materializing K/V in HBM.)
    xkv = xkv_ref[0].astype(mxu_dtype)
    kv = jnp.dot(xkv, wkv_ref[...],
                 preferred_element_type=jnp.float32).astype(mxu_dtype)  # (tk, 2C)

    # Per-head online softmax; H is small and static, so a static unroll with
    # lane slices of the lane-dense projections (no per-head thin projections).
    for h in range(num_heads):
        lo = h * head_dim
        qh = q_sc[:, lo:lo + head_dim]                   # (tq, Dh)
        kh = kv[:, lo:lo + head_dim]                     # (tk, Dh)
        vh = kv[:, C + lo:C + lo + head_dim]             # (tk, Dh)

        # Scores: contract last dims directly (no k.T / XLU transpose).
        s = jax.lax.dot_general(qh, kh, (((1,), (1,)), ((), ())),
                                preferred_element_type=jnp.float32)  # (tq, tk)

        m_prev = m_sc[h]                                              # (tq, 1)
        m_new = jnp.maximum(m_prev, jnp.max(s, axis=-1, keepdims=True))
        alpha = jnp.exp(m_prev - m_new)
        p = jnp.exp(s - m_new)
        l_sc[h] = alpha * l_sc[h] + jnp.sum(p, axis=-1, keepdims=True)

        o_h = jnp.dot(p.astype(mxu_dtype), vh,
                      preferred_element_type=jnp.float32)             # (tq, Dh)
        # Accumulate this head into its lane-offset slice of the concat buffer.
        acc_sc[:, lo:lo + head_dim] = alpha * acc_sc[:, lo:lo + head_dim] + o_h
        m_sc[h] = m_new

    @pl.when(ki == pl.num_programs(2) - 1)
    def _finalize():
        # Per-head normalization (EUP reciprocal), then ONE lane-dense,
        # 128-deep output projection with the original proj weight.
        for h in range(num_heads):
            lo = h * head_dim
            inv = pl.reciprocal(l_sc[h], approx=True)                 # (tq, 1)
            acc_sc[:, lo:lo + head_dim] = acc_sc[:, lo:lo + head_dim] * inv
        o = acc_sc[...].astype(mxu_dtype)                             # (tq, C)
        out = jnp.dot(o, wo_ref[...],
                      preferred_element_type=jnp.float32) + bo_ref[...]
        out_ref[0] = out.astype(out_ref.dtype)


def seq_parallel_attention_pallas(x, wq, wkv, wo, bo, *, num_heads,
                                  block_q=128, block_kv=128,
                                  mxu_dtype=jnp.bfloat16):
    """x: (B, N, C) -> (B, N, C). wq:(C,C) scale-folded, wkv:(C,2C), wo:(C,C), bo:(1,C)."""
    B, N, C = x.shape
    assert C % num_heads == 0
    head_dim = C // num_heads
    assert C % 128 == 0, "channel dim must be lane-dense (multiple of 128)"

    tq = min(block_q, N)
    tk = min(block_kv, N)
    # TODO(synk): pad/mask ragged sequence lengths; here we require exact tiling.
    assert N % tq == 0 and N % tk == 0
    assert tq % 8 == 0 and tk % 8 == 0
    nq, nk = N // tq, N // tk

    # Cast resident weights once on the host side (native MXU feed dtype).
    wq = wq.astype(mxu_dtype)
    wkv = wkv.astype(mxu_dtype)
    wo = wo.astype(mxu_dtype)
    bo = bo.astype(jnp.float32)

    kernel = functools.partial(
        _seq_parallel_attention_kernel,
        num_heads=num_heads, head_dim=head_dim, mxu_dtype=mxu_dtype)

    return pl.pallas_call(
        kernel,
        out_shape=jax.ShapeDtypeStruct((B, N, C), x.dtype),
        grid=(B, nq, nk),
        in_specs=[
            pl.BlockSpec((1, tq, C), lambda b, qi, ki: (b, qi, 0)),   # x (query tile)
            pl.BlockSpec((1, tk, C), lambda b, qi, ki: (b, ki, 0)),   # x (kv tile)
            pl.BlockSpec((C, C), lambda b, qi, ki: (0, 0)),           # wq (resident)
            pl.BlockSpec((C, 2 * C), lambda b, qi, ki: (0, 0)),       # wkv (resident)
            pl.BlockSpec((C, C), lambda b, qi, ki: (0, 0)),           # wo (resident)
            pl.BlockSpec((1, C), lambda b, qi, ki: (0, 0)),           # bias (resident)
        ],
        out_specs=pl.BlockSpec((1, tq, C), lambda b, qi, ki: (b, qi, 0)),
        scratch_shapes=[
            pltpu.VMEM((tq, C), mxu_dtype),                 # Q tile (scaled)
            pltpu.VMEM((num_heads, tq, 1), jnp.float32),    # running max m
            pltpu.VMEM((num_heads, tq, 1), jnp.float32),    # running denom l
            pltpu.VMEM((tq, C), jnp.float32),               # head-concat accumulator
        ],
        compiler_params=pltpu.CompilerParams(
            dimension_semantics=("parallel", "parallel", "arbitrary"),
            vmem_limit_bytes=32 * 1024 * 1024),
    )(x, x, wq, wkv, wo, bo)


class SeqParallelAttentionJAX:
    """JAX/Pallas port of OpenSora SeqParallelAttention (forward, inference).

    Default config of the PyTorch module: qkv_bias=False, qk_norm=False
    (q/k norms are Identity), dropout inactive, rope unsupported.
    """

    def __init__(self, dim, num_heads=8, key=None, mxu_dtype=jnp.bfloat16):
        assert dim % num_heads == 0, "dim should be divisible by num_heads"
        self.dim = dim
        self.num_heads = num_heads
        self.head_dim = dim // num_heads
        self.scale = self.head_dim ** (-0.5)
        self.mxu_dtype = mxu_dtype

        if key is None:
            key = jax.random.PRNGKey(0)
        k1, k2, k3 = jax.random.split(key, 3)
        lim = 1.0 / math.sqrt(dim)  # torch.nn.Linear default init range
        # Stored "in-features x out-features" (transposed torch layout).
        self.wqkv = jax.random.uniform(k1, (dim, 3 * dim), jnp.float32, -lim, lim)
        self.wproj = jax.random.uniform(k2, (dim, dim), jnp.float32, -lim, lim)
        self.bproj = jax.random.uniform(k3, (1, dim), jnp.float32, -lim, lim)

        # Kernel-side weights: keep the lane-dense (C, C)/(C, 2C) layouts.
        # Fold the softmax scale into Wq once (weight pre-scaling, zero runtime cost).
        self.wq = self.wqkv[:, :dim] * self.scale   # (C, C)
        self.wkv = self.wqkv[:, dim:]               # (C, 2C) = [K | V]
        self.wo = self.wproj                        # (C, C)
        # TODO(synk): qkv_bias=True and qk_norm=True (LlamaRMSNorm on q/k) paths of
        # the PyTorch module are not implemented (defaults are False).

    def __call__(self, x, mxu_dtype=None):
        # TODO(synk): multi-device sequence-parallel all_to_all (torch.distributed
        # over the sp group) is not implemented; with sp world size 1 it is identity.
        if mxu_dtype is None:
            mxu_dtype = self.mxu_dtype
        return seq_parallel_attention_pallas(
            x, self.wq, self.wkv, self.wo, self.bproj,
            num_heads=self.num_heads, mxu_dtype=mxu_dtype)


def _reference_forward(mod, x):
    """Pure-JAX f32 reference mirroring the PyTorch math (sp_size=1, eval mode)."""
    B, N, C = x.shape
    H, Dh = mod.num_heads, mod.head_dim
    qkv = x @ mod.wqkv                                  # (B, N, 3C)
    qkv = qkv.reshape(B, N, 3, H, Dh)
    qkv = jnp.transpose(qkv, (2, 0, 3, 1, 4))           # (3, B, H, N, Dh)
    q, k, v = qkv[0], qkv[1], qkv[2]
    q = q * mod.scale
    attn = jnp.einsum("bhnd,bhmd->bhnm", q, k).astype(jnp.float32)
    attn = jax.nn.softmax(attn, axis=-1).astype(x.dtype)
    o = jnp.einsum("bhnm,bhmd->bhnd", attn, v)          # (B, H, N, Dh)
    o = jnp.transpose(o, (0, 2, 1, 3)).reshape(B, N, C)
    return o @ mod.wproj + mod.bproj


if __name__ == "__main__":
    key = jax.random.PRNGKey(0)
    k_param, k_x = jax.random.split(key)

    # Lane-dense toy shapes: 2 q-tiles x 2 kv-tiles per batch element exercises
    # the online-softmax tiling; both v7x TensorCores get parallel work.
    B, N, dim, num_heads = 2, 256, 128, 4      # head_dim = 32
    attn = SeqParallelAttentionJAX(dim, num_heads=num_heads, key=k_param)
    x = jax.random.normal(k_x, (B, N, dim), jnp.float32)

    ref = _reference_forward(attn, x)

    # f32 MXU feed: tight numerical check against the f32 reference.
    out_f32 = jax.block_until_ready(attn(x, mxu_dtype=jnp.float32))
    assert out_f32.shape == (B, N, dim), out_f32.shape
    err_f32 = float(jnp.max(jnp.abs(out_f32 - ref)))
    assert err_f32 < 5e-3, f"f32-feed max err {err_f32}"

    # bf16 MXU feed (native MXU rate on v5e/v6e/v7x), f32 accumulation/softmax.
    out_bf16 = jax.block_until_ready(attn(x, mxu_dtype=jnp.bfloat16))
    err_bf16 = float(jnp.max(jnp.abs(out_bf16 - ref)))
    assert err_bf16 < 2e-2, f"bf16-feed max err {err_bf16}"

    print("KERNEL_OK")
</pallas_src>

<mosaic_0001>
module attributes {stable_mosaic.version = 11 : i64} {
  func.func @_seq_parallel_attention_kernel(%arg0: i32, %arg1: i32, %arg2: i32, %arg3: memref<1x128x128xf32, #tpu.memory_space<vmem>>, %arg4: memref<1x128x128xf32, #tpu.memory_space<vmem>>, %arg5: memref<128x128xf32, #tpu.memory_space<vmem>>, %arg6: memref<128x256xf32, #tpu.memory_space<vmem>>, %arg7: memref<128x128xf32, #tpu.memory_space<vmem>>, %arg8: memref<1x128xf32, #tpu.memory_space<vmem>>, %arg9: memref<1x128x128xf32, #tpu.memory_space<vmem>>, %arg10: memref<128x128xf32, #tpu.memory_space<vmem>>, %arg11: memref<4x128x1xf32, #tpu.memory_space<vmem>>, %arg12: memref<4x128x1xf32, #tpu.memory_space<vmem>>, %arg13: memref<128x128xf32, #tpu.memory_space<vmem>>) attributes {dimension_semantics = [#tpu.dimension_semantics<parallel>, #tpu.dimension_semantics<parallel>, #tpu.dimension_semantics<arbitrary>], iteration_bounds = array<i64: 2, 2, 2>, scalar_prefetch = 0 : i64, scratch_operands = 4 : i64, tpu.core_type = #tpu.core_type<tc>, window_params = [{transform_indices = @transform_0, window_bounds = array<i64: 1, 128, 128>}, {transform_indices = @transform_1, window_bounds = array<i64: 1, 128, 128>}, {pipeline_mode = #tpu.pipeline_mode<synchronous>, transform_indices = @transform_2, window_bounds = array<i64: 128, 128>}, {pipeline_mode = #tpu.pipeline_mode<synchronous>, transform_indices = @transform_3, window_bounds = array<i64: 128, 256>}, {pipeline_mode = #tpu.pipeline_mode<synchronous>, transform_indices = @transform_4, window_bounds = array<i64: 128, 128>}, {pipeline_mode = #tpu.pipeline_mode<synchronous>, transform_indices = @transform_5, window_bounds = array<i64: 1, 128>}, {transform_indices = @transform_6, window_bounds = array<i64: 1, 128, 128>}]} {
    %c0_i32 = arith.constant 0 : i32
    %0 = arith.cmpi eq, %arg2, %c0_i32 : i32
    %1 = arith.extui %0 : i1 to i32
    %c0_i32_0 = arith.constant 0 : i32
    %2 = arith.cmpi ne, %1, %c0_i32_0 : i32
    scf.if %2 {
      %c0_88 = arith.constant 0 : index
      %c0_89 = arith.constant 0 : index
      %c0_90 = arith.constant 0 : index
      %138 = vector.load %arg3[%c0_88, %c0_89, %c0_90] : memref<1x128x128xf32, #tpu.memory_space<vmem>>, vector<1x128x128xf32>
      %139 = vector.shape_cast %138 : vector<1x128x128xf32> to vector<128x128xf32>
      %c0_91 = arith.constant 0 : index
      %c0_92 = arith.constant 0 : index
      %140 = vector.load %arg5[%c0_91, %c0_92] : memref<128x128xf32, #tpu.memory_space<vmem>>, vector<128x128xf32>
      %cst_93 = arith.constant dense<0.000000e+00> : vector<128x128xf32>
      %141 = tpu.matmul %139, %140, %cst_93 {dimension_numbers = #tpu.dot_dimension_numbers<[1], [0], [0], [1], [0, 0, 1, 1], [], []>} : vector<128x128xf32>, vector<128x128xf32>, vector<128x128xf32> -> vector<128x128xf32>
      %c0_94 = arith.constant 0 : index
      %c0_95 = arith.constant 0 : index
      %142 = vector.load %arg10[%c0_94, %c0_95] : memref<128x128xf32, #tpu.memory_space<vmem>>, vector<128x128xf32>
      tpu.vector_store %arg10[%c0_94, %c0_95], %141 {strides = array<i32>} : memref<128x128xf32, #tpu.memory_space<vmem>>, vector<128x128xf32>,
      %cst_96 = arith.constant 0xFF800000 : f32
      %143 = vector.broadcast %cst_96 : f32 to vector<4x128x1xf32>
      %c0_97 = arith.constant 0 : index
      %c0_98 = arith.constant 0 : index
      %c0_99 = arith.constant 0 : index
      %144 = vector.load %arg11[%c0_97, %c0_98, %c0_99] : memref<4x128x1xf32, #tpu.memory_space<vmem>>, vector<4x128x1xf32>
      tpu.vector_store %arg11[%c0_97, %c0_98, %c0_99], %143 {strides = array<i32>} : memref<4x128x1xf32, #tpu.memory_space<vmem>>, vector<4x128x1xf32>,
      %cst_100 = arith.constant 0.000000e+00 : f32
      %145 = vector.broadcast %cst_100 : f32 to vector<4x128x1xf32>
      %c0_101 = arith.constant 0 : index
      %c0_102 = arith.constant 0 : index
      %c0_103 = arith.constant 0 : index
      %146 = vector.load %arg12[%c0_101, %c0_102, %c0_103] : memref<4x128x1xf32, #tpu.memory_space<vmem>>, vector<4x128x1xf32>
      tpu.vector_store %arg12[%c0_101, %c0_102, %c0_103], %145 {strides = array<i32>} : memref<4x128x1xf32, #tpu.memory_space<vmem>>, vector<4x128x1xf32>,
      %cst_104 = arith.constant 0.000000e+00 : f32
      %147 = vector.broadcast %cst_104 : f32 to vector<128x128xf32>
      %c0_105 = arith.constant 0 : index
      %c0_106 = arith.constant 0 : index
      %148 = vector.load %arg13[%c0_105, %c0_106] : memref<128x128xf32, #tpu.memory_space<vmem>>, vector<128x128xf32>
      tpu.vector_store %arg13[%c0_105, %c0_106], %147 {strides = array<i32>} : memref<128x128xf32, #tpu.memory_space<vmem>>, vector<128x128xf32>,
    } else {
    }
    %c0 = arith.constant 0 : index
    %c0_1 = arith.constant 0 : index
    %c0_2 = arith.constant 0 : index
    %3 = vector.load %arg4[%c0, %c0_1, %c0_2] : memref<1x128x128xf32, #tpu.memory_space<vmem>>, vector<1x128x128xf32>
    %4 = vector.shape_cast %3 : vector<1x128x128xf32> to vector<128x128xf32>
    %c0_3 = arith.constant 0 : index
    %c0_4 = arith.constant 0 : index
    %5 = vector.load %arg6[%c0_3, %c0_4] : memref<128x256xf32, #tpu.memory_space<vmem>>, vector<128x256xf32>
    %cst = arith.constant dense<0.000000e+00> : vector<128x256xf32>
    %6 = tpu.matmul %4, %5, %cst {dimension_numbers = #tpu.dot_dimension_numbers<[1], [0], [0], [1], [0, 0, 1, 1], [], []>} : vector<128x128xf32>, vector<128x256xf32>, vector<128x256xf32> -> vector<128x256xf32>
    %c0_5 = arith.constant 0 : index
    %c0_6 = arith.constant 0 : index
    %7 = vector.load %arg10[%c0_5, %c0_6] : memref<128x128xf32, #tpu.memory_space<vmem>>, vector<128x32xf32>
    %8 = vector.extract_strided_slice %6 {offsets = [0, 0], sizes = [128, 32], strides = [1, 1]} : vector<128x256xf32> to vector<128x32xf32>
    %9 = vector.extract_strided_slice %6 {offsets = [0, 128], sizes = [128, 32], strides = [1, 1]} : vector<128x256xf32> to vector<128x32xf32>
    %cst_7 = arith.constant dense<0.000000e+00> : vector<128x128xf32>
    %10 = tpu.matmul %7, %8, %cst_7 {dimension_numbers = #tpu.dot_dimension_numbers<[1], [1], [0], [0], [0, 0, 1, 0], [], []>} : vector<128x32xf32>, vector<128x32xf32>, vector<128x128xf32> -> vector<128x128xf32>
    %c0_8 = arith.constant 0 : index
    %c0_9 = arith.constant 0 : index
    %c0_10 = arith.constant 0 : index
    %11 = vector.load %arg11[%c0_8, %c0_9, %c0_10] : memref<4x128x1xf32, #tpu.memory_space<vmem>>, vector<1x128x1xf32>
    %12 = vector.shape_cast %11 : vector<1x128x1xf32> to vector<128x1xf32>
    %cst_11 = arith.constant dense<0xFF800000> : vector<128xf32>
    %13 = vector.multi_reduction <maximumf>, %10, %cst_11 [1] : vector<128x128xf32> to vector<128xf32>
    %14 = vector.shape_cast %13 : vector<128xf32> to vector<128x1xf32>
    %15 = arith.maximumf %12, %14 : vector<128x1xf32>
    %16 = arith.subf %12, %15 : vector<128x1xf32>
    %17 = math.exp %16 : vector<128x1xf32>
    %18 = vector.broadcast %15 : vector<128x1xf32> to vector<128x128xf32>
    %19 = arith.subf %10, %18 : vector<128x128xf32>
    %20 = math.exp %19 : vector<128x128xf32>
    %c0_12 = arith.constant 0 : index
    %c0_13 = arith.constant 0 : index
    %c0_14 = arith.constant 0 : index
    %21 = vector.load %arg12[%c0_12, %c0_13, %c0_14] : memref<4x128x1xf32, #tpu.memory_space<vmem>>, vector<1x128x1xf32>
    %22 = vector.shape_cast %21 : vector<1x128x1xf32> to vector<128x1xf32>
    %23 = arith.mulf %17, %22 : vector<128x1xf32>
    %cst_15 = arith.constant dense<0.000000e+00> : vector<128xf32>
    %24 = vector.multi_reduction <add>, %20, %cst_15 [1] : vector<128x128xf32> to vector<128xf32>
    %25 = vector.shape_cast %24 : vector<128xf32> to vector<128x1xf32>
    %26 = arith.addf %23, %25 : vector<128x1xf32>
    %c0_16 = arith.constant 0 : index
    %c0_17 = arith.constant 0 : index
    %c0_18 = arith.constant 0 : index
    %27 = vector.load %arg12[%c0_16, %c0_17, %c0_18] : memref<4x128x1xf32, #tpu.memory_space<vmem>>, vector<1x128x1xf32>
    %28 = vector.shape_cast %27 : vector<1x128x1xf32> to vector<128x1xf32>
    %29 = vector.shape_cast %26 : vector<128x1xf32> to vector<1x128x1xf32>
    tpu.vector_store %arg12[%c0_16, %c0_17, %c0_18], %29 {strides = array<i32>} : memref<4x128x1xf32, #tpu.memory_space<vmem>>, vector<1x128x1xf32>,
    %cst_19 = arith.constant dense<0.000000e+00> : vector<128x32xf32>
    %30 = tpu.matmul %20, %9, %cst_19 {dimension_numbers = #tpu.dot_dimension_numbers<[1], [0], [0], [1], [0, 0, 1, 1], [], []>} : vector<128x128xf32>, vector<128x32xf32>, vector<128x32xf32> -> vector<128x32xf32>
    %c0_20 = arith.constant 0 : index
    %c0_21 = arith.constant 0 : index
    %31 = vector.load %arg13[%c0_20, %c0_21] : memref<128x128xf32, #tpu.memory_space<vmem>>, vector<128x32xf32>
    %32 = vector.broadcast %17 : vector<128x1xf32> to vector<128x32xf32>
    %33 = arith.mulf %32, %31 : vector<128x32xf32>
    %34 = arith.addf %33, %30 : vector<128x32xf32>
    %c0_22 = arith.constant 0 : index
    %c0_23 = arith.constant 0 : index
    %35 = vector.load %arg13[%c0_22, %c0_23] : memref<128x128xf32, #tpu.memory_space<vmem>>, vector<128x32xf32>
    tpu.vector_store %arg13[%c0_22, %c0_23], %34 {strides = array<i32>} : memref<128x128xf32, #tpu.memory_space<vmem>>, vector<128x32xf32>,
    %c0_24 = arith.constant 0 : index
    %c0_25 = arith.constant 0 : index
    %c0_26 = arith.constant 0 : index
    %36 = vector.load %arg11[%c0_24, %c0_25, %c0_26] : memref<4x128x1xf32, #tpu.memory_space<vmem>>, vector<1x128x1xf32>
    %37 = vector.shape_cast %36 : vector<1x128x1xf32> to vector<128x1xf32>
    %38 = vector.shape_cast %15 : vector<128x1xf32> to vector<1x128x1xf32>
    tpu.vector_store %arg11[%c0_24, %c0_25, %c0_26], %38 {strides = array<i32>} : memref<4x128x1xf32, #tpu.memory_space<vmem>>, vector<1x128x1xf32>,
    %c0_27 = arith.constant 0 : index
    %c32 = arith.constant 32 : index
    %39 = vector.load %arg10[%c0_27, %c32] : memref<128x128xf32, #tpu.memory_space<vmem>>, vector<128x32xf32>
    %40 = vector.extract_strided_slice %6 {offsets = [0, 32], sizes = [128, 32], strides = [1, 1]} : vector<128x256xf32> to vector<128x32xf32>
    %41 = vector.extract_strided_slice %6 {offsets = [0, 160], sizes = [128, 32], strides = [1, 1]} : vector<128x256xf32> to vector<128x32xf32>
    %cst_28 = arith.constant dense<0.000000e+00> : vector<128x128xf32>
    %42 = tpu.matmul %39, %40, %cst_28 {dimension_numbers = #tpu.dot_dimension_numbers<[1], [1], [0], [0], [0, 0, 1, 0], [], []>} : vector<128x32xf32>, vector<128x32xf32>, vector<128x128xf32> -> vector<128x128xf32>
    %c1 = arith.constant 1 : index
    %c0_29 = arith.constant 0 : index
    %c0_30 = arith.constant 0 : index
    %43 = vector.load %arg11[%c1, %c0_29, %c0_30] : memref<4x128x1xf32, #tpu.memory_space<vmem>>, vector<1x128x1xf32>
    %44 = vector.shape_cast %43 : vector<1x128x1xf32> to vector<128x1xf32>
    %cst_31 = arith.constant dense<0xFF800000> : vector<128xf32>
    %45 = vector.multi_reduction <maximumf>, %42, %cst_31 [1] : vector<128x128xf32> to vector<128xf32>
    %46 = vector.shape_cast %45 : vector<128xf32> to vector<128x1xf32>
    %47 = arith.maximumf %44, %46 : vector<128x1xf32>
    %48 = arith.subf %44, %47 : vector<128x1xf32>
    %49 = math.exp %48 : vector<128x1xf32>
    %50 = vector.broadcast %47 : vector<128x1xf32> to vector<128x128xf32>
    %51 = arith.subf %42, %50 : vector<128x128xf32>
    %52 = math.exp %51 : vector<128x128xf32>
    %c1_32 = arith.constant 1 : index
    %c0_33 = arith.constant 0 : index
    %c0_34 = arith.constant 0 : index
    %53 = vector.load %arg12[%c1_32, %c0_33, %c0_34] : memref<4x128x1xf32, #tpu.memory_space<vmem>>, vector<1x128x1xf32>
    %54 = vector.shape_cast %53 : vector<1x128x1xf32> to vector<128x1xf32>
    %55 = arith.mulf %49, %54 : vector<128x1xf32>
    %cst_35 = arith.constant dense<0.000000e+00> : vector<128xf32>
    %56 = vector.multi_reduction <add>, %52, %cst_35 [1] : vector<128x128xf32> to vector<128xf32>
    %57 = vector.shape_cast %56 : vector<128xf32> to vector<128x1xf32>
    %58 = arith.addf %55, %57 : vector<128x1xf32>
    %c1_36 = arith.constant 1 : index
    %c0_37 = arith.constant 0 : index
    %c0_38 = arith.constant 0 : index
    %59 = vector.load %arg12[%c1_36, %c0_37, %c0_38] : memref<4x128x1xf32, #tpu.memory_space<vmem>>, vector<1x128x1xf32>
    %60 = vector.shape_cast %59 : vector<1x128x1xf32> to vector<128x1xf32>
    %61 = vector.shape_cast %58 : vector<128x1xf32> to vector<1x128x1xf32>
    tpu.vector_store %arg12[%c1_36, %c0_37, %c0_38], %61 {strides = array<i32>} : memref<4x128x1xf32, #tpu.memory_space<vmem>>, vector<1x128x1xf32>,
    %cst_39 = arith.constant dense<0.000000e+00> : vector<128x32xf32>
    %62 = tpu.matmul %52, %41, %cst_39 {dimension_numbers = #tpu.dot_dimension_numbers<[1], [0], [0], [1], [0, 0, 1, 1], [], []>} : vector<128x128xf32>, vector<128x32xf32>, vector<128x32xf32> -> vector<128x32xf32>
    %c0_40 = arith.constant 0 : index
    %c32_41 = arith.constant 32 : index
    %63 = vector.load %arg13[%c0_40, %c32_41] : memref<128x128xf32, #tpu.memory_space<vmem>>, vector<128x32xf32>
    %64 = vector.broadcast %49 : vector<128x1xf32> to vector<128x32xf32>
    %65 = arith.mulf %64, %63 : vector<128x32xf32>
    %66 = arith.addf %65, %62 : vector<128x32xf32>
    %c0_42 = arith.constant 0 : index
    %c32_43 = arith.constant 32 : index
    %67 = vector.load %arg13[%c0_42, %c32_43] : memref<128x128xf32, #tpu.memory_space<vmem>>, vector<128x32xf32>
    tpu.vector_store %arg13[%c0_42, %c32_43], %66 {strides = array<i32>} : memref<128x128xf32, #tpu.memory_space<vmem>>, vector<128x32xf32>,
    %c1_44 = arith.constant 1 : index
    %c0_45 = arith.constant 0 : index
    %c0_46 = arith.constant 0 : index
    %68 = vector.load %arg11[%c1_44, %c0_45, %c0_46] : memref<4x128x1xf32, #tpu.memory_space<vmem>>, vector<1x128x1xf32>
    %69 = vector.shape_cast %68 : vector<1x128x1xf32> to vector<128x1xf32>
    %70 = vector.shape_cast %47 : vector<128x1xf32> to vector<1x128x1xf32>
    tpu.vector_store %arg11[%c1_44, %c0_45, %c0_46], %70 {strides = array<i32>} : memref<4x128x1xf32, #tpu.memory_space<vmem>>, vector<1x128x1xf32>,
    %c0_47 = arith.constant 0 : index
    %c64 = arith.constant 64 : index
    %71 = vector.load %arg10[%c0_47, %c64] : memref<128x128xf32, #tpu.memory_space<vmem>>, vector<128x32xf32>
    %72 = vector.extract_strided_slice %6 {offsets = [0, 64], sizes = [128, 32], strides = [1, 1]} : vector<128x256xf32> to vector<128x32xf32>
    %73 = vector.extract_strided_slice %6 {offsets = [0, 192], sizes = [128, 32], strides = [1, 1]} : vector<128x256xf32> to vector<128x32xf32>
    %cst_48 = arith.constant dense<0.000000e+00> : vector<128x128xf32>
    %74 = tpu.matmul %71, %72, %cst_48 {dimension_numbers = #tpu.dot_dimension_numbers<[1], [1], [0], [0], [0, 0, 1, 0], [], []>} : vector<128x32xf32>, vector<128x32xf32>, vector<128x128xf32> -> vector<128x128xf32>
    %c2 = arith.constant 2 : index
    %c0_49 = arith.constant 0 : index
    %c0_50 = arith.constant 0 : index
    %75 = vector.load %arg11[%c2, %c0_49, %c0_50] : memref<4x128x1xf32, #tpu.memory_space<vmem>>, vector<1x128x1xf32>
    %76 = vector.shape_cast %75 : vector<1x128x1xf32> to vector<128x1xf32>
    %cst_51 = arith.constant dense<0xFF800000> : vector<128xf32>
    %77 = vector.multi_reduction <maximumf>, %74, %cst_51 [1] : vector<128x128xf32> to vector<128xf32>
    %78 = vector.shape_cast %77 : vector<128xf32> to vector<128x1xf32>
    %79 = arith.maximumf %76, %78 : vector<128x1xf32>
    %80 = arith.subf %76, %79 : vector<128x1xf32>
    %81 = math.exp %80 : vector<128x1xf32>
    %82 = vector.broadcast %79 : vector<128x1xf32> to vector<128x128xf32>
    %83 = arith.subf %74, %82 : vector<128x128xf32>
    %84 = math.exp %83 : vector<128x128xf32>
    %c2_52 = arith.constant 2 : index
    %c0_53 = arith.constant 0 : index
    %c0_54 = arith.constant 0 : index
    %85 = vector.load %arg12[%c2_52, %c0_53, %c0_54] : memref<4x128x1xf32, #tpu.memory_space<vmem>>, vector<1x128x1xf32>
    %86 = vector.shape_cast %85 : vector<1x128x1xf32> to vector<128x1xf32>
    %87 = arith.mulf %81, %86 : vector<128x1xf32>
    %cst_55 = arith.constant dense<0.000000e+00> : vector<128xf32>
    %88 = vector.multi_reduction <add>, %84, %cst_55 [1] : vector<128x128xf32> to vector<128xf32>
    %89 = vector.shape_cast %88 : vector<128xf32> to vector<128x1xf32>
    %90 = arith.addf %87, %89 : vector<128x1xf32>
    %c2_56 = arith.constant 2 : index
    %c0_57 = arith.constant 0 : index
    %c0_58 = arith.constant 0 : index
    %91 = vector.load %arg12[%c2_56, %c0_57, %c0_58] : memref<4x128x1xf32, #tpu.memory_space<vmem>>, vector<1x128x1xf32>
    %92 = vector.shape_cast %91 : vector<1x128x1xf32> to vector<128x1xf32>
    %93 = vector.shape_cast %90 : vector<128x1xf32> to vector<1x128x1xf32>
    tpu.vector_store %arg12[%c2_56, %c0_57, %c0_58], %93 {strides = array<i32>} : memref<4x128x1xf32, #tpu.memory_space<vmem>>, vector<1x128x1xf32>,
    %cst_59 = arith.constant dense<0.000000e+00> : vector<128x32xf32>
    %94 = tpu.matmul %84, %73, %cst_59 {dimension_numbers = #tpu.dot_dimension_numbers<[1], [0], [0], [1], [0, 0, 1, 1], [], []>} : vector<128x128xf32>, vector<128x32xf32>, vector<128x32xf32> -> vector<128x32xf32>
    %c0_60 = arith.constant 0 : index
    %c64_61 = arith.constant 64 : index
    %95 = vector.load %arg13[%c0_60, %c64_61] : memref<128x128xf32, #tpu.memory_space<vmem>>, vector<128x32xf32>
    %96 = vector.broadcast %81 : vector<128x1xf32> to vector<128x32xf32>
    %97 = arith.mulf %96, %95 : vector<128x32xf32>
    %98 = arith.addf %97, %94 : vector<128x32xf32>
    %c0_62 = arith.constant 0 : index
    %c64_63 = arith.constant 64 : index
    %99 = vector.load %arg13[%c0_62, %c64_63] : memref<128x128xf32, #tpu.memory_space<vmem>>, vector<128x32xf32>
    tpu.vector_store %arg13[%c0_62, %c64_63], %98 {strides = array<i32>} : memref<128x128xf32, #tpu.memory_space<vmem>>, vector<128x32xf32>,
    %c2_64 = arith.constant 2 : index
    %c0_65 = arith.constant 0 : index
    %c0_66 = arith.constant 0 : index
    %100 = vector.load %arg11[%c2_64, %c0_65, %c0_66] : memref<4x128x1xf32, #tpu.memory_space<vmem>>, vector<1x128x1xf32>
    %101 = vector.shape_cast %100 : vector<1x128x1xf32> to vector<128x1xf32>
    %102 = vector.shape_cast %79 : vector<128x1xf32> to vector<1x128x1xf32>
    tpu.vector_store %arg11[%c2_64, %c0_65, %c0_66], %102 {strides = array<i32>} : memref<4x128x1xf32, #tpu.memory_space<vmem>>, vector<1x128x1xf32>,
    %c0_67 = arith.constant 0 : index
    %c96 = arith.constant 96 : index
    %103 = vector.load %arg10[%c0_67, %c96] : memref<128x128xf32, #tpu.memory_space<vmem>>, vector<128x32xf32>
    %104 = vector.extract_strided_slice %6 {offsets = [0, 96], sizes = [128, 32], strides = [1, 1]} : vector<128x256xf32> to vector<128x32xf32>
    %105 = vector.extract_strided_slice %6 {offsets = [0, 224], sizes = [128, 32], strides = [1, 1]} : vector<128x256xf32> to vector<128x32xf32>
    %cst_68 = arith.constant dense<0.000000e+00> : vector<128x128xf32>
    %106 = tpu.matmul %103, %104, %cst_68 {dimension_numbers = #tpu.dot_dimension_numbers<[1], [1], [0], [0], [0, 0, 1, 0], [], []>} : vector<128x32xf32>, vector<128x32xf32>, vector<128x128xf32> -> vector<128x128xf32>
    %c3 = arith.constant 3 : index
    %c0_69 = arith.constant 0 : index
    %c0_70 = arith.constant 0 : index
    %107 = vector.load %arg11[%c3, %c0_69, %c0_70] : memref<4x128x1xf32, #tpu.memory_space<vmem>>, vector<1x128x1xf32>
    %108 = vector.shape_cast %107 : vector<1x128x1xf32> to vector<128x1xf32>
    %cst_71 = arith.constant dense<0xFF800000> : vector<128xf32>
    %109 = vector.multi_reduction <maximumf>, %106, %cst_71 [1] : vector<128x128xf32> to vector<128xf32>
    %110 = vector.shape_cast %109 : vector<128xf32> to vector<128x1xf32>
    %111 = arith.maximumf %108, %110 : vector<128x1xf32>
    %112 = arith.subf %108, %111 : vector<128x1xf32>
    %113 = math.exp %112 : vector<128x1xf32>
    %114 = vector.broadcast %111 : vector<128x1xf32> to vector<128x128xf32>
    %115 = arith.subf %106, %114 : vector<128x128xf32>
    %116 = math.exp %115 : vector<128x128xf32>
    %c3_72 = arith.constant 3 : index
    %c0_73 = arith.constant 0 : index
    %c0_74 = arith.constant 0 : index
    %117 = vector.load %arg12[%c3_72, %c0_73, %c0_74] : memref<4x128x1xf32, #tpu.memory_space<vmem>>, vector<1x128x1xf32>
    %118 = vector.shape_cast %117 : vector<1x128x1xf32> to vector<128x1xf32>
    %119 = arith.mulf %113, %118 : vector<128x1xf32>
    %cst_75 = arith.constant dense<0.000000e+00> : vector<128xf32>
    %120 = vector.multi_reduction <add>, %116, %cst_75 [1] : vector<128x128xf32> to vector<128xf32>
    %121 = vector.shape_cast %120 : vector<128xf32> to vector<128x1xf32>
    %122 = arith.addf %119, %121 : vector<128x1xf32>
    %c3_76 = arith.constant 3 : index
    %c0_77 = arith.constant 0 : index
    %c0_78 = arith.constant 0 : index
    %123 = vector.load %arg12[%c3_76, %c0_77, %c0_78] : memref<4x128x1xf32, #tpu.memory_space<vmem>>, vector<1x128x1xf32>
    %124 = vector.shape_cast %123 : vector<1x128x1xf32> to vector<128x1xf32>
    %125 = vector.shape_cast %122 : vector<128x1xf32> to vector<1x128x1xf32>
    tpu.vector_store %arg12[%c3_76, %c0_77, %c0_78], %125 {strides = array<i32>} : memref<4x128x1xf32, #tpu.memory_space<vmem>>, vector<1x128x1xf32>,
    %cst_79 = arith.constant dense<0.000000e+00> : vector<128x32xf32>
    %126 = tpu.matmul %116, %105, %cst_79 {dimension_numbers = #tpu.dot_dimension_numbers<[1], [0], [0], [1], [0, 0, 1, 1], [], []>} : vector<128x128xf32>, vector<128x32xf32>, vector<128x32xf32> -> vector<128x32xf32>
    %c0_80 = arith.constant 0 : index
    %c96_81 = arith.constant 96 : index
    %127 = vector.load %arg13[%c0_80, %c96_81] : memref<128x128xf32, #tpu.memory_space<vmem>>, vector<128x32xf32>
    %128 = vector.broadcast %113 : vector<128x1xf32> to vector<128x32xf32>
    %129 = arith.mulf %128, %127 : vector<128x32xf32>
    %130 = arith.addf %129, %126 : vector<128x32xf32>
    %c0_82 = arith.constant 0 : index
    %c96_83 = arith.constant 96 : index
    %131 = vector.load %arg13[%c0_82, %c96_83] : memref<128x128xf32, #tpu.memory_space<vmem>>, vector<128x32xf32>
    tpu.vector_store %arg13[%c0_82, %c96_83], %130 {strides = array<i32>} : memref<128x128xf32, #tpu.memory_space<vmem>>, vector<128x32xf32>,
    %c3_84 = arith.constant 3 : index
    %c0_85 = arith.constant 0 : index
    %c0_86 = arith.constant 0 : index
    %132 = vector.load %arg11[%c3_84, %c0_85, %c0_86] : memref<4x128x1xf32, #tpu.memory_space<vmem>>, vector<1x128x1xf32>
    %133 = vector.shape_cast %132 : vector<1x128x1xf32> to vector<128x1xf32>
    %134 = vector.shape_cast %111 : vector<128x1xf32> to vector<1x128x1xf32>
    tpu.vector_store %arg11[%c3_84, %c0_85, %c0_86], %134 {strides = array<i32>} : memref<4x128x1xf32, #tpu.memory_space<vmem>>, vector<1x128x1xf32>,
    %c1_i32 = arith.constant 1 : i32
    %135 = arith.cmpi eq, %arg2, %c1_i32 : i32
    %136 = arith.extui %135 : i1 to i32
    %c0_i32_87 = arith.constant 0 : i32
    %137 = arith.cmpi ne, %136, %c0_i32_87 : i32
    scf.if %137 {
      %c0_88 = arith.constant 0 : index
      %c0_89 = arith.constant 0 : index
      %c0_90 = arith.constant 0 : index
      %138 = vector.load %arg12[%c0_88, %c0_89, %c0_90] : memref<4x128x1xf32, #tpu.memory_space<vmem>>, vector<1x128x1xf32>
      %139 = vector.shape_cast %138 : vector<1x128x1xf32> to vector<128x1xf32>
      %140 = tpu.reciprocal %139 {approx = true} : vector<128x1xf32> -> vector<128x1xf32>
      %c0_91 = arith.constant 0 : index
      %c0_92 = arith.constant 0 : index
      %141 = vector.load %arg13[%c0_91, %c0_92] : memref<128x128xf32, #tpu.memory_space<vmem>>, vector<128x32xf32>
      %142 = vector.broadcast %140 : vector<128x1xf32> to vector<128x32xf32>
      %143 = arith.mulf %141, %142 : vector<128x32xf32>
      %c0_93 = arith.constant 0 : index
      %c0_94 = arith.constant 0 : index
      %144 = vector.load %arg13[%c0_93, %c0_94] : memref<128x128xf32, #tpu.memory_space<vmem>>, vector<128x32xf32>
      tpu.vector_store %arg13[%c0_93, %c0_94], %143 {strides = array<i32>} : memref<128x128xf32, #tpu.memory_space<vmem>>, vector<128x32xf32>,
      %c1_95 = arith.constant 1 : index
      %c0_96 = arith.constant 0 : index
      %c0_97 = arith.constant 0 : index
      %145 = vector.load %arg12[%c1_95, %c0_96, %c0_97] : memref<4x128x1xf32, #tpu.memory_space<vmem>>, vector<1x128x1xf32>
      %146 = vector.shape_cast %145 : vector<1x128x1xf32> to vector<128x1xf32>
      %147 = tpu.reciprocal %146 {approx = true} : vector<128x1xf32> -> vector<128x1xf32>
      %c0_98 = arith.constant 0 : index
      %c32_99 = arith.constant 32 : index
      %148 = vector.load %arg13[%c0_98, %c32_99] : memref<128x128xf32, #tpu.memory_space<vmem>>, vector<128x32xf32>
      %149 = vector.broadcast %147 : vector<128x1xf32> to vector<128x32xf32>
      %150 = arith.mulf %148, %149 : vector<128x32xf32>
      %c0_100 = arith.constant 0 : index
      %c32_101 = arith.constant 32 : index
      %151 = vector.load %arg13[%c0_100, %c32_101] : memref<128x128xf32, #tpu.memory_space<vmem>>, vector<128x32xf32>
      tpu.vector_store %arg13[%c0_100, %c32_101], %150 {strides = array<i32>} : memref<128x128xf32, #tpu.memory_space<vmem>>, vector<128x32xf32>,
      %c2_102 = arith.constant 2 : index
      %c0_103 = arith.constant 0 : index
      %c0_104 = arith.constant 0 : index
      %152 = vector.load %arg12[%c2_102, %c0_103, %c0_104] : memref<4x128x1xf32, #tpu.memory_space<vmem>>, vector<1x128x1xf32>
      %153 = vector.shape_cast %152 : vector<1x128x1xf32> to vector<128x1xf32>
      %154 = tpu.reciprocal %153 {approx = true} : vector<128x1xf32> -> vector<128x1xf32>
      %c0_105 = arith.constant 0 : index
      %c64_106 = arith.constant 64 : index
      %155 = vector.load %arg13[%c0_105, %c64_106] : memref<128x128xf32, #tpu.memory_space<vmem>>, vector<128x32xf32>
      %156 = vector.broadcast %154 : vector<128x1xf32> to vector<128x32xf32>
      %157 = arith.mulf %155, %156 : vector<128x32xf32>
      %c0_107 = arith.constant 0 : index
      %c64_108 = arith.constant 64 : index
      %158 = vector.load %arg13[%c0_107, %c64_108] : memref<128x128xf32, #tpu.memory_space<vmem>>, vector<128x32xf32>
      tpu.vector_store %arg13[%c0_107, %c64_108], %157 {strides = array<i32>} : memref<128x128xf32, #tpu.memory_space<vmem>>, vector<128x32xf32>,
      %c3_109 = arith.constant 3 : index
      %c0_110 = arith.constant 0 : index
      %c0_111 = arith.constant 0 : index
      %159 = vector.load %arg12[%c3_109, %c0_110, %c0_111] : memref<4x128x1xf32, #tpu.memory_space<vmem>>, vector<1x128x1xf32>
      %160 = vector.shape_cast %159 : vector<1x128x1xf32> to vector<128x1xf32>
      %161 = tpu.reciprocal %160 {approx = true} : vector<128x1xf32> -> vector<128x1xf32>
      %c0_112 = arith.constant 0 : index
      %c96_113 = arith.constant 96 : index
      %162 = vector.load %arg13[%c0_112, %c96_113] : memref<128x128xf32, #tpu.memory_space<vmem>>, vector<128x32xf32>
      %163 = vector.broadcast %161 : vector<128x1xf32> to vector<128x32xf32>
      %164 = arith.mulf %162, %163 : vector<128x32xf32>
      %c0_114 = arith.constant 0 : index
      %c96_115 = arith.constant 96 : index
      %165 = vector.load %arg13[%c0_114, %c96_115] : memref<128x128xf32, #tpu.memory_space<vmem>>, vector<128x32xf32>
      tpu.vector_store %arg13[%c0_114, %c96_115], %164 {strides = array<i32>} : memref<128x128xf32, #tpu.memory_space<vmem>>, vector<128x32xf32>,
      %c0_116 = arith.constant 0 : index
      %c0_117 = arith.constant 0 : index
      %166 = vector.load %arg13[%c0_116, %c0_117] : memref<128x128xf32, #tpu.memory_space<vmem>>, vector<128x128xf32>
      %c0_118 = arith.constant 0 : index
      %c0_119 = arith.constant 0 : index
      %167 = vector.load %arg7[%c0_118, %c0_119] : memref<128x128xf32, #tpu.memory_space<vmem>>, vector<128x128xf32>
      %cst_120 = arith.constant dense<0.000000e+00> : vector<128x128xf32>
      %168 = tpu.matmul %166, %167, %cst_120 {dimension_numbers = #tpu.dot_dimension_numbers<[1], [0], [0], [1], [0, 0, 1, 1], [], []>} : vector<128x128xf32>, vector<128x128xf32>, vector<128x128xf32> -> vector<128x128xf32>
      %c0_121 = arith.constant 0 : index
      %c0_122 = arith.constant 0 : index
      %169 = vector.load %arg8[%c0_121, %c0_122] : memref<1x128xf32, #tpu.memory_space<vmem>>, vector<1x128xf32>
      %170 = vector.broadcast %169 : vector<1x128xf32> to vector<128x128xf32>
      %171 = arith.addf %168, %170 : vector<128x128xf32>
      %c0_123 = arith.constant 0 : index
      %c0_124 = arith.constant 0 : index
      %c0_125 = arith.constant 0 : index
      %172 = vector.load %arg9[%c0_123, %c0_124, %c0_125] : memref<1x128x128xf32, #tpu.memory_space<vmem>>, vector<1x128x128xf32>
      %173 = vector.shape_cast %172 : vector<1x128x128xf32> to vector<128x128xf32>
      %174 = vector.shape_cast %171 : vector<128x128xf32> to vector<1x128x128xf32>
      tpu.vector_store %arg9[%c0_123, %c0_124, %c0_125], %174 {strides = array<i32>} : memref<1x128x128xf32, #tpu.memory_space<vmem>>, vector<1x128x128xf32>,
    } else {
    }
    return
  }
  func.func @transform_0(%arg0: i32, %arg1: i32, %arg2: i32) -> (i32, i32, i32) {
    %c0_i32 = arith.constant 0 : i32
    %c0_i32_0 = arith.constant 0 : i32
    return %arg0, %arg1, %c0_i32 : i32, i32, i32
  }
  func.func @transform_1(%arg0: i32, %arg1: i32, %arg2: i32) -> (i32, i32, i32) {
    %c0_i32 = arith.constant 0 : i32
    %c0_i32_0 = arith.constant 0 : i32
    return %arg0, %arg2, %c0_i32 : i32, i32, i32
  }
  func.func @transform_2(%arg0: i32, %arg1: i32, %arg2: i32) -> (i32, i32) {
    %c0_i32 = arith.constant 0 : i32
    %c0_i32_0 = arith.constant 0 : i32
    %c0_i32_1 = arith.constant 0 : i32
    return %c0_i32, %c0_i32_0 : i32, i32
  }
  func.func @transform_3(%arg0: i32, %arg1: i32, %arg2: i32) -> (i32, i32) {
    %c0_i32 = arith.constant 0 : i32
    %c0_i32_0 = arith.constant 0 : i32
    %c0_i32_1 = arith.constant 0 : i32
    return %c0_i32, %c0_i32_0 : i32, i32
  }
  func.func @transform_4(%arg0: i32, %arg1: i32, %arg2: i32) -> (i32, i32) {
    %c0_i32 = arith.constant 0 : i32
    %c0_i32_0 = arith.constant 0 : i32
    %c0_i32_1 = arith.constant 0 : i32
    return %c0_i32, %c0_i32_0 : i32, i32
  }
  func.func @transform_5(%arg0: i32, %arg1: i32, %arg2: i32) -> (i32, i32) {
    %c0_i32 = arith.constant 0 : i32
    %c0_i32_0 = arith.constant 0 : i32
    %c0_i32_1 = arith.constant 0 : i32
    return %c0_i32, %c0_i32_0 : i32, i32
  }
  func.func @transform_6(%arg0: i32, %arg1: i32, %arg2: i32) -> (i32, i32, i32) {
    %c0_i32 = arith.constant 0 : i32
    %c0_i32_0 = arith.constant 0 : i32
    return %arg0, %arg1, %c0_i32 : i32, i32, i32
  }
}

</mosaic_0001>

<bundles_post_ra>
// kernel: tpu_custom_call.1
= control target key start
LH: loop header
LB: loop body
LE: loop exit
PB: predicated region body
PF: predicated region fallthrough
CT: control target
= control target key end

     0   :  { %s9617_s0 = inlined_call_operand.hbm [shape: f32[2,256,128], index: 0, kind: input, shape index: {}]   ;;  %s9618_s1 = inlined_call_operand.hbm [shape: f32[2,256,128], index: 1, kind: input, shape index: {}]   ;;  %s9619_s2 = inlined_call_operand.hbm [shape: f32[128,128], index: 2, kind: input, shape index: {}]   ;;  %s9620_s3 = inlined_call_operand.hbm [shape: f32[128,256], index: 3, kind: input, shape index: {}]   ;;  %s9621_s4 = inlined_call_operand.hbm [shape: f32[128,128], index: 4, kind: input, shape index: {}]   ;;  %s9622_s5 = inlined_call_operand.vmem [shape: f32[1,128], index: 5, kind: input, shape index: {}]   ;;  %s9623_s6 = inlined_call_operand.hbm [shape: f32[2,256,128], index: 6, kind: output, shape index: {}]  }
   0x1   :  { %9732 = sst [smem:[#allocation96_spill]] %s9617_s0 }
   0x2   :  { %9733 = sst [smem:[#allocation97_spill]] %s9619_s2 }
   0x3   :  { %9734 = sst [smem:[#allocation98_spill]] %s9620_s3 }
   0x4   :  { %9735 = sst [smem:[#allocation99_spill]] %s9621_s4 }
   0x5   :  { %9736 = sst [smem:[#allocation100_spill]] %s9622_s5 }
   0x6   :  { %9737 = sst [smem:[#allocation101_spill]] %s9623_s6 }
   0x7   :  { %11 = vsyncpa [#allocation7], 0 }
   0x8   :  { %13 = vsyncpa [#allocation7 + $0x1], 0 }
   0x9   :  { %14 = vsyncpa [#allocation10], 0 }
   0xa   :  { %16 = vsyncpa [#allocation10 + $0x1], 0 }
   0xb   :  { %17 = vsyncpa [#allocation13], 0 }
   0xc   :  { %18 = vsyncpa [#allocation8], 0 }
   0xd   :  { %20 = vsyncpa [#allocation8 + $0x1], 0  ;;  %s6540_s21 = smov 0   ;;  %s6542_s22 = smov 0  }
   0xe   :  { %s6544_s23 = smov 0   ;;  %s6546_s24 = smov 0  }
   0xf   :  { %s6548_s25 = smov 0   ;;  %s6550_s26 = smov 0  }
  0x10   :  { %s6552_s27 = smov 0   ;;  %s6554_s28 = smov 0  }
  0x11   :  { %s6556_s29 = smov 0   ;;  %s6558_s30 = smov 0  }
  0x12   :  { %s6560_s7 = smov 0   ;;  %s6562_s8 = smov 0  }
  0x13   :  { %s6564_s9 = smov 0  }
  0x14 LB: > { %9738 = sst [smem:[#allocation21_spill]] %s6451_s24  ;;  %s6604_s10 = sadd.s32 4294967295, %s6487_s9   ;;  %s6487_s9 = sphi %s6564_s9, %s26_s9   ;;  %s6483_s8 = sphi %s6562_s8, %s9997_s8   ;;  %s6479_s7 = sphi %s6560_s7, %s9996_s7   ;;  %s6475_s30 = sphi %s6558_s30, %s10005_s30   ;;  %s6471_s29 = sphi %s6556_s29, %s9994_s29   ;;  %s6467_s28 = sphi %s6554_s28, %s9993_s28   ;;  %s6463_s27 = sphi %s6552_s27, %s10004_s27   ;;  %s6459_s26 = sphi %s6550_s26, %s10003_s26   ;;  %s6455_s25 = sphi %s6548_s25, %s10002_s25   ;;  %s6451_s24 = sphi %s6546_s24, %s10001_s24   ;;  %s6447_s23 = sphi %s6544_s23, %s10000_s23   ;;  %s6443_s22 = sphi %s6542_s22, %s9999_s22   ;;  %s6439_s21 = sphi %s6540_s21, %s9998_s21  }
  0x15   : > { %9739 = sst [smem:[#allocation22_spill]] %s6463_s27  ;;  %p95_p0 = scmp.ne.s32.totalorder %s6443_s22, %s6439_s21 }
  0x16   : > { %9740 = sst [smem:[#allocation23_spill]] %s6467_s28  ;;  %p68_p1 = scmp.eq.s32.totalorder %s6604_s10, 0 }
  0x17   : > { %9741 = sst [smem:[#allocation24_spill]] %s6471_s29  ;;  %p205_p2 = scmp.eq.s32.totalorder %s6604_s10, 7 }
  0x18   : > { %9742 = sst [smem:[#allocation25_spill]] %s6479_s7  ;;  %p5225_p3 = scmp.ge.s32.totalorder %s6487_s9, 1 }
  0x19   : > { %9743 = sst [smem:[#allocation26_spill]] %s6483_s8  ;;  %p218_p4 = scmp.lt.s32.totalorder %s6487_s9, 9 }
  0x1a   : > { %p6613_p5 = por %p95_p0, %p68_p1  ;;  %s9746_s2 = sld [smem:[#allocation97_spill]] }
  0x1b   : > { %p6617_p6 = pnand %p5225_p3, %p218_p4  ;;  %s6489_s16 = smov [#allocation11]  }
  0x1c   : > { %s231_s17 = sshll.u32 %s6489_s16, 4  ;;  %s9748_s3 = sld [smem:[#allocation98_spill]]  ;;  %s232_s17 = int_to_ptr.vmem [resolvable:$true] %s231_s17 }
  0x1d   : > { %p5527_p7 = pneg %p6617_p6  ;;  %s9625_s13 = smov 128  }
  0x1e   : > { %s9627_s14 = smov 8   ;;  %s6492_s16 = smov [#allocation12]  }
  0x1f   : > { %p6628_p8 = pnand %p5527_p7, %p68_p1  ;;  %s9749_s4 = sld [smem:[#allocation99_spill]] }
  0x20   : > { %s229_s15 = sshll.u32 %s9746_s2, 4  ;;  %s245_s2 = sshll.u32 %s6492_s16, 4  ;;  %s230_s15 = int_to_ptr.hbm [resolvable:$true] %s229_s15  ;;  %s246_s2 = int_to_ptr.vmem [resolvable:$true] %s245_s2 }
  0x21   : > { %5530 = dma.hbm_to_vmem [thread:$0]  (!%p6628_p8), %s230_s15, 2048, %s232_s17, [#allocation10], %s9625_s13, %s9625_s13, %s9627_s14  }
  0x22   : > { %s243_s21 = sshll.u32 %s9748_s3, 4  ;;  %s6493_s6 = smov 256   ;;  %s244_s21 = int_to_ptr.hbm [resolvable:$true] %s243_s21 }
  0x23   : > { %s6494_s29 = smov 16   ;;  %s6495_s15 = smov [#allocation14]  }
  0x24   : > { %5533 = dma.hbm_to_vmem [thread:$0]  (!%p6628_p8), %s244_s21, 4096, %s246_s2, [#allocation13], %s6493_s6, %s6493_s6, %s6494_s29  }
  0x25   : > { %s257_s3 = sshll.u32 %s9749_s4, 4  ;;  %s259_s17 = sshll.u32 %s6495_s15, 4  ;;  %s258_s3 = int_to_ptr.hbm [resolvable:$true] %s257_s3  ;;  %s260_s17 = int_to_ptr.vmem [resolvable:$true] %s259_s17 }
  0x26   : > { %5536 = dma.hbm_to_vmem [thread:$0]  (!%p6628_p8), %s258_s3, 2048, %s260_s17, [#allocation13], %s9625_s13, %s9625_s13, %s9627_s14  }
  0x27   : > { %s5224_s16 = sadd.s32 4294967294, %s6487_s9   ;;  %s38_s19 = sadd.s32 1, %s6475_s30 }
  0x28   : > { %p39_p9 = scmp.ge.s32.totalorder %s38_s19, 2  ;;  %s41_s2 = sadd.s32 1, %s6479_s7 }
  0x29   : > { %s45_s6 = sadd.s32 1, %s6483_s8  ;;  %s54_s29 = sadd.s32 1, %s6459_s26 }
  0x2a   : > { %s10007_s19 = smov (%p39_p9, %s38_s19), 0  ;;  %s10009_s2 = smov (!%p39_p9, %s41_s2), %s6479_s7 }
  0x2b   : > { %9750 = sst [smem:[#allocation27_spill]] %s10007_s19  ;;  %p61_p10 = scmp.ne.s32.totalorder %s6459_s26, %s6455_s25 }
  0x2c   : > { %p62_p11 = scmp.eq.s32.totalorder %s6487_s9, 0  ;;  %p43_p12 = scmp.ge.s32.totalorder %s10009_s2, 2 }
  0x2d   : > { %p67_p13 = scmp.ne.s32.totalorder %s6455_s25, %s6451_s24  ;;  %s78_s18 = ssub.s32 %s6475_s30, %s10007_s19 }
  0x2e   : > { %p6665_p0 = por %p62_p11, %p61_p10  ;;  %s10011_s2 = smov (%p43_p12, %s10009_s2), 0 }
  0x2f   : > { %9752 = sst [smem:[#allocation28_spill]] %s10011_s2  ;;  %s10013_s6 = smov (!%p43_p12, %s45_s6), %s6483_s8 }
  0x30   : > { %s50_s21 = ssub.s32 %s6479_s7, %s10011_s2  ;;  %p6678_p3 = por %p68_p1, %p67_p13 }
  0x31   : > { %p47_p4 = scmp.ge.s32.totalorder %s10013_s6, 2  ;;  %p6684_p7 = por %p205_p2, %p61_p10 }
  0x32   : > { %p211_p8 = scmp.eq.s32.totalorder %s5224_s16, 7  ;;  %p5551_p9 = scmp.lt.s32.totalorder %s6487_s9, 8 }
  0x33   : > { %s9754_s15 = scalar_select %p6684_p7, 1, 0 }
  0x34   : > { %s10015_s6 = smov (%p47_p4, %s10013_s6), 0  ;;  %p6691_p12 = por %p211_p8, %p67_p13 }
  0x35   : > { %9755 = sst [smem:[#allocation29_spill]] %s9754_s15  ;;  %s276_s13 = sand.u32 1, %s6459_s26  }
  0x36   : > { %9756 = sst [smem:[#allocation30_spill]] %s10015_s6  ;;  %s49_s14 = ssub.s32 %s6483_s8, %s10015_s6 }
  0x37   : > { %s9757_s17 = scalar_select %p6691_p12, 1, 0 }
  0x38   : > { %s51_s4 = sor.u32 %s50_s21, %s49_s14  ;;  %s79_s2 = sor.u32 %s78_s18, %s49_s14 }
  0x39   : > { %9758 = sst [smem:[#allocation31_spill]] %s9757_s17  ;;  %p52_p2 = scmp.eq.s32.totalorder %s51_s4, 0 }
  0x3a   : > { %p80_p10 = scmp.eq.s32.totalorder %s79_s2, 0  ;;  %s5230_s19 = sshll.u32 %s276_s13, 7 }
  0x3b   : > { %s5231_s24 = sshll.u32 %s6479_s7, 4  ;;  %s5232_s15 = sshll.u32 %s6483_s8, 5 }
  0x3c   : > { %s6700_s16 = scalar_select %p52_p2, %s6459_s26, %s54_s29  }
  0x3d   : > { %s285_s28 = sadd.s32 %s5232_s15, %s5231_s24  ;;  %s280_s5 = scalar_lea.vmem [#allocation6], %s5230_s19 }
  0x3e   : > { %s290_s17 = sshll.u32 %s280_s5, 4  ;;  %s5233_s27 = sshll.u32 %s285_s28, 3  ;;  %s291_s17 = int_to_ptr.vmem [resolvable:$true] %s290_s17 }
  0x3f   : > { %s9759_s0 = sld [smem:[#allocation96_spill]]  ;;  %p5538_p13 = pnand %p5551_p9, %p6665_p0 }
  0x40   : > { %s5235_s18 = sshll.u32 %s6475_s30, 4  ;;  %s277_s24 = scalar_lea.sflag [#allocation7], %s276_s13 }
  0x41   : > { %s9760_s19 = smov 8   ;;  %s9761_s6 = smov 128  }
  0x42   : > { %s309_s5 = sadd.s32 %s5235_s18, %s5232_s15  ;;  %s82_s14 = sadd.s32 1, %s6447_s23 }
  0x43   : > { %s5237_s28 = sshll.u32 %s309_s5, 3  ;;  %p89_p0 = scmp.ne.s32.totalorder %s6447_s23, %s6443_s22 }
  0x44   : > { %s311_s21 = scalar_lea.hbm %s9618_s1, %s5237_s28  ;;  %s300_s3 = sand.u32 1, %s6487_s9  }
  0x45   : > { %s287_s4 = scalar_lea.hbm %s9759_s0, %s5233_s27  ;;  %p91_p4 = por %p89_p0, %p62_p11 }
  0x46   : > { %s288_s29 = sshll.u32 %s287_s4, 4  ;;  %s302_s4 = sand.u32 1, %s6447_s23   ;;  %s289_s29 = int_to_ptr.hbm [resolvable:$true] %s288_s29 }
  0x47   : > { %5540 = dma.hbm_to_vmem [thread:$0]  (!%p5538_p13), %s289_s29, 2048, %s291_s17, %s277_s24, %s9761_s6, %s9761_s6, %s9760_s19  }
  0x48   : > { %s6720_s27 = scalar_select %p80_p10, %s6447_s23, %s82_s14  }
  0x49   : > { %s5234_s13 = sshll.u32 %s302_s4, 7  ;;  %s312_s0 = sshll.u32 %s311_s21, 4  ;;  %s313_s0 = int_to_ptr.hbm [resolvable:$true] %s312_s0 }
  0x4a   : > { %s304_s17 = scalar_lea.vmem [#allocation9], %s5234_s13  ;;  %p5541_p8 = pnand %p5551_p9, %p91_p4 }
  0x4b   : > { %s314_s29 = sshll.u32 %s304_s17, 4  ;;  %s301_s15 = scalar_lea.sflag [#allocation10], %s300_s3  ;;  %s315_s29 = int_to_ptr.vmem [resolvable:$true] %s314_s29 }
  0x4c   : > { %5543 = dma.hbm_to_vmem [thread:$0]  (!%p5541_p8), %s313_s0, 2048, %s315_s29, %s301_s15, %s9761_s6, %s9761_s6, %s9760_s19  }
  0x4d   : > { %326 = sbr.rel (%p6617_p6) target bundleno = 3598 (0xe0e), region = 44 }
  0x52   : > { %s6736_s7 = sand.u32 1, %s6455_s25  }
  0x53   : > { %s5239_s8 = sshll.u32 %s6736_s7, 7  ;;  %s329_s2 = scalar_lea.sflag [#allocation7], %s6736_s7 }
  0x54   : > { %s6740_s18 = scalar_lea.vmem [#allocation6], %s5239_s8 }
  0x55   : > { %6418 = dma.done.wait (%p6678_p3), %s329_s2, 2048  }
  0x56   : > { %6420 = vsyncadd (%p6678_p3), %s329_s2, 4294965248  ;;  %s338_s0 = sand.u32 1, %s6604_s10   ;;  %s340_s12 = sand.u32 1, %s6443_s22  }
  0x57   : > { %s5240_s6 = sshll.u32 %s340_s12, 7  ;;  %s339_s24 = scalar_lea.sflag [#allocation10], %s338_s0 }
  0x58   : > { %s6748_s19 = scalar_lea.vmem [#allocation9], %s5240_s6 }
  0x59   : > { %6422 = dma.done.wait (%p6613_p5), %s339_s24, 2048  }
  0x5a   : > { %6424 = vsyncadd (%p6613_p5), %s339_s24, 4294965248 }
  0x5b   : > { %6426 = dma.done.wait (%p68_p1), [#allocation10], 2048  }
  0x5c   : > { %6428 = vsyncadd (%p68_p1), [#allocation10], 4294965248 }
  0x5d   : > { %6430 = dma.done.wait (%p68_p1), [#allocation13], 6144  }
  0x5e   : > { %6432 = vsyncadd (%p68_p1), [#allocation13], 4294961152  ;;  %s6762_s20 = scalar_lea.vmem [#allocation15], %s5239_s8  ;;  %s9762_s5 = sld [smem:[#allocation22_spill]] }
  0x64   : > { %p5245_p6 = scmp.ne.s32.totalorder %s9762_s5, 0 }
  0x66   : > { %398 = sbr.rel (%p5245_p6) target bundleno = 297 (0x129), region = 68 }
  0x6b   : > { %v430_v0 = vld [vmem:[#allocation11 + $0x78] sm:$0xff]  ;;  %v429_v1 = vld [vmem:[#allocation11 + $0x70] sm:$0xff]  ;;  %v428_v2 = vld [vmem:[#allocation11 + $0x68] sm:$0xff]  ;;  %vm512_vm0 = vcmask 7168   ;;  %v6496_v32 = vmov -inf   ;;  %v6497_v49 = vmov 0.0  }
  0x6c   : > { %5382 = vmatpush.msra.mxu2 %v430_v0  ;;  %5383 = vmatpush.msra.mxu3 %v430_v0  ;;  %v427_v3 = vld [vmem:[#allocation11 + $0x60] sm:$0xff]  ;;  %v426_v4 = vld [vmem:[#allocation11 + $0x58] sm:$0xff]  ;;  %v425_v5 = vld [vmem:[#allocation11 + $0x50] sm:$0xff]  ;;  %513 = vst.msk [vmem:[#allocation3] sm:$0xff] %vm512_vm0, %v6496_v32 }
  0x6d   : > { %431 = vmatpush.msra.mxu0 %v430_v0  ;;  %5381 = vmatpush.msra.mxu1 %v430_v0  ;;  %v424_v6 = vld [vmem:[#allocation11 + $0x48] sm:$0xff]  ;;  %v423_v7 = vld [vmem:[#allocation11 + $0x40] sm:$0xff]  ;;  %v422_v8 = vld [vmem:[#allocation11 + $0x38] sm:$0xff]  ;;  %514 = vst.msk [vmem:[#allocation3 + $0x8] sm:$0xff] %vm512_vm0, %v6496_v32 }
  0x6e   : > { %5385 = vmatpush.msra.mxu2 %v429_v1  ;;  %5386 = vmatpush.msra.mxu3 %v429_v1  ;;  %v421_v9 = vld [vmem:[#allocation11 + $0x30] sm:$0xff]  ;;  %v420_v10 = vld [vmem:[#allocation11 + $0x28] sm:$0xff]  ;;  %v419_v11 = vld [vmem:[#allocation11 + $0x20] sm:$0xff]  ;;  %515 = vst.msk [vmem:[#allocation3 + $0x10] sm:$0xff] %vm512_vm0, %v6496_v32 }
  0x6f   : > { %432 = vmatpush.msra.mxu0 %v429_v1  ;;  %5384 = vmatpush.msra.mxu1 %v429_v1  ;;  %v418_v12 = vld [vmem:[#allocation11 + $0x18] sm:$0xff]  ;;  %v417_v13 = vld [vmem:[#allocation11 + $0x10] sm:$0xff]  ;;  %v416_v14 = vld [vmem:[#allocation11 + $0x8] sm:$0xff]  ;;  %516 = vst.msk [vmem:[#allocation3 + $0x18] sm:$0xff] %vm512_vm0, %v6496_v32 }
  0x70   : > { %5388 = vmatpush.msra.mxu2 %v428_v2  ;;  %5389 = vmatpush.msra.mxu3 %v428_v2  ;;  %v415_v15 = vld [vmem:[#allocation11] sm:$0xff]  ;;  %v408_v20 = vld [vmem:[%s6740_s18 + $0x48] sm:$0xff]  ;;  %v409_v24 = vld [vmem:[%s6740_s18 + $0x50] sm:$0xff]  ;;  %517 = vst.msk [vmem:[#allocation3 + $0x20] sm:$0xff] %vm512_vm0, %v6496_v32 }
  0x71   : > { %433 = vmatpush.msra.mxu0 %v428_v2  ;;  %5387 = vmatpush.msra.mxu1 %v428_v2  ;;  %v407_v16 = vld [vmem:[%s6740_s18 + $0x40] sm:$0xff]  ;;  %v412_v21 = vld [vmem:[%s6740_s18 + $0x68] sm:$0xff]  ;;  %v413_v25 = vld [vmem:[%s6740_s18 + $0x70] sm:$0xff]  ;;  %518 = vst.msk [vmem:[#allocation3 + $0x28] sm:$0xff] %vm512_vm0, %v6496_v32 }
  0x72   : > { %5391 = vmatpush.msra.mxu2 %v427_v3  ;;  %5392 = vmatpush.msra.mxu3 %v427_v3  ;;  %v411_v17 = vld [vmem:[%s6740_s18 + $0x60] sm:$0xff]  ;;  %v400_v22 = vld [vmem:[%s6740_s18 + $0x8] sm:$0xff]  ;;  %v401_v26 = vld [vmem:[%s6740_s18 + $0x10] sm:$0xff]  ;;  %519 = vst.msk [vmem:[#allocation3 + $0x30] sm:$0xff] %vm512_vm0, %v6496_v32 }
  0x73   : > { %434 = vmatpush.msra.mxu0 %v427_v3  ;;  %5390 = vmatpush.msra.mxu1 %v427_v3  ;;  %v399_v18 = vld [vmem:[%s6740_s18] sm:$0xff]  ;;  %v404_v23 = vld [vmem:[%s6740_s18 + $0x28] sm:$0xff]  ;;  %v405_v27 = vld [vmem:[%s6740_s18 + $0x30] sm:$0xff]  ;;  %520 = vst.msk [vmem:[#allocation3 + $0x38] sm:$0xff] %vm512_vm0, %v6496_v32 }
  0x74   : > { %5394 = vmatpush.msra.mxu2 %v426_v4  ;;  %5395 = vmatpush.msra.mxu3 %v426_v4  ;;  %v403_v19 = vld [vmem:[%s6740_s18 + $0x20] sm:$0xff]  ;;  %v410_v28 = vld [vmem:[%s6740_s18 + $0x58] sm:$0xff]  ;;  %521 = vst.msk [vmem:[#allocation3 + $0x40] sm:$0xff] %vm512_vm0, %v6496_v32 }
  0x75   : > { %435 = vmatpush.msra.mxu0 %v426_v4  ;;  %5393 = vmatpush.msra.mxu1 %v426_v4  ;;  %v414_v29 = vld [vmem:[%s6740_s18 + $0x78] sm:$0xff]  ;;  %522 = vst.msk [vmem:[#allocation3 + $0x48] sm:$0xff] %vm512_vm0, %v6496_v32 }
  0x76   : > { %5397 = vmatpush.msra.mxu2 %v425_v5  ;;  %5398 = vmatpush.msra.mxu3 %v425_v5  ;;  %v402_v30 = vld [vmem:[%s6740_s18 + $0x18] sm:$0xff]  ;;  %523 = vst.msk [vmem:[#allocation3 + $0x50] sm:$0xff] %vm512_vm0, %v6496_v32 }
  0x77   : > { %436 = vmatpush.msra.mxu0 %v425_v5  ;;  %5396 = vmatpush.msra.mxu1 %v425_v5  ;;  %v406_v31 = vld [vmem:[%s6740_s18 + $0x38] sm:$0xff]  ;;  %524 = vst.msk [vmem:[#allocation3 + $0x58] sm:$0xff] %vm512_vm0, %v6496_v32 }
  0x78   : > { %5400 = vmatpush.msra.mxu2 %v424_v6  ;;  %5401 = vmatpush.msra.mxu3 %v424_v6  ;;  %525 = vst.msk [vmem:[#allocation3 + $0x60] sm:$0xff] %vm512_vm0, %v6496_v32 }
  0x79   : > { %437 = vmatpush.msra.mxu0 %v424_v6  ;;  %5399 = vmatpush.msra.mxu1 %v424_v6  ;;  %526 = vst.msk [vmem:[#allocation3 + $0x68] sm:$0xff] %vm512_vm0, %v6496_v32 }
  0x7a   : > { %5403 = vmatpush.msra.mxu2 %v423_v7  ;;  %5404 = vmatpush.msra.mxu3 %v423_v7  ;;  %527 = vst.msk [vmem:[#allocation3 + $0x70] sm:$0xff] %vm512_vm0, %v6496_v32 }
  0x7b   : > { %438 = vmatpush.msra.mxu0 %v423_v7  ;;  %5402 = vmatpush.msra.mxu1 %v423_v7  ;;  %528 = vst.msk [vmem:[#allocation3 + $0x78] sm:$0xff] %vm512_vm0, %v6496_v32 }
  0x7c   : > { %5406 = vmatpush.msra.mxu2 %v422_v8  ;;  %5407 = vmatpush.msra.mxu3 %v422_v8  ;;  %529 = vst.msk [vmem:[#allocation3 + $0x80] sm:$0xff] %vm512_vm0, %v6496_v32 }
  0x7d   : > { %439 = vmatpush.msra.mxu0 %v422_v8  ;;  %5405 = vmatpush.msra.mxu1 %v422_v8  ;;  %530 = vst.msk [vmem:[#allocation3 + $0x88] sm:$0xff] %vm512_vm0, %v6496_v32 }
  0x7e   : > { %5409 = vmatpush.msra.mxu2 %v421_v9  ;;  %5410 = vmatpush.msra.mxu3 %v421_v9  ;;  %531 = vst.msk [vmem:[#allocation3 + $0x90] sm:$0xff] %vm512_vm0, %v6496_v32 }
  0x7f   : > { %440 = vmatpush.msra.mxu0 %v421_v9  ;;  %5408 = vmatpush.msra.mxu1 %v421_v9  ;;  %532 = vst.msk [vmem:[#allocation3 + $0x98] sm:$0xff] %vm512_vm0, %v6496_v32 }
  0x80   : > { %5412 = vmatpush.msra.mxu2 %v420_v10  ;;  %5413 = vmatpush.msra.mxu3 %v420_v10  ;;  %533 = vst.msk [vmem:[#allocation3 + $0xa0] sm:$0xff] %vm512_vm0, %v6496_v32 }
  0x81   : > { %441 = vmatpush.msra.mxu0 %v420_v10  ;;  %5411 = vmatpush.msra.mxu1 %v420_v10  ;;  %534 = vst.msk [vmem:[#allocation3 + $0xa8] sm:$0xff] %vm512_vm0, %v6496_v32 }
  0x82   : > { %5415 = vmatpush.msra.mxu2 %v419_v11  ;;  %5416 = vmatpush.msra.mxu3 %v419_v11  ;;  %535 = vst.msk [vmem:[#allocation3 + $0xb0] sm:$0xff] %vm512_vm0, %v6496_v32 }
  0x83   : > { %442 = vmatpush.msra.mxu0 %v419_v11  ;;  %5414 = vmatpush.msra.mxu1 %v419_v11  ;;  %536 = vst.msk [vmem:[#allocation3 + $0xb8] sm:$0xff] %vm512_vm0, %v6496_v32 }
  0x84   : > { %5418 = vmatpush.msra.mxu2 %v418_v12  ;;  %5419 = vmatpush.msra.mxu3 %v418_v12  ;;  %537 = vst.msk [vmem:[#allocation3 + $0xc0] sm:$0xff] %vm512_vm0, %v6496_v32 }
  0x85   : > { %443 = vmatpush.msra.mxu0 %v418_v12  ;;  %5417 = vmatpush.msra.mxu1 %v418_v12  ;;  %538 = vst.msk [vmem:[#allocation3 + $0xc8] sm:$0xff] %vm512_vm0, %v6496_v32 }
  0x86   : > { %5421 = vmatpush.msra.mxu2 %v417_v13  ;;  %5422 = vmatpush.msra.mxu3 %v417_v13  ;;  %539 = vst.msk [vmem:[#allocation3 + $0xd0] sm:$0xff] %vm512_vm0, %v6496_v32 }
  0x87   : > { %444 = vmatpush.msra.mxu0 %v417_v13  ;;  %5420 = vmatpush.msra.mxu1 %v417_v13  ;;  %540 = vst.msk [vmem:[#allocation3 + $0xd8] sm:$0xff] %vm512_vm0, %v6496_v32 }
  0x88   : > { %5424 = vmatpush.msra.mxu2 %v416_v14  ;;  %5425 = vmatpush.msra.mxu3 %v416_v14  ;;  %541 = vst.msk [vmem:[#allocation3 + $0xe0] sm:$0xff] %vm512_vm0, %v6496_v32 }
  0x89   : > { %445 = vmatpush.msra.mxu0 %v416_v14  ;;  %5423 = vmatpush.msra.mxu1 %v416_v14  ;;  %542 = vst.msk [vmem:[#allocation3 + $0xe8] sm:$0xff] %vm512_vm0, %v6496_v32 }
  0x8a   : > { %5427 = vmatpush.msra.mxu2 %v415_v15  ;;  %5428 = vmatpush.msra.mxu3 %v415_v15  ;;  %543 = vst.msk [vmem:[#allocation3 + $0xf0] sm:$0xff] %vm512_vm0, %v6496_v32 }
  0x8b   : > { %471 = vmatmul.f32.vlgmr.msra.gmra.mxu2 %v407_v16  ;;  %483 = vmatmul.f32.vlgmr.msra.gmra.mxu3 %v411_v17  ;;  %544 = vst.msk [vmem:[#allocation3 + $0xf8] sm:$0xff] %vm512_vm0, %v6496_v32 }
  0x8c   : > { %446 = vmatpush.msra.mxu0 %v415_v15  ;;  %5426 = vmatpush.msra.mxu1 %v415_v15  ;;  %545 = vst.msk [vmem:[#allocation3 + $0x100] sm:$0xff] %vm512_vm0, %v6496_v32 }
  0x8d   : > { %447 = vmatmul.f32.vlgmr.msra.gmra.mxu0 %v399_v18  ;;  %459 = vmatmul.f32.vlgmr.msra.gmra.mxu1 %v403_v19  ;;  %546 = vst.msk [vmem:[#allocation3 + $0x108] sm:$0xff] %vm512_vm0, %v6496_v32 }
  0x8e   : > { %547 = vst.msk [vmem:[#allocation3 + $0x110] sm:$0xff] %vm512_vm0, %v6496_v32 }
  0x8f   : > { %548 = vst.msk [vmem:[#allocation3 + $0x118] sm:$0xff] %vm512_vm0, %v6496_v32 }
  0x90   : > { %549 = vst.msk [vmem:[#allocation3 + $0x120] sm:$0xff] %vm512_vm0, %v6496_v32 }
  0x91   : > { %550 = vst.msk [vmem:[#allocation3 + $0x128] sm:$0xff] %vm512_vm0, %v6496_v32 }
  0x92   : > { %551 = vst.msk [vmem:[#allocation3 + $0x130] sm:$0xff] %vm512_vm0, %v6496_v32 }
  0x93   : > { %474 = vmatmul.f32.gmra.mxu2 %v408_v20  ;;  %486 = vmatmul.f32.gmra.mxu3 %v412_v21  ;;  %552 = vst.msk [vmem:[#allocation3 + $0x138] sm:$0xff] %vm512_vm0, %v6496_v32 }
  0x94   : > { %553 = vst.msk [vmem:[#allocation3 + $0x140] sm:$0xff] %vm512_vm0, %v6496_v32 }
  0x95   : > { %450 = vmatmul.f32.gmra.mxu0 %v400_v22  ;;  %462 = vmatmul.f32.gmra.mxu1 %v404_v23  ;;  %554 = vst.msk [vmem:[#allocation3 + $0x148] sm:$0xff] %vm512_vm0, %v6496_v32 }
  0x96   : > { %555 = vst.msk [vmem:[#allocation3 + $0x150] sm:$0xff] %vm512_vm0, %v6496_v32 }
  0x97   : > { %556 = vst.msk [vmem:[#allocation3 + $0x158] sm:$0xff] %vm512_vm0, %v6496_v32 }
  0x98   : > { %557 = vst.msk [vmem:[#allocation3 + $0x160] sm:$0xff] %vm512_vm0, %v6496_v32 }
  0x99   : > { %558 = vst.msk [vmem:[#allocation3 + $0x168] sm:$0xff] %vm512_vm0, %v6496_v32 }
  0x9a   : > { %559 = vst.msk [vmem:[#allocation3 + $0x170] sm:$0xff] %vm512_vm0, %v6496_v32 }
  0x9b   : > { %477 = vmatmul.f32.gmra.mxu2 %v409_v24  ;;  %489 = vmatmul.f32.gmra.mxu3 %v413_v25  ;;  %560 = vst.msk [vmem:[#allocation3 + $0x178] sm:$0xff] %vm512_vm0, %v6496_v32 }
  0x9c   : > { %561 = vst.msk [vmem:[#allocation3 + $0x180] sm:$0xff] %vm512_vm0, %v6496_v32 }
  0x9d   : > { %453 = vmatmul.f32.gmra.mxu0 %v401_v26  ;;  %465 = vmatmul.f32.gmra.mxu1 %v405_v27  ;;  %562 = vst.msk [vmem:[#allocation3 + $0x188] sm:$0xff] %vm512_vm0, %v6496_v32 }
  0x9e   : > { %563 = vst.msk [vmem:[#allocation3 + $0x190] sm:$0xff] %vm512_vm0, %v6496_v32 }
  0x9f   : > { %564 = vst.msk [vmem:[#allocation3 + $0x198] sm:$0xff] %vm512_vm0, %v6496_v32 }
  0xa0   : > { %565 = vst.msk [vmem:[#allocation3 + $0x1a0] sm:$0xff] %vm512_vm0, %v6496_v32 }
  0xa1   : > { %566 = vst.msk [vmem:[#allocation3 + $0x1a8] sm:$0xff] %vm512_vm0, %v6496_v32 }
  0xa2   : > { %567 = vst.msk [vmem:[#allocation3 + $0x1b0] sm:$0xff] %vm512_vm0, %v6496_v32 }
  0xa3   : > { %480 = vmatmul.f32.gmra.mxu2 %v410_v28  ;;  %492 = vmatmul.f32.gmra.mxu3 %v414_v29  ;;  %568 = vst.msk [vmem:[#allocation3 + $0x1b8] sm:$0xff] %vm512_vm0, %v6496_v32 }
  0xa4   : > { %569 = vst.msk [vmem:[#allocation3 + $0x1c0] sm:$0xff] %vm512_vm0, %v6496_v32 }
  0xa5   : > { %456 = vmatmul.f32.gmra.mxu0 %v402_v30  ;;  %468 = vmatmul.f32.gmra.mxu1 %v406_v31  ;;  %570 = vst.msk [vmem:[#allocation3 + $0x1c8] sm:$0xff] %vm512_vm0, %v6496_v32 }
  0xa6   : > { %571 = vst.msk [vmem:[#allocation3 + $0x1d0] sm:$0xff] %vm512_vm0, %v6496_v32 }
  0xa7   : > { %572 = vst.msk [vmem:[#allocation3 + $0x1d8] sm:$0xff] %vm512_vm0, %v6496_v32 }
  0xa8   : > { %573 = vst.msk [vmem:[#allocation3 + $0x1e0] sm:$0xff] %vm512_vm0, %v6496_v32 }
  0xa9   : > { %574 = vst.msk [vmem:[#allocation3 + $0x1e8] sm:$0xff] %vm512_vm0, %v6496_v32 }
  0xaa   : > { %575 = vst.msk [vmem:[#allocation3 + $0x1f0] sm:$0xff] %vm512_vm0, %v6496_v32 }
  0xab   : > { %576 = vst.msk [vmem:[#allocation3 + $0x1f8] sm:$0xff] %vm512_vm0, %v6496_v32 }
  0xac   : > { %577 = vst.msk [vmem:[#allocation4] sm:$0xff] %vm512_vm0, %v6497_v49 }
  0xad   : > { %578 = vst.msk [vmem:[#allocation4 + $0x8] sm:$0xff] %vm512_vm0, %v6497_v49 }
  0xae   : > { %579 = vst.msk [vmem:[#allocation4 + $0x10] sm:$0xff] %vm512_vm0, %v6497_v49 }
  0xaf   : > { %580 = vst.msk [vmem:[#allocation4 + $0x18] sm:$0xff] %vm512_vm0, %v6497_v49 }
  0xb0   : > { %581 = vst.msk [vmem:[#allocation4 + $0x20] sm:$0xff] %vm512_vm0, %v6497_v49 }
  0xb1   : > { %582 = vst.msk [vmem:[#allocation4 + $0x28] sm:$0xff] %vm512_vm0, %v6497_v49 }
  0xb2   : > { %583 = vst.msk [vmem:[#allocation4 + $0x30] sm:$0xff] %vm512_vm0, %v6497_v49 }
  0xb3   : > { %584 = vst.msk [vmem:[#allocation4 + $0x38] sm:$0xff] %vm512_vm0, %v6497_v49 }
  0xb4   : > { %585 = vst.msk [vmem:[#allocation4 + $0x40] sm:$0xff] %vm512_vm0, %v6497_v49 }
  0xb5   : > { %586 = vst.msk [vmem:[#allocation4 + $0x48] sm:$0xff] %vm512_vm0, %v6497_v49 }
  0xb6   : > { %587 = vst.msk [vmem:[#allocation4 + $0x50] sm:$0xff] %vm512_vm0, %v6497_v49 }
  0xb7   : > { %588 = vst.msk [vmem:[#allocation4 + $0x58] sm:$0xff] %vm512_vm0, %v6497_v49 }
  0xb8   : > { %589 = vst.msk [vmem:[#allocation4 + $0x60] sm:$0xff] %vm512_vm0, %v6497_v49 }
  0xb9   : > { %590 = vst.msk [vmem:[#allocation4 + $0x68] sm:$0xff] %vm512_vm0, %v6497_v49 }
  0xba   : > { %591 = vst.msk [vmem:[#allocation4 + $0x70] sm:$0xff] %vm512_vm0, %v6497_v49 }
  0xbb   : > { %592 = vst.msk [vmem:[#allocation4 + $0x78] sm:$0xff] %vm512_vm0, %v6497_v49 }
  0xbc   : > { %593 = vst.msk [vmem:[#allocation4 + $0x80] sm:$0xff] %vm512_vm0, %v6497_v49 }
  0xbd   : > { %594 = vst.msk [vmem:[#allocation4 + $0x88] sm:$0xff] %vm512_vm0, %v6497_v49 }
  0xbe   : > { %595 = vst.msk [vmem:[#allocation4 + $0x90] sm:$0xff] %vm512_vm0, %v6497_v49 }
  0xbf   : > { %596 = vst.msk [vmem:[#allocation4 + $0x98] sm:$0xff] %vm512_vm0, %v6497_v49 }
  0xc0   : > { %597 = vst.msk [vmem:[#allocation4 + $0xa0] sm:$0xff] %vm512_vm0, %v6497_v49 }
  0xc1   : > { %598 = vst.msk [vmem:[#allocation4 + $0xa8] sm:$0xff] %vm512_vm0, %v6497_v49 }
  0xc2   : > { %599 = vst.msk [vmem:[#allocation4 + $0xb0] sm:$0xff] %vm512_vm0, %v6497_v49 }
  0xc3   : > { %600 = vst.msk [vmem:[#allocation4 + $0xb8] sm:$0xff] %vm512_vm0, %v6497_v49 }
  0xc4   : > { %601 = vst.msk [vmem:[#allocation4 + $0xc0] sm:$0xff] %vm512_vm0, %v6497_v49 }
  0xc5   : > { %602 = vst.msk [vmem:[#allocation4 + $0xc8] sm:$0xff] %vm512_vm0, %v6497_v49 }
  0xc6   : > { %603 = vst.msk [vmem:[#allocation4 + $0xd0] sm:$0xff] %vm512_vm0, %v6497_v49 }
  0xc7   : > { %604 = vst.msk [vmem:[#allocation4 + $0xd8] sm:$0xff] %vm512_vm0, %v6497_v49 }
  0xc8   : > { %605 = vst.msk [vmem:[#allocation4 + $0xe0] sm:$0xff] %vm512_vm0, %v6497_v49 }
  0xc9   : > { %606 = vst.msk [vmem:[#allocation4 + $0xe8] sm:$0xff] %vm512_vm0, %v6497_v49 }
  0xca   : > { %607 = vst.msk [vmem:[#allocation4 + $0xf0] sm:$0xff] %vm512_vm0, %v6497_v49 }
  0xcb   : > { %608 = vst.msk [vmem:[#allocation4 + $0xf8] sm:$0xff] %vm512_vm0, %v6497_v49 }
  0xcc   : > { %609 = vst.msk [vmem:[#allocation4 + $0x100] sm:$0xff] %vm512_vm0, %v6497_v49 }
  0xcd   : > { %610 = vst.msk [vmem:[#allocation4 + $0x108] sm:$0xff] %vm512_vm0, %v6497_v49 }
  0xce   : > { %611 = vst.msk [vmem:[#allocation4 + $0x110] sm:$0xff] %vm512_vm0, %v6497_v49 }
  0xcf   : > { %612 = vst.msk [vmem:[#allocation4 + $0x118] sm:$0xff] %vm512_vm0, %v6497_v49 }
  0xd0   : > { %613 = vst.msk [vmem:[#allocation4 + $0x120] sm:$0xff] %vm512_vm0, %v6497_v49 }
  0xd1   : > { %614 = vst.msk [vmem:[#allocation4 + $0x128] sm:$0xff] %vm512_vm0, %v6497_v49 }
  0xd2   : > { %615 = vst.msk [vmem:[#allocation4 + $0x130] sm:$0xff] %vm512_vm0, %v6497_v49 }
  0xd3   : > { %616 = vst.msk [vmem:[#allocation4 + $0x138] sm:$0xff] %vm512_vm0, %v6497_v49 }
  0xd4   : > { %617 = vst.msk [vmem:[#allocation4 + $0x140] sm:$0xff] %vm512_vm0, %v6497_v49 }
  0xd5   : > { %618 = vst.msk [vmem:[#allocation4 + $0x148] sm:$0xff] %vm512_vm0, %v6497_v49 }
  0xd6   : > { %619 = vst.msk [vmem:[#allocation4 + $0x150] sm:$0xff] %vm512_vm0, %v6497_v49 }
  0xd7   : > { %620 = vst.msk [vmem:[#allocation4 + $0x158] sm:$0xff] %vm512_vm0, %v6497_v49 }
  0xd8   : > { %621 = vst.msk [vmem:[#allocation4 + $0x160] sm:$0xff] %vm512_vm0, %v6497_v49 }
  0xd9   : > { %622 = vst.msk [vmem:[#allocation4 + $0x168] sm:$0xff] %vm512_vm0, %v6497_v49 }
  0xda   : > { %623 = vst.msk [vmem:[#allocation4 + $0x170] sm:$0xff] %vm512_vm0, %v6497_v49 }
  0xdb   : > { %624 = vst.msk [vmem:[#allocation4 + $0x178] sm:$0xff] %vm512_vm0, %v6497_v49 }
  0xdc   : > { %625 = vst.msk [vmem:[#allocation4 + $0x180] sm:$0xff] %vm512_vm0, %v6497_v49 }
  0xdd   : > { %626 = vst.msk [vmem:[#allocation4 + $0x188] sm:$0xff] %vm512_vm0, %v6497_v49 }
  0xde   : > { %627 = vst.msk [vmem:[#allocation4 + $0x190] sm:$0xff] %vm512_vm0, %v6497_v49 }
  0xdf   : > { %628 = vst.msk [vmem:[#allocation4 + $0x198] sm:$0xff] %vm512_vm0, %v6497_v49 }
  0xe0   : > { %629 = vst.msk [vmem:[#allocation4 + $0x1a0] sm:$0xff] %vm512_vm0, %v6497_v49 }
  0xe1   : > { %630 = vst.msk [vmem:[#allocation4 + $0x1a8] sm:$0xff] %vm512_vm0, %v6497_v49 }
  0xe2   : > { %631 = vst.msk [vmem:[#allocation4 + $0x1b0] sm:$0xff] %vm512_vm0, %v6497_v49 }
  0xe3   : > { %632 = vst.msk [vmem:[#allocation4 + $0x1b8] sm:$0xff] %vm512_vm0, %v6497_v49 }
  0xe4   : > { %633 = vst.msk [vmem:[#allocation4 + $0x1c0] sm:$0xff] %vm512_vm0, %v6497_v49 }
  0xe5   : > { %634 = vst.msk [vmem:[#allocation4 + $0x1c8] sm:$0xff] %vm512_vm0, %v6497_v49 }
  0xe6   : > { %635 = vst.msk [vmem:[#allocation4 + $0x1d0] sm:$0xff] %vm512_vm0, %v6497_v49 }
  0xe7   : > { %636 = vst.msk [vmem:[#allocation4 + $0x1d8] sm:$0xff] %vm512_vm0, %v6497_v49 }
  0xe8   : > { %637 = vst.msk [vmem:[#allocation4 + $0x1e0] sm:$0xff] %vm512_vm0, %v6497_v49 }
  0xe9   : > { %638 = vst.msk [vmem:[#allocation4 + $0x1e8] sm:$0xff] %vm512_vm0, %v6497_v49 }
  0xea   : > { %639 = vst.msk [vmem:[#allocation4 + $0x1f0] sm:$0xff] %vm512_vm0, %v6497_v49 }
  0xeb   : > { %640 = vst.msk [vmem:[#allocation4 + $0x1f8] sm:$0xff] %vm512_vm0, %v6497_v49 }
  0xec   : > { %641 = vst [vmem:[#allocation5] sm:$0xff] %v6497_v49 }
  0xed   : > { %642 = vst [vmem:[#allocation5 + $0x8] sm:$0xff] %v6497_v49 }
  0xee   : > { %643 = vst [vmem:[#allocation5 + $0x10] sm:$0xff] %v6497_v49 }
  0xef   : > { %644 = vst [vmem:[#allocation5 + $0x18] sm:$0xff] %v6497_v49 }
  0xf0   : > { %645 = vst [vmem:[#allocation5 + $0x20] sm:$0xff] %v6497_v49 }
  0xf1   : > { %646 = vst [vmem:[#allocation5 + $0x28] sm:$0xff] %v6497_v49 }
  0xf2   : > { %647 = vst [vmem:[#allocation5 + $0x30] sm:$0xff] %v6497_v49 }
  0xf3   : > { %648 = vst [vmem:[#allocation5 + $0x38] sm:$0xff] %v6497_v49 }
  0xf4   : > { %649 = vst [vmem:[#allocation5 + $0x40] sm:$0xff] %v6497_v49 }
  0xf5   : > { %650 = vst [vmem:[#allocation5 + $0x48] sm:$0xff] %v6497_v49 }
  0xf6   : > { %651 = vst [vmem:[#allocation5 + $0x50] sm:$0xff] %v6497_v49 }
  0xf7   : > { %652 = vst [vmem:[#allocation5 + $0x58] sm:$0xff] %v6497_v49 }
  0xf8   : > { %653 = vst [vmem:[#allocation5 + $0x60] sm:$0xff] %v6497_v49 }
  0xf9   : > { %654 = vst [vmem:[#allocation5 + $0x68] sm:$0xff] %v6497_v49 }
  0xfa   : > { %655 = vst [vmem:[#allocation5 + $0x70] sm:$0xff] %v6497_v49 }
  0xfb   : > { %656 = vst [vmem:[#allocation5 + $0x78] sm:$0xff] %v6497_v49 }
 0x10a   : > { %v448_v33 = vpop.f32.mrf.mxu0  ;;  %v460_v34 = vpop.f32.mrf.mxu1 }
 0x10b   : > { %496 = vst [vmem:[#allocation2 + $0x30] sm:$0xff] %v448_v33 }
 0x10c   : > { %500 = vst [vmem:[#allocation2 + $0x50] sm:$0xff] %v460_v34 }
 0x10e   : > { %v472_v35 = vpop.f32.mrf.mxu2  ;;  %v484_v36 = vpop.f32.mrf.mxu3 }
 0x10f   : > { %504 = vst [vmem:[#allocation2 + $0x40] sm:$0xff] %v472_v35 }
 0x110   : > { %508 = vst [vmem:[#allocation2 + $0x60] sm:$0xff] %v484_v36 }
 0x112   : > { %v451_v37 = vpop.f32.mrf.mxu0  ;;  %v463_v38 = vpop.f32.mrf.mxu1 }
 0x113   : > { %497 = vst [vmem:[#allocation2] sm:$0xff] %v451_v37 }
 0x114   : > { %501 = vst [vmem:[#allocation2 + $0x68] sm:$0xff] %v463_v38 }
 0x116   : > { %v475_v39 = vpop.f32.mrf.mxu2  ;;  %v487_v40 = vpop.f32.mrf.mxu3 }
 0x117   : > { %505 = vst [vmem:[#allocation2 + $0x20] sm:$0xff] %v475_v39 }
 0x118   : > { %509 = vst [vmem:[#allocation2 + $0x70] sm:$0xff] %v487_v40 }
 0x11a   : > { %v454_v41 = vpop.f32.mrf.mxu0  ;;  %v466_v42 = vpop.f32.mrf.mxu1 }
 0x11b   : > { %498 = vst [vmem:[#allocation2 + $0x58] sm:$0xff] %v454_v41 }
 0x11c   : > { %502 = vst [vmem:[#allocation2 + $0x8] sm:$0xff] %v466_v42 }
 0x11e   : > { %v478_v43 = vpop.f32.mrf.mxu2  ;;  %v490_v44 = vpop.f32.mrf.mxu3 }
 0x11f   : > { %506 = vst [vmem:[#allocation2 + $0x10] sm:$0xff] %v478_v43 }
 0x120   : > { %510 = vst [vmem:[#allocation2 + $0x78] sm:$0xff] %v490_v44 }
 0x122   : > { %v457_v45 = vpop.f32.mrf.mxu0  ;;  %v469_v46 = vpop.f32.mrf.mxu1 }
 0x123   : > { %499 = vst [vmem:[#allocation2 + $0x18] sm:$0xff] %v457_v45 }
 0x124   : > { %503 = vst [vmem:[#allocation2 + $0x48] sm:$0xff] %v469_v46 }
 0x126   : > { %v481_v47 = vpop.f32.mrf.mxu2  ;;  %v493_v48 = vpop.f32.mrf.mxu3 }
 0x127   : > { %507 = vst [vmem:[#allocation2 + $0x38] sm:$0xff] %v481_v47 }
 0x128   : > { %511 = vst [vmem:[#allocation2 + $0x28] sm:$0xff] %v493_v48 }
 0x129 PF: > { %v703_v50 = vld [vmem:[#allocation12 + $0xf0] sm:$0xff]  ;;  %v704_v51 = vld [vmem:[#allocation12 + $0xf8] sm:$0xff]  ;;  %v701_v52 = vld [vmem:[#allocation12 + $0xe0] sm:$0xff]  ;;  %s6498_s10 = smov 96   ;;  %s6499_s11 = smov 64   ;;  %vm851_vm1 = vcmask 261120  }
 0x12a   : > { %705 = vmatpush.msra.mxu0 %v703_v50  ;;  %5429 = vmatpush.msra.mxu3 %v703_v50  ;;  %v702_v53 = vld [vmem:[#allocation12 + $0xe8] sm:$0xff]  ;;  %v699_v54 = vld [vmem:[#allocation12 + $0xd0] sm:$0xff]  ;;  %v700_v55 = vld [vmem:[#allocation12 + $0xd8] sm:$0xff]  ;;  %s6500_s28 = smov 32   ;;  %vm1333_vm2 = vcmask 7168   ;;  %vm2459_vm3 = vcmask 523520  }
 0x12b   : > { %5445 = vmatpush.msra.mxu2 %v704_v51  ;;  %770 = vmatpush.msra.mxu1 %v704_v51  ;;  %v697_v56 = vld [vmem:[#allocation12 + $0xc0] sm:$0xff]  ;;  %v698_v57 = vld [vmem:[#allocation12 + $0xc8] sm:$0xff]  ;;  %v695_v58 = vld [vmem:[#allocation12 + $0xb0] sm:$0xff]  ;;  %vm3360_vm4 = vcmask 785920   ;;  %vm4261_vm5 = vcmask 1048320   ;;  %s9983_s21 = sld [smem:[#allocation22_spill]] }
 0x12c   : > { %706 = vmatpush.msra.mxu0 %v701_v52  ;;  %5430 = vmatpush.msra.mxu3 %v701_v52  ;;  %v696_v59 = vld [vmem:[#allocation12 + $0xb8] sm:$0xff]  ;;  %v693_v60 = vld [vmem:[#allocation12 + $0xa0] sm:$0xff]  ;;  %v694_v61 = vld [vmem:[#allocation12 + $0xa8] sm:$0xff] }
 0x12d   : > { %5446 = vmatpush.msra.mxu2 %v702_v53  ;;  %771 = vmatpush.msra.mxu1 %v702_v53  ;;  %v691_v62 = vld [vmem:[#allocation12 + $0x90] sm:$0xff]  ;;  %v692_v63 = vld [vmem:[#allocation12 + $0x98] sm:$0xff]  ;;  %v689_v0 = vld [vmem:[#allocation12 + $0x80] sm:$0xff] }
 0x12e   : > { %707 = vmatpush.msra.mxu0 %v699_v54  ;;  %5431 = vmatpush.msra.mxu3 %v699_v54  ;;  %v690_v1 = vld [vmem:[#allocation12 + $0x88] sm:$0xff]  ;;  %v687_v2 = vld [vmem:[#allocation12 + $0x70] sm:$0xff]  ;;  %v688_v3 = vld [vmem:[#allocation12 + $0x78] sm:$0xff] }
 0x12f   : > { %5447 = vmatpush.msra.mxu2 %v700_v55  ;;  %772 = vmatpush.msra.mxu1 %v700_v55  ;;  %v685_v4 = vld [vmem:[#allocation12 + $0x60] sm:$0xff]  ;;  %v686_v5 = vld [vmem:[#allocation12 + $0x68] sm:$0xff]  ;;  %v683_v6 = vld [vmem:[#allocation12 + $0x50] sm:$0xff] }
 0x130   : > { %708 = vmatpush.msra.mxu0 %v697_v56  ;;  %5432 = vmatpush.msra.mxu3 %v697_v56  ;;  %v684_v7 = vld [vmem:[#allocation12 + $0x58] sm:$0xff]  ;;  %v681_v8 = vld [vmem:[#allocation12 + $0x40] sm:$0xff]  ;;  %v682_v9 = vld [vmem:[#allocation12 + $0x48] sm:$0xff] }
 0x131   : > { %5448 = vmatpush.msra.mxu2 %v698_v57  ;;  %773 = vmatpush.msra.mxu1 %v698_v57  ;;  %v679_v10 = vld [vmem:[#allocation12 + $0x30] sm:$0xff]  ;;  %v680_v11 = vld [vmem:[#allocation12 + $0x38] sm:$0xff]  ;;  %v677_v12 = vld [vmem:[#allocation12 + $0x20] sm:$0xff]  ;;  %p5374_p1 = scmp.ne.s32.totalorder %s9983_s21, 1 }
 0x132   : > { %709 = vmatpush.msra.mxu0 %v695_v58  ;;  %5433 = vmatpush.msra.mxu3 %v695_v58  ;;  %v678_v13 = vld [vmem:[#allocation12 + $0x28] sm:$0xff]  ;;  %v675_v14 = vld [vmem:[#allocation12 + $0x10] sm:$0xff]  ;;  %v676_v15 = vld [vmem:[#allocation12 + $0x18] sm:$0xff]  ;;  %s9984_s4 = sld [smem:[#allocation100_spill]] (!%p5374_p1) }
 0x133   : > { %5449 = vmatpush.msra.mxu2 %v696_v59  ;;  %774 = vmatpush.msra.mxu1 %v696_v59  ;;  %v673_v16 = vld [vmem:[#allocation12] sm:$0xff]  ;;  %v674_v17 = vld [vmem:[#allocation12 + $0x8] sm:$0xff]  ;;  %v7055_v20 = vld [vmem:[#allocation2 + $0x30] sm:$0xff] }
 0x134   : > { %710 = vmatpush.msra.mxu0 %v693_v60  ;;  %5434 = vmatpush.msra.mxu3 %v693_v60  ;;  %v657_v18 = vld [vmem:[%s6748_s19] sm:$0xff]  ;;  %v658_v21 = vld [vmem:[%s6748_s19 + $0x8] sm:$0xff]  ;;  %v7061_v23 = vld [vmem:[#allocation2 + $0x18] sm:$0xff] }
 0x135   : > { %5450 = vmatpush.msra.mxu2 %v694_v61  ;;  %775 = vmatpush.msra.mxu1 %v694_v61  ;;  %v665_v19 = vld [vmem:[%s6748_s19 + $0x40] sm:$0xff]  ;;  %v666_v22 = vld [vmem:[%s6748_s19 + $0x48] sm:$0xff]  ;;  %v7063_v24 = vld [vmem:[#allocation2 + $0x58] sm:$0xff] }
 0x136   : > { %711 = vmatpush.msra.mxu0 %v691_v62  ;;  %5435 = vmatpush.msra.mxu3 %v691_v62  ;;  %v7065_v25 = vld [vmem:[#allocation2] sm:$0xff]  ;;  %v667_v26 = vld [vmem:[%s6748_s19 + $0x50] sm:$0xff]  ;;  %v7075_v28 = vld [vmem:[#allocation2 + $0x8] sm:$0xff] }
 0x137   : > { %5451 = vmatpush.msra.mxu2 %v692_v63  ;;  %776 = vmatpush.msra.mxu1 %v692_v63  ;;  %v659_v27 = vld [vmem:[%s6748_s19 + $0x10] sm:$0xff]  ;;  %v7077_v29 = vld [vmem:[#allocation2 + $0x68] sm:$0xff]  ;;  %v668_v31 = vld [vmem:[%s6748_s19 + $0x58] sm:$0xff] }
 0x138   : > { %712 = vmatpush.msra.mxu0 %v689_v0  ;;  %5436 = vmatpush.msra.mxu3 %v689_v0  ;;  %v7079_v30 = vld [vmem:[#allocation2 + $0x50] sm:$0xff]  ;;  %v660_v32 = vld [vmem:[%s6748_s19 + $0x18] sm:$0xff]  ;;  %v7089_v33 = vld [vmem:[#allocation2 + $0x20] sm:$0xff] }
 0x139   : > { %5452 = vmatpush.msra.mxu2 %v690_v1  ;;  %777 = vmatpush.msra.mxu1 %v690_v1  ;;  %v7091_v34 = vld [vmem:[#allocation2 + $0x40] sm:$0xff]  ;;  %v7093_v35 = vld [vmem:[#allocation2 + $0x48] sm:$0xff]  ;;  %v7105_v39 = vld [vmem:[#allocation2 + $0x38] sm:$0xff] }
 0x13a   : > { %713 = vmatpush.msra.mxu0 %v687_v2  ;;  %5437 = vmatpush.msra.mxu3 %v687_v2  ;;  %v661_v36 = vld [vmem:[%s6748_s19 + $0x20] sm:$0xff]  ;;  %v7107_v40 = vld [vmem:[#allocation2 + $0x10] sm:$0xff]  ;;  %v670_v41 = vld [vmem:[%s6748_s19 + $0x68] sm:$0xff] }
 0x13b   : > { %5453 = vmatpush.msra.mxu2 %v688_v3  ;;  %778 = vmatpush.msra.mxu1 %v688_v3  ;;  %v669_v37 = vld [vmem:[%s6748_s19 + $0x60] sm:$0xff]  ;;  %v662_v42 = vld [vmem:[%s6748_s19 + $0x28] sm:$0xff]  ;;  %v7119_v44 = vld [vmem:[#allocation2 + $0x78] sm:$0xff] }
 0x13c   : > { %714 = vmatpush.msra.mxu0 %v685_v4  ;;  %5438 = vmatpush.msra.mxu3 %v685_v4  ;;  %v7103_v38 = vld [vmem:[#allocation2 + $0x60] sm:$0xff]  ;;  %v7117_v43 = vld [vmem:[#allocation2 + $0x28] sm:$0xff]  ;;  %v7121_v45 = vld [vmem:[#allocation2 + $0x70] sm:$0xff] }
 0x13d   : > { %5454 = vmatpush.msra.mxu2 %v686_v5  ;;  %779 = vmatpush.msra.mxu1 %v686_v5  ;;  %v671_v46 = vld [vmem:[%s6748_s19 + $0x70] sm:$0xff]  ;;  %v672_v48 = vld [vmem:[%s6748_s19 + $0x78] sm:$0xff] }
 0x13e   : > { %715 = vmatpush.msra.mxu0 %v683_v6  ;;  %5439 = vmatpush.msra.mxu3 %v683_v6  ;;  %v663_v47 = vld [vmem:[%s6748_s19 + $0x30] sm:$0xff]  ;;  %v664_v49 = vld [vmem:[%s6748_s19 + $0x38] sm:$0xff] }
 0x13f   : > { %5455 = vmatpush.msra.mxu2 %v684_v7  ;;  %780 = vmatpush.msra.mxu1 %v684_v7 }
 0x140   : > { %716 = vmatpush.msra.mxu0 %v681_v8  ;;  %5440 = vmatpush.msra.mxu3 %v681_v8 }
 0x141   : > { %5456 = vmatpush.msra.mxu2 %v682_v9  ;;  %781 = vmatpush.msra.mxu1 %v682_v9 }
 0x142   : > { %717 = vmatpush.msra.mxu0 %v679_v10  ;;  %5441 = vmatpush.msra.mxu3 %v679_v10 }
 0x143   : > { %5457 = vmatpush.msra.mxu2 %v680_v11  ;;  %782 = vmatpush.msra.mxu1 %v680_v11 }
 0x144   : > { %718 = vmatpush.msra.mxu0 %v677_v12  ;;  %5442 = vmatpush.msra.mxu3 %v677_v12 }
 0x145   : > { %5458 = vmatpush.msra.mxu2 %v678_v13  ;;  %783 = vmatpush.msra.mxu1 %v678_v13 }
 0x146   : > { %719 = vmatpush.msra.mxu0 %v675_v14  ;;  %5443 = vmatpush.msra.mxu3 %v675_v14 }
 0x147   : > { %5459 = vmatpush.msra.mxu2 %v676_v15  ;;  %784 = vmatpush.msra.mxu1 %v676_v15 }
 0x148   : > { %720 = vmatpush.msra.mxu0 %v673_v16  ;;  %5444 = vmatpush.msra.mxu3 %v673_v16 }
 0x149   : > { %5460 = vmatpush.msra.mxu2 %v674_v17  ;;  %721 = vmatmul.f32.vlgmr.msra.gmra.mxu0 %v657_v18 }
 0x14a   : > { %745 = vmatmul.f32.vlgmr.msra.gmra.mxu3 %v665_v19  ;;  %810 = vmatmul.f32.vlgmr.msra.gmra.mxu2 %v665_v19 }
 0x14b   : > { %785 = vmatpush.msra.mxu1 %v674_v17  ;;  %1607 = vrot.lane.b32.xlu0 %v7055_v20, %s6498_s10 }
 0x14c   : > { %786 = vmatmul.f32.vlgmr.msra.gmra.mxu1 %v657_v18  ;;  %1611 = vrot.lane.b32.xlu1 %v7063_v24, %s6498_s10 }
 0x14d   : > { %1609 = vrot.lane.b32.xlu2 %v7065_v25, %s6498_s10 }
 0x151   : > { %724 = vmatmul.f32.gmra.mxu0 %v658_v21 }
 0x152   : > { %748 = vmatmul.f32.gmra.mxu3 %v666_v22  ;;  %813 = vmatmul.f32.gmra.mxu2 %v666_v22 }
 0x153   : > { %1613 = vrot.lane.b32.xlu0 %v7061_v23, %s6498_s10 }
 0x154   : > { %789 = vmatmul.f32.gmra.mxu1 %v658_v21  ;;  %1617 = vrot.lane.b32.xlu1 %v7077_v29, %s6498_s10 }
 0x155   : > { %1615 = vrot.lane.b32.xlu2 %v7079_v30, %s6498_s10 }
 0x159   : > { %727 = vmatmul.f32.gmra.mxu0 %v659_v27 }
 0x15a   : > { %751 = vmatmul.f32.gmra.mxu3 %v667_v26  ;;  %816 = vmatmul.f32.gmra.mxu2 %v667_v26 }
 0x15b   : > { %1619 = vrot.lane.b32.xlu0 %v7075_v28, %s6498_s10 }
 0x15c   : > { %792 = vmatmul.f32.gmra.mxu1 %v659_v27  ;;  %1623 = vrot.lane.b32.xlu1 %v7091_v34, %s6498_s10 }
 0x15d   : > { %1621 = vrot.lane.b32.xlu2 %v7093_v35, %s6498_s10 }
 0x161   : > { %730 = vmatmul.f32.gmra.mxu0 %v660_v32 }
 0x162   : > { %754 = vmatmul.f32.gmra.mxu3 %v668_v31  ;;  %819 = vmatmul.f32.gmra.mxu2 %v668_v31 }
 0x163   : > { %1625 = vrot.lane.b32.xlu0 %v7089_v33, %s6498_s10 }
 0x164   : > { %795 = vmatmul.f32.gmra.mxu1 %v660_v32  ;;  %1629 = vrot.lane.b32.xlu1 %v7105_v39, %s6498_s10 }
 0x165   : > { %1627 = vrot.lane.b32.xlu2 %v7107_v40, %s6498_s10 }
 0x169   : > { %733 = vmatmul.f32.gmra.mxu0 %v661_v36 }
 0x16a   : > { %757 = vmatmul.f32.gmra.mxu3 %v669_v37  ;;  %822 = vmatmul.f32.gmra.mxu2 %v669_v37 }
 0x16b   : > { %1631 = vrot.lane.b32.xlu0 %v7103_v38, %s6498_s10 }
 0x16c   : > { %798 = vmatmul.f32.gmra.mxu1 %v661_v36  ;;  %1635 = vrot.lane.b32.xlu1 %v7119_v44, %s6498_s10 }
 0x16d   : > { %1633 = vrot.lane.b32.xlu2 %v7121_v45, %s6498_s10 }
 0x171   : > { %736 = vmatmul.f32.gmra.mxu0 %v662_v42 }
 0x172   : > { %760 = vmatmul.f32.gmra.mxu3 %v670_v41  ;;  %825 = vmatmul.f32.gmra.mxu2 %v670_v41 }
 0x173   : > { %1637 = vrot.lane.b32.xlu0 %v7117_v43, %s6498_s10 }
 0x174   : > { %801 = vmatmul.f32.gmra.mxu1 %v662_v42  ;;  %2526 = vrot.lane.b32.xlu1 %v7065_v25, %s6499_s11 }
 0x175   : > { %2528 = vrot.lane.b32.xlu2 %v7063_v24, %s6499_s11 }
 0x179   : > { %739 = vmatmul.f32.gmra.mxu0 %v663_v47 }
 0x17a   : > { %763 = vmatmul.f32.gmra.mxu3 %v671_v46  ;;  %828 = vmatmul.f32.gmra.mxu2 %v671_v46 }
 0x17b   : > { %2524 = vrot.lane.b32.xlu0 %v7055_v20, %s6499_s11 }
 0x17c   : > { %804 = vmatmul.f32.gmra.mxu1 %v663_v47  ;;  %2532 = vrot.lane.b32.xlu1 %v7079_v30, %s6499_s11 }
 0x17d   : > { %2534 = vrot.lane.b32.xlu2 %v7077_v29, %s6499_s11 }
 0x181   : > { %742 = vmatmul.f32.gmra.mxu0 %v664_v49 }
 0x182   : > { %766 = vmatmul.f32.gmra.mxu3 %v672_v48  ;;  %831 = vmatmul.f32.gmra.mxu2 %v672_v48 }
 0x183   : > { %2530 = vrot.lane.b32.xlu0 %v7061_v23, %s6499_s11 }
 0x184   : > { %807 = vmatmul.f32.gmra.mxu1 %v664_v49  ;;  %2538 = vrot.lane.b32.xlu1 %v7093_v35, %s6499_s11 }
 0x185   : > { %2540 = vrot.lane.b32.xlu2 %v7091_v34, %s6499_s11 }
 0x18b   : > { %2536 = vrot.lane.b32.xlu0 %v7075_v28, %s6499_s11 }
 0x18c   : > { %2544 = vrot.lane.b32.xlu1 %v7107_v40, %s6499_s11 }
 0x18d   : > { %2546 = vrot.lane.b32.xlu2 %v7105_v39, %s6499_s11 }
 0x193   : > { %2542 = vrot.lane.b32.xlu0 %v7089_v33, %s6499_s11 }
 0x194   : > { %2550 = vrot.lane.b32.xlu1 %v7121_v45, %s6499_s11 }
 0x195   : > { %2552 = vrot.lane.b32.xlu2 %v7119_v44, %s6499_s11 }
 0x19b   : > { %2548 = vrot.lane.b32.xlu0 %v7103_v38, %s6499_s11 }
 0x1a3   : > { %2554 = vrot.lane.b32.xlu0 %v7117_v43, %s6499_s11 }
 0x1a7   : > { %v7165_v50 = vpop.permute.xlu2 %1609 }
 0x1af   : > { %v7169_v52 = vpop.permute.xlu2 %1615 }
 0x1b7   : > { %v7191_v58 = vpop.permute.xlu2 %1621 }
 0x1bd   : > { %v7175_v53 = vpop.permute.xlu0 %1607 }
 0x1be   : > { %v7197_v61 = vpop.permute.xlu1 %1611 }
 0x1bf   : > { %v7213_v2 = vpop.permute.xlu2 %1627 }
 0x1c5   : > { %v7195_v60 = vpop.permute.xlu0 %1613 }
 0x1c6   : > { %v7167_v51 = vpop.f32.mrf.mxu0  ;;  %v7227_v7 = vpop.permute.xlu1 %1617 }
 0x1c7   : > { %2556 = vrot.lane.b32.xlu1 %v7167_v51, %s6499_s11  ;;  %1639 = vrot.lane.b32.xlu2 %v7167_v51, %s6498_s10  ;;  %v7245_v12 = vpop.permute.xlu2 %1633 }
 0x1c8   : > { %9770 = vst [vmem:[#allocation39_spill] sm:$0xff] %v7245_v12 }
 0x1c9   : > { %v7177_v54 = vpop.f32.mrf.mxu1 }
 0x1ca   : > { %9763 = vst [vmem:[#allocation32_spill] sm:$0xff] %v7177_v54 }
 0x1cd   : > { %v7179_v55 = vpop.f32.mrf.mxu3  ;;  %v7181_v56 = vpop.f32.mrf.mxu2 }
 0x1ce   : > { %9764 = vst [vmem:[#allocation33_spill] sm:$0xff] %v7181_v56  ;;  %1655 = vrot.lane.b32.xlu0 %v7179_v55, %s6498_s10  ;;  %v7185_v57 = vpop.f32.mrf.mxu0  ;;  %v7219_v4 = vpop.permute.xlu0 %1619 }
 0x1cf   : > { %2558 = vrot.lane.b32.xlu2 %v7185_v57, %s6499_s11  ;;  %1641 = vrot.lane.b32.xlu1 %v7185_v57, %s6498_s10  ;;  %v7259_v16 = vpop.permute.xlu1 %1623  ;;  %v7275_v22 = vpop.permute.xlu2 %2528 }
 0x1d0   : > { %9774 = vst [vmem:[#allocation43_spill] sm:$0xff] %v7275_v22 }
 0x1d1   : > { %v7193_v59 = vpop.f32.mrf.mxu1 }
 0x1d2   : > { %9765 = vst [vmem:[#allocation34_spill] sm:$0xff] %v7193_v59  ;;  %v7217_v3 = vpack.i.bf16 %v7193_v59, %v7177_v54 }
 0x1d5   : > { %v7199_v62 = vpop.f32.mrf.mxu3  ;;  %v7201_v63 = vpop.f32.mrf.mxu2 }
 0x1d6   : > { %9766 = vst [vmem:[#allocation35_spill] sm:$0xff] %v7201_v63  ;;  %2572 = vrot.lane.b32.xlu0 %v7179_v55, %s6499_s11  ;;  %v7209_v0 = vpop.f32.mrf.mxu0  ;;  %v7243_v11 = vpack.i.bf16 %v7201_v63, %v7181_v56  ;;  %v7253_v15 = vpop.permute.xlu0 %1625 }
 0x1d7   : > { %1657 = vrot.lane.b32.xlu2 %v7199_v62, %s6498_s10  ;;  %2574 = vrot.lane.b32.xlu1 %v7199_v62, %s6499_s11  ;;  %v7279_v27 = vpop.permute.xlu1 %1629  ;;  %v7297_v41 = vpop.permute.xlu2 %2534 }
 0x1d8   : > { %9776 = vst [vmem:[#allocation45_spill] sm:$0xff] %v7279_v27 }
 0x1d9   : > { %v7211_v1 = vpop.f32.mrf.mxu1  ;;  %9779 = vst [vmem:[#allocation48_spill] sm:$0xff] %v7297_v41 }
 0x1da   : > { %9767 = vst [vmem:[#allocation36_spill] sm:$0xff] %v7211_v1 }
 0x1dd   : > { %v7221_v5 = vpop.f32.mrf.mxu3  ;;  %v7223_v6 = vpop.f32.mrf.mxu2 }
 0x1de   : > { %9768 = vst [vmem:[#allocation37_spill] sm:$0xff] %v7223_v6  ;;  %5677 = vrot.lane.b32.xlu0 %v7217_v3, %s6498_s10  ;;  %v7235_v9 = vpop.f32.mrf.mxu0  ;;  %v7277_v26 = vpop.permute.xlu0 %1631 }
 0x1df   : > { %2576 = vrot.lane.b32.xlu2 %v7221_v5, %s6499_s11  ;;  %1659 = vrot.lane.b32.xlu1 %v7221_v5, %s6498_s10  ;;  %9775 = vst [vmem:[#allocation44_spill] sm:$0xff] %v7277_v26  ;;  %v7305_v47 = vpop.permute.xlu1 %1635  ;;  %v7321_v22 = vpop.permute.xlu2 %2540 }
 0x1e0   : > { %9781 = vst [vmem:[#allocation50_spill] sm:$0xff] %v7305_v47 }
 0x1e1   : > { %v7233_v8 = vpop.f32.mrf.mxu1  ;;  %9783 = vst [vmem:[#allocation52_spill] sm:$0xff] %v7321_v22 }
 0x1e2   : > { %9769 = vst [vmem:[#allocation38_spill] sm:$0xff] %v7233_v8  ;;  %v7239_v10 = vpack.i.bf16 %v7233_v8, %v7211_v1 }
 0x1e5   : > { %v7247_v13 = vpop.f32.mrf.mxu3  ;;  %v7249_v14 = vpop.f32.mrf.mxu2 }
 0x1e6   : > { %9771 = vst [vmem:[#allocation40_spill] sm:$0xff] %v7249_v14  ;;  %5682 = vrot.lane.b32.xlu0 %v7243_v11, %s6498_s10  ;;  %v7261_v17 = vpop.f32.mrf.mxu0  ;;  %v7283_v31 = vpack.i.bf16 %v7249_v14, %v7223_v6  ;;  %v7299_v42 = vpop.permute.xlu0 %1637 }
 0x1e7   : > { %5687 = vrot.lane.b32.xlu1 %v7239_v10, %s6498_s10  ;;  %1645 = vrot.lane.b32.xlu2 %v7235_v9, %s6498_s10  ;;  %9780 = vst [vmem:[#allocation49_spill] sm:$0xff] %v7299_v42  ;;  %v7336_v26 = vpop.permute.xlu1 %2526  ;;  %v7349_v27 = vpop.permute.xlu2 %2546 }
 0x1e8   : > { %9786 = vst [vmem:[#allocation55_spill] sm:$0xff] %v7336_v26 }
 0x1e9   : > { %v7269_v21 = vpop.f32.mrf.mxu1  ;;  %9788 = vst [vmem:[#allocation57_spill] sm:$0xff] %v7349_v27 }
 0x1ea   : > { %9773 = vst [vmem:[#allocation42_spill] sm:$0xff] %v7269_v21 }
 0x1ed   : > { %v7263_v18 = vpop.f32.mrf.mxu3  ;;  %v7265_v19 = vpop.f32.mrf.mxu2 }
 0x1ee   : > { %9772 = vst [vmem:[#allocation41_spill] sm:$0xff] %v7265_v19  ;;  %1643 = vrot.lane.b32.xlu0 %v7209_v0, %s6498_s10  ;;  %v7323_v42 = vpop.permute.xlu0 %2524 }
 0x1ef   : > { %2562 = vrot.lane.b32.xlu1 %v7235_v9, %s6499_s11  ;;  %2564 = vrot.lane.b32.xlu2 %v7261_v17, %s6499_s11  ;;  %9784 = vst [vmem:[#allocation53_spill] sm:$0xff] %v7323_v42  ;;  %v7346_v42 = vpop.f32.mrf.mxu0 }
 0x1f1   : > { %v7295_v37 = vpop.f32.mrf.mxu1 }
 0x1f2   : > { %9778 = vst [vmem:[#allocation47_spill] sm:$0xff] %v7295_v37  ;;  %v7303_v46 = vpack.i.bf16 %v7295_v37, %v7269_v21 }
 0x1f5   : > { %v7285_v32 = vpop.f32.mrf.mxu3  ;;  %v7287_v36 = vpop.f32.mrf.mxu2 }
 0x1f6   : > { %9777 = vst [vmem:[#allocation46_spill] sm:$0xff] %v7287_v36  ;;  %2560 = vrot.lane.b32.xlu0 %v7209_v0, %s6499_s11  ;;  %v7319_v41 = vpack.i.bf16 %v7287_v36, %v7265_v19  ;;  %v7354_v26 = vpop.permute.xlu0 %2530 }
 0x1f7   : > { %5692 = vrot.lane.b32.xlu1 %v7283_v31, %s6498_s10  ;;  %1663 = vrot.lane.b32.xlu2 %v7263_v18, %s6498_s10  ;;  %9789 = vst [vmem:[#allocation58_spill] sm:$0xff] %v7354_v26 }
 0x1f9   : > { %v7341_v22 = vpop.f32.mrf.mxu1 }
 0x1fa   : > { %9787 = vst [vmem:[#allocation56_spill] sm:$0xff] %v7341_v22 }
 0x1fd   : > { %v7307_v48 = vpop.f32.mrf.mxu3  ;;  %v7309_v49 = vpop.f32.mrf.mxu2 }
 0x1fe   : > { %9782 = vst [vmem:[#allocation51_spill] sm:$0xff] %v7309_v49  ;;  %1661 = vrot.lane.b32.xlu0 %v7247_v13, %s6498_s10 }
 0x1ff   : > { %5697 = vrot.lane.b32.xlu2 %v7303_v46, %s6498_s10  ;;  %1647 = vrot.lane.b32.xlu1 %v7261_v17, %s6498_s10 }
 0x205   : > { %v7325_v47 = vpop.f32.mrf.mxu3  ;;  %v7327_v12 = vpop.f32.mrf.mxu2 }
 0x206   : > { %9785 = vst [vmem:[#allocation54_spill] sm:$0xff] %v7327_v12  ;;  %5246 = vmatpush.xpose.msk.msrb.mxu2 %vm851_vm1, %v7325_v47  ;;  %1350 = vmatpush.msrb.mxu3 %v7327_v12 }
 0x207   : > { %2578 = vrot.lane.b32.xlu0 %v7247_v13, %s6499_s11  ;;  %5702 = vrot.lane.b32.xlu2 %v7319_v41, %s6498_s10 }
 0x208   : > { %1351 = vmatpush.msrb.mxu3 %v7309_v49  ;;  %2580 = vrot.lane.b32.xlu1 %v7263_v18, %s6499_s11 }
 0x20a   : > { %5247 = vmatpush.xpose.msk.msrb.mxu2 %vm851_vm1, %v7307_v48  ;;  %1352 = vmatpush.msrb.mxu3 %v7287_v36  ;;  %v7368_v36 = vpop.f32.mrf.mxu0 }
 0x20c   : > { %1353 = vmatpush.msrb.mxu3 %v7265_v19  ;;  %v7363_v19 = vpop.permute.xlu1 %2532 }
 0x20d   : > { %9790 = vst [vmem:[#allocation59_spill] sm:$0xff] %v7363_v19 }
 0x20e   : > { %5248 = vmatpush.xpose.msk.msrb.mxu2 %vm851_vm1, %v7285_v32  ;;  %1354 = vmatpush.msrb.mxu3 %v7249_v14  ;;  %v7370_v14 = vpop.f32.mrf.mxu1 }
 0x20f   : > { %1649 = vrot.lane.b32.xlu0 %v7346_v42, %s6498_s10  ;;  %2582 = vrot.lane.b32.xlu2 %v7285_v32, %s6499_s11  ;;  %9791 = vst [vmem:[#allocation60_spill] sm:$0xff] %v7370_v14 }
 0x210   : > { %1355 = vmatpush.msrb.mxu3 %v7223_v6  ;;  %1665 = vrot.lane.b32.xlu1 %v7285_v32, %s6498_s10  ;;  %v7380_v6 = vpop.permute.xlu2 %2552 }
 0x211   : > { %9792 = vst [vmem:[#allocation61_spill] sm:$0xff] %v7380_v6 }
 0x212   : > { %5249 = vmatpush.xpose.msk.msrb.mxu2 %vm851_vm1, %v7263_v18  ;;  %1356 = vmatpush.msrb.mxu3 %v7201_v63  ;;  %v7385_v63 = vpop.permute.xlu0 %2536  ;;  %v743_v27 = vpop.f32.mrf.mxu0 }
 0x213   : > { %9793 = vst [vmem:[#allocation62_spill] sm:$0xff] %v7385_v63 }
 0x214   : > { %1357 = vmatpush.msrb.mxu3 %v7181_v56  ;;  %v7390_v56 = vpop.permute.xlu1 %2538 }
 0x215   : > { %9794 = vst [vmem:[#allocation63_spill] sm:$0xff] %v7390_v56 }
 0x216   : > { %5250 = vmatpush.xpose.msk.msrb.mxu2 %vm851_vm1, %v7247_v13  ;;  %1358 = vmatpush.msrb.mxu3 %v7370_v14 }
 0x217   : > { %2566 = vrot.lane.b32.xlu0 %v7346_v42, %s6499_s11  ;;  %1651 = vrot.lane.b32.xlu2 %v7368_v36, %s6498_s10 }
 0x218   : > { %1359 = vmatpush.msrb.mxu3 %v7341_v22  ;;  %2568 = vrot.lane.b32.xlu1 %v7368_v36, %s6499_s11 }
 0x21a   : > { %5251 = vmatpush.xpose.msk.msrb.mxu2 %vm851_vm1, %v7221_v5  ;;  %1360 = vmatpush.msrb.mxu3 %v7295_v37 }
 0x21c   : > { %1361 = vmatpush.msrb.mxu3 %v7269_v21  ;;  %v7406_v21 = vpop.permute.xlu0 %2542 }
 0x21d   : > { %9795 = vst [vmem:[#allocation64_spill] sm:$0xff] %v7406_v21 }
 0x21e   : > { %5252 = vmatpush.xpose.msk.msrb.mxu2 %vm851_vm1, %v7199_v62  ;;  %1362 = vmatpush.msrb.mxu3 %v7233_v8  ;;  %v7409_v8 = vpop.permute.xlu1 %2544 }
 0x21f   : > { %1667 = vrot.lane.b32.xlu0 %v7307_v48, %s6498_s10  ;;  %2570 = vrot.lane.b32.xlu2 %v743_v27, %s6499_s11  ;;  %9796 = vst [vmem:[#allocation65_spill] sm:$0xff] %v7409_v8 }
 0x220   : > { %1363 = vmatpush.msrb.mxu3 %v7211_v1  ;;  %1653 = vrot.lane.b32.xlu1 %v743_v27, %s6498_s10 }
 0x221   : > { %v7401_v37 = vpop.permute.xlu2 %1639 }
 0x222   : > { %5253 = vmatpush.xpose.msk.msrb.mxu2 %vm851_vm1, %v7179_v55  ;;  %1364 = vmatpush.msrb.mxu3 %v7193_v59 }
 0x224   : > { %1365 = vmatpush.msrb.mxu3 %v7177_v54  ;;  %v5706_v54 = vpack.i.bf16 %v7370_v14, %v7341_v22  ;;  %v7424_v59 = vpop.permute.xlu0 %2548  ;;  %v5711_v22 = vpack.i.bf16 %v7327_v12, %v7309_v49 }
 0x225   : > { %9797 = vst [vmem:[#allocation66_spill] sm:$0xff] %v7424_v59 }
 0x226   : > { %5254 = vmatpush.xpose.msk.msrb.mxu2 %vm851_vm1, %v743_v27  ;;  %v7431_v6 = vpop.permute.xlu1 %2550 }
 0x227   : > { %2584 = vrot.lane.b32.xlu0 %v7307_v48, %s6499_s11  ;;  %1669 = vrot.lane.b32.xlu2 %v7325_v47, %s6498_s10  ;;  %9798 = vst [vmem:[#allocation67_spill] sm:$0xff] %v7431_v6 }
 0x228   : > { %2586 = vrot.lane.b32.xlu1 %v7325_v47, %s6499_s11 }
 0x229   : > { %v7418_v1 = vpop.permute.xlu2 %2558 }
 0x22a   : > { %5255 = vmatpush.xpose.msk.msrb.mxu2 %vm851_vm1, %v7368_v36 }
 0x22c   : > { %v7443_v14 = vpop.permute.xlu0 %2554 }
 0x22d   : > { %9799 = vst [vmem:[#allocation68_spill] sm:$0xff] %v7443_v14 }
 0x22e   : > { %5256 = vmatpush.xpose.msk.msrb.mxu2 %vm851_vm1, %v7346_v42 }
 0x22f   : > { %5707 = vrot.lane.b32.xlu0 %v5706_v54, %s6498_s10  ;;  %5727 = vrot.lane.b32.xlu2 %v7303_v46, %s6499_s11 }
 0x230   : > { %5717 = vrot.lane.b32.xlu1 %v7217_v3, %s6499_s11 }
 0x231   : > { %v7435_v8 = vpop.permute.xlu2 %1657 }
 0x232   : > { %5257 = vmatpush.xpose.msk.msrb.mxu2 %vm851_vm1, %v7261_v17 }
 0x236   : > { %5258 = vmatpush.xpose.msk.msrb.mxu2 %vm851_vm1, %v7235_v9 }
 0x237   : > { %5712 = vrot.lane.b32.xlu0 %v5711_v22, %s6498_s10  ;;  %5742 = vrot.lane.b32.xlu2 %v7283_v31, %s6499_s11 }
 0x238   : > { %5737 = vrot.lane.b32.xlu1 %v7243_v11, %s6499_s11 }
 0x239   : > { %v7450_v3 = vpop.permute.xlu1 %2556  ;;  %v7452_v46 = vpop.permute.xlu2 %2576 }
 0x23a   : > { %5259 = vmatpush.xpose.msk.msrb.mxu2 %vm851_vm1, %v7209_v0 }
 0x23e   : > { %5260 = vmatpush.xpose.msk.msrb.mxu2 %vm851_vm1, %v7185_v57 }
 0x23f   : > { %5722 = vrot.lane.b32.xlu0 %v7239_v10, %s6499_s11  ;;  %3487 = vrot.lane.b32.xlu2 %v7325_v47, %s6500_s28 }
 0x240   : > { %v7462_v31 = vpop.permute.xlu0 %1655  ;;  %5752 = vrot.lane.b32.xlu1 %v5711_v22, %s6499_s11 }
 0x241   : > { %v7465_v11 = vpop.permute.xlu1 %1641  ;;  %v7467_v49 = vpop.permute.xlu2 %1645 }
 0x242   : > { %5261 = vmatpush.xpose.msk.msrb.mxu2 %vm851_vm1, %v7167_v51 }
 0x245   : > { %5262 = vmatmul.msk.f32.vlgmr.msrb.gmra.mxu2 %vm851_vm1, %v7055_v20 }
 0x247   : > { %5732 = vrot.lane.b32.xlu0 %v5706_v54, %s6499_s11  ;;  %3481 = vrot.lane.b32.xlu2 %v7263_v18, %s6500_s28 }
 0x248   : > { %v7476_v10 = vpop.permute.xlu0 %2572  ;;  %3483 = vrot.lane.b32.xlu1 %v7285_v32, %s6500_s28 }
 0x249   : > { %v7480_v22 = vpop.permute.xlu1 %2574  ;;  %v7482_v47 = vpop.permute.xlu2 %2564 }
 0x24d   : > { %5263 = vmatmul.msk.f32.gmra.mxu2 %vm851_vm1, %v7065_v25 }
 0x24f   : > { %5747 = vrot.lane.b32.xlu0 %v7319_v41, %s6499_s11  ;;  %3477 = vrot.lane.b32.xlu2 %v7221_v5, %s6500_s28 }
 0x250   : > { %v7490_v54 = vpop.permute.xlu0 %5677  ;;  %3479 = vrot.lane.b32.xlu1 %v7247_v13, %s6500_s28 }
 0x251   : > { %v7494_v18 = vpop.permute.xlu1 %1659  ;;  %v1664_v32 = vpop.permute.xlu2 %1663 }
 0x255   : > { %5264 = vmatmul.msk.f32.gmra.mxu2 %vm851_vm1, %v7063_v24 }
 0x257   : > { %3485 = vrot.lane.b32.xlu0 %v7307_v48, %s6500_s28  ;;  %3471 = vrot.lane.b32.xlu2 %v743_v27, %s6500_s28 }
 0x258   : > { %v7501_v41 = vpop.permute.xlu0 %5682  ;;  %3473 = vrot.lane.b32.xlu1 %v7179_v55, %s6500_s28 }
 0x259   : > { %v7505_v5 = vpop.permute.xlu1 %5687  ;;  %v7507_v12 = vpop.permute.xlu2 %5697 }
 0x25d   : > { %5265 = vmatmul.msk.f32.gmra.mxu2 %vm851_vm1, %v7061_v23 }
 0x25f   : > { %3475 = vrot.lane.b32.xlu0 %v7199_v62, %s6500_s28  ;;  %3467 = vrot.lane.b32.xlu2 %v7346_v42, %s6500_s28 }
 0x260   : > { %v7515_v13 = vpop.permute.xlu0 %1643  ;;  %3463 = vrot.lane.b32.xlu1 %v7235_v9, %s6500_s28 }
 0x261   : > { %v7519_v27 = vpop.permute.xlu1 %2562  ;;  %v7521_v55 = vpop.permute.xlu2 %5702 }
 0x265   : > { %5266 = vmatmul.msk.f32.gmra.mxu2 %vm851_vm1, %v7079_v30 }
 0x267   : > { %3469 = vrot.lane.b32.xlu0 %v7368_v36, %s6500_s28  ;;  %3461 = vrot.lane.b32.xlu2 %v7209_v0, %s6500_s28 }
 0x268   : > { %v7529_v62 = vpop.permute.xlu0 %2560  ;;  %3457 = vrot.lane.b32.xlu1 %v7167_v51, %s6500_s28 }
 0x269   : > { %v7533_v42 = vpop.permute.xlu1 %5692  ;;  %v2583_v9 = vpop.permute.xlu2 %2582 }
 0x26d   : > { %5267 = vmatmul.msk.f32.gmra.mxu2 %vm851_vm1, %v7077_v29 }
 0x26f   : > { %3465 = vrot.lane.b32.xlu0 %v7261_v17, %s6500_s28  ;;  %3425 = vrot.lane.b32.xlu2 %v7055_v20, %s6500_s28 }
 0x270   : > { %v1662_v36 = vpop.permute.xlu0 %1661  ;;  %3427 = vrot.lane.b32.xlu1 %v7065_v25, %s6500_s28 }
 0x271   : > { %v7543_v0 = vpop.permute.xlu1 %1647  ;;  %v7545_v48 = vpop.permute.xlu2 %1651 }
 0x275   : > { %5268 = vmatmul.msk.f32.gmra.mxu2 %vm851_vm1, %v7075_v28 }
 0x277   : > { %3459 = vrot.lane.b32.xlu0 %v7185_v57, %s6500_s28  ;;  %3431 = vrot.lane.b32.xlu2 %v7061_v23, %s6500_s28 }
 0x278   : > { %3433 = vrot.lane.b32.xlu1 %v7079_v30, %s6500_s28 }
 0x279   : > { %v2579_v20 = vpop.permute.xlu0 %2578  ;;  %v7555_v51 = vpop.permute.xlu2 %2570 }
 0x27a   : > { %v2581_v25 = vpop.permute.xlu1 %2580 }
 0x27d   : > { %5269 = vmatmul.msk.f32.gmra.mxu2 %vm851_vm1, %v7093_v35 }
 0x27f   : > { %3429 = vrot.lane.b32.xlu0 %v7063_v24, %s6500_s28  ;;  %3449 = vrot.lane.b32.xlu2 %v7103_v38, %s6500_s28 }
 0x280   : > { %3437 = vrot.lane.b32.xlu1 %v7075_v28, %s6500_s28 }
 0x281   : > { %v1650_v23 = vpop.permute.xlu0 %1649  ;;  %v1670_v57 = vpop.permute.xlu2 %1669 }
 0x282   : > { %v1666_v17 = vpop.permute.xlu1 %1665  ;;  %5278 = vmatpush.xpose.msk.msrb.mxu0 %vm851_vm1, %v1670_v57 }
 0x285   : > { %5270 = vmatmul.msk.f32.gmra.mxu2 %vm851_vm1, %v7091_v34 }
 0x287   : > { %3435 = vrot.lane.b32.xlu0 %v7077_v29, %s6500_s28  ;;  %3451 = vrot.lane.b32.xlu2 %v7121_v45, %s6500_s28 }
 0x288   : > { %3439 = vrot.lane.b32.xlu1 %v7093_v35, %s6500_s28 }
 0x289   : > { %v7574_v24 = vpop.permute.xlu0 %2566  ;;  %v7632_v57 = vpop.permute.xlu2 %5727 }
 0x28a   : > { %v7576_v28 = vpop.permute.xlu1 %2568 }
 0x28d   : > { %5271 = vmatmul.msk.f32.gmra.mxu2 %vm851_vm1, %v7089_v33 }
 0x28f   : > { %3443 = vrot.lane.b32.xlu0 %v7089_v33, %s6500_s28  ;;  %3453 = vrot.lane.b32.xlu2 %v7119_v44, %s6500_s28 }
 0x290   : > { %3441 = vrot.lane.b32.xlu1 %v7091_v34, %s6500_s28 }
 0x291   : > { %v1668_v29 = vpop.permute.xlu0 %1667 }
 0x292   : > { %5279 = vmatpush.xpose.msk.msrb.mxu0 %vm851_vm1, %v1668_v29  ;;  %v1654_v30 = vpop.permute.xlu1 %1653 }
 0x295   : > { %5272 = vmatmul.msk.f32.gmra.mxu2 %vm851_vm1, %v7107_v40 }
 0x296   : > { %5280 = vmatpush.xpose.msk.msrb.mxu0 %vm851_vm1, %v1666_v17 }
 0x297   : > { %3445 = vrot.lane.b32.xlu0 %v7107_v40, %s6500_s28 }
 0x298   : > { %3455 = vrot.lane.b32.xlu1 %v7117_v43, %s6500_s28 }
 0x299   : > { %v2585_v33 = vpop.permute.xlu0 %2584 }
 0x29a   : > { %5281 = vmatpush.xpose.msk.msrb.mxu0 %vm851_vm1, %v1664_v32  ;;  %v2587_v35 = vpop.permute.xlu1 %2586 }
 0x29b   : > { %5310 = vmatpush.xpose.msk.msra.mxu3 %vm851_vm1, %v2587_v35 }
 0x29d   : > { %5273 = vmatmul.msk.f32.gmra.mxu2 %vm851_vm1, %v7105_v39 }
 0x29e   : > { %5282 = vmatpush.xpose.msk.msrb.mxu0 %vm851_vm1, %v1662_v36 }
 0x29f   : > { %5311 = vmatpush.xpose.msk.msra.mxu3 %vm851_vm1, %v2585_v33  ;;  %3447 = vrot.lane.b32.xlu0 %v7105_v39, %s6500_s28 }
 0x2a1   : > { %v5708_v34 = vpop.permute.xlu0 %5707 }
 0x2a2   : > { %5283 = vmatpush.xpose.msk.msrb.mxu0 %vm851_vm1, %v7494_v18  ;;  %v7604_v40 = vpop.permute.xlu1 %5717  ;;  %v5710_v17 = vunpack.i.h.bf16 %v5708_v34 }
 0x2a3   : > { %5312 = vmatpush.xpose.msk.msra.mxu3 %vm851_vm1, %v2583_v9 }
 0x2a5   : > { %5274 = vmatmul.msk.f32.gmra.mxu2 %vm851_vm1, %v7103_v38  ;;  %v5705_v38 = vunpack.i.h.bf16 %v7521_v55 }
 0x2a6   : > { %5284 = vmatpush.xpose.msk.msrb.mxu0 %vm851_vm1, %v7435_v8  ;;  %v5704_v8 = vunpack.i.l.bf16 %v7521_v55  ;;  %v5685_v55 = vunpack.i.h.bf16 %v7501_v41 }
 0x2a7   : > { %5313 = vmatpush.xpose.msk.msra.mxu3 %vm851_vm1, %v2581_v25 }
 0x2a9   : > { %v5713_v32 = vpop.permute.xlu0 %5712 }
 0x2aa   : > { %5285 = vmatpush.xpose.msk.msrb.mxu0 %vm851_vm1, %v7462_v31  ;;  %v7614_v39 = vpop.permute.xlu1 %5737  ;;  %v5715_v36 = vunpack.i.h.bf16 %v5713_v32  ;;  %v5714_v18 = vunpack.i.l.bf16 %v5713_v32 }
 0x2ab   : > { %5314 = vmatpush.xpose.msk.msra.mxu3 %vm851_vm1, %v2579_v20 }
 0x2ac   : > { %2202 = vmatpush.msrb.mxu1 %v5715_v36  ;;  %v5720_v36 = vunpack.i.h.bf16 %v7604_v40 }
 0x2ad   : > { %5275 = vmatmul.msk.f32.gmra.mxu2 %vm851_vm1, %v7121_v45  ;;  %v5695_v45 = vunpack.i.h.bf16 %v7533_v42 }
 0x2ae   : > { %5286 = vmatpush.xpose.msk.msrb.mxu0 %vm851_vm1, %v1654_v30  ;;  %2203 = vmatpush.msrb.mxu1 %v5714_v18 }
 0x2af   : > { %5315 = vmatpush.xpose.msk.msra.mxu3 %vm851_vm1, %v7452_v46  ;;  %v5694_v46 = vunpack.i.l.bf16 %v7533_v42  ;;  %v5709_v42 = vunpack.i.l.bf16 %v5708_v34  ;;  %v5729_v34 = vunpack.i.l.bf16 %v7632_v57 }
 0x2b0   : > { %2204 = vmatpush.msrb.mxu1 %v5705_v38 }
 0x2b1   : > { %v7624_v31 = vpop.permute.xlu0 %5722 }
 0x2b2   : > { %2205 = vmatpush.msrb.mxu1 %v5704_v8  ;;  %5287 = vmatpush.xpose.msk.msrb.mxu0 %vm851_vm1, %v7545_v48  ;;  %v5753_v9 = vpop.permute.xlu1 %5752  ;;  %v5684_v48 = vunpack.i.l.bf16 %v7501_v41  ;;  %v5699_v41 = vunpack.i.l.bf16 %v7507_v12 }
 0x2b3   : > { %v5755_v20 = vunpack.i.h.bf16 %v5753_v9  ;;  %v5754_v25 = vunpack.i.l.bf16 %v5753_v9  ;;  %5316 = vmatpush.xpose.msk.msra.mxu3 %vm851_vm1, %v7480_v22 }
 0x2b4   : > { %2206 = vmatpush.msrb.mxu1 %v5695_v45 }
 0x2b5   : > { %3103 = vmatpush.msra.mxu2 %v5755_v20 }
 0x2b6   : > { %5288 = vmatpush.xpose.msk.msrb.mxu0 %vm851_vm1, %v1650_v23  ;;  %2207 = vmatpush.msrb.mxu1 %v5694_v46 }
 0x2b7   : > { %5317 = vmatpush.xpose.msk.msra.mxu3 %vm851_vm1, %v7476_v10  ;;  %3104 = vmatpush.msra.mxu2 %v5754_v25  ;;  %v5700_v10 = vunpack.i.h.bf16 %v7507_v12 }
 0x2b8   : > { %2208 = vmatpush.msrb.mxu1 %v5685_v55  ;;  %5276 = vmatmul.msk.f32.gmra.mxu2 %vm851_vm1, %v7119_v44  ;;  %v5743_v44 = vpop.permute.xlu2 %5742 }
 0x2b9   : > { %v5733_v22 = vpop.permute.xlu0 %5732  ;;  %v5745_v12 = vunpack.i.h.bf16 %v5743_v44  ;;  %v5744_v29 = vunpack.i.l.bf16 %v5743_v44 }
 0x2ba   : > { %2209 = vmatpush.msrb.mxu1 %v5684_v48  ;;  %5289 = vmatpush.xpose.msk.msrb.mxu0 %vm851_vm1, %v7543_v0  ;;  %v5735_v30 = vunpack.i.h.bf16 %v5733_v22  ;;  %v5734_v35 = vunpack.i.l.bf16 %v5733_v22 }
 0x2bb   : > { %5318 = vmatpush.xpose.msk.msra.mxu3 %vm851_vm1, %v7555_v51  ;;  %v5689_v51 = vunpack.i.l.bf16 %v7505_v5 }
 0x2bc   : > { %2210 = vmatpush.msrb.mxu1 %v5710_v17 }
 0x2be   : > { %5290 = vmatpush.xpose.msk.msrb.mxu0 %vm851_vm1, %v7467_v49  ;;  %2211 = vmatpush.msrb.mxu1 %v5709_v42  ;;  %v5690_v49 = vunpack.i.h.bf16 %v7505_v5 }
 0x2bf   : > { %5319 = vmatpush.xpose.msk.msra.mxu3 %vm851_vm1, %v7576_v28 }
 0x2c0   : > { %2212 = vmatpush.msrb.mxu1 %v5700_v10  ;;  %5277 = vmatmul.msk.f32.gmra.mxu2 %vm851_vm1, %v7117_v43  ;;  %v5680_v43 = vunpack.i.h.bf16 %v7490_v54  ;;  %v3488_v5 = vpop.permute.xlu2 %3487 }
 0x2c1   : > { %v5748_v0 = vpop.permute.xlu0 %5747 }
 0x2c2   : > { %v5750_v23 = vunpack.i.h.bf16 %v5748_v0  ;;  %2213 = vmatpush.msrb.mxu1 %v5699_v41  ;;  %5291 = vmatpush.xpose.msk.msrb.mxu0 %vm851_vm1, %v7515_v13  ;;  %v5749_v28 = vunpack.i.l.bf16 %v5748_v0  ;;  %v5679_v13 = vunpack.i.l.bf16 %v7490_v54 }
 0x2c3   : > { %5320 = vmatpush.xpose.msk.msra.mxu3 %vm851_vm1, %v7574_v24 }
 0x2c4   : > { %2214 = vmatpush.msrb.mxu1 %v5690_v49  ;;  %3105 = vmatpush.msra.mxu2 %v5750_v23  ;;  %v9801_v49 = vld [vmem:[#allocation44_spill] sm:$0xff] }
 0x2c6   : > { %5292 = vmatpush.xpose.msk.msrb.mxu0 %vm851_vm1, %v7465_v11  ;;  %2215 = vmatpush.msrb.mxu1 %v5689_v51  ;;  %v5740_v11 = vunpack.i.h.bf16 %v7614_v39 }
 0x2c7   : > { %3106 = vmatpush.msra.mxu2 %v5749_v28  ;;  %5321 = vmatpush.xpose.msk.msra.mxu3 %vm851_vm1, %v7482_v47  ;;  %v5739_v47 = vunpack.i.l.bf16 %v7614_v39  ;;  %v5724_v39 = vunpack.i.l.bf16 %v7624_v31 }
 0x2c8   : > { %2216 = vmatpush.msrb.mxu1 %v5680_v43  ;;  %v7665_v24 = vpop.f32.mrf.mxu2 }
 0x2c9   : > { %3107 = vmatpush.msra.mxu2 %v5745_v12  ;;  %1029 = vmax.xlane.f32.xlu0 %v7665_v24  ;;  %v3486_v54 = vpop.permute.xlu0 %3485  ;;  %v9802_v12 = vld [vmem:[#allocation39_spill] sm:$0xff] }
 0x2ca   : > { %5293 = vmatpush.xpose.msk.msrb.mxu0 %vm851_vm1, %v7401_v37  ;;  %2217 = vmatpush.msrb.mxu1 %v5679_v13  ;;  %v3484_v37 = vpop.permute.xlu1 %3483 }
 0x2cb   : > { %3108 = vmatpush.msra.mxu2 %v5744_v29  ;;  %5322 = vmatpush.xpose.msk.msra.mxu3 %vm851_vm1, %v7519_v27  ;;  %v5730_v27 = vunpack.i.h.bf16 %v7632_v57  ;;  %v1013_v29 = vld [vmem:[#allocation3] sm:$0xff] }
 0x2cd   : > { %3109 = vmatpush.msra.mxu2 %v5740_v11  ;;  %5294 = vmatmul.msk.f32.vlgmr.msrb.gmra.mxu0 %vm851_vm1, %v7175_v53  ;;  %v3482_v53 = vpop.permute.xlu2 %3481 }
 0x2ce   : > { %5342 = vmatpush.xpose.msk.msra.mxu0 %vm851_vm1, %v3488_v5 }
 0x2cf   : > { %3110 = vmatpush.msra.mxu2 %v5739_v47  ;;  %5323 = vmatpush.xpose.msk.msra.mxu3 %vm851_vm1, %v7529_v62  ;;  %v5725_v62 = vunpack.i.h.bf16 %v7624_v31  ;;  %v9803_v47 = vld [vmem:[#allocation50_spill] sm:$0xff] }
 0x2d0   : > { %v7680_v33 = vpop.f32.mrf.mxu2 }
 0x2d1   : > { %3111 = vmatpush.msra.mxu2 %v5735_v30  ;;  %1031 = vmax.xlane.f32.xlu0 %v7680_v33  ;;  %v3476_v38 = vpop.permute.xlu0 %3475 }
 0x2d2   : > { %5343 = vmatpush.xpose.msk.msra.mxu0 %vm851_vm1, %v3486_v54 }
 0x2d3   : > { %3112 = vmatpush.msra.mxu2 %v5734_v35  ;;  %5324 = vmatpush.xpose.msk.msra.mxu3 %vm851_vm1, %v7418_v1  ;;  %v3480_v1 = vpop.permute.xlu1 %3479  ;;  %v1014_v35 = vld [vmem:[#allocation3 + $0x8] sm:$0xff] }
 0x2d5   : > { %3113 = vmatpush.msra.mxu2 %v5730_v27  ;;  %5295 = vmatmul.msk.f32.gmra.mxu0 %vm851_vm1, %v7165_v50  ;;  %v5719_v50 = vunpack.i.l.bf16 %v7604_v40  ;;  %v6501_v27 = vmov 0  }
 0x2d6   : > { %5344 = vmatpush.xpose.msk.msra.mxu0 %vm851_vm1, %v3484_v37  ;;  %5756 = vset.pattern.permute.xlu1 %v6501_v27 }
 0x2d7   : > { %3114 = vmatpush.msra.mxu2 %v5729_v34  ;;  %5325 = vmatpush.xpose.msk.msra.mxu3 %vm851_vm1, %v7450_v3  ;;  %v3478_v3 = vpop.permute.xlu2 %3477  ;;  %v9804_v34 = vld [vmem:[#allocation49_spill] sm:$0xff] }
 0x2d8   : > { %v7694_v32 = vpop.f32.mrf.mxu2  ;;  %5758 = vset.pattern.permute.xlu0 %v6501_v27  ;;  %5757 = vset.pattern.permute.xlu2 %v6501_v27 }
 0x2d9   : > { %3115 = vmatpush.msra.mxu2 %v5725_v62  ;;  %1033 = vmax.xlane.f32.xlu1 %v7694_v32 }
 0x2da   : > { %5345 = vmatpush.xpose.msk.msra.mxu0 %vm851_vm1, %v3482_v53 }
 0x2db   : > { %3116 = vmatpush.msra.mxu2 %v5724_v39  ;;  %v3474_v8 = vpop.permute.xlu1 %3473 }
 0x2dd   : > { %3117 = vmatpush.msra.mxu2 %v5720_v36  ;;  %5296 = vmatmul.msk.f32.gmra.mxu0 %vm851_vm1, %v7197_v61  ;;  %v3470_v61 = vpop.permute.xlu0 %3469  ;;  %v7804_v36 = vld [vmem:[#allocation3 + $0x10] sm:$0xff] }
 0x2de   : > { %5346 = vmatpush.xpose.msk.msra.mxu0 %vm851_vm1, %v3480_v1 }
 0x2df   : > { %3118 = vmatpush.msra.mxu2 %v5719_v50  ;;  %v3472_v40 = vpop.permute.xlu2 %3471 }
 0x2e0   : > { %v7704_v18 = vpop.f32.mrf.mxu2 }
 0x2e1   : > { %1035 = vmax.xlane.f32.xlu1 %v7704_v18 }
 0x2e2   : > { %5347 = vmatpush.xpose.msk.msra.mxu0 %vm851_vm1, %v3478_v3 }
 0x2e5   : > { %5297 = vmatmul.msk.f32.gmra.mxu0 %vm851_vm1, %v7195_v60  ;;  %v3466_v45 = vpop.permute.xlu0 %3465 }
 0x2e6   : > { %5348 = vmatpush.xpose.msk.msra.mxu0 %vm851_vm1, %v3476_v38 }
 0x2e7   : > { %v3468_v60 = vpop.permute.xlu2 %3467 }
 0x2e8   : > { %v7711_v31 = vpop.f32.mrf.mxu2 }
 0x2e9   : > { %1037 = vmax.xlane.f32.xlu2 %v7711_v31 }
 0x2ea   : > { %5349 = vmatpush.xpose.msk.msra.mxu0 %vm851_vm1, %v3474_v8 }
 0x2ed   : > { %5298 = vmatmul.msk.f32.gmra.mxu0 %vm851_vm1, %v7169_v52  ;;  %v3464_v52 = vpop.permute.xlu1 %3463 }
 0x2ee   : > { %5350 = vmatpush.xpose.msk.msra.mxu0 %vm851_vm1, %v3472_v40 }
 0x2ef   : > { %v3462_v25 = vpop.permute.xlu2 %3461 }
 0x2f0   : > { %v7718_v9 = vpop.f32.mrf.mxu2 }
 0x2f1   : > { %1039 = vmax.xlane.f32.xlu2 %v7718_v9 }
 0x2f2   : > { %5351 = vmatpush.xpose.msk.msra.mxu0 %vm851_vm1, %v3470_v61  ;;  %v7819_v61 = vld [vmem:[#allocation3 + $0x18] sm:$0xff] }
 0x2f5   : > { %5299 = vmatmul.msk.f32.gmra.mxu0 %vm851_vm1, %v7227_v7  ;;  %v3460_v7 = vpop.permute.xlu0 %3459  ;;  %v3458_v57 = vpop.permute.xlu1 %3457 }
 0x2f6   : > { %5352 = vmatpush.xpose.msk.msra.mxu0 %vm851_vm1, %v3468_v60 }
 0x2f7   : > { %v3426_v23 = vpop.permute.xlu2 %3425 }
 0x2f8   : > { %v7725_v20 = vpop.f32.mrf.mxu2 }
 0x2f9   : > { %1041 = vmax.xlane.f32.xlu0 %v7725_v20 }
 0x2fa   : > { %5353 = vmatpush.xpose.msk.msra.mxu0 %vm851_vm1, %v3466_v45 }
 0x2fd   : > { %5300 = vmatmul.msk.f32.gmra.mxu0 %vm851_vm1, %v7219_v4  ;;  %v7742_v4 = vpop.permute.xlu0 %3429  ;;  %v3428_v17 = vpop.permute.xlu1 %3427 }
 0x2fe   : > { %5354 = vmatpush.xpose.msk.msra.mxu0 %vm851_vm1, %v3464_v52 }
 0x2ff   : > { %v3432_v43 = vpop.permute.xlu2 %3431 }
 0x300   : > { %v7732_v46 = vpop.f32.mrf.mxu2 }
 0x301   : > { %1043 = vmax.xlane.f32.xlu1 %v7732_v46 }
 0x302   : > { %5355 = vmatpush.xpose.msk.msra.mxu0 %vm851_vm1, %v3462_v25 }
 0x305   : > { %5301 = vmatmul.msk.f32.gmra.mxu0 %vm851_vm1, %v7191_v58  ;;  %v7751_v58 = vpop.permute.xlu0 %3435  ;;  %v7756_v42 = vpop.permute.xlu1 %3433 }
 0x306   : > { %5356 = vmatpush.xpose.msk.msra.mxu0 %vm851_vm1, %v3460_v7 }
 0x307   : > { %v7792_v30 = vpop.permute.xlu2 %3449 }
 0x308   : > { %v7739_v55 = vpop.f32.mrf.mxu2 }
 0x309   : > { %1045 = vmax.xlane.f32.xlu2 %v7739_v55 }
 0x30a   : > { %5357 = vmatpush.xpose.msk.msra.mxu0 %vm851_vm1, %v3458_v57  ;;  %v7834_v57 = vld [vmem:[#allocation3 + $0x20] sm:$0xff] }
 0x30d   : > { %5302 = vmatmul.msk.f32.gmra.mxu0 %vm851_vm1, %v7259_v16  ;;  %v7760_v16 = vpop.permute.xlu0 %3443  ;;  %v7765_v44 = vpop.permute.xlu1 %3437 }
 0x30f   : > { %v7800_v39 = vpop.permute.xlu2 %3451 }
 0x310   : > { %v7746_v48 = vpop.f32.mrf.mxu2 }
 0x311   : > { %1047 = vmax.xlane.f32.xlu0 %v7746_v48 }
 0x315   : > { %5303 = vmatmul.msk.f32.gmra.mxu0 %vm851_vm1, %v7253_v15  ;;  %v9800_v15 = vld [vmem:[#allocation45_spill] sm:$0xff]  ;;  %v7772_v0 = vpop.permute.xlu0 %3445 }
 0x317   : > { %v7817_v40 = vpop.permute.xlu2 %3453 }
 0x318   : > { %v7753_v22 = vpop.f32.mrf.mxu2 }
 0x319   : > { %1049 = vmax.xlane.f32.xlu1 %v7753_v22 }
 0x31d   : > { %5304 = vmatmul.msk.f32.gmra.mxu0 %vm851_vm1, %v7213_v2  ;;  %v7776_v2 = vpop.permute.xlu1 %3439  ;;  %v7781_v28 = vpop.permute.xlu0 %3447 }
 0x320   : > { %v7762_v10 = vpop.f32.mrf.mxu2 }
 0x321   : > { %1051 = vmax.xlane.f32.xlu2 %v7762_v10 }
 0x325   : > { %5305 = vmatmul.msk.f32.gmra.mxu0 %vm851_vm1, %v9800_v15  ;;  %v7785_v13 = vpop.permute.xlu1 %3441 }
 0x328   : > { %v7769_v41 = vpop.f32.mrf.mxu2 }
 0x329   : > { %1053 = vmax.xlane.f32.xlu0 %v7769_v41 }
 0x32d   : > { %5306 = vmatmul.msk.f32.gmra.mxu0 %vm851_vm1, %v9801_v49  ;;  %v7795_v37 = vpop.permute.xlu1 %3455 }
 0x330   : > { %v7778_v51 = vpop.f32.mrf.mxu2 }
 0x331   : > { %1055 = vmax.xlane.f32.xlu1 %v7778_v51 }
 0x335   : > { %5307 = vmatmul.msk.f32.gmra.mxu0 %vm851_vm1, %v9802_v12  ;;  %v7845_v12 = vld [vmem:[#allocation3 + $0x28] sm:$0xff] }
 0x33b   : > { %v7787_v5 = vpop.f32.mrf.mxu2 }
 0x33c   : > { %v1030_v11 = vpop.xlane.xlu0 %1029  ;;  %1057 = vmax.xlane.f32.xlu2 %v7787_v5 }
 0x33d   : > { %5308 = vmatmul.msk.f32.gmra.mxu0 %vm851_vm1, %v9803_v47  ;;  %v1061_v54 = vmax.f32 %v1013_v29, %v1030_v11 }
 0x33f   : > { %1559 = vst.msk [vmem:[#allocation3] sm:$0xff] %vm1333_vm2, %v1061_v54  ;;  %v1077_v15 = vsub.f32 %v1013_v29, %v1061_v54 }
 0x341   : > { %v1093_v49 = vmul.f32 1.442695, %v1077_v15 }
 0x343   : > { %v7830_v25 = vpop.f32.mrf.mxu2  ;;  %5799 = vpow2.f32 %v1093_v49 }
 0x344   : > { %v1032_v53 = vpop.xlane.xlu0 %1031 }
 0x345   : > { %5309 = vmatmul.msk.f32.gmra.mxu0 %vm851_vm1, %v9804_v34  ;;  %v1062_v62 = vmax.f32 %v1014_v35, %v1032_v53  ;;  %v7866_v34 = vld [vmem:[#allocation3 + $0x38] sm:$0xff] }
 0x347   : > { %1560 = vst.msk [vmem:[#allocation3 + $0x8] sm:$0xff] %vm1333_vm2, %v1062_v62  ;;  %v1078_v27 = vsub.f32 %v1014_v35, %v1062_v62 }
 0x349   : > { %v7855_v29 = vpop.eup %5799 }
 0x34a   : > { %v7802_v1 = vpop.f32.mrf.mxu0 }
 0x34b   : > { %1817 = vmax.xlane.f32.xlu1 %v7802_v1 }
 0x34c   : > { %v1034_v50 = vpop.xlane.xlu1 %1033 }
 0x34d   : > { %5358 = vmatmul.msk.f32.vlgmr.msra.gmra.mxu0 %vm851_vm1, %v3426_v23  ;;  %v7809_v3 = vmax.f32 %v7804_v36, %v1034_v50 }
 0x34f   : > { %v1079_v38 = vsub.f32 %v7804_v36, %v7809_v3  ;;  %1561 = vst.msk [vmem:[#allocation3 + $0x10] sm:$0xff] %vm1333_vm2, %v7809_v3 }
 0x352   : > { %v7815_v8 = vpop.f32.mrf.mxu0 }
 0x353   : > { %1819 = vmax.xlane.f32.xlu0 %v7815_v8 }
 0x354   : > { %v1036_v60 = vpop.xlane.xlu1 %1035 }
 0x355   : > { %5359 = vmatmul.msk.f32.gmra.mxu0 %vm851_vm1, %v3428_v17  ;;  %v7824_v45 = vmax.f32 %v7819_v61, %v1036_v60  ;;  %v7877_v60 = vld [vmem:[#allocation3 + $0x40] sm:$0xff] }
 0x357   : > { %1562 = vst.msk [vmem:[#allocation3 + $0x18] sm:$0xff] %vm1333_vm2, %v7824_v45 }
 0x35a   : > { %v7832_v7 = vpop.f32.mrf.mxu0 }
 0x35b   : > { %1821 = vmax.xlane.f32.xlu2 %v7832_v7  ;;  %1059 = vmax.xlane.f32.xlu0 %v7830_v25 }
 0x35c   : > { %v1038_v17 = vpop.xlane.xlu2 %1037 }
 0x35d   : > { %5360 = vmatmul.msk.f32.gmra.mxu0 %vm851_vm1, %v7742_v4  ;;  %v7841_v23 = vmax.f32 %v7834_v57, %v1038_v17  ;;  %v7853_v4 = vld [vmem:[#allocation3 + $0x30] sm:$0xff] }
 0x35f   : > { %1563 = vst.msk [vmem:[#allocation3 + $0x20] sm:$0xff] %vm1333_vm2, %v7841_v23 }
 0x364   : > { %1127 = vperm.xlu1 %5756, %v1061_v54   ;;  %v1040_v11 = vpop.xlane.xlu2 %1039 }
 0x365   : > { %5361 = vmatmul.msk.f32.gmra.mxu0 %vm851_vm1, %v3432_v43  ;;  %v7849_v47 = vmax.f32 %v7845_v12, %v1040_v11  ;;  %v1095_v43 = vmul.f32 1.442695, %v1078_v27 }
 0x367   : > { %1564 = vst.msk [vmem:[#allocation3 + $0x28] sm:$0xff] %vm1333_vm2, %v7849_v47  ;;  %5801 = vpow2.f32 %v1095_v43 }
 0x36c   : > { %1433 = vperm.xlu1 %5756, %v7855_v29   ;;  %v1042_v53 = vpop.xlane.xlu0 %1041 }
 0x36d   : > { %5362 = vmatmul.msk.f32.gmra.mxu0 %vm851_vm1, %v7756_v42  ;;  %v7861_v54 = vmax.f32 %v7853_v4, %v1042_v53  ;;  %v7875_v42 = vpop.eup %5801  ;;  %v7904_v53 = vpop.f32.mrf.mxu0 }
 0x36e   : > { %9805 = vst [vmem:[#allocation45_spill] sm:$0xff] %v7875_v42 }
 0x36f   : > { %1137 = vperm.xlu0 %5758, %v7809_v3   ;;  %1565 = vst.msk [vmem:[#allocation3 + $0x30] sm:$0xff] %vm1333_vm2, %v7861_v54  ;;  %v9807_v3 = vsub.f32 %v7819_v61, %v7824_v45 }
 0x373   : > { %1132 = vperm.xlu2 %5757, %v1062_v62  }
 0x374   : > { %v1044_v35 = vpop.xlane.xlu1 %1043 }
 0x375   : > { %5363 = vmatmul.msk.f32.gmra.mxu0 %vm851_vm1, %v7751_v58  ;;  %v7871_v50 = vmax.f32 %v7866_v34, %v1044_v35  ;;  %v7887_v58 = vld [vmem:[#allocation3 + $0x48] sm:$0xff] }
 0x377   : > { %1566 = vst.msk [vmem:[#allocation3 + $0x38] sm:$0xff] %vm1333_vm2, %v7871_v50 }
 0x37b   : > { %1438 = vperm.xlu2 %5757, %v7875_v42  }
 0x37c   : > { %v1046_v17 = vpop.xlane.xlu2 %1045 }
 0x37d   : > { %5364 = vmatmul.msk.f32.gmra.mxu0 %vm851_vm1, %v7765_v44  ;;  %v7883_v62 = vmax.f32 %v7877_v60, %v1046_v17  ;;  %v7897_v44 = vld [vmem:[#allocation3 + $0x50] sm:$0xff]  ;;  %v7921_v17 = vld [vmem:[#allocation3 + $0x60] sm:$0xff] }
 0x37f   : > { %1567 = vst.msk [vmem:[#allocation3 + $0x40] sm:$0xff] %vm1333_vm2, %v7883_v62 }
 0x383   : > { %1142 = vperm.xlu2 %5757, %v7824_v45  }
 0x384   : > { %v1048_v15 = vpop.xlane.xlu0 %1047 }
 0x385   : > { %5365 = vmatmul.msk.f32.gmra.mxu0 %vm851_vm1, %v7776_v2  ;;  %v7893_v49 = vmax.f32 %v7887_v58, %v1048_v15  ;;  %v7908_v2 = vld [vmem:[#allocation3 + $0x58] sm:$0xff] }
 0x387   : > { %1568 = vst.msk [vmem:[#allocation3 + $0x48] sm:$0xff] %vm1333_vm2, %v7893_v49 }
 0x38c   : > { %v1050_v11 = vpop.xlane.xlu1 %1049 }
 0x38d   : > { %5366 = vmatmul.msk.f32.gmra.mxu0 %vm851_vm1, %v7785_v13  ;;  %v7902_v27 = vmax.f32 %v7897_v44, %v1050_v11  ;;  %v7918_v13 = vpop.f32.mrf.mxu0  ;;  %v1097_v11 = vmul.f32 1.442695, %v1079_v38  ;;  %v1099_v38 = vmul.f32 1.442695, %v9807_v3  ;;  %v7985_v3 = vld [vmem:[#allocation3 + $0x88] sm:$0xff] }
 0x38e   : > { %9812 = vst [vmem:[#allocation70_spill] sm:$0xff] %v7985_v3 }
 0x38f   : > { %1569 = vst.msk [vmem:[#allocation3 + $0x50] sm:$0xff] %vm1333_vm2, %v7902_v27  ;;  %5803 = vpow2.f32 %v1097_v11  ;;  %v1082_v11 = vsub.f32 %v7845_v12, %v7849_v47 }
 0x394   : > { %v1052_v43 = vpop.xlane.xlu2 %1051 }
 0x395   : > { %5367 = vmatmul.msk.f32.gmra.mxu0 %vm851_vm1, %v7760_v16  ;;  %v7913_v35 = vmax.f32 %v7908_v2, %v1052_v43  ;;  %v7933_v43 = vld [vmem:[#allocation3 + $0x68] sm:$0xff]  ;;  %v7944_v6 = vpop.f32.mrf.mxu0  ;;  %v7946_v36 = vpop.eup %5803 }
 0x396   : > { %1823 = vmax.xlane.f32.xlu1 %v7904_v53  ;;  %9806 = vst [vmem:[#allocation44_spill] sm:$0xff] %v7944_v6 }
 0x397   : > { %1570 = vst.msk [vmem:[#allocation3 + $0x58] sm:$0xff] %vm1333_vm2, %v7913_v35 }
 0x399   : > { %1825 = vmax.xlane.f32.xlu0 %v7918_v13 }
 0x39c   : > { %v1054_v15 = vpop.xlane.xlu0 %1053 }
 0x39d   : > { %5368 = vmatmul.msk.f32.gmra.mxu0 %vm851_vm1, %v7772_v0  ;;  %v7926_v16 = vmax.f32 %v7921_v17, %v1054_v15  ;;  %v1081_v0 = vsub.f32 %v7834_v57, %v7841_v23  ;;  %v7971_v45 = vpop.f32.mrf.mxu0 }
 0x39e   : > { %9810 = vst [vmem:[#allocation49_spill] sm:$0xff] %v7971_v45 }
 0x39f   : > { %1571 = vst.msk [vmem:[#allocation3 + $0x60] sm:$0xff] %vm1333_vm2, %v7926_v16  ;;  %v1101_v15 = vmul.f32 1.442695, %v1081_v0 }
 0x3a1   : > { %5805 = vpow2.f32 %v1101_v15 }
 0x3a2   : > { %5807 = vpow2.f32 %v1099_v38 }
 0x3a4   : > { %v1056_v52 = vpop.xlane.xlu1 %1055 }
 0x3a5   : > { %5369 = vmatmul.msk.f32.gmra.mxu0 %vm851_vm1, %v7781_v28  ;;  %v7938_v14 = vmax.f32 %v7933_v43, %v1056_v52  ;;  %v7955_v28 = vld [vmem:[#allocation3 + $0x70] sm:$0xff]  ;;  %v7987_v38 = vpop.f32.mrf.mxu0 }
 0x3a6   : > { %9813 = vst [vmem:[#allocation71_spill] sm:$0xff] %v7987_v38 }
 0x3a7   : > { %1572 = vst.msk [vmem:[#allocation3 + $0x68] sm:$0xff] %vm1333_vm2, %v7938_v14  ;;  %v7963_v61 = vpop.eup %5805 }
 0x3a8   : > { %9808 = vst [vmem:[#allocation39_spill] sm:$0xff] %v7963_v61 }
 0x3ac   : > { %1827 = vmax.xlane.f32.xlu2 %v7944_v6 }
 0x3ad   : > { %5370 = vmatmul.msk.f32.gmra.mxu0 %vm851_vm1, %v7792_v30  ;;  %1443 = vperm.xlu0 %5758, %v7946_v36   ;;  %v7968_v30 = vpop.eup %5807 }
 0x3ae   : > { %9809 = vst [vmem:[#allocation50_spill] sm:$0xff] %v7968_v30 }
 0x3af   : > { %1147 = vperm.xlu1 %5756, %v7841_v23   ;;  %v1058_v52 = vpop.xlane.xlu2 %1057  ;;  %v7973_v23 = vld [vmem:[#allocation3 + $0x80] sm:$0xff] }
 0x3b0   : > { %v7959_v57 = vmax.f32 %v7955_v28, %v1058_v52  ;;  %9811 = vst [vmem:[#allocation69_spill] sm:$0xff] %v7973_v23 }
 0x3b2   : > { %1573 = vst.msk [vmem:[#allocation3 + $0x70] sm:$0xff] %vm1333_vm2, %v7959_v57 }
 0x3b5   : > { %5371 = vmatmul.msk.f32.gmra.mxu0 %vm851_vm1, %v7800_v39  ;;  %1453 = vperm.xlu0 %5758, %v7963_v61   ;;  %v1103_v39 = vmul.f32 1.442695, %v1082_v11  ;;  %v8001_v11 = vld [vmem:[#allocation3 + $0x78] sm:$0xff] }
 0x3b7   : > { %1448 = vperm.xlu1 %5756, %v7968_v30   ;;  %5809 = vpow2.f32 %v1103_v39 }
 0x3bd   : > { %5372 = vmatmul.msk.f32.gmra.mxu0 %vm851_vm1, %v7817_v40  ;;  %v7996_v52 = vpop.eup %5809 }
 0x3be   : > { %v1818_v0 = vpop.xlane.xlu1 %1817  ;;  %9814 = vst [vmem:[#allocation72_spill] sm:$0xff] %v7996_v52 }
 0x3bf   : > { %v7980_v15 = vmax.f32 %v7973_v23, %v1818_v0 }
 0x3c1   : > { %2476 = vst.msk [vmem:[#allocation3 + $0x80] sm:$0xff] %vm1333_vm2, %v7980_v15 }
 0x3c4   : > { %1152 = vperm.xlu2 %5757, %v7849_v47   ;;  %v7999_v47 = vld [vmem:[#allocation3 + $0x90] sm:$0xff] }
 0x3c5   : > { %5373 = vmatmul.msk.f32.gmra.mxu0 %vm851_vm1, %v7795_v37 }
 0x3c6   : > { %v1820_v12 = vpop.xlane.xlu0 %1819 }
 0x3c7   : > { %v7992_v40 = vmax.f32 %v7985_v3, %v1820_v12 }
 0x3c9   : > { %2477 = vst.msk [vmem:[#allocation3 + $0x88] sm:$0xff] %vm1333_vm2, %v7992_v40 }
 0x3cc   : > { %1458 = vperm.xlu2 %5757, %v7996_v52  }
 0x3ce   : > { %v1822_v0 = vpop.xlane.xlu2 %1821  ;;  %v1060_v39 = vpop.xlane.xlu0 %1059 }
 0x3cf   : > { %v8004_v23 = vmax.f32 %v7999_v47, %v1822_v0  ;;  %v8007_v37 = vmax.f32 %v8001_v11, %v1060_v39 }
 0x3d1   : > { %2478 = vst.msk [vmem:[#allocation3 + $0x90] sm:$0xff] %vm1333_vm2, %v8004_v23 }
 0x3d2   : > { %1574 = vst.msk [vmem:[#allocation3 + $0x78] sm:$0xff] %vm1333_vm2, %v8007_v37 }
 0x3d6   : > { %v1128_v12 = vpop.permute.xlu1 %1127  ;;  %v1133_v3 = vpop.permute.xlu2 %1132 }
 0x3d7   : > { %v1205_v52 = vsub.f32 %v7665_v24, %v1128_v12  ;;  %v1206_v59 = vsub.f32 %v7680_v33, %v1133_v3  ;;  %v1084_v24 = vsub.f32 %v7866_v34, %v7871_v50 }
 0x3d9   : > { %v1221_v61 = vmul.f32 1.442695, %v1205_v52  ;;  %v1223_v0 = vmul.f32 1.442695, %v1206_v59  ;;  %v1107_v33 = vmul.f32 1.442695, %v1084_v24 }
 0x3db   : > { %5811 = vpow2.f32 %v1221_v61 }
 0x3dc   : > { %5813 = vpow2.f32 %v1223_v0 }
 0x3de   : > { %v8015_v21 = vpop.permute.xlu2 %1438  ;;  %v8046_v24 = vpop.permute.xlu1 %1433 }
 0x3df   : > { %1831 = vmax.xlane.f32.xlu0 %v7987_v38 }
 0x3e1   : > { %v8018_v39 = vpop.eup %5811  ;;  %1829 = vmax.xlane.f32.xlu1 %v7971_v45  ;;  %v1138_v56 = vpop.permute.xlu0 %1137 }
 0x3e2   : > { %1366 = vmatmul.f32.vlgmr.msrb.gmra.mxu3 %v8018_v39  ;;  %v1207_v63 = vsub.f32 %v7694_v32, %v1138_v56  ;;  %v8025_v52 = vpop.eup %5813  ;;  %v1083_v56 = vsub.f32 %v7853_v4, %v7861_v54  ;;  %v1085_v4 = vsub.f32 %v7877_v60, %v7883_v62 }
 0x3e4   : > { %v1225_v61 = vmul.f32 1.442695, %v1207_v63  ;;  %v8037_v63 = vpop.f32.mrf.mxu0  ;;  %v1105_v32 = vmul.f32 1.442695, %v1083_v56 }
 0x3e5   : > { %9816 = vst [vmem:[#allocation74_spill] sm:$0xff] %v8037_v63 }
 0x3e6   : > { %v1143_v3 = vpop.permute.xlu2 %1142  ;;  %5815 = vpow2.f32 %v1225_v61  ;;  %v8051_v61 = vld [vmem:[#allocation3 + $0x98] sm:$0xff] }
 0x3e7   : > { %v1208_v59 = vsub.f32 %v7704_v18, %v1143_v3  ;;  %5817 = vpow2.f32 %v1107_v33  ;;  %9818 = vst [vmem:[#allocation76_spill] sm:$0xff] %v8051_v61  ;;  %v1109_v3 = vmul.f32 1.442695, %v1085_v4 }
 0x3e9   : > { %v1227_v12 = vmul.f32 1.442695, %v1208_v59 }
 0x3ea   : > { %1369 = vmatmul.f32.gmra.mxu3 %v8025_v52 }
 0x3eb   : > { %5819 = vpow2.f32 %v1227_v12 }
 0x3ec   : > { %v8029_v38 = vpop.eup %5815  ;;  %5821 = vpow2.f32 %v1105_v32  ;;  %v8066_v60 = vpop.f32.mrf.mxu0 }
 0x3ed   : > { %v8031_v0 = vpop.eup %5817  ;;  %5823 = vpow2.f32 %v1109_v3  ;;  %9820 = vst [vmem:[#allocation78_spill] sm:$0xff] %v8066_v60 }
 0x3ee   : > { %9815 = vst [vmem:[#allocation73_spill] sm:$0xff] %v8031_v0 }
 0x3f1   : > { %v8040_v18 = vpop.eup %5819 }
 0x3f2   : > { %1372 = vmatmul.f32.gmra.mxu3 %v8029_v38  ;;  %v8044_v34 = vpop.eup %5821 }
 0x3f3   : > { %1468 = vperm.xlu0 %5758, %v8031_v0   ;;  %9817 = vst [vmem:[#allocation75_spill] sm:$0xff] %v8044_v34  ;;  %v8068_v32 = vpop.eup %5823 }
 0x3f4   : > { %9821 = vst [vmem:[#allocation79_spill] sm:$0xff] %v8068_v32  ;;  %v8071_v4 = vpop.f32.mrf.mxu0 }
 0x3f5   : > { %1833 = vmax.xlane.f32.xlu2 %v8037_v63  ;;  %9822 = vst [vmem:[#allocation80_spill] sm:$0xff] %v8071_v4 }
 0x3fa   : > { %1157 = vperm.xlu1 %5756, %v7861_v54   ;;  %1375 = vmatmul.f32.gmra.mxu3 %v8040_v18  ;;  %v8056_v54 = vld [vmem:[#allocation3 + $0xa0] sm:$0xff] }
 0x3fb   : > { %9819 = vst [vmem:[#allocation77_spill] sm:$0xff] %v8056_v54 }
 0x402   : > { %1463 = vperm.xlu1 %5756, %v8044_v34  }
 0x409   : > { %v1824_v33 = vpop.xlane.xlu1 %1823 }
 0x40a   : > { %v8054_v59 = vmax.f32 %v8051_v61, %v1824_v33  ;;  %v8074_v33 = vld [vmem:[#allocation3 + $0xa8] sm:$0xff] }
 0x40c   : > { %2479 = vst.msk [vmem:[#allocation3 + $0x98] sm:$0xff] %vm1333_vm2, %v8054_v59  ;;  %v1826_v12 = vpop.xlane.xlu0 %1825 }
 0x40d   : > { %v8061_v56 = vmax.f32 %v8056_v54, %v1826_v12  ;;  %1162 = vperm.xlu2 %5757, %v7871_v50  }
 0x40f   : > { %2480 = vst.msk [vmem:[#allocation3 + $0xa0] sm:$0xff] %vm1333_vm2, %v8061_v56 }
 0x415   : > { %1473 = vperm.xlu2 %5757, %v8068_v32  }
 0x41d   : > { %1837 = vmax.xlane.f32.xlu0 %v8071_v4  ;;  %v1087_v4 = vsub.f32 %v7897_v44, %v7902_v27  ;;  %v8096_v44 = vpop.f32.mrf.mxu0 }
 0x41e   : > { %9824 = vst [vmem:[#allocation82_spill] sm:$0xff] %v8096_v44 }
 0x41f   : > { %v1828_v12 = vpop.xlane.xlu2 %1827 }
 0x420   : > { %v8077_v61 = vmax.f32 %v8074_v33, %v1828_v12  ;;  %v1113_v12 = vmul.f32 1.442695, %v1087_v4 }
 0x421   : > { %v1148_v50 = vpop.permute.xlu1 %1147 }
 0x422   : > { %2481 = vst.msk [vmem:[#allocation3 + $0xa8] sm:$0xff] %vm1333_vm2, %v8077_v61  ;;  %v1209_v3 = vsub.f32 %v7711_v31, %v1148_v50 }
 0x424   : > { %v1229_v0 = vmul.f32 1.442695, %v1209_v3  ;;  %v1088_v3 = vsub.f32 %v7908_v2, %v7913_v35 }
 0x425   : > { %v8124_v2 = vpop.f32.mrf.mxu0 }
 0x426   : > { %5825 = vpow2.f32 %v1229_v0  ;;  %v1086_v0 = vsub.f32 %v7887_v58, %v7893_v49 }
 0x427   : > { %v1153_v54 = vpop.permute.xlu2 %1152 }
 0x428   : > { %v1210_v32 = vsub.f32 %v7718_v9, %v1153_v54  ;;  %v1444_v54 = vpop.permute.xlu0 %1443 }
 0x429   : > { %v1449_v50 = vpop.permute.xlu1 %1448 }
 0x42a   : > { %v1231_v63 = vmul.f32 1.442695, %v1210_v32 }
 0x42c   : > { %1835 = vmax.xlane.f32.xlu1 %v8066_v60  ;;  %v8086_v45 = vpop.eup %5825  ;;  %5827 = vpow2.f32 %v1231_v63  ;;  %v1111_v63 = vmul.f32 1.442695, %v1086_v0 }
 0x42d   : > { %1378 = vmatmul.f32.gmra.mxu3 %v8086_v45  ;;  %5829 = vpow2.f32 %v1113_v12  ;;  %v8109_v12 = vld [vmem:[#allocation3 + $0xb8] sm:$0xff] }
 0x42e   : > { %5831 = vpow2.f32 %v1111_v63  ;;  %9826 = vst [vmem:[#allocation84_spill] sm:$0xff] %v8109_v12 }
 0x430   : > { %v8102_v32 = vpop.permute.xlu0 %1453 }
 0x431   : > { %1172 = vperm.xlu0 %5758, %v7893_v49   ;;  %v8111_v49 = vld [vmem:[#allocation3 + $0xb0] sm:$0xff] }
 0x432   : > { %v8090_v31 = vpop.eup %5827  ;;  %9827 = vst [vmem:[#allocation85_spill] sm:$0xff] %v8111_v49 }
 0x433   : > { %v8093_v9 = vpop.eup %5829 }
 0x434   : > { %9823 = vst [vmem:[#allocation81_spill] sm:$0xff] %v8093_v9  ;;  %v8104_v4 = vpop.eup %5831 }
 0x435   : > { %1381 = vmatmul.f32.gmra.mxu3 %v8090_v31  ;;  %9825 = vst [vmem:[#allocation83_spill] sm:$0xff] %v8104_v4 }
 0x439   : > { %1483 = vperm.xlu0 %5758, %v8093_v9   ;;  %v1115_v9 = vmul.f32 1.442695, %v1088_v3  ;;  %v8129_v3 = vpop.permute.xlu2 %1458 }
 0x43b   : > { %5833 = vpow2.f32 %v1115_v9 }
 0x43e   : > { %1839 = vmax.xlane.f32.xlu2 %v8096_v44 }
 0x441   : > { %v8126_v44 = vpop.eup %5833 }
 0x442   : > { %9828 = vst [vmem:[#allocation86_spill] sm:$0xff] %v8126_v44 }
 0x445   : > { %1167 = vperm.xlu1 %5756, %v7883_v62  }
 0x44d   : > { %1478 = vperm.xlu1 %5756, %v8104_v4   ;;  %v1416_v4 = vld [vmem:[#allocation5 + $0x8] sm:$0xff] }
 0x452   : > { %v1832_v58 = vpop.xlane.xlu0 %1831 }
 0x453   : > { %v8114_v0 = vmax.f32 %v8109_v12, %v1832_v58  ;;  %v1415_v58 = vld [vmem:[#allocation5] sm:$0xff]  ;;  %v8131_v12 = vpop.f32.mrf.mxu0 }
 0x454   : > { %v1830_v62 = vpop.xlane.xlu1 %1829  ;;  %9829 = vst [vmem:[#allocation87_spill] sm:$0xff] %v8131_v12 }
 0x455   : > { %2483 = vst.msk [vmem:[#allocation3 + $0xb8] sm:$0xff] %vm1333_vm2, %v8114_v0  ;;  %v8119_v63 = vmax.f32 %v8111_v49, %v1830_v62  ;;  %v1511_v62 = vmul.f32 %v8046_v24, %v1415_v58  ;;  %v8135_v49 = vld [vmem:[#allocation3 + $0xc0] sm:$0xff] }
 0x456   : > { %1177 = vperm.xlu2 %5757, %v7902_v27   ;;  %9830 = vst [vmem:[#allocation88_spill] sm:$0xff] %v8135_v49 }
 0x457   : > { %2482 = vst.msk [vmem:[#allocation3 + $0xb0] sm:$0xff] %vm1333_vm2, %v8119_v63 }
 0x45e   : > { %1488 = vperm.xlu2 %5757, %v8126_v44   ;;  %v1512_v44 = vmul.f32 %v8015_v21, %v1416_v4  ;;  %v1418_v21 = vld [vmem:[#allocation5 + $0x18] sm:$0xff]  ;;  %v1089_v4 = vsub.f32 %v7921_v17, %v7926_v16 }
 0x463   : > { %1843 = vmax.xlane.f32.xlu0 %v8131_v12 }
 0x465   : > { %v1367_v27 = vpop.f32.mrf.mxu3 }
 0x466   : > { %v1527_v9 = vadd.f32 %v1511_v62, %v1367_v27 }
 0x468   : > { %1543 = vst.msk [vmem:[#allocation5] sm:$0xff] %vm851_vm1, %v1527_v9  ;;  %v1834_v60 = vpop.xlane.xlu2 %1833  ;;  %v1417_v9 = vld [vmem:[#allocation5 + $0x10] sm:$0xff] }
 0x469   : > { %v8139_v30 = vmax.f32 %v8135_v49, %v1834_v60  ;;  %v1513_v60 = vmul.f32 %v1444_v54, %v1417_v9  ;;  %v8166_v54 = vpop.permute.xlu0 %1468  ;;  %v1091_v9 = vsub.f32 %v7955_v28, %v7959_v57 }
 0x46b   : > { %2484 = vst.msk [vmem:[#allocation3 + $0xc0] sm:$0xff] %vm1333_vm2, %v8139_v30 }
 0x46c   : > { %v1158_v19 = vpop.permute.xlu1 %1157 }
 0x46d   : > { %v1211_v12 = vsub.f32 %v7725_v20, %v1158_v19  ;;  %v1370_v24 = vpop.f32.mrf.mxu3  ;;  %v1090_v19 = vsub.f32 %v7933_v43, %v7938_v14 }
 0x46e   : > { %v1528_v58 = vadd.f32 %v1512_v44, %v1370_v24 }
 0x46f   : > { %v1233_v62 = vmul.f32 1.442695, %v1211_v12  ;;  %v1119_v20 = vmul.f32 1.442695, %v1090_v19  ;;  %v8170_v12 = vld [vmem:[#allocation3 + $0xd0] sm:$0xff] }
 0x470   : > { %1544 = vst.msk [vmem:[#allocation5 + $0x8] sm:$0xff] %vm851_vm1, %v1528_v58  ;;  %v1163_v27 = vpop.permute.xlu2 %1162  ;;  %v1121_v19 = vmul.f32 1.442695, %v1091_v9 }
 0x471   : > { %5835 = vpow2.f32 %v1233_v62  ;;  %v1212_v34 = vsub.f32 %v7732_v46, %v1163_v27  ;;  %v1514_v46 = vmul.f32 %v1449_v50, %v1418_v21  ;;  %v1117_v50 = vmul.f32 1.442695, %v1089_v4 }
 0x473   : > { %v1235_v49 = vmul.f32 1.442695, %v1212_v34 }
 0x475   : > { %v1373_v42 = vpop.f32.mrf.mxu3  ;;  %5837 = vpow2.f32 %v1235_v49  ;;  %v1867_v49 = vsub.f32 %v7999_v47, %v8004_v23  ;;  %v8187_v47 = vld [vmem:[#allocation3 + $0xc8] sm:$0xff] }
 0x476   : > { %v1529_v26 = vadd.f32 %v1513_v60, %v1373_v42  ;;  %5839 = vpow2.f32 %v1119_v20  ;;  %v1419_v20 = vld [vmem:[#allocation5 + $0x20] sm:$0xff] }
 0x477   : > { %v8147_v6 = vpop.eup %5835  ;;  %1841 = vmax.xlane.f32.xlu1 %v8124_v2  ;;  %1187 = vperm.xlu0 %5758, %v7926_v16   ;;  %5841 = vpow2.f32 %v1117_v50  ;;  %v1885_v62 = vmul.f32 1.442695, %v1867_v49  ;;  %v8183_v16 = vpop.permute.xlu1 %1463  ;;  %v1515_v28 = vmul.f32 %v8102_v32, %v1419_v20  ;;  %v1420_v49 = vld [vmem:[#allocation5 + $0x28] sm:$0xff] }
 0x478   : > { %1545 = vst.msk [vmem:[#allocation5 + $0x10] sm:$0xff] %vm851_vm1, %v1529_v26  ;;  %1384 = vmatmul.f32.gmra.mxu3 %v8147_v6  ;;  %v8162_v26 = vpop.f32.mrf.mxu0  ;;  %v8201_v21 = vpop.permute.xlu2 %1473 }
 0x479   : > { %5843 = vpow2.f32 %v1885_v62  ;;  %v1516_v62 = vmul.f32 %v8129_v3, %v1420_v49 }
 0x47a   : > { %5845 = vpow2.f32 %v1121_v19 }
 0x47b   : > { %v8155_v42 = vpop.eup %5837 }
 0x47c   : > { %v8160_v43 = vpop.eup %5839 }
 0x47d   : > { %v1376_v34 = vpop.f32.mrf.mxu3  ;;  %9831 = vst [vmem:[#allocation89_spill] sm:$0xff] %v8160_v43  ;;  %v8181_v17 = vpop.eup %5841 }
 0x47e   : > { %v1530_v44 = vadd.f32 %v1514_v46, %v1376_v34 }
 0x47f   : > { %1915 = vperm.xlu0 %5758, %v7980_v15  }
 0x480   : > { %1546 = vst.msk [vmem:[#allocation5 + $0x18] sm:$0xff] %vm851_vm1, %v1530_v44  ;;  %1387 = vmatmul.f32.gmra.mxu3 %v8155_v42 }
 0x487   : > { %1845 = vmax.xlane.f32.xlu2 %v8162_v26  ;;  %1498 = vperm.xlu0 %5758, %v8160_v43  }
 0x48f   : > { %1202 = vperm.xlu0 %5758, %v8007_v37  }
 0x490   : > { %1182 = vperm.xlu1 %5756, %v7913_v35   ;;  %v1838_v24 = vpop.xlane.xlu0 %1837  ;;  %v8189_v35 = vpop.eup %5843 }
 0x491   : > { %v8177_v58 = vmax.f32 %v8170_v12, %v1838_v24  ;;  %9832 = vst [vmem:[#allocation90_spill] sm:$0xff] %v8189_v35  ;;  %v8203_v46 = vpop.eup %5845 }
 0x493   : > { %2486 = vst.msk [vmem:[#allocation3 + $0xd0] sm:$0xff] %vm1333_vm2, %v8177_v58 }
 0x497   : > { %1930 = vperm.xlu0 %5758, %v8054_v59  }
 0x498   : > { %1493 = vperm.xlu1 %5756, %v8181_v17  }
 0x49f   : > { %v1836_v27 = vpop.xlane.xlu1 %1835  ;;  %1192 = vperm.xlu2 %5757, %v7938_v14   ;;  %2295 = vperm.xlu0 %5758, %v8189_v35   ;;  %v8206_v14 = vld [vmem:[#allocation3 + $0xd8] sm:$0xff] }
 0x4a0   : > { %v8196_v60 = vmax.f32 %v8187_v47, %v1836_v27  ;;  %9833 = vst [vmem:[#allocation91_spill] sm:$0xff] %v8206_v14 }
 0x4a2   : > { %2485 = vst.msk [vmem:[#allocation3 + $0xc8] sm:$0xff] %vm1333_vm2, %v8196_v60 }
 0x4a3   : > { %v1173_v9 = vpop.permute.xlu0 %1172 }
 0x4a7   : > { %1920 = vperm.xlu2 %5757, %v7992_v40  }
 0x4ab   : > { %v8230_v49 = vpop.permute.xlu0 %1483 }
 0x4af   : > { %1503 = vperm.xlu2 %5757, %v8203_v46  }
 0x4b0   : > { %v1379_v34 = vpop.f32.mrf.mxu3 }
 0x4b1   : > { %v1840_v44 = vpop.xlane.xlu2 %1839  ;;  %v1531_v4 = vadd.f32 %v1515_v28, %v1379_v34  ;;  %v1214_v28 = vsub.f32 %v7746_v48, %v1173_v9 }
 0x4b2   : > { %v8210_v50 = vmax.f32 %v8206_v14, %v1840_v44  ;;  %v8219_v44 = vpop.f32.mrf.mxu0 }
 0x4b3   : > { %1547 = vst.msk [vmem:[#allocation5 + $0x20] sm:$0xff] %vm851_vm1, %v1531_v4  ;;  %v1239_v34 = vmul.f32 1.442695, %v1214_v28 }
 0x4b4   : > { %2487 = vst.msk [vmem:[#allocation3 + $0xd8] sm:$0xff] %vm1333_vm2, %v8210_v50 }
 0x4b7   : > { %v1168_v24 = vpop.permute.xlu1 %1167 }
 0x4b8   : > { %v1213_v27 = vsub.f32 %v7739_v55, %v1168_v24  ;;  %v1382_v19 = vpop.f32.mrf.mxu3 }
 0x4b9   : > { %v1532_v20 = vadd.f32 %v1516_v62, %v1382_v19  ;;  %v1178_v4 = vpop.permute.xlu2 %1177  ;;  %v8235_v62 = vld [vmem:[#allocation3 + $0xe8] sm:$0xff]  ;;  %v1092_v19 = vsub.f32 %v8001_v11, %v8007_v37 }
 0x4ba   : > { %v1237_v32 = vmul.f32 1.442695, %v1213_v27  ;;  %v1215_v55 = vsub.f32 %v7753_v22, %v1178_v4  ;;  %v1870_v27 = vsub.f32 %v8074_v33, %v8077_v61 }
 0x4bb   : > { %1548 = vst.msk [vmem:[#allocation5 + $0x28] sm:$0xff] %vm851_vm1, %v1532_v20 }
 0x4bc   : > { %5847 = vpow2.f32 %v1237_v32  ;;  %v1241_v3 = vmul.f32 1.442695, %v1215_v55  ;;  %v1123_v32 = vmul.f32 1.442695, %v1092_v19  ;;  %v1421_v55 = vld [vmem:[#allocation5 + $0x30] sm:$0xff] }
 0x4bd   : > { %5849 = vpow2.f32 %v1239_v34 }
 0x4be   : > { %5851 = vpow2.f32 %v1241_v3  ;;  %v8270_v3 = vld [vmem:[#allocation3 + $0xf0] sm:$0xff] }
 0x4bf   : > { %v8249_v33 = vpop.permute.xlu1 %1478  ;;  %9835 = vst [vmem:[#allocation93_spill] sm:$0xff] %v8270_v3 }
 0x4c1   : > { %v8267_v37 = vpop.permute.xlu2 %1488 }
 0x4c2   : > { %v8221_v14 = vpop.eup %5847  ;;  %1847 = vmax.xlane.f32.xlu1 %v8219_v44 }
 0x4c3   : > { %1390 = vmatmul.f32.gmra.mxu3 %v8221_v14  ;;  %v8227_v48 = vpop.eup %5849 }
 0x4c4   : > { %v8232_v24 = vpop.eup %5851 }
 0x4c9   : > { %1289 = vadd.xlane.f32.xlu0 %v8029_v38  ;;  %v1891_v38 = vmul.f32 1.442695, %v1870_v27  ;;  %v1517_v27 = vmul.f32 %v8183_v16, %v1421_v55 }
 0x4cb   : > { %1393 = vmatmul.f32.gmra.mxu3 %v8227_v48  ;;  %5853 = vpow2.f32 %v1891_v38 }
 0x4cc   : > { %5855 = vpow2.f32 %v1123_v32 }
 0x4d1   : > { %v8252_v20 = vpop.eup %5853 }
 0x4d2   : > { %9834 = vst [vmem:[#allocation92_spill] sm:$0xff] %v8252_v20 }
 0x4d3   : > { %1396 = vmatmul.f32.gmra.mxu3 %v8232_v24 }
 0x4d6   : > { %v1844_v22 = vpop.xlane.xlu0 %1843 }
 0x4d7   : > { %v8240_v9 = vmax.f32 %v8235_v62, %v1844_v22 }
 0x4d8   : > { %1285 = vadd.xlane.f32.xlu2 %v8018_v39  ;;  %v8255_v39 = vld [vmem:[#allocation3 + $0xe0] sm:$0xff] }
 0x4d9   : > { %2489 = vst.msk [vmem:[#allocation3 + $0xe8] sm:$0xff] %vm1333_vm2, %v8240_v9 }
 0x4db   : > { %1197 = vperm.xlu1 %5756, %v7959_v57   ;;  %v8257_v57 = vpop.eup %5855 }
 0x4dd   : > { %1940 = vperm.xlu0 %5758, %v8077_v61  }
 0x4e3   : > { %1925 = vperm.xlu1 %5756, %v8004_v23  }
 0x4e5   : > { %2310 = vperm.xlu0 %5758, %v8252_v20  }
 0x4e9   : > { %v1188_v28 = vpop.permute.xlu0 %1187 }
 0x4ea   : > { %v1842_v34 = vpop.xlane.xlu1 %1841  ;;  %v1217_v20 = vsub.f32 %v7769_v41, %v1188_v28 }
 0x4eb   : > { %v8260_v11 = vmax.f32 %v8255_v39, %v1842_v34  ;;  %1508 = vperm.xlu1 %5756, %v8257_v57  }
 0x4ed   : > { %2488 = vst.msk [vmem:[#allocation3 + $0xe0] sm:$0xff] %vm1333_vm2, %v8260_v11  ;;  %1955 = vperm.xlu0 %5758, %v8139_v30  }
 0x4f0   : > { %1935 = vperm.xlu2 %5757, %v8061_v56  }
 0x4f1   : > { %v1916_v23 = vpop.permute.xlu0 %1915 }
 0x4f2   : > { %v1993_v61 = vsub.f32 %v7802_v1, %v1916_v23  ;;  %v1422_v1 = vld [vmem:[#allocation5 + $0x38] sm:$0xff] }
 0x4f3   : > { %v1518_v23 = vmul.f32 %v8166_v54, %v1422_v1 }
 0x4f4   : > { %v2009_v4 = vmul.f32 1.442695, %v1993_v61 }
 0x4f6   : > { %5857 = vpow2.f32 %v2009_v4 }
 0x4fa   : > { %v1846_v22 = vpop.xlane.xlu2 %1845 }
 0x4fb   : > { %v8274_v38 = vmax.f32 %v8270_v3, %v1846_v22  ;;  %v1385_v19 = vpop.f32.mrf.mxu3 }
 0x4fc   : > { %v8276_v32 = vpop.eup %5857  ;;  %v1533_v34 = vadd.f32 %v1517_v27, %v1385_v19  ;;  %v1245_v27 = vmul.f32 1.442695, %v1217_v20  ;;  %v8296_v20 = vpop.permute.xlu0 %1498 }
 0x4fd   : > { %2490 = vst.msk [vmem:[#allocation3 + $0xf0] sm:$0xff] %vm1333_vm2, %v8274_v38  ;;  %2218 = vmatmul.f32.vlgmr.msrb.gmra.mxu1 %v8276_v32 }
 0x4fe   : > { %1549 = vst.msk [vmem:[#allocation5 + $0x30] sm:$0xff] %vm851_vm1, %v1533_v34 }
 0x502   : > { %v1183_v61 = vpop.permute.xlu1 %1182  ;;  %v1193_v16 = vpop.permute.xlu2 %1192 }
 0x503   : > { %v1216_v4 = vsub.f32 %v7762_v10, %v1183_v61  ;;  %v1388_v55 = vpop.f32.mrf.mxu3  ;;  %v1218_v10 = vsub.f32 %v7778_v51, %v1193_v16 }
 0x504   : > { %v1534_v22 = vadd.f32 %v1518_v23, %v1388_v55 }
 0x505   : > { %v1243_v3 = vmul.f32 1.442695, %v1216_v4  ;;  %v1247_v54 = vmul.f32 1.442695, %v1218_v10  ;;  %v1423_v4 = vld [vmem:[#allocation5 + $0x40] sm:$0xff] }
 0x506   : > { %1550 = vst.msk [vmem:[#allocation5 + $0x38] sm:$0xff] %vm851_vm1, %v1534_v22  ;;  %v1519_v22 = vmul.f32 %v8201_v21, %v1423_v4  ;;  %v1253_v10 = vld [vmem:[#allocation4] sm:$0xff] }
 0x507   : > { %5859 = vpow2.f32 %v1243_v3  ;;  %v1255_v3 = vld [vmem:[#allocation4 + $0x10] sm:$0xff] }
 0x508   : > { %5861 = vpow2.f32 %v1245_v27  ;;  %v1271_v23 = vmul.f32 %v7946_v36, %v1255_v3 }
 0x50a   : > { %v1921_v19 = vpop.permute.xlu2 %1920 }
 0x50b   : > { %v1994_v35 = vsub.f32 %v7815_v8, %v1921_v19  ;;  %v1203_v8 = vpop.permute.xlu0 %1202 }
 0x50c   : > { %v1220_v4 = vsub.f32 %v7830_v25, %v1203_v8 }
 0x50d   : > { %v8287_v34 = vpop.eup %5859  ;;  %v2011_v43 = vmul.f32 1.442695, %v1994_v35  ;;  %v8310_v35 = vld [vmem:[#allocation3 + $0xf8] sm:$0xff] }
 0x50e   : > { %1399 = vmatmul.f32.gmra.mxu3 %v8287_v34  ;;  %v8291_v1 = vpop.eup %5861  ;;  %9836 = vst [vmem:[#allocation94_spill] sm:$0xff] %v8310_v35 }
 0x50f   : > { %5863 = vpow2.f32 %v2011_v43 }
 0x510   : > { %5865 = vpow2.f32 %v1247_v54  ;;  %v1424_v54 = vld [vmem:[#allocation5 + $0x48] sm:$0xff] }
 0x511   : > { %v1520_v36 = vmul.f32 %v8249_v33, %v1424_v54 }
 0x512   : > { %v8321_v55 = vpop.permute.xlu2 %1503 }
 0x513   : > { %v1931_v43 = vpop.permute.xlu0 %1930 }
 0x514   : > { %v1996_v25 = vsub.f32 %v7904_v53, %v1931_v43  ;;  %v9838_v53 = vld [vmem:[#allocation44_spill] sm:$0xff]  ;;  %v9839_v43 = vld [vmem:[#allocation53_spill] sm:$0xff] }
 0x515   : > { %v8293_v41 = vpop.eup %5863  ;;  %1287 = vadd.xlane.f32.xlu1 %v8025_v52  ;;  %v8306_v52 = vpop.permute.xlu1 %1493 }
 0x516   : > { %1402 = vmatmul.f32.gmra.mxu3 %v8291_v1  ;;  %2221 = vmatmul.f32.gmra.mxu1 %v8293_v41  ;;  %v8302_v51 = vpop.eup %5865 }
 0x517   : > { %1297 = vadd.xlane.f32.xlu0 %v8147_v6 }
 0x519   : > { %1291 = vadd.xlane.f32.xlu2 %v8040_v18 }
 0x51b   : > { %v8312_v28 = vpop.permute.xlu0 %2295 }
 0x51c   : > { %9837 = vst [vmem:[#allocation95_spill] sm:$0xff] %v8312_v28 }
 0x51e   : > { %1405 = vmatmul.f32.gmra.mxu3 %v8302_v51 }
 0x52b   : > { %1970 = vperm.xlu0 %5758, %v8210_v50  }
 0x52e   : > { %1945 = vperm.xlu1 %5756, %v8119_v63  }
 0x531   : > { %1950 = vperm.xlu2 %5757, %v8114_v0  }
 0x535   : > { %v1848_v6 = vpop.xlane.xlu1 %1847 }
 0x536   : > { %v8315_v18 = vmax.f32 %v8310_v35, %v1848_v6  ;;  %v1269_v6 = vmul.f32 %v7855_v29, %v1253_v10 }
 0x538   : > { %2491 = vst.msk [vmem:[#allocation3 + $0xf8] sm:$0xff] %vm1333_vm2, %v8315_v18 }
 0x53c   : > { %v1290_v61 = vpop.xlane.xlu0 %1289 }
 0x53d   : > { %v1319_v16 = vadd.f32 %v1290_v61, %v1271_v23 }
 0x53f   : > { %1336 = vst.msk [vmem:[#allocation4 + $0x10] sm:$0xff] %vm1333_vm2, %v1319_v16 }
 0x546   : > { %v1391_v27 = vpop.f32.mrf.mxu3 }
 0x547   : > { %v1535_v19 = vadd.f32 %v1519_v22, %v1391_v27  ;;  %v1425_v22 = vld [vmem:[#allocation5 + $0x50] sm:$0xff]  ;;  %v1251_v27 = vmul.f32 1.442695, %v1220_v4 }
 0x548   : > { %v1521_v29 = vmul.f32 %v8230_v49, %v1425_v22  ;;  %v9842_v22 = vld [vmem:[#allocation43_spill] sm:$0xff] }
 0x549   : > { %1551 = vst.msk [vmem:[#allocation5 + $0x40] sm:$0xff] %vm851_vm1, %v1535_v19 }
 0x54b   : > { %v1286_v28 = vpop.xlane.xlu2 %1285 }
 0x54c   : > { %v1317_v35 = vadd.f32 %v1286_v28, %v1269_v6 }
 0x54d   : > { %v1198_v3 = vpop.permute.xlu1 %1197 }
 0x54e   : > { %1334 = vst.msk [vmem:[#allocation4] sm:$0xff] %vm1333_vm2, %v1317_v35  ;;  %v1219_v23 = vsub.f32 %v7787_v5, %v1198_v3  ;;  %v1394_v61 = vpop.f32.mrf.mxu3 }
 0x54f   : > { %v1536_v16 = vadd.f32 %v1520_v36, %v1394_v61  ;;  %v1941_v6 = vpop.permute.xlu0 %1940  ;;  %v8357_v61 = vpop.f32.mrf.mxu0 }
 0x550   : > { %v1249_v21 = vmul.f32 1.442695, %v1219_v23 }
 0x551   : > { %1552 = vst.msk [vmem:[#allocation5 + $0x48] sm:$0xff] %vm851_vm1, %v1536_v16 }
 0x552   : > { %5867 = vpow2.f32 %v1249_v21 }
 0x553   : > { %5869 = vpow2.f32 %v1251_v27 }
 0x555   : > { %v1926_v28 = vpop.permute.xlu1 %1925  ;;  %1303 = vadd.xlane.f32.xlu0 %v8227_v48  ;;  %v2015_v48 = vmul.f32 1.442695, %v1996_v25 }
 0x556   : > { %v1995_v33 = vsub.f32 %v7832_v7, %v1926_v28  ;;  %v1397_v35 = vpop.f32.mrf.mxu3  ;;  %v1936_v7 = vpop.permute.xlu2 %1935  ;;  %v9843_v28 = vld [vmem:[#allocation58_spill] sm:$0xff] }
 0x557   : > { %v1537_v19 = vadd.f32 %v1521_v29, %v1397_v35  ;;  %v8366_v21 = vpop.permute.xlu0 %2310  ;;  %v8369_v4 = vpop.f32.mrf.mxu0  ;;  %v1254_v35 = vld [vmem:[#allocation4 + $0x8] sm:$0xff] }
 0x558   : > { %v8334_v5 = vpop.eup %5867  ;;  %v2013_v10 = vmul.f32 1.442695, %v1995_v33  ;;  %1293 = vadd.xlane.f32.xlu1 %v8086_v45  ;;  %v1997_v45 = vsub.f32 %v7918_v13, %v1936_v7  ;;  %v9840_v13 = vld [vmem:[#allocation55_spill] sm:$0xff]  ;;  %9841 = vst [vmem:[#allocation44_spill] sm:$0xff] %v8366_v21 }
 0x559   : > { %1553 = vst.msk [vmem:[#allocation5 + $0x50] sm:$0xff] %vm851_vm1, %v1537_v19  ;;  %1408 = vmatmul.f32.gmra.mxu3 %v8334_v5  ;;  %v8341_v49 = vpop.eup %5869  ;;  %v1259_v19 = vld [vmem:[#allocation4 + $0x30] sm:$0xff]  ;;  %v1256_v7 = vld [vmem:[#allocation4 + $0x18] sm:$0xff] }
 0x55a   : > { %5871 = vpow2.f32 %v2013_v10  ;;  %1295 = vadd.xlane.f32.xlu2 %v8090_v31  ;;  %v2017_v54 = vmul.f32 1.442695, %v1997_v45  ;;  %v1998_v31 = vsub.f32 %v9838_v53, %v1941_v6  ;;  %v9845_v10 = vld [vmem:[#allocation45_spill] sm:$0xff]  ;;  %v9847_v53 = vld [vmem:[#allocation59_spill] sm:$0xff] }
 0x55b   : > { %5873 = vpow2.f32 %v2015_v48  ;;  %v1270_v25 = vmul.f32 %v9845_v10, %v1254_v35 }
 0x55c   : > { %5875 = vpow2.f32 %v2017_v54  ;;  %v2019_v3 = vmul.f32 1.442695, %v1998_v31  ;;  %v9846_v54 = vld [vmem:[#allocation75_spill] sm:$0xff] }
 0x55d   : > { %v8373_v29 = vpop.permute.xlu1 %1508  ;;  %v1275_v6 = vmul.f32 %v9846_v54, %v1259_v19 }
 0x55e   : > { %5877 = vpow2.f32 %v2019_v3  ;;  %v9848_v3 = vld [vmem:[#allocation50_spill] sm:$0xff] }
 0x55f   : > { %v1956_v27 = vpop.permute.xlu0 %1955  ;;  %v8377_v33 = vpop.f32.mrf.mxu0 }
 0x560   : > { %v8343_v8 = vpop.eup %5871  ;;  %9844 = vst [vmem:[#allocation53_spill] sm:$0xff] %v8377_v33 }
 0x561   : > { %1411 = vmatmul.f32.gmra.mxu3 %v8341_v49  ;;  %2224 = vmatmul.f32.gmra.mxu1 %v8343_v8  ;;  %v8348_v36 = vpop.eup %5873 }
 0x562   : > { %v8355_v23 = vpop.eup %5875 }
 0x564   : > { %v8364_v16 = vpop.eup %5877 }
 0x567   : > { %v8386_v35 = vpop.f32.mrf.mxu0 }
 0x569   : > { %1985 = vperm.xlu0 %5758, %v8274_v38   ;;  %2227 = vmatmul.f32.gmra.mxu1 %v8348_v36 }
 0x56a   : > { %5326 = vmatmul.msk.f32.vlgmr.msra.gmra.mxu3 %vm851_vm1, %v9839_v43 }
 0x571   : > { %1960 = vperm.xlu1 %5756, %v8196_v60   ;;  %2230 = vmatmul.f32.gmra.mxu1 %v8355_v23 }
 0x572   : > { %5327 = vmatmul.msk.f32.gmra.mxu3 %vm851_vm1, %v9840_v13  ;;  %1965 = vperm.xlu2 %5757, %v8177_v58   ;;  %v1272_v13 = vmul.f32 %v9848_v3, %v1256_v7  ;;  %v1427_v7 = vld [vmem:[#allocation5 + $0x60] sm:$0xff] }
 0x573   : > { %v1523_v54 = vmul.f32 %v8306_v52, %v1427_v7  ;;  %v9858_v7 = vld [vmem:[#allocation74_spill] sm:$0xff] }
 0x579   : > { %2233 = vmatmul.f32.gmra.mxu1 %v8364_v16 }
 0x57a   : > { %5328 = vmatmul.msk.f32.gmra.mxu3 %vm851_vm1, %v9842_v22 }
 0x582   : > { %5329 = vmatmul.msk.f32.gmra.mxu3 %vm851_vm1, %v9843_v28  ;;  %v1426_v28 = vld [vmem:[#allocation5 + $0x58] sm:$0xff] }
 0x583   : > { %v1522_v19 = vmul.f32 %v8267_v37, %v1426_v28  ;;  %v1428_v37 = vld [vmem:[#allocation5 + $0x68] sm:$0xff]  ;;  %v9854_v28 = vld [vmem:[#allocation63_spill] sm:$0xff] }
 0x588   : > { %v1288_v48 = vpop.xlane.xlu1 %1287 }
 0x589   : > { %v1318_v45 = vadd.f32 %v1288_v48, %v1270_v25  ;;  %v9849_v48 = vld [vmem:[#allocation48_spill] sm:$0xff] }
 0x58a   : > { %5330 = vmatmul.msk.f32.gmra.mxu3 %vm851_vm1, %v9847_v53  ;;  %v1298_v31 = vpop.xlane.xlu0 %1297 }
 0x58b   : > { %1335 = vst.msk [vmem:[#allocation4 + $0x8] sm:$0xff] %vm1333_vm2, %v1318_v45  ;;  %v1323_v43 = vadd.f32 %v1298_v31, %v1275_v6  ;;  %v8394_v45 = vpop.f32.mrf.mxu0  ;;  %v9851_v31 = vld [vmem:[#allocation62_spill] sm:$0xff] }
 0x58c   : > { %v1292_v22 = vpop.xlane.xlu2 %1291  ;;  %9850 = vst [vmem:[#allocation55_spill] sm:$0xff] %v8394_v45 }
 0x58d   : > { %1340 = vst.msk [vmem:[#allocation4 + $0x30] sm:$0xff] %vm1333_vm2, %v1323_v43  ;;  %v1320_v21 = vadd.f32 %v1292_v22, %v1272_v13  ;;  %v9852_v43 = vld [vmem:[#allocation49_spill] sm:$0xff] }
 0x58f   : > { %1337 = vst.msk [vmem:[#allocation4 + $0x18] sm:$0xff] %vm1333_vm2, %v1320_v21 }
 0x591   : > { %v1400_v10 = vpop.f32.mrf.mxu3 }
 0x592   : > { %v1538_v25 = vadd.f32 %v1522_v19, %v1400_v10  ;;  %5331 = vmatmul.msk.f32.gmra.mxu3 %vm851_vm1, %v9849_v48  ;;  %v9856_v10 = vld [vmem:[#allocation52_spill] sm:$0xff] }
 0x593   : > { %1309 = vadd.xlane.f32.xlu0 %v8291_v1  ;;  %v1524_v1 = vmul.f32 %v8296_v20, %v1428_v37  ;;  %v8405_v13 = vpop.f32.mrf.mxu0 }
 0x594   : > { %1554 = vst.msk [vmem:[#allocation5 + $0x58] sm:$0xff] %vm851_vm1, %v1538_v25 }
 0x595   : > { %9853 = vst [vmem:[#allocation43_spill] sm:$0xff] %v8405_v13 }
 0x599   : > { %v1403_v6 = vpop.f32.mrf.mxu3 }
 0x59a   : > { %v1539_v53 = vadd.f32 %v1523_v54, %v1403_v6  ;;  %5332 = vmatmul.msk.f32.gmra.mxu3 %vm851_vm1, %v9851_v31  ;;  %v2001_v54 = vsub.f32 %v9858_v7, %v1956_v27 }
 0x59b   : > { %1299 = vadd.xlane.f32.xlu1 %v8155_v42  ;;  %1301 = vadd.xlane.f32.xlu2 %v8221_v14  ;;  %v1951_v42 = vpop.permute.xlu2 %1950  ;;  %v9855_v14 = vld [vmem:[#allocation71_spill] sm:$0xff]  ;;  %v8416_v48 = vpop.f32.mrf.mxu0 }
 0x59c   : > { %1555 = vst.msk [vmem:[#allocation5 + $0x60] sm:$0xff] %vm851_vm1, %v1539_v53  ;;  %2076 = vadd.xlane.f32.xlu0 %v8293_v41  ;;  %v2000_v41 = vsub.f32 %v9855_v14, %v1951_v42  ;;  %v2025_v6 = vmul.f32 1.442695, %v2001_v54 }
 0x59d   : > { %9857 = vst [vmem:[#allocation58_spill] sm:$0xff] %v8416_v48 }
 0x59e   : > { %v2023_v20 = vmul.f32 1.442695, %v2000_v41  ;;  %v9866_v41 = vld [vmem:[#allocation66_spill] sm:$0xff] }
 0x5a0   : > { %v1946_v21 = vpop.permute.xlu1 %1945 }
 0x5a1   : > { %v1999_v3 = vsub.f32 %v9852_v43, %v1946_v21  ;;  %v1406_v52 = vpop.f32.mrf.mxu3  ;;  %v9863_v21 = vld [vmem:[#allocation57_spill] sm:$0xff] }
 0x5a2   : > { %v1540_v22 = vadd.f32 %v1524_v1, %v1406_v52  ;;  %5333 = vmatmul.msk.f32.gmra.mxu3 %vm851_vm1, %v9854_v28  ;;  %v1971_v1 = vpop.permute.xlu0 %1970  ;;  %v1262_v43 = vld [vmem:[#allocation4 + $0x48] sm:$0xff] }
 0x5a3   : > { %v2021_v19 = vmul.f32 1.442695, %v1999_v3  ;;  %v8426_v31 = vpop.f32.mrf.mxu0  ;;  %v9864_v3 = vld [vmem:[#allocation83_spill] sm:$0xff] }
 0x5a4   : > { %1556 = vst.msk [vmem:[#allocation5 + $0x68] sm:$0xff] %vm851_vm1, %v1540_v22  ;;  %1315 = vadd.xlane.f32.xlu0 %v8341_v49  ;;  %v9859_v49 = vld [vmem:[#allocation64_spill] sm:$0xff]  ;;  %v1278_v52 = vmul.f32 %v9864_v3, %v1262_v43 }
 0x5a5   : > { %5879 = vpow2.f32 %v2021_v19  ;;  %9860 = vst [vmem:[#allocation45_spill] sm:$0xff] %v8426_v31  ;;  %v1257_v22 = vld [vmem:[#allocation4 + $0x20] sm:$0xff]  ;;  %v1258_v19 = vld [vmem:[#allocation4 + $0x28] sm:$0xff] }
 0x5a6   : > { %5881 = vpow2.f32 %v2023_v20  ;;  %v9867_v20 = vld [vmem:[#allocation39_spill] sm:$0xff] }
 0x5a7   : > { %5883 = vpow2.f32 %v2025_v6  ;;  %v9868_v6 = vld [vmem:[#allocation72_spill] sm:$0xff] }
 0x5aa   : > { %5334 = vmatmul.msk.f32.gmra.mxu3 %vm851_vm1, %v9856_v10  ;;  %v1273_v10 = vmul.f32 %v9867_v20, %v1257_v22 }
 0x5ab   : > { %v8414_v25 = vpop.eup %5879  ;;  %v8434_v37 = vpop.f32.mrf.mxu0 }
 0x5ac   : > { %2082 = vadd.xlane.f32.xlu0 %v8355_v23  ;;  %2236 = vmatmul.f32.gmra.mxu1 %v8414_v25  ;;  %v5882_v53 = vpop.eup %5881  ;;  %v9861_v23 = vld [vmem:[#allocation65_spill] sm:$0xff]  ;;  %9862 = vst [vmem:[#allocation75_spill] sm:$0xff] %v8434_v37 }
 0x5ad   : > { %v8430_v27 = vpop.eup %5883 }
 0x5b2   : > { %5335 = vmatmul.msk.f32.gmra.mxu3 %vm851_vm1, %v9859_v49  ;;  %v1274_v49 = vmul.f32 %v9868_v6, %v1258_v19  ;;  %v9872_v19 = vld [vmem:[#allocation61_spill] sm:$0xff]  ;;  %v1430_v6 = vld [vmem:[#allocation5 + $0x78] sm:$0xff] }
 0x5b3   : > { %1980 = vperm.xlu2 %5757, %v8240_v9   ;;  %v8439_v14 = vpop.f32.mrf.mxu0 }
 0x5b4   : > { %3635 = vmax.xlane.f32.xlu0 %v8357_v61  ;;  %1975 = vperm.xlu1 %5756, %v8260_v11   ;;  %9865 = vst [vmem:[#allocation59_spill] sm:$0xff] %v8439_v14 }
 0x5b5   : > { %2239 = vmatmul.f32.gmra.mxu1 %v5882_v53 }
 0x5ba   : > { %5336 = vmatmul.msk.f32.gmra.mxu3 %vm851_vm1, %v9861_v23 }
 0x5bb   : > { %v8451_v43 = vpop.f32.mrf.mxu0 }
 0x5bc   : > { %3641 = vmax.xlane.f32.xlu0 %v8386_v35  ;;  %9870 = vst [vmem:[#allocation50_spill] sm:$0xff] %v8451_v43 }
 0x5bd   : > { %2242 = vmatmul.f32.gmra.mxu1 %v8430_v27 }
 0x5c2   : > { %5337 = vmatmul.msk.f32.gmra.mxu3 %vm851_vm1, %v9863_v21  ;;  %v9869_v21 = vld [vmem:[#allocation67_spill] sm:$0xff] }
 0x5c4   : > { %2088 = vadd.xlane.f32.xlu0 %v5882_v53 }
 0x5c8   : > { %v1304_v28 = vpop.xlane.xlu0 %1303 }
 0x5c9   : > { %v1326_v42 = vadd.f32 %v1304_v28, %v1278_v52  ;;  %v9871_v52 = vld [vmem:[#allocation80_spill] sm:$0xff]  ;;  %v1429_v28 = vld [vmem:[#allocation5 + $0x70] sm:$0xff] }
 0x5ca   : > { %5338 = vmatmul.msk.f32.gmra.mxu3 %vm851_vm1, %v9866_v41  ;;  %v1525_v41 = vmul.f32 %v8321_v55, %v1429_v28  ;;  %v9875_v55 = vld [vmem:[#allocation78_spill] sm:$0xff] }
 0x5cb   : > { %1343 = vst.msk [vmem:[#allocation4 + $0x48] sm:$0xff] %vm1333_vm2, %v1326_v42  ;;  %v1294_v7 = vpop.xlane.xlu1 %1293 }
 0x5cc   : > { %v1321_v54 = vadd.f32 %v1294_v7, %v1273_v10  ;;  %3647 = vmax.xlane.f32.xlu0 %v8416_v48  ;;  %v8459_v7 = vpop.f32.mrf.mxu0 }
 0x5cd   : > { %v1296_v53 = vpop.xlane.xlu2 %1295  ;;  %9873 = vst [vmem:[#allocation48_spill] sm:$0xff] %v8459_v7 }
 0x5ce   : > { %1338 = vst.msk [vmem:[#allocation4 + $0x20] sm:$0xff] %vm1333_vm2, %v1321_v54  ;;  %v1322_v23 = vadd.f32 %v1296_v53, %v1274_v49  ;;  %v9874_v49 = vld [vmem:[#allocation68_spill] sm:$0xff]  ;;  %v1526_v53 = vmul.f32 %v8373_v29, %v1430_v6  ;;  %v9877_v29 = vld [vmem:[#allocation82_spill] sm:$0xff]  ;;  %v1260_v6 = vld [vmem:[#allocation4 + $0x38] sm:$0xff] }
 0x5cf   : > { %v2004_v28 = vsub.f32 %v9877_v29, %v1971_v1  ;;  %v1265_v1 = vld [vmem:[#allocation4 + $0x60] sm:$0xff] }
 0x5d0   : > { %1339 = vst.msk [vmem:[#allocation4 + $0x28] sm:$0xff] %vm1333_vm2, %v1322_v23 }
 0x5d2   : > { %5339 = vmatmul.msk.f32.gmra.mxu3 %vm851_vm1, %v9869_v21 }
 0x5d4   : > { %3653 = vmax.xlane.f32.xlu0 %v8439_v14 }
 0x5d5   : > { %v1966_v3 = vpop.permute.xlu2 %1965 }
 0x5d6   : > { %v2003_v22 = vsub.f32 %v9871_v52, %v1966_v3 }
 0x5d8   : > { %v2029_v42 = vmul.f32 1.442695, %v2003_v22 }
 0x5da   : > { %5885 = vpow2.f32 %v2029_v42  ;;  %5340 = vmatmul.msk.f32.gmra.mxu3 %vm851_vm1, %v9872_v19  ;;  %v2031_v42 = vmul.f32 1.442695, %v2004_v28 }
 0x5dc   : > { %1307 = vadd.xlane.f32.xlu2 %v8287_v34  ;;  %v1409_v20 = vpop.f32.mrf.mxu3 }
 0x5dd   : > { %v1541_v10 = vadd.f32 %v1525_v41, %v1409_v20  ;;  %v8481_v20 = vpop.permute.xlu0 %1985 }
 0x5de   : > { %1305 = vadd.xlane.f32.xlu1 %v8232_v24  ;;  %v8469_v24 = vpop.f32.mrf.mxu0 }
 0x5df   : > { %1557 = vst.msk [vmem:[#allocation5 + $0x70] sm:$0xff] %vm851_vm1, %v1541_v10 }
 0x5e0   : > { %v5886_v54 = vpop.eup %5885  ;;  %9876 = vst [vmem:[#allocation62_spill] sm:$0xff] %v8469_v24 }
 0x5e1   : > { %2094 = vadd.xlane.f32.xlu0 %v5886_v54 }
 0x5e2   : > { %5341 = vmatmul.msk.f32.gmra.mxu3 %vm851_vm1, %v9874_v49  ;;  %v1261_v49 = vld [vmem:[#allocation4 + $0x40] sm:$0xff] }
 0x5e3   : > { %v1961_v23 = vpop.permute.xlu1 %1960 }
 0x5e4   : > { %v2002_v21 = vsub.f32 %v9875_v55, %v1961_v23  ;;  %2074 = vadd.xlane.f32.xlu2 %v8276_v32  ;;  %v1412_v34 = vpop.f32.mrf.mxu3  ;;  %v9878_v32 = vld [vmem:[#allocation70_spill] sm:$0xff]  ;;  %v9879_v23 = vld [vmem:[#allocation77_spill] sm:$0xff] }
 0x5e5   : > { %v1542_v3 = vadd.f32 %v1526_v53, %v1412_v34  ;;  %v1866_v19 = vsub.f32 %v9878_v32, %v7992_v40  ;;  %v2043_v53 = vld [vmem:[#allocation4 + $0x88] sm:$0xff]  ;;  %v1869_v55 = vsub.f32 %v9879_v23, %v8061_v56  ;;  %v1268_v56 = vld [vmem:[#allocation4 + $0x78] sm:$0xff] }
 0x5e6   : > { %v2027_v52 = vmul.f32 1.442695, %v2002_v21  ;;  %v9880_v21 = vld [vmem:[#allocation73_spill] sm:$0xff]  ;;  %v8750_v14 = vpop.f32.mrf.mxu0 }
 0x5e7   : > { %1558 = vst.msk [vmem:[#allocation5 + $0x78] sm:$0xff] %vm851_vm1, %v1542_v3  ;;  %v1276_v34 = vmul.f32 %v9880_v21, %v1260_v6  ;;  %v9881_v3 = vld [vmem:[#allocation79_spill] sm:$0xff]  ;;  %v2046_v21 = vld [vmem:[#allocation4 + $0xa0] sm:$0xff] }
 0x5e8   : > { %5887 = vpow2.f32 %v2027_v52  ;;  %v1277_v52 = vmul.f32 %v9881_v3, %v1261_v49  ;;  %9917 = vst [vmem:[#allocation77_spill] sm:$0xff] %v8750_v14 }
 0x5e9   : > { %3659 = vmax.xlane.f32.xlu0 %v8469_v24  ;;  %5889 = vpow2.f32 %v2031_v42 }
 0x5ec   : > { %1313 = vadd.xlane.f32.xlu2 %v8334_v5  ;;  %v1883_v5 = vmul.f32 1.442695, %v1866_v19 }
 0x5ee   : > { %v5888_v22 = vpop.eup %5887  ;;  %5891 = vpow2.f32 %v1883_v5 }
 0x5ef   : > { %2245 = vmatmul.f32.gmra.mxu1 %v5888_v22  ;;  %v8479_v41 = vpop.eup %5889 }
 0x5f4   : > { %2080 = vadd.xlane.f32.xlu2 %v8348_v36  ;;  %v1281_v36 = vmul.f32 %v8181_v17, %v1265_v1  ;;  %v8487_v40 = vpop.eup %5891  ;;  %v1889_v1 = vmul.f32 1.442695, %v1869_v55 }
 0x5f5   : > { %v2059_v28 = vmul.f32 %v8487_v40, %v2043_v53  ;;  %v8501_v53 = vpop.f32.mrf.mxu1 }
 0x5f6   : > { %5893 = vpow2.f32 %v1889_v1 }
 0x5f7   : > { %1990 = vperm.xlu1 %5756, %v8315_v18   ;;  %2248 = vmatmul.f32.gmra.mxu1 %v5886_v54 }
 0x5fc   : > { %3639 = vmax.xlane.f32.xlu2 %v8377_v33  ;;  %v8504_v55 = vpop.eup %5893 }
 0x5ff   : > { %2251 = vmatmul.f32.gmra.mxu1 %v8479_v41 }
 0x604   : > { %3645 = vmax.xlane.f32.xlu2 %v8405_v13 }
 0x606   : > { %v1310_v10 = vpop.xlane.xlu0 %1309 }
 0x607   : > { %v1329_v54 = vadd.f32 %v1310_v10, %v1281_v36  ;;  %v1284_v36 = vmul.f32 %v8257_v57, %v1268_v56  ;;  %v9882_v10 = vld [vmem:[#allocation87_spill] sm:$0xff] }
 0x609   : > { %1346 = vst.msk [vmem:[#allocation4 + $0x60] sm:$0xff] %vm1333_vm2, %v1329_v54 }
 0x60c   : > { %2086 = vadd.xlane.f32.xlu2 %v8414_v25 }
 0x60e   : > { %v1300_v29 = vpop.xlane.xlu1 %1299  ;;  %v1302_v17 = vpop.xlane.xlu2 %1301 }
 0x60f   : > { %v1324_v42 = vadd.f32 %v1300_v29, %v1276_v34  ;;  %v1325_v32 = vadd.f32 %v1302_v17, %v1277_v52  ;;  %v2077_v19 = vpop.xlane.xlu0 %2076  ;;  %v2062_v34 = vmul.f32 %v8504_v55, %v2046_v21  ;;  %v2222_v29 = vpop.f32.mrf.mxu1  ;;  %v9883_v17 = vld [vmem:[#allocation84_spill] sm:$0xff] }
 0x610   : > { %v2107_v5 = vadd.f32 %v2077_v19, %v2059_v28  ;;  %v1872_v28 = vsub.f32 %v9883_v17, %v8114_v0  ;;  %v8523_v0 = vld [vmem:[#allocation3 + $0x198] sm:$0xff]  ;;  %v1875_v17 = vsub.f32 %v8170_v12, %v8177_v58  ;;  %v1263_v58 = vld [vmem:[#allocation4 + $0x50] sm:$0xff] }
 0x611   : > { %1341 = vst.msk [vmem:[#allocation4 + $0x38] sm:$0xff] %vm1333_vm2, %v1324_v42  ;;  %v8512_v42 = vld [vmem:[#allocation3 + $0x180] sm:$0xff]  ;;  %v1264_v12 = vld [vmem:[#allocation4 + $0x58] sm:$0xff] }
 0x612   : > { %1342 = vst.msk [vmem:[#allocation4 + $0x40] sm:$0xff] %vm1333_vm2, %v1325_v32  ;;  %v1895_v56 = vmul.f32 1.442695, %v1872_v28 }
 0x613   : > { %2123 = vst.msk [vmem:[#allocation4 + $0x88] sm:$0xff] %vm1333_vm2, %v2107_v5 }
 0x614   : > { %3651 = vmax.xlane.f32.xlu2 %v8434_v37  ;;  %9884 = vst [vmem:[#allocation49_spill] sm:$0xff] %v8512_v42 }
 0x615   : > { %9885 = vst [vmem:[#allocation63_spill] sm:$0xff] %v8523_v0 }
 0x616   : > { %v1981_v25 = vpop.permute.xlu2 %1980 }
 0x617   : > { %v2006_v54 = vsub.f32 %v9882_v10, %v1981_v25  ;;  %v1316_v6 = vpop.xlane.xlu0 %1315  ;;  %v8518_v25 = vpop.f32.mrf.mxu1  ;;  %v2007_v10 = vsub.f32 %v8162_v26, %v8481_v20 }
 0x618   : > { %v1332_v49 = vadd.f32 %v1316_v6, %v1284_v36  ;;  %v2049_v6 = vld [vmem:[#allocation4 + $0xb8] sm:$0xff] }
 0x619   : > { %v2035_v23 = vmul.f32 1.442695, %v2006_v54 }
 0x61a   : > { %1349 = vst.msk [vmem:[#allocation4 + $0x78] sm:$0xff] %vm1333_vm2, %v1332_v49 }
 0x61b   : > { %5895 = vpow2.f32 %v2035_v23  ;;  %v2037_v23 = vmul.f32 1.442695, %v2007_v10 }
 0x61c   : > { %3657 = vmax.xlane.f32.xlu2 %v8459_v7 }
 0x61f   : > { %v2083_v3 = vpop.xlane.xlu0 %2082  ;;  %v8535_v54 = vpop.f32.mrf.mxu1 }
 0x620   : > { %v2110_v52 = vadd.f32 %v2083_v3, %v2062_v34 }
 0x621   : > { %v5896_v57 = vpop.eup %5895  ;;  %1311 = vadd.xlane.f32.xlu1 %v8302_v51 }
 0x622   : > { %2126 = vst.msk [vmem:[#allocation4 + $0xa0] sm:$0xff] %vm1333_vm2, %v2110_v52  ;;  %2100 = vadd.xlane.f32.xlu0 %v5896_v57  ;;  %v8541_v52 = vld [vmem:[#allocation3 + $0x1b0] sm:$0xff] }
 0x623   : > { %9886 = vst [vmem:[#allocation71_spill] sm:$0xff] %v8541_v52 }
 0x624   : > { %2092 = vadd.xlane.f32.xlu2 %v5888_v22 }
 0x626   : > { %v1976_v32 = vpop.permute.xlu1 %1975 }
 0x627   : > { %v2005_v19 = vsub.f32 %v8124_v2, %v1976_v32  ;;  %v3636_v5 = vpop.xlane.xlu0 %3635  ;;  %v2231_v3 = vpop.f32.mrf.mxu1  ;;  %v8554_v32 = vld [vmem:[#allocation3 + $0x1c8] sm:$0xff] }
 0x628   : > { %v8516_v1 = vmax.f32 %v8512_v42, %v3636_v5  ;;  %9889 = vst [vmem:[#allocation74_spill] sm:$0xff] %v8554_v32 }
 0x629   : > { %v2033_v51 = vmul.f32 1.442695, %v2005_v19  ;;  %2078 = vadd.xlane.f32.xlu1 %v8343_v8  ;;  %v1901_v19 = vmul.f32 1.442695, %v1875_v17  ;;  %v2042_v17 = vld [vmem:[#allocation4 + $0x80] sm:$0xff] }
 0x62a   : > { %4278 = vst.msk [vmem:[#allocation3 + $0x180] sm:$0xff] %vm1333_vm2, %v8516_v1 }
 0x62b   : > { %5897 = vpow2.f32 %v2033_v51 }
 0x62c   : > { %5899 = vpow2.f32 %v1895_v56 }
 0x62d   : > { %5901 = vpow2.f32 %v2037_v23  ;;  %v2052_v23 = vld [vmem:[#allocation4 + $0xd0] sm:$0xff] }
 0x62e   : > { %5903 = vpow2.f32 %v1901_v19 }
 0x62f   : > { %v3642_v22 = vpop.xlane.xlu0 %3641 }
 0x630   : > { %v8526_v2 = vmax.f32 %v8523_v0, %v3642_v22 }
 0x631   : > { %v5898_v36 = vpop.eup %5897  ;;  %3637 = vmax.xlane.f32.xlu1 %v8369_v4 }
 0x632   : > { %4281 = vst.msk [vmem:[#allocation3 + $0x198] sm:$0xff] %vm1333_vm2, %v8526_v2  ;;  %2098 = vadd.xlane.f32.xlu2 %v5898_v36  ;;  %2254 = vmatmul.f32.gmra.mxu1 %v5898_v36  ;;  %v8531_v8 = vpop.eup %5899 }
 0x633   : > { %v2065_v49 = vmul.f32 %v8531_v8, %v2049_v6  ;;  %v9892_v6 = vld [vmem:[#allocation81_spill] sm:$0xff] }
 0x636   : > { %2397 = vrot.lane.b32.xlu0 %v2222_v29, %s6500_s28  ;;  %v5902_v29 = vpop.eup %5901 }
 0x637   : > { %v2089_v21 = vpop.xlane.xlu0 %2088  ;;  %v8563_v36 = vpop.eup %5903 }
 0x638   : > { %v2113_v34 = vadd.f32 %v2089_v21, %v2065_v49  ;;  %v1279_v49 = vmul.f32 %v9892_v6, %v1263_v58  ;;  %v8580_v6 = vpop.f32.mrf.mxu3 }
 0x639   : > { %3643 = vmax.xlane.f32.xlu1 %v8394_v45 }
 0x63a   : > { %2129 = vst.msk [vmem:[#allocation4 + $0xb8] sm:$0xff] %vm1333_vm2, %v2113_v34  ;;  %2257 = vmatmul.f32.gmra.mxu1 %v5896_v57  ;;  %v9888_v57 = vld [vmem:[#allocation69_spill] sm:$0xff] }
 0x63b   : > { %v1865_v28 = vsub.f32 %v9888_v57, %v7980_v15 }
 0x63d   : > { %v1881_v51 = vmul.f32 1.442695, %v1865_v28  ;;  %v9893_v28 = vld [vmem:[#allocation76_spill] sm:$0xff] }
 0x63e   : > { %2403 = vrot.lane.b32.xlu0 %v2231_v3, %s6500_s28  ;;  %v1868_v19 = vsub.f32 %v9893_v28, %v8054_v59 }
 0x63f   : > { %v3648_v26 = vpop.xlane.xlu0 %3647  ;;  %5905 = vpow2.f32 %v1881_v51 }
 0x640   : > { %v8545_v20 = vmax.f32 %v8541_v52, %v3648_v26  ;;  %v2068_v26 = vmul.f32 %v8563_v36, %v2052_v23  ;;  %v2053_v52 = vld [vmem:[#allocation4 + $0xd8] sm:$0xff] }
 0x641   : > { %2084 = vadd.xlane.f32.xlu1 %v8364_v16  ;;  %v9891_v16 = vld [vmem:[#allocation86_spill] sm:$0xff] }
 0x642   : > { %9887 = vst [vmem:[#allocation52_spill] sm:$0xff] %v8545_v20  ;;  %2260 = vmatmul.f32.gmra.mxu1 %v5902_v29  ;;  %v1280_v22 = vmul.f32 %v9891_v16, %v1264_v12  ;;  %v1887_v16 = vmul.f32 1.442695, %v1868_v19 }
 0x643   : > { %4284 = vst.msk [vmem:[#allocation3 + $0x1b0] sm:$0xff] %vm1333_vm2, %v8545_v20 }
 0x644   : > { %5907 = vpow2.f32 %v1887_v16  ;;  %v8602_v16 = vld [vmem:[#allocation3 + $0x190] sm:$0xff] }
 0x645   : > { %v8568_v3 = vpop.eup %5905  ;;  %9898 = vst [vmem:[#allocation83_spill] sm:$0xff] %v8602_v16 }
 0x646   : > { %v2058_v51 = vmul.f32 %v8568_v3, %v2042_v17  ;;  %v8593_v17 = vpop.f32.mrf.mxu3 }
 0x647   : > { %v3654_v5 = vpop.xlane.xlu0 %3653 }
 0x648   : > { %v8557_v56 = vmax.f32 %v8554_v32, %v3654_v5 }
 0x649   : > { %3649 = vmax.xlane.f32.xlu1 %v8426_v31 }
 0x64a   : > { %9890 = vst [vmem:[#allocation64_spill] sm:$0xff] %v8557_v56 }
 0x64b   : > { %4287 = vst.msk [vmem:[#allocation3 + $0x1c8] sm:$0xff] %vm1333_vm2, %v8557_v56 }
 0x64f   : > { %v1308_v15 = vpop.xlane.xlu2 %1307 }
 0x650   : > { %v1328_v10 = vadd.f32 %v1308_v15, %v1280_v22  ;;  %v8578_v22 = vld [vmem:[#allocation3 + $0x1e0] sm:$0xff]  ;;  %v1267_v15 = vld [vmem:[#allocation4 + $0x70] sm:$0xff] }
 0x651   : > { %v1306_v21 = vpop.xlane.xlu1 %1305  ;;  %3655 = vmax.xlane.f32.xlu1 %v8451_v43  ;;  %9894 = vst [vmem:[#allocation65_spill] sm:$0xff] %v8578_v22 }
 0x652   : > { %1345 = vst.msk [vmem:[#allocation4 + $0x58] sm:$0xff] %vm1333_vm2, %v1328_v10  ;;  %v1327_v34 = vadd.f32 %v1306_v21, %v1279_v49  ;;  %v1283_v49 = vmul.f32 %v8203_v46, %v1267_v15 }
 0x654   : > { %1344 = vst.msk [vmem:[#allocation4 + $0x50] sm:$0xff] %vm1333_vm2, %v1327_v34  ;;  %v2095_v57 = vpop.xlane.xlu0 %2094  ;;  %v2045_v34 = vld [vmem:[#allocation4 + $0x98] sm:$0xff] }
 0x655   : > { %v2116_v5 = vadd.f32 %v2095_v57, %v2068_v26 }
 0x657   : > { %2132 = vst.msk [vmem:[#allocation4 + $0xd0] sm:$0xff] %vm1333_vm2, %v2116_v5  ;;  %v2075_v12 = vpop.xlane.xlu2 %2074 }
 0x658   : > { %v2106_v58 = vadd.f32 %v2075_v12, %v2058_v51  ;;  %v9897_v12 = vld [vmem:[#allocation88_spill] sm:$0xff] }
 0x659   : > { %2090 = vadd.xlane.f32.xlu1 %v8430_v27  ;;  %v8590_v27 = vpop.eup %5907 }
 0x65a   : > { %2122 = vst.msk [vmem:[#allocation4 + $0x80] sm:$0xff] %vm1333_vm2, %v2106_v58  ;;  %v2061_v26 = vmul.f32 %v8590_v27, %v2045_v34  ;;  %v1873_v58 = vsub.f32 %v9897_v12, %v8139_v30  ;;  %v1874_v12 = vsub.f32 %v8187_v47, %v8196_v60 }
 0x65c   : > { %v3660_v10 = vpop.xlane.xlu0 %3659 }
 0x65d   : > { %v8583_v59 = vmax.f32 %v8578_v22, %v3660_v10 }
 0x65f   : > { %9895 = vst [vmem:[#allocation57_spill] sm:$0xff] %v8583_v59  ;;  %v1314_v23 = vpop.xlane.xlu2 %1313 }
 0x660   : > { %4290 = vst.msk [vmem:[#allocation3 + $0x1e0] sm:$0xff] %vm1333_vm2, %v8583_v59  ;;  %v1331_v21 = vadd.f32 %v1314_v23, %v1283_v49  ;;  %v2234_v23 = vpop.f32.mrf.mxu1 }
 0x661   : > { %2096 = vadd.xlane.f32.xlu1 %v8479_v41  ;;  %v9896_v41 = vld [vmem:[#allocation85_spill] sm:$0xff] }
 0x662   : > { %1348 = vst.msk [vmem:[#allocation4 + $0x70] sm:$0xff] %vm1333_vm2, %v1331_v21  ;;  %v1871_v5 = vsub.f32 %v9896_v41, %v8119_v63  ;;  %v8609_v63 = vld [vmem:[#allocation3 + $0x1a8] sm:$0xff] }
 0x663   : > { %9899 = vst [vmem:[#allocation66_spill] sm:$0xff] %v8609_v63 }
 0x664   : > { %v1893_v10 = vmul.f32 1.442695, %v1871_v5  ;;  %v1878_v5 = vsub.f32 %v8235_v62, %v8240_v9  ;;  %v8642_v62 = vld [vmem:[#allocation3 + $0x1d8] sm:$0xff]  ;;  %v1266_v9 = vld [vmem:[#allocation4 + $0x68] sm:$0xff] }
 0x665   : > { %9901 = vst [vmem:[#allocation72_spill] sm:$0xff] %v8642_v62 }
 0x667   : > { %v2081_v57 = vpop.xlane.xlu2 %2080 }
 0x668   : > { %v2109_v28 = vadd.f32 %v2081_v57, %v2061_v26  ;;  %2736 = vmax.xlane.f32.xlu0 %v8593_v17  ;;  %v8614_v34 = vpop.f32.mrf.mxu1 }
 0x669   : > { %v1991_v46 = vpop.permute.xlu1 %1990  ;;  %2102 = vadd.xlane.f32.xlu1 %v5902_v29  ;;  %v1897_v29 = vmul.f32 1.442695, %v1873_v58  ;;  %v8632_v58 = vld [vmem:[#allocation3 + $0x1c0] sm:$0xff] }
 0x66a   : > { %2125 = vst.msk [vmem:[#allocation4 + $0x98] sm:$0xff] %vm1333_vm2, %v2109_v28  ;;  %v2008_v19 = vsub.f32 %v8219_v44, %v1991_v46  ;;  %v2048_v28 = vld [vmem:[#allocation4 + $0xb0] sm:$0xff] }
 0x66b   : > { %9900 = vst [vmem:[#allocation39_spill] sm:$0xff] %v8632_v58 }
 0x66c   : > { %v2039_v51 = vmul.f32 1.442695, %v2008_v19 }
 0x66e   : > { %5909 = vpow2.f32 %v2039_v51 }
 0x66f   : > { %v3640_v15 = vpop.xlane.xlu2 %3639  ;;  %5911 = vpow2.f32 %v1893_v10 }
 0x670   : > { %v8605_v49 = vmax.f32 %v8602_v16, %v3640_v15  ;;  %5913 = vpow2.f32 %v1897_v29  ;;  %v2240_v51 = vpop.f32.mrf.mxu1  ;;  %v1907_v15 = vmul.f32 1.442695, %v1878_v5 }
 0x672   : > { %4280 = vst.msk [vmem:[#allocation3 + $0x190] sm:$0xff] %vm1333_vm2, %v8605_v49  ;;  %5915 = vpow2.f32 %v1907_v15 }
 0x674   : > { %v5910_v44 = vpop.eup %5909 }
 0x675   : > { %2104 = vadd.xlane.f32.xlu2 %v5910_v44  ;;  %2263 = vmatmul.f32.gmra.mxu1 %v5910_v44  ;;  %v8616_v26 = vpop.eup %5911  ;;  %v1899_v44 = vmul.f32 1.442695, %v1874_v12 }
 0x676   : > { %v8620_v57 = vpop.eup %5913  ;;  %v2064_v46 = vmul.f32 %v8616_v26, %v2048_v28 }
 0x677   : > { %v3646_v30 = vpop.xlane.xlu2 %3645  ;;  %5917 = vpow2.f32 %v1899_v44 }
 0x678   : > { %v8612_v21 = vmax.f32 %v8609_v63, %v3646_v30  ;;  %v2055_v30 = vld [vmem:[#allocation4 + $0xe8] sm:$0xff]  ;;  %v2243_v22 = vpop.f32.mrf.mxu1 }
 0x679   : > { %v8845_v63 = vld [vmem:[#allocation3 + $0x1e8] sm:$0xff] }
 0x67a   : > { %4283 = vst.msk [vmem:[#allocation3 + $0x1a8] sm:$0xff] %vm1333_vm2, %v8612_v21 }
 0x67b   : > { %9920 = vst [vmem:[#allocation87_spill] sm:$0xff] %v8845_v63 }
 0x67c   : > { %2325 = vperm.xlu0 %5758, %v8620_v57  }
 0x67f   : > { %v2087_v19 = vpop.xlane.xlu2 %2086 }
 0x680   : > { %v2112_v41 = vadd.f32 %v2087_v19, %v2064_v46  ;;  %v9903_v46 = vld [vmem:[#allocation89_spill] sm:$0xff] }
 0x681   : > { %v2051_v19 = vld [vmem:[#allocation4 + $0xc8] sm:$0xff] }
 0x682   : > { %2128 = vst.msk [vmem:[#allocation4 + $0xb0] sm:$0xff] %vm1333_vm2, %v2112_v41  ;;  %2399 = vrot.lane.b32.xlu1 %v8518_v25, %s6500_s28  ;;  %v8647_v25 = vpop.eup %5915 }
 0x683   : > { %v8651_v28 = vpop.eup %5917  ;;  %v2071_v5 = vmul.f32 %v8647_v25, %v2055_v30  ;;  %v9904_v30 = vld [vmem:[#allocation90_spill] sm:$0xff] }
 0x684   : > { %2409 = vrot.lane.b32.xlu0 %v2240_v51, %s6500_s28 }
 0x687   : > { %v3652_v10 = vpop.xlane.xlu2 %3651 }
 0x688   : > { %v8635_v29 = vmax.f32 %v8632_v58, %v3652_v10  ;;  %v2067_v10 = vmul.f32 %v8651_v28, %v2051_v19 }
 0x68a   : > { %4286 = vst.msk [vmem:[#allocation3 + $0x1c0] sm:$0xff] %vm1333_vm2, %v8635_v29  ;;  %2405 = vrot.lane.b32.xlu1 %v2234_v23, %s6500_s28  ;;  %v1877_v23 = vsub.f32 %v8255_v39, %v8260_v11  ;;  %v2044_v11 = vld [vmem:[#allocation4 + $0x90] sm:$0xff] }
 0x68c   : > { %v1905_v44 = vmul.f32 1.442695, %v1877_v23  ;;  %v2054_v23 = vld [vmem:[#allocation4 + $0xe0] sm:$0xff] }
 0x68d   : > { %2395 = vrot.lane.b32.xlu2 %v8501_v53, %s6500_s28  ;;  %v1282_v53 = vmul.f32 %v9903_v46, %v1266_v9  ;;  %v8662_v9 = vpop.f32.mrf.mxu3  ;;  %v2060_v46 = vmul.f32 %v9904_v30, %v2044_v11 }
 0x68e   : > { %5919 = vpow2.f32 %v1905_v44 }
 0x68f   : > { %v3658_v47 = vpop.xlane.xlu2 %3657 }
 0x690   : > { %v8645_v60 = vmax.f32 %v8642_v62, %v3658_v47 }
 0x692   : > { %9902 = vst [vmem:[#allocation67_spill] sm:$0xff] %v8645_v60 }
 0x693   : > { %4289 = vst.msk [vmem:[#allocation3 + $0x1d8] sm:$0xff] %vm1333_vm2, %v8645_v60 }
 0x694   : > { %v1312_v41 = vpop.xlane.xlu1 %1311  ;;  %v8667_v19 = vpop.eup %5919 }
 0x695   : > { %v1330_v51 = vadd.f32 %v1312_v41, %v1282_v53  ;;  %2401 = vrot.lane.b32.xlu2 %v8535_v54, %s6500_s28  ;;  %v2101_v12 = vpop.xlane.xlu0 %2100  ;;  %v8669_v41 = vld [vmem:[#allocation3 + $0x188] sm:$0xff] }
 0x696   : > { %v2119_v15 = vadd.f32 %v2101_v12, %v2071_v5  ;;  %9905 = vst [vmem:[#allocation80_spill] sm:$0xff] %v8669_v41  ;;  %v8671_v5 = vpop.f32.mrf.mxu3  ;;  %v2070_v12 = vmul.f32 %v8667_v19, %v2054_v23  ;;  %v9908_v23 = vld [vmem:[#allocation92_spill] sm:$0xff] }
 0x697   : > { %1347 = vst.msk [vmem:[#allocation4 + $0x68] sm:$0xff] %vm1333_vm2, %v1330_v51  ;;  %v2093_v47 = vpop.xlane.xlu2 %2092 }
 0x698   : > { %2135 = vst.msk [vmem:[#allocation4 + $0xe8] sm:$0xff] %vm1333_vm2, %v2119_v15  ;;  %v2115_v39 = vadd.f32 %v2093_v47, %v2067_v10  ;;  %v8680_v47 = vld [vmem:[#allocation3 + $0x1a0] sm:$0xff] }
 0x699   : > { %9906 = vst [vmem:[#allocation61_spill] sm:$0xff] %v8680_v47 }
 0x69a   : > { %2131 = vst.msk [vmem:[#allocation4 + $0xc8] sm:$0xff] %vm1333_vm2, %v2115_v39 }
 0x69c   : > { %v2079_v54 = vpop.xlane.xlu1 %2078 }
 0x69d   : > { %v2108_v53 = vadd.f32 %v2079_v54, %v2060_v46  ;;  %v2047_v46 = vld [vmem:[#allocation4 + $0xa8] sm:$0xff]  ;;  %v9907_v54 = vld [vmem:[#allocation91_spill] sm:$0xff] }
 0x69e   : > { %v8682_v11 = vpop.f32.mrf.mxu3 }
 0x69f   : > { %2124 = vst.msk [vmem:[#allocation4 + $0x90] sm:$0xff] %vm1333_vm2, %v2108_v53  ;;  %v1876_v53 = vsub.f32 %v9907_v54, %v8210_v50  ;;  %v8701_v50 = vpop.f32.mrf.mxu1  ;;  %v8705_v54 = vld [vmem:[#allocation3 + $0x1d0] sm:$0xff] }
 0x6a0   : > { %9911 = vst [vmem:[#allocation82_spill] sm:$0xff] %v8705_v54 }
 0x6a4   : > { %v3638_v51 = vpop.xlane.xlu1 %3637 }
 0x6a5   : > { %v8675_v15 = vmax.f32 %v8669_v41, %v3638_v51  ;;  %v2099_v10 = vpop.xlane.xlu2 %2098  ;;  %v2063_v51 = vmul.f32 %v9908_v23, %v2047_v46  ;;  %v8798_v41 = vpop.f32.mrf.mxu0 }
 0x6a6   : > { %v2118_v44 = vadd.f32 %v2099_v10, %v2070_v12  ;;  %9918 = vst [vmem:[#allocation73_spill] sm:$0xff] %v8798_v41 }
 0x6a7   : > { %4279 = vst.msk [vmem:[#allocation3 + $0x188] sm:$0xff] %vm1333_vm2, %v8675_v15 }
 0x6a8   : > { %2134 = vst.msk [vmem:[#allocation4 + $0xe0] sm:$0xff] %vm1333_vm2, %v2118_v44  ;;  %v1903_v44 = vmul.f32 1.442695, %v1876_v53 }
 0x6aa   : > { %5921 = vpow2.f32 %v1903_v44 }
 0x6ac   : > { %v3644_v39 = vpop.xlane.xlu1 %3643 }
 0x6ad   : > { %v8685_v30 = vmax.f32 %v8680_v47, %v3644_v39  ;;  %v8695_v39 = vld [vmem:[#allocation3 + $0x1b8] sm:$0xff] }
 0x6ae   : > { %2742 = vmax.xlane.f32.xlu0 %v8682_v11  ;;  %9909 = vst [vmem:[#allocation68_spill] sm:$0xff] %v8695_v39 }
 0x6af   : > { %4282 = vst.msk [vmem:[#allocation3 + $0x1a0] sm:$0xff] %vm1333_vm2, %v8685_v30 }
 0x6b0   : > { %v5922_v46 = vpop.eup %5921 }
 0x6b4   : > { %v2085_v12 = vpop.xlane.xlu1 %2084  ;;  %2738 = vmax.xlane.f32.xlu1 %v8662_v9 }
 0x6b5   : > { %v2111_v10 = vadd.f32 %v2085_v12, %v2063_v51  ;;  %v2249_v51 = vpop.f32.mrf.mxu1  ;;  %v8712_v12 = vpop.permute.xlu0 %2397 }
 0x6b7   : > { %2127 = vst.msk [vmem:[#allocation4 + $0xa8] sm:$0xff] %vm1333_vm2, %v2111_v10  ;;  %v9913_v10 = vld [vmem:[#allocation93_spill] sm:$0xff] }
 0x6b8   : > { %v1879_v44 = vsub.f32 %v9913_v10, %v8274_v38  ;;  %v9914_v38 = vld [vmem:[#allocation94_spill] sm:$0xff] }
 0x6b9   : > { %v1880_v10 = vsub.f32 %v9914_v38, %v8315_v18  ;;  %v8734_v18 = vpop.f32.mrf.mxu3  ;;  %v2269_v38 = vld [vmem:[#allocation5 + $0x10] sm:$0xff] }
 0x6bc   : > { %v3650_v43 = vpop.xlane.xlu1 %3649 }
 0x6bd   : > { %v8698_v32 = vmax.f32 %v8695_v39, %v3650_v43  ;;  %v2050_v43 = vld [vmem:[#allocation4 + $0xc0] sm:$0xff] }
 0x6be   : > { %2734 = vmax.xlane.f32.xlu2 %v8580_v6  ;;  %v2066_v24 = vmul.f32 %v8620_v57, %v2050_v43  ;;  %v1911_v57 = vmul.f32 1.442695, %v1880_v10  ;;  %v9915_v10 = vld [vmem:[#allocation95_spill] sm:$0xff] }
 0x6bf   : > { %9910 = vst [vmem:[#allocation78_spill] sm:$0xff] %v8698_v32 }
 0x6c0   : > { %4285 = vst.msk [vmem:[#allocation3 + $0x1b8] sm:$0xff] %vm1333_vm2, %v8698_v32  ;;  %v2275_v32 = vld [vmem:[#allocation5 + $0x40] sm:$0xff] }
 0x6c2   : > { %2340 = vperm.xlu0 %5758, %v5922_v46  }
 0x6c4   : > { %v3656_v53 = vpop.xlane.xlu1 %3655 }
 0x6c5   : > { %v8708_v23 = vmax.f32 %v8705_v54, %v3656_v53  ;;  %v1909_v53 = vmul.f32 1.442695, %v1879_v44  ;;  %v8720_v54 = vpop.permute.xlu0 %2403  ;;  %v8740_v44 = vpop.f32.mrf.mxu3 }
 0x6c7   : > { %9912 = vst [vmem:[#allocation70_spill] sm:$0xff] %v8708_v23  ;;  %5923 = vpow2.f32 %v1909_v53 }
 0x6c8   : > { %4288 = vst.msk [vmem:[#allocation3 + $0x1d0] sm:$0xff] %vm1333_vm2, %v8708_v23  ;;  %v2069_v23 = vmul.f32 %v5922_v46, %v2053_v52  ;;  %5925 = vpow2.f32 %v1911_v57 }
 0x6ca   : > { %2415 = vrot.lane.b32.xlu0 %v2249_v51, %s6500_s28 }
 0x6cc   : > { %v2091_v31 = vpop.xlane.xlu1 %2090 }
 0x6cd   : > { %v2114_v62 = vadd.f32 %v2091_v31, %v2066_v24  ;;  %2411 = vrot.lane.b32.xlu1 %v2243_v22, %s6500_s28  ;;  %v5924_v31 = vpop.eup %5923  ;;  %v2056_v24 = vld [vmem:[#allocation4 + $0xf0] sm:$0xff]  ;;  %v8727_v22 = vld [vmem:[#allocation3 + $0x108] sm:$0xff]  ;;  %v8744_v57 = vpop.f32.mrf.mxu3 }
 0x6ce   : > { %v2072_v43 = vmul.f32 %v5924_v31, %v2056_v24  ;;  %v2365_v24 = vmul.f32 %v9915_v10, %v2269_v38 }
 0x6cf   : > { %2130 = vst.msk [vmem:[#allocation4 + $0xc0] sm:$0xff] %vm1333_vm2, %v2114_v62 }
 0x6d4   : > { %v2097_v39 = vpop.xlane.xlu1 %2096 }
 0x6d5   : > { %v2117_v58 = vadd.f32 %v2097_v39, %v2069_v23 }
 0x6d6   : > { %2407 = vrot.lane.b32.xlu2 %v8614_v34, %s6500_s28  ;;  %v8737_v34 = vpop.eup %5925 }
 0x6d7   : > { %2133 = vst.msk [vmem:[#allocation4 + $0xd8] sm:$0xff] %vm1333_vm2, %v2117_v58  ;;  %v2057_v58 = vld [vmem:[#allocation4 + $0xf8] sm:$0xff] }
 0x6d8   : > { %v2073_v46 = vmul.f32 %v8737_v34, %v2057_v58 }
 0x6db   : > { %v2737_v62 = vpop.xlane.xlu0 %2736 }
 0x6dc   : > { %v8730_v51 = vmax.f32 %v8727_v22, %v2737_v62  ;;  %v2103_v52 = vpop.xlane.xlu1 %2102 }
 0x6dd   : > { %v2120_v39 = vadd.f32 %v2103_v52, %v2072_v43  ;;  %v2272_v52 = vld [vmem:[#allocation5 + $0x28] sm:$0xff] }
 0x6de   : > { %3378 = vst.msk [vmem:[#allocation3 + $0x108] sm:$0xff] %vm1333_vm2, %v8730_v51 }
 0x6df   : > { %2136 = vst.msk [vmem:[#allocation4 + $0xf0] sm:$0xff] %vm1333_vm2, %v2120_v39  ;;  %v9916_v39 = vld [vmem:[#allocation44_spill] sm:$0xff] }
 0x6e0   : > { %v2368_v58 = vmul.f32 %v9916_v39, %v2272_v52  ;;  %v2722_v39 = vld [vmem:[#allocation3 + $0x120] sm:$0xff] }
 0x6e8   : > { %v2105_v23 = vpop.xlane.xlu2 %2104 }
 0x6e9   : > { %v2121_v53 = vadd.f32 %v2105_v23, %v2073_v46  ;;  %v2252_v23 = vpop.f32.mrf.mxu1 }
 0x6eb   : > { %2137 = vst.msk [vmem:[#allocation4 + $0xf8] sm:$0xff] %vm1333_vm2, %v2121_v53 }
 0x6f0   : > { %v8765_v52 = vpop.permute.xlu2 %2395 }
 0x6f1   : > { %v8755_v38 = vpop.f32.mrf.mxu1 }
 0x6f4   : > { %2748 = vmax.xlane.f32.xlu0 %v8744_v57  ;;  %v2400_v62 = vpop.permute.xlu1 %2399 }
 0x6f5   : > { %v2445_v43 = vadd.f32 %v2400_v62, %v2365_v24  ;;  %v2326_v24 = vpop.permute.xlu0 %2325  ;;  %v8758_v62 = vpop.f32.mrf.mxu3 }
 0x6f7   : > { %2462 = vst.msk [vmem:[#allocation5 + $0x10] sm:$0xff] %vm2459_vm3, %v2445_v43  ;;  %2744 = vmax.xlane.f32.xlu1 %v8734_v18 }
 0x6f9   : > { %v2258_v10 = vpop.f32.mrf.mxu1 }
 0x6fc   : > { %v2406_v46 = vpop.permute.xlu1 %2405 }
 0x6fd   : > { %v2448_v53 = vadd.f32 %v2406_v46, %v2368_v58  ;;  %v8763_v43 = vpop.permute.xlu0 %2409  ;;  %v8768_v58 = vpop.f32.mrf.mxu3 }
 0x6ff   : > { %2465 = vst.msk [vmem:[#allocation5 + $0x28] sm:$0xff] %vm2459_vm3, %v2448_v53  ;;  %2740 = vmax.xlane.f32.xlu2 %v8671_v5  ;;  %3661 = vmax.xlane.f32.xlu1 %v8750_v14  ;;  %v8774_v53 = vld [vmem:[#allocation3 + $0x110] sm:$0xff] }
 0x708   : > { %2355 = vperm.xlu0 %5758, %v5924_v31  }
 0x710   : > { %2421 = vrot.lane.b32.xlu0 %v2258_v10, %s6500_s28  ;;  %v8780_v10 = vpop.permute.xlu2 %2401 }
 0x717   : > { %2413 = vrot.lane.b32.xlu2 %v8701_v50, %s6500_s28 }
 0x718   : > { %2285 = vperm.xlu1 %5756, %v8568_v3  }
 0x720   : > { %2300 = vperm.xlu1 %5756, %v8590_v27   ;;  %v8784_v27 = vpop.f32.mrf.mxu3 }
 0x721   : > { %v2743_v31 = vpop.xlane.xlu0 %2742 }
 0x722   : > { %v8770_v46 = vmax.f32 %v2722_v39, %v2743_v31  ;;  %v8786_v31 = vld [vmem:[#allocation3 + $0x100] sm:$0xff] }
 0x724   : > { %3381 = vst.msk [vmem:[#allocation3 + $0x120] sm:$0xff] %vm1333_vm2, %v8770_v46 }
 0x727   : > { %v2739_v50 = vpop.xlane.xlu1 %2738 }
 0x728   : > { %v8777_v3 = vmax.f32 %v8774_v53, %v2739_v50  ;;  %2315 = vperm.xlu1 %5756, %v8616_v26   ;;  %v8796_v26 = vpop.f32.mrf.mxu3  ;;  %v8806_v50 = vpop.f32.mrf.mxu0 }
 0x729   : > { %9919 = vst [vmem:[#allocation79_spill] sm:$0xff] %v8806_v50 }
 0x72a   : > { %3379 = vst.msk [vmem:[#allocation3 + $0x110] sm:$0xff] %vm1333_vm2, %v8777_v3  ;;  %v2784_v45 = vsub.f32 %v8774_v53, %v8777_v3 }
 0x730   : > { %2330 = vperm.xlu1 %5756, %v8651_v28   ;;  %v2371_v28 = vmul.f32 %v2326_v24, %v2275_v32  ;;  %v8802_v7 = vpop.f32.mrf.mxu3  ;;  %v2783_v24 = vsub.f32 %v8727_v22, %v8730_v51  ;;  %v8831_v22 = vld [vmem:[#allocation3 + $0x128] sm:$0xff] }
 0x731   : > { %v2735_v14 = vpop.xlane.xlu2 %2734 }
 0x732   : > { %v8790_v47 = vmax.f32 %v8786_v31, %v2735_v14 }
 0x734   : > { %3377 = vst.msk [vmem:[#allocation3 + $0x100] sm:$0xff] %vm1333_vm2, %v8790_v47  ;;  %v8814_v32 = vpop.permute.xlu0 %2340 }
 0x738   : > { %2345 = vperm.xlu1 %5756, %v8667_v19   ;;  %v8811_v19 = vpop.f32.mrf.mxu3 }
 0x73a   : > { %2754 = vmax.xlane.f32.xlu0 %v8784_v27 }
 0x73f   : > { %v2412_v14 = vpop.permute.xlu1 %2411 }
 0x740   : > { %v2451_v48 = vadd.f32 %v2412_v14, %v2371_v28  ;;  %2746 = vmax.xlane.f32.xlu2 %v8740_v44  ;;  %2417 = vrot.lane.b32.xlu1 %v2252_v23, %s6500_s28  ;;  %v2800_v28 = vmul.f32 1.442695, %v2783_v24  ;;  %v8819_v23 = vpop.permute.xlu0 %2415  ;;  %v8824_v14 = vld [vmem:[#allocation3 + $0x138] sm:$0xff]  ;;  %v2408_v24 = vpop.permute.xlu2 %2407 }
 0x742   : > { %2468 = vst.msk [vmem:[#allocation5 + $0x40] sm:$0xff] %vm2459_vm3, %v2451_v48  ;;  %3665 = vmax.xlane.f32.xlu0 %v8806_v50  ;;  %5927 = vpow2.f32 %v2800_v28 }
 0x748   : > { %3663 = vmax.xlane.f32.xlu2 %v8798_v41  ;;  %v8822_v48 = vpop.eup %5927 }
 0x74a   : > { %2760 = vmax.xlane.f32.xlu0 %v8811_v19 }
 0x75e   : > { %2832 = vperm.xlu0 %5758, %v8790_v47  }
 0x760   : > { %2290 = vperm.xlu2 %5757, %v8487_v40  }
 0x766   : > { %3191 = vperm.xlu0 %5758, %v8822_v48  }
 0x767   : > { %v2749_v50 = vpop.xlane.xlu0 %2748 }
 0x768   : > { %v8828_v41 = vmax.f32 %v8824_v14, %v2749_v50  ;;  %2305 = vperm.xlu2 %5757, %v8504_v55   ;;  %v2786_v50 = vsub.f32 %v2722_v39, %v8770_v46  ;;  %v8843_v55 = vld [vmem:[#allocation3 + $0x118] sm:$0xff] }
 0x76a   : > { %3384 = vst.msk [vmem:[#allocation3 + $0x138] sm:$0xff] %vm1333_vm2, %v8828_v41  ;;  %2750 = vmax.xlane.f32.xlu1 %v8758_v62  ;;  %v2745_v40 = vpop.xlane.xlu1 %2744  ;;  %v2806_v37 = vmul.f32 1.442695, %v2786_v50 }
 0x76b   : > { %v8837_v28 = vmax.f32 %v8831_v22, %v2745_v40 }
 0x76c   : > { %5929 = vpow2.f32 %v2806_v37 }
 0x76d   : > { %3382 = vst.msk [vmem:[#allocation3 + $0x128] sm:$0xff] %vm1333_vm2, %v8837_v28 }
 0x770   : > { %2320 = vperm.xlu2 %5757, %v8531_v8  }
 0x772   : > { %v2741_v16 = vpop.xlane.xlu2 %2740  ;;  %v3662_v59 = vpop.xlane.xlu1 %3661 }
 0x773   : > { %v8848_v56 = vmax.f32 %v8843_v55, %v2741_v16  ;;  %v8851_v40 = vmax.f32 %v8845_v63, %v3662_v59  ;;  %v8861_v8 = vpop.eup %5929  ;;  %v2261_v59 = vpop.f32.mrf.mxu1  ;;  %v2267_v16 = vld [vmem:[#allocation5] sm:$0xff] }
 0x775   : > { %9921 = vst [vmem:[#allocation84_spill] sm:$0xff] %v8851_v40  ;;  %2847 = vperm.xlu0 %5758, %v8848_v56  }
 0x776   : > { %3380 = vst.msk [vmem:[#allocation3 + $0x118] sm:$0xff] %vm1333_vm2, %v8848_v56 }
 0x777   : > { %4291 = vst.msk [vmem:[#allocation3 + $0x1e8] sm:$0xff] %vm1333_vm2, %v8851_v40 }
 0x778   : > { %2335 = vperm.xlu2 %5757, %v8563_v36   ;;  %v2270_v36 = vld [vmem:[#allocation5 + $0x18] sm:$0xff] }
 0x77d   : > { %3206 = vperm.xlu0 %5758, %v8861_v8  }
 0x780   : > { %2350 = vperm.xlu2 %5757, %v8647_v25  }
 0x783   : > { %2360 = vperm.xlu1 %5756, %v8737_v34   ;;  %v2273_v34 = vld [vmem:[#allocation5 + $0x30] sm:$0xff] }
 0x788   : > { %2419 = vrot.lane.b32.xlu2 %v8755_v38, %s6500_s28  ;;  %v8873_v38 = vpop.permute.xlu0 %2355 }
 0x78a   : > { %v2286_v39 = vpop.permute.xlu1 %2285 }
 0x78b   : > { %v2363_v37 = vmul.f32 %v2286_v39, %v2267_v16  ;;  %2423 = vrot.lane.b32.xlu1 %v2261_v59, %s6500_s28  ;;  %v2276_v59 = vld [vmem:[#allocation5 + $0x48] sm:$0xff]  ;;  %v2414_v39 = vpop.permute.xlu2 %2413 }
 0x78d   : > { %v2443_v50 = vadd.f32 %v8765_v52, %v2363_v37 }
 0x78f   : > { %2460 = vst.msk [vmem:[#allocation5] sm:$0xff] %vm2459_vm3, %v2443_v50 }
 0x790   : > { %v8876_v37 = vpop.permute.xlu0 %2421 }
 0x792   : > { %v2301_v20 = vpop.permute.xlu1 %2300 }
 0x793   : > { %v2366_v63 = vmul.f32 %v2301_v20, %v2270_v36 }
 0x795   : > { %v2446_v25 = vadd.f32 %v8780_v10, %v2366_v63  ;;  %v8881_v63 = vld [vmem:[#allocation3 + $0x150] sm:$0xff] }
 0x797   : > { %2463 = vst.msk [vmem:[#allocation5 + $0x18] sm:$0xff] %vm2459_vm3, %v2446_v25 }
 0x79a   : > { %v2316_v40 = vpop.permute.xlu1 %2315 }
 0x79b   : > { %v2369_v0 = vmul.f32 %v2316_v40, %v2273_v34  ;;  %v8892_v40 = vld [vmem:[#allocation3 + $0x130] sm:$0xff] }
 0x79d   : > { %v2449_v13 = vadd.f32 %v2408_v24, %v2369_v0  ;;  %v2278_v0 = vld [vmem:[#allocation5 + $0x58] sm:$0xff] }
 0x79e   : > { %v2374_v24 = vmul.f32 %v8814_v32, %v2278_v0  ;;  %v8913_v0 = vld [vmem:[#allocation3 + $0x168] sm:$0xff] }
 0x79f   : > { %2466 = vst.msk [vmem:[#allocation5 + $0x30] sm:$0xff] %vm2459_vm3, %v2449_v13  ;;  %v2789_v13 = vsub.f32 %v8824_v14, %v8828_v41 }
 0x7a1   : > { %v2812_v34 = vmul.f32 1.442695, %v2789_v13 }
 0x7a2   : > { %v2331_v16 = vpop.permute.xlu1 %2330 }
 0x7a3   : > { %v2372_v52 = vmul.f32 %v2331_v16, %v2276_v59  ;;  %5931 = vpow2.f32 %v2812_v34 }
 0x7a5   : > { %v2452_v50 = vadd.f32 %v2414_v39, %v2372_v52  ;;  %v8894_v52 = vld [vmem:[#allocation3 + $0x1f8] sm:$0xff] }
 0x7a6   : > { %9922 = vst [vmem:[#allocation69_spill] sm:$0xff] %v8894_v52 }
 0x7a7   : > { %2469 = vst.msk [vmem:[#allocation5 + $0x48] sm:$0xff] %vm2459_vm3, %v2452_v50 }
 0x7aa   : > { %v8879_v20 = vpop.permute.xlu1 %2345 }
 0x7ad   : > { %v2755_v10 = vpop.xlane.xlu0 %2754 }
 0x7ae   : > { %v8884_v36 = vmax.f32 %v8881_v63, %v2755_v10  ;;  %v8911_v10 = vld [vmem:[#allocation3 + $0x1f0] sm:$0xff] }
 0x7af   : > { %9924 = vst [vmem:[#allocation81_spill] sm:$0xff] %v8911_v10 }
 0x7b0   : > { %3387 = vst.msk [vmem:[#allocation3 + $0x150] sm:$0xff] %vm1333_vm2, %v8884_v36 }
 0x7b1   : > { %2752 = vmax.xlane.f32.xlu2 %v8768_v58 }
 0x7b2   : > { %v2418_v25 = vpop.permute.xlu1 %2417 }
 0x7b3   : > { %v2454_v59 = vadd.f32 %v2418_v25, %v2374_v24  ;;  %v2747_v16 = vpop.xlane.xlu2 %2746  ;;  %v8915_v24 = vpop.f32.mrf.mxu3 }
 0x7b4   : > { %v8897_v39 = vmax.f32 %v8892_v40, %v2747_v16 }
 0x7b5   : > { %2471 = vst.msk [vmem:[#allocation5 + $0x58] sm:$0xff] %vm2459_vm3, %v2454_v59  ;;  %2756 = vmax.xlane.f32.xlu1 %v8796_v26  ;;  %v3666_v14 = vpop.xlane.xlu0 %3665  ;;  %v8920_v59 = vpop.eup %5931 }
 0x7b6   : > { %3383 = vst.msk [vmem:[#allocation3 + $0x130] sm:$0xff] %vm1333_vm2, %v8897_v39  ;;  %v8906_v50 = vmax.f32 %v8894_v52, %v3666_v14  ;;  %2862 = vperm.xlu0 %5758, %v8897_v39   ;;  %v2268_v14 = vld [vmem:[#allocation5 + $0x8] sm:$0xff] }
 0x7b8   : > { %9923 = vst [vmem:[#allocation86_spill] sm:$0xff] %v8906_v50 }
 0x7b9   : > { %4293 = vst.msk [vmem:[#allocation3 + $0x1f8] sm:$0xff] %vm1333_vm2, %v8906_v50  ;;  %v2271_v50 = vld [vmem:[#allocation5 + $0x20] sm:$0xff] }
 0x7bb   : > { %v3664_v13 = vpop.xlane.xlu2 %3663 }
 0x7bc   : > { %v8918_v25 = vmax.f32 %v8911_v10, %v3664_v13  ;;  %v2264_v10 = vpop.f32.mrf.mxu1 }
 0x7bd   : > { %2762 = vmax.xlane.f32.xlu1 %v8915_v24  ;;  %v2761_v16 = vpop.xlane.xlu0 %2760 }
 0x7be   : > { %9925 = vst [vmem:[#allocation76_spill] sm:$0xff] %v8918_v25  ;;  %v8926_v34 = vmax.f32 %v8913_v0, %v2761_v16  ;;  %3221 = vperm.xlu0 %5758, %v8920_v59  }
 0x7bf   : > { %4292 = vst.msk [vmem:[#allocation3 + $0x1f0] sm:$0xff] %vm1333_vm2, %v8918_v25 }
 0x7c0   : > { %3390 = vst.msk [vmem:[#allocation3 + $0x168] sm:$0xff] %vm1333_vm2, %v8926_v34 }
 0x7c3   : > { %v2291_v32 = vpop.permute.xlu2 %2290 }
 0x7c4   : > { %v2364_v13 = vmul.f32 %v2291_v32, %v2268_v14  ;;  %v2802_v14 = vmul.f32 1.442695, %v2784_v45 }
 0x7c6   : > { %v2444_v52 = vadd.f32 %v8712_v12, %v2364_v13  ;;  %v2274_v13 = vld [vmem:[#allocation5 + $0x38] sm:$0xff] }
 0x7c8   : > { %2461 = vst.msk [vmem:[#allocation5 + $0x8] sm:$0xff] %vm2459_vm3, %v2444_v52 }
 0x7c9   : > { %2425 = vrot.lane.b32.xlu2 %v2264_v10, %s6500_s28 }
 0x7cb   : > { %v2306_v42 = vpop.permute.xlu2 %2305 }
 0x7cc   : > { %v2367_v25 = vmul.f32 %v2306_v42, %v2271_v50  ;;  %v2726_v50 = vld [vmem:[#allocation3 + $0x140] sm:$0xff] }
 0x7ce   : > { %v2447_v16 = vadd.f32 %v8720_v54, %v2367_v25  ;;  %v2277_v54 = vld [vmem:[#allocation5 + $0x50] sm:$0xff] }
 0x7d0   : > { %2464 = vst.msk [vmem:[#allocation5 + $0x20] sm:$0xff] %vm2459_vm3, %v2447_v16  ;;  %v2833_v60 = vpop.permute.xlu0 %2832  ;;  %v2280_v16 = vld [vmem:[#allocation5 + $0x68] sm:$0xff] }
 0x7d1   : > { %v2910_v32 = vsub.f32 %v8580_v6, %v2833_v60 }
 0x7d3   : > { %v2926_v12 = vmul.f32 1.442695, %v2910_v32  ;;  %v2321_v33 = vpop.permute.xlu2 %2320 }
 0x7d4   : > { %v2370_v52 = vmul.f32 %v2321_v33, %v2274_v13 }
 0x7d5   : > { %5933 = vpow2.f32 %v2926_v12 }
 0x7d6   : > { %v2450_v10 = vadd.f32 %v8763_v43, %v2370_v52  ;;  %2837 = vperm.xlu1 %5756, %v8730_v51   ;;  %5935 = vpow2.f32 %v2802_v14  ;;  %v2787_v51 = vsub.f32 %v8831_v22, %v8837_v28 }
 0x7d8   : > { %2467 = vst.msk [vmem:[#allocation5 + $0x38] sm:$0xff] %vm2459_vm3, %v2450_v10  ;;  %v2808_v43 = vmul.f32 1.442695, %v2787_v51 }
 0x7da   : > { %5937 = vpow2.f32 %v2808_v43 }
 0x7db   : > { %v8942_v42 = vpop.eup %5933  ;;  %v2336_v53 = vpop.permute.xlu2 %2335 }
 0x7dc   : > { %v2373_v25 = vmul.f32 %v2336_v53, %v2277_v54  ;;  %3119 = vmatmul.f32.vlgmr.msra.gmra.mxu2 %v8942_v42  ;;  %v8945_v45 = vpop.eup %5935 }
 0x7dd   : > { %v2751_v6 = vpop.xlane.xlu1 %2750 }
 0x7de   : > { %v2453_v33 = vadd.f32 %v8819_v23, %v2373_v25  ;;  %v2774_v60 = vmax.f32 %v2726_v50, %v2751_v6  ;;  %3196 = vperm.xlu1 %5756, %v8945_v45   ;;  %v2279_v23 = vld [vmem:[#allocation5 + $0x60] sm:$0xff] }
 0x7df   : > { %v2375_v13 = vmul.f32 %v8879_v20, %v2279_v23  ;;  %v2281_v20 = vld [vmem:[#allocation5 + $0x70] sm:$0xff] }
 0x7e0   : > { %2470 = vst.msk [vmem:[#allocation5 + $0x50] sm:$0xff] %vm2459_vm3, %v2453_v33  ;;  %v8957_v10 = vpop.eup %5937  ;;  %v2790_v54 = vsub.f32 %v2726_v50, %v2774_v60  ;;  %v2377_v25 = vmul.f32 %v8873_v38, %v2281_v20  ;;  %v9926_v50 = vsub.f32 %v8786_v31, %v8790_v47  ;;  %v9927_v38 = vsub.f32 %v8843_v55, %v8848_v56 }
 0x7e1   : > { %3385 = vst.msk [vmem:[#allocation3 + $0x140] sm:$0xff] %vm1333_vm2, %v2774_v60  ;;  %v9928_v20 = vsub.f32 %v8892_v40, %v8897_v39  ;;  %v2795_v40 = vsub.f32 %v8913_v0, %v8926_v34 }
 0x7e3   : > { %v2351_v32 = vpop.permute.xlu2 %2350  ;;  %v2824_v39 = vmul.f32 1.442695, %v2795_v40 }
 0x7e4   : > { %v2376_v14 = vmul.f32 %v2351_v32, %v2280_v16  ;;  %v2804_v16 = vmul.f32 1.442695, %v9927_v38  ;;  %v2727_v32 = vld [vmem:[#allocation3 + $0x148] sm:$0xff] }
 0x7e6   : > { %v2456_v12 = vadd.f32 %v8876_v37, %v2376_v14  ;;  %2857 = vperm.xlu1 %5756, %v8837_v28   ;;  %v2814_v37 = vmul.f32 1.442695, %v2790_v54  ;;  %v8962_v28 = vpop.f32.mrf.mxu3  ;;  %v2792_v14 = vsub.f32 %v8881_v63, %v8884_v36 }
 0x7e8   : > { %2473 = vst.msk [vmem:[#allocation5 + $0x68] sm:$0xff] %vm2459_vm3, %v2456_v12  ;;  %5939 = vpow2.f32 %v2814_v37  ;;  %v2729_v12 = vld [vmem:[#allocation3 + $0x158] sm:$0xff]  ;;  %v2732_v37 = vld [vmem:[#allocation3 + $0x170] sm:$0xff] }
 0x7eb   : > { %v2420_v52 = vpop.permute.xlu2 %2419 }
 0x7ec   : > { %v2455_v22 = vadd.f32 %v2420_v52, %v2375_v13  ;;  %v2818_v13 = vmul.f32 1.442695, %v2792_v14 }
 0x7ee   : > { %2472 = vst.msk [vmem:[#allocation5 + $0x60] sm:$0xff] %vm2459_vm3, %v2455_v22  ;;  %3211 = vperm.xlu1 %5756, %v8957_v10   ;;  %v8966_v6 = vpop.eup %5939  ;;  %v2282_v22 = vld [vmem:[#allocation5 + $0x78] sm:$0xff] }
 0x7f2   : > { %2758 = vmax.xlane.f32.xlu2 %v8802_v7 }
 0x7f5   : > { %v2361_v53 = vpop.permute.xlu1 %2360 }
 0x7f6   : > { %2872 = vperm.xlu1 %5756, %v2774_v60   ;;  %v2798_v60 = vmul.f32 1.442695, %v9926_v50 }
 0x7f8   : > { %5941 = vpow2.f32 %v2798_v60 }
 0x7f9   : > { %5943 = vpow2.f32 %v2804_v16 }
 0x7fa   : > { %2764 = vmax.xlane.f32.xlu2 %v8962_v28 }
 0x7fd   : > { %v2424_v33 = vpop.permute.xlu1 %2423 }
 0x7fe   : > { %v2457_v51 = vadd.f32 %v2424_v33, %v2377_v25  ;;  %3226 = vperm.xlu1 %5756, %v8966_v6   ;;  %v8973_v43 = vpop.eup %5941  ;;  %v2810_v25 = vmul.f32 1.442695, %v9928_v20 }
 0x7ff   : > { %v8984_v52 = vpop.eup %5943 }
 0x800   : > { %2474 = vst.msk [vmem:[#allocation5 + $0x70] sm:$0xff] %vm2459_vm3, %v2457_v51 }
 0x812   : > { %3186 = vperm.xlu2 %5757, %v8973_v43  }
 0x81a   : > { %2842 = vperm.xlu2 %5757, %v8777_v3  }
 0x822   : > { %2852 = vperm.xlu2 %5757, %v8770_v46   ;;  %v2378_v46 = vmul.f32 %v2361_v53, %v2282_v22  ;;  %v2733_v22 = vld [vmem:[#allocation3 + $0x178] sm:$0xff] }
 0x824   : > { %v2753_v47 = vpop.xlane.xlu2 %2752 }
 0x825   : > { %v2775_v31 = vmax.f32 %v2727_v32, %v2753_v47 }
 0x827   : > { %v2791_v23 = vsub.f32 %v2727_v32, %v2775_v31  ;;  %3386 = vst.msk [vmem:[#allocation3 + $0x148] sm:$0xff] %vm1333_vm2, %v2775_v31  ;;  %2877 = vperm.xlu0 %5758, %v2775_v31   ;;  %v2730_v31 = vld [vmem:[#allocation3 + $0x160] sm:$0xff] }
 0x828   : > { %v2757_v3 = vpop.xlane.xlu1 %2756 }
 0x829   : > { %v2816_v56 = vmul.f32 1.442695, %v2791_v23  ;;  %v2777_v55 = vmax.f32 %v2729_v12, %v2757_v3 }
 0x82a   : > { %3201 = vperm.xlu2 %5757, %v8984_v52  }
 0x82b   : > { %5945 = vpow2.f32 %v2816_v56  ;;  %3388 = vst.msk [vmem:[#allocation3 + $0x158] sm:$0xff] %vm1333_vm2, %v2777_v55  ;;  %2887 = vperm.xlu1 %5756, %v2777_v55   ;;  %v2793_v47 = vsub.f32 %v2729_v12, %v2777_v55 }
 0x82c   : > { %5947 = vpow2.f32 %v2818_v13  ;;  %v2426_v63 = vpop.permute.xlu2 %2425 }
 0x82d   : > { %v2458_v54 = vadd.f32 %v2426_v63, %v2378_v46  ;;  %5949 = vpow2.f32 %v2810_v25  ;;  %v2820_v23 = vmul.f32 1.442695, %v2793_v47 }
 0x82e   : > { %5951 = vpow2.f32 %v2824_v39 }
 0x82f   : > { %2475 = vst.msk [vmem:[#allocation5 + $0x78] sm:$0xff] %vm2459_vm3, %v2458_v54  ;;  %v9021_v54 = vpop.permute.xlu0 %3191 }
 0x830   : > { %v2763_v33 = vpop.xlane.xlu1 %2762 }
 0x831   : > { %v8992_v51 = vpop.eup %5945  ;;  %v2780_v50 = vmax.f32 %v2732_v37, %v2763_v33 }
 0x832   : > { %v8994_v60 = vpop.eup %5947  ;;  %2867 = vperm.xlu2 %5757, %v8828_v41   ;;  %3231 = vperm.xlu0 %5758, %v8992_v51  }
 0x833   : > { %v2796_v53 = vsub.f32 %v2732_v37, %v2780_v50  ;;  %3391 = vst.msk [vmem:[#allocation3 + $0x170] sm:$0xff] %vm1333_vm2, %v2780_v50  ;;  %3236 = vperm.xlu1 %5756, %v8994_v60   ;;  %v9002_v38 = vpop.eup %5949 }
 0x834   : > { %v9005_v16 = vpop.eup %5951 }
 0x835   : > { %v2826_v55 = vmul.f32 1.442695, %v2796_v53 }
 0x837   : > { %v2848_v33 = vpop.permute.xlu0 %2847 }
 0x838   : > { %v2913_v40 = vsub.f32 %v8671_v5, %v2848_v33 }
 0x83a   : > { %3216 = vperm.xlu2 %5757, %v9002_v38   ;;  %v2932_v53 = vmul.f32 1.442695, %v2913_v40 }
 0x83b   : > { %2902 = vperm.xlu1 %5756, %v2780_v50  }
 0x842   : > { %2882 = vperm.xlu2 %5757, %v8884_v36  }
 0x843   : > { %3251 = vperm.xlu1 %5756, %v9005_v16  }
 0x848   : > { %v2838_v41 = vpop.permute.xlu1 %2837 }
 0x849   : > { %v2911_v32 = vsub.f32 %v8593_v17, %v2838_v41 }
 0x84a   : > { %2897 = vperm.xlu2 %5757, %v8926_v34  }
 0x84b   : > { %v2928_v14 = vmul.f32 1.442695, %v2911_v32 }
 0x84d   : > { %5953 = vpow2.f32 %v2928_v14  ;;  %v9929_v14 = vld [vmem:[#allocation40_spill] sm:$0xff] }
 0x84e   : > { %5955 = vpow2.f32 %v2820_v23  ;;  %v9035_v23 = vpop.permute.xlu0 %3206 }
 0x850   : > { %v9028_v39 = vpop.permute.xlu1 %3196 }
 0x853   : > { %v5954_v0 = vpop.eup %5953 }
 0x854   : > { %3122 = vmatmul.f32.gmra.mxu2 %v5954_v0  ;;  %v9012_v46 = vpop.eup %5955 }
 0x858   : > { %v2858_v5 = vpop.permute.xlu1 %2857 }
 0x865   : > { %v2759_v13 = vpop.xlane.xlu2 %2758 }
 0x866   : > { %v2778_v3 = vmax.f32 %v2730_v31, %v2759_v13 }
 0x868   : > { %v2794_v56 = vsub.f32 %v2730_v31, %v2778_v3  ;;  %3389 = vst.msk [vmem:[#allocation3 + $0x160] sm:$0xff] %vm1333_vm2, %v2778_v3  ;;  %2892 = vperm.xlu0 %5758, %v2778_v3   ;;  %v2915_v3 = vsub.f32 %v8734_v18, %v2858_v5 }
 0x86a   : > { %v2822_v36 = vmul.f32 1.442695, %v2794_v56 }
 0x86c   : > { %5957 = vpow2.f32 %v2822_v36  ;;  %v2936_v36 = vmul.f32 1.442695, %v2915_v3 }
 0x86d   : > { %v2765_v17 = vpop.xlane.xlu2 %2764  ;;  %2993 = vadd.xlane.f32.xlu1 %v5954_v0  ;;  %5959 = vpow2.f32 %v2826_v55  ;;  %v9930_v0 = vld [vmem:[#allocation37_spill] sm:$0xff] }
 0x86e   : > { %v2781_v34 = vmax.f32 %v2733_v22, %v2765_v17  ;;  %v5769_v47 = vpack.i.bf16 %v9930_v0, %v9929_v14 }
 0x870   : > { %3392 = vst.msk [vmem:[#allocation3 + $0x178] sm:$0xff] %vm1333_vm2, %v2781_v34  ;;  %3241 = vperm.xlu0 %5758, %v9012_v46   ;;  %v2797_v40 = vsub.f32 %v2733_v22, %v2781_v34 }
 0x872   : > { %v9016_v12 = vpop.eup %5957  ;;  %v2828_v14 = vmul.f32 1.442695, %v2797_v40 }
 0x873   : > { %3246 = vperm.xlu2 %5757, %v9016_v12   ;;  %v9024_v25 = vpop.eup %5959 }
 0x875   : > { %v9019_v63 = vpop.permute.xlu2 %3186 }
 0x878   : > { %2907 = vperm.xlu0 %5758, %v2781_v34  }
 0x87d   : > { %v2843_v37 = vpop.permute.xlu2 %2842 }
 0x87e   : > { %v2912_v20 = vsub.f32 %v8662_v9, %v2843_v37  ;;  %v9045_v37 = vpop.permute.xlu1 %3211 }
 0x880   : > { %v2930_v50 = vmul.f32 1.442695, %v2912_v20  ;;  %3256 = vperm.xlu0 %5758, %v9024_v25  }
 0x882   : > { %5961 = vpow2.f32 %v2930_v50 }
 0x883   : > { %5963 = vpow2.f32 %v2932_v53 }
 0x885   : > { %v2853_v41 = vpop.permute.xlu2 %2852 }
 0x886   : > { %3733 = vperm.xlu1 %5756, %v8516_v1   ;;  %v2914_v9 = vsub.f32 %v8682_v11, %v2853_v41  ;;  %v2863_v11 = vpop.permute.xlu0 %2862 }
 0x887   : > { %v2916_v55 = vsub.f32 %v8740_v44, %v2863_v11 }
 0x888   : > { %v5962_v32 = vpop.eup %5961  ;;  %v2934_v31 = vmul.f32 1.442695, %v2914_v9  ;;  %v2873_v9 = vpop.permute.xlu1 %2872 }
 0x889   : > { %3125 = vmatmul.f32.gmra.mxu2 %v5962_v32  ;;  %v9037_v13 = vpop.eup %5963  ;;  %v2938_v20 = vmul.f32 1.442695, %v2916_v55  ;;  %v9931_v55 = vld [vmem:[#allocation54_spill] sm:$0xff] }
 0x88a   : > { %5965 = vpow2.f32 %v2934_v31 }
 0x88b   : > { %5967 = vpow2.f32 %v2936_v36 }
 0x88c   : > { %5969 = vpow2.f32 %v2938_v20  ;;  %v9932_v20 = vld [vmem:[#allocation51_spill] sm:$0xff] }
 0x88d   : > { %v9041_v56 = vpop.permute.xlu2 %3201 }
 0x88e   : > { %5770 = vrot.lane.b32.xlu1 %v5769_v47, %s6500_s28  ;;  %v9051_v41 = vpop.permute.xlu0 %3221 }
 0x890   : > { %v5966_v17 = vpop.eup %5965  ;;  %v9062_v22 = vpop.permute.xlu1 %3226 }
 0x891   : > { %3128 = vmatmul.f32.gmra.mxu2 %v9037_v13  ;;  %v9047_v50 = vpop.eup %5967 }
 0x892   : > { %v9053_v44 = vpop.eup %5969 }
 0x895   : > { %v2868_v33 = vpop.permute.xlu2 %2867 }
 0x896   : > { %v2917_v18 = vsub.f32 %v8744_v57, %v2868_v33  ;;  %v5759_v33 = vpack.i.bf16 %v9932_v20, %v9931_v55  ;;  %v9940_v55 = vld [vmem:[#allocation42_spill] sm:$0xff] }
 0x898   : > { %v2940_v53 = vmul.f32 1.442695, %v2917_v18  ;;  %v9934_v18 = vld [vmem:[#allocation41_spill] sm:$0xff] }
 0x899   : > { %3131 = vmatmul.f32.gmra.mxu2 %v5966_v17  ;;  %v2878_v31 = vpop.permute.xlu0 %2877 }
 0x89a   : > { %5971 = vpow2.f32 %v2940_v53  ;;  %v2919_v34 = vsub.f32 %v8768_v58, %v2878_v31  ;;  %v9933_v58 = vld [vmem:[#allocation46_spill] sm:$0xff]  ;;  %v9937_v31 = vld [vmem:[#allocation35_spill] sm:$0xff] }
 0x89b   : > { %5973 = vpow2.f32 %v2828_v14  ;;  %v5764_v40 = vpack.i.bf16 %v9934_v18, %v9933_v58  ;;  %v9935_v14 = vld [vmem:[#allocation60_spill] sm:$0xff]  ;;  %v9941_v18 = vld [vmem:[#allocation34_spill] sm:$0xff] }
 0x89c   : > { %2991 = vadd.xlane.f32.xlu2 %v8942_v42  ;;  %v2918_v42 = vsub.f32 %v8758_v62, %v2873_v9  ;;  %v2944_v62 = vmul.f32 1.442695, %v2919_v34  ;;  %v9938_v34 = vld [vmem:[#allocation33_spill] sm:$0xff] }
 0x89d   : > { %v9057_v0 = vpop.permute.xlu2 %3216  ;;  %v2888_v36 = vpop.permute.xlu1 %2887 }
 0x89e   : > { %v2942_v47 = vmul.f32 1.442695, %v2918_v42 }
 0x8a0   : > { %v9059_v57 = vpop.eup %5971  ;;  %5975 = vpow2.f32 %v2942_v47 }
 0x8a1   : > { %3134 = vmatmul.f32.gmra.mxu2 %v9047_v50  ;;  %v9065_v5 = vpop.eup %5973  ;;  %5977 = vpow2.f32 %v2944_v62  ;;  %v5774_v62 = vpack.i.bf16 %v9938_v34, %v9937_v31  ;;  %v2960_v31 = vld [vmem:[#allocation4 + $0x108] sm:$0xff] }
 0x8a4   : > { %v9099_v58 = vpop.permute.xlu0 %3231 }
 0x8a5   : > { %v9084_v47 = vpop.permute.xlu1 %3236 }
 0x8a6   : > { %v9068_v3 = vpop.eup %5975 }
 0x8a7   : > { %v9078_v9 = vpop.eup %5977 }
 0x8a9   : > { %3137 = vmatmul.f32.gmra.mxu2 %v9053_v44 }
 0x8aa   : > { %2995 = vadd.xlane.f32.xlu0 %v5962_v32  ;;  %v2883_v32 = vpop.permute.xlu2 %2882 }
 0x8ab   : > { %v2920_v11 = vsub.f32 %v8784_v27, %v2883_v32  ;;  %v9936_v27 = vld [vmem:[#allocation56_spill] sm:$0xff] }
 0x8ac   : > { %v5779_v42 = vpack.i.bf16 %v9936_v27, %v9935_v14 }
 0x8ad   : > { %v2946_v53 = vmul.f32 1.442695, %v2920_v11 }
 0x8af   : > { %5979 = vpow2.f32 %v2946_v53 }
 0x8b1   : > { %3140 = vmatmul.f32.gmra.mxu2 %v9059_v57 }
 0x8b4   : > { %3261 = vperm.xlu2 %5757, %v9065_v5  }
 0x8b5   : > { %v9090_v11 = vpop.eup %5979 }
 0x8b8   : > { %2999 = vadd.xlane.f32.xlu1 %v5966_v17  ;;  %v2921_v17 = vsub.f32 %v8796_v26, %v2888_v36  ;;  %v2903_v26 = vpop.permute.xlu1 %2902  ;;  %v9939_v36 = vld [vmem:[#allocation47_spill] sm:$0xff] }
 0x8b9   : > { %3143 = vmatmul.f32.gmra.mxu2 %v9068_v3  ;;  %v5784_v20 = vpack.i.bf16 %v9940_v55, %v9939_v36 }
 0x8ba   : > { %v2948_v32 = vmul.f32 1.442695, %v2921_v17 }
 0x8bc   : > { %5760 = vrot.lane.b32.xlu2 %v5759_v33, %s6500_s28  ;;  %5981 = vpow2.f32 %v2948_v32  ;;  %v2976_v32 = vmul.f32 %v8822_v48, %v2960_v31  ;;  %v9944_v31 = vld [vmem:[#allocation36_spill] sm:$0xff] }
 0x8be   : > { %5765 = vrot.lane.b32.xlu0 %v5764_v40, %s6500_s28  ;;  %v9942_v40 = vld [vmem:[#allocation32_spill] sm:$0xff] }
 0x8bf   : > { %v5794_v53 = vpack.i.bf16 %v9942_v40, %v9941_v18 }
 0x8c0   : > { %v9103_v17 = vpop.permute.xlu1 %3251 }
 0x8c1   : > { %3146 = vmatmul.f32.gmra.mxu2 %v9078_v9 }
 0x8c2   : > { %v9095_v33 = vpop.eup %5981 }
 0x8c4   : > { %5780 = vrot.lane.b32.xlu2 %v5779_v42, %s6500_s28  ;;  %v2898_v42 = vpop.permute.xlu2 %2897 }
 0x8c6   : > { %5775 = vrot.lane.b32.xlu0 %v5774_v62, %s6500_s28  ;;  %v2923_v62 = vsub.f32 %v8811_v19, %v2898_v42 }
 0x8c8   : > { %v2952_v18 = vmul.f32 1.442695, %v2923_v62 }
 0x8c9   : > { %3149 = vmatmul.f32.gmra.mxu2 %v9090_v11 }
 0x8d1   : > { %5785 = vrot.lane.b32.xlu1 %v5784_v20, %s6500_s28  ;;  %3152 = vmatmul.f32.gmra.mxu2 %v9095_v33 }
 0x8d9   : > { %5795 = vrot.lane.b32.xlu1 %v5794_v53, %s6500_s28 }
 0x8da   : > { %v2893_v14 = vpop.permute.xlu0 %2892 }
 0x8db   : > { %v2922_v27 = vsub.f32 %v8802_v7, %v2893_v14  ;;  %v2924_v7 = vsub.f32 %v8915_v24, %v2903_v26  ;;  %v9943_v26 = vld [vmem:[#allocation38_spill] sm:$0xff] }
 0x8dd   : > { %v2950_v34 = vmul.f32 1.442695, %v2922_v27  ;;  %v2954_v53 = vmul.f32 1.442695, %v2924_v7 }
 0x8df   : > { %5983 = vpow2.f32 %v2950_v34 }
 0x8e0   : > { %v2994_v36 = vpop.xlane.xlu1 %2993  ;;  %5985 = vpow2.f32 %v2952_v18  ;;  %v2961_v18 = vld [vmem:[#allocation4 + $0x110] sm:$0xff] }
 0x8e1   : > { %v3024_v55 = vadd.f32 %v2994_v36, %v2976_v32  ;;  %5987 = vpow2.f32 %v2954_v53  ;;  %v2977_v7 = vmul.f32 %v8945_v45, %v2961_v18 }
 0x8e2   : > { %v9109_v20 = vpop.permute.xlu0 %3241 }
 0x8e3   : > { %3040 = vst.msk [vmem:[#allocation4 + $0x108] sm:$0xff] %vm1333_vm2, %v3024_v55 }
 0x8e5   : > { %v9112_v40 = vpop.eup %5983 }
 0x8e6   : > { %3155 = vmatmul.f32.gmra.mxu2 %v9112_v40  ;;  %v9116_v19 = vpop.eup %5985 }
 0x8e7   : > { %v9122_v42 = vpop.eup %5987 }
 0x8ea   : > { %v2908_v14 = vpop.permute.xlu0 %2907 }
 0x8eb   : > { %v2925_v48 = vsub.f32 %v8962_v28, %v2908_v14  ;;  %v9133_v28 = vpop.permute.xlu2 %3246 }
 0x8ed   : > { %2997 = vadd.xlane.f32.xlu2 %v9037_v13  ;;  %v2956_v27 = vmul.f32 1.442695, %v2925_v48  ;;  %v5789_v13 = vpack.i.bf16 %v9944_v31, %v9943_v26  ;;  %v2963_v31 = vld [vmem:[#allocation4 + $0x120] sm:$0xff] }
 0x8ee   : > { %3158 = vmatmul.f32.gmra.mxu2 %v9116_v19 }
 0x8ef   : > { %5989 = vpow2.f32 %v2956_v27 }
 0x8f0   : > { %3001 = vadd.xlane.f32.xlu0 %v9047_v50  ;;  %v2959_v50 = vld [vmem:[#allocation4 + $0x100] sm:$0xff] }
 0x8f1   : > { %v2975_v34 = vmul.f32 %v8973_v43, %v2959_v50 }
 0x8f2   : > { %v9139_v36 = vpop.permute.xlu0 %3256 }
 0x8f5   : > { %v9125_v24 = vpop.eup %5989 }
 0x8f6   : > { %3161 = vmatmul.f32.gmra.mxu2 %v9122_v42 }
 0x8f8   : > { %v3734_v55 = vpop.permute.xlu1 %3733 }
 0x8fe   : > { %3164 = vmatmul.f32.gmra.mxu2 %v9125_v24 }
 0x900   : > { %v5771_v26 = vpop.permute.xlu1 %5770 }
 0x901   : > { %v5772_v18 = vunpack.i.l.bf16 %v5771_v26 }
 0x903   : > { %3005 = vadd.xlane.f32.xlu1 %v9059_v57 }
 0x904   : > { %5790 = vrot.lane.b32.xlu0 %v5789_v13, %s6500_s28  ;;  %v2979_v13 = vmul.f32 %v8861_v8, %v2963_v31 }
 0x905   : > { %3738 = vperm.xlu2 %5757, %v8675_v15  }
 0x90c   : > { %3743 = vperm.xlu0 %5758, %v8605_v49  }
 0x90d   : > { %3748 = vperm.xlu2 %5757, %v8526_v2  }
 0x90f   : > { %v2992_v62 = vpop.xlane.xlu2 %2991 }
 0x910   : > { %v3023_v32 = vadd.f32 %v2992_v62, %v2975_v34 }
 0x912   : > { %3039 = vst.msk [vmem:[#allocation4 + $0x100] sm:$0xff] %vm1333_vm2, %v3023_v32 }
 0x917   : > { %v9141_v57 = vpop.permute.xlu2 %3261 }
 0x91c   : > { %3753 = vperm.xlu1 %5756, %v8685_v30  }
 0x91d   : > { %v2996_v53 = vpop.xlane.xlu0 %2995 }
 0x91e   : > { %v3025_v14 = vadd.f32 %v2996_v53, %v2977_v7  ;;  %v5773_v7 = vunpack.i.h.bf16 %v5771_v26 }
 0x91f   : > { %v5761_v48 = vpop.permute.xlu2 %5760 }
 0x920   : > { %3041 = vst.msk [vmem:[#allocation4 + $0x110] sm:$0xff] %vm1333_vm2, %v3025_v14  ;;  %v5762_v43 = vunpack.i.l.bf16 %v5761_v48  ;;  %v5763_v27 = vunpack.i.h.bf16 %v5761_v48 }
 0x922   : > { %4004 = vmatpush.msra.mxu1 %v5762_v43 }
 0x924   : > { %4005 = vmatpush.msra.mxu1 %v5763_v27 }
 0x927   : > { %v5781_v8 = vpop.permute.xlu2 %5780 }
 0x928   : > { %v5782_v43 = vunpack.i.l.bf16 %v5781_v8  ;;  %v5783_v27 = vunpack.i.h.bf16 %v5781_v8 }
 0x92b   : > { %v3000_v50 = vpop.xlane.xlu1 %2999 }
 0x92c   : > { %v3027_v34 = vadd.f32 %v3000_v50, %v2979_v13  ;;  %v3120_v50 = vpop.f32.mrf.mxu2 }
 0x92e   : > { %3043 = vst.msk [vmem:[#allocation4 + $0x120] sm:$0xff] %vm1333_vm2, %v3027_v34 }
 0x930   : > { %v5766_v62 = vpop.permute.xlu0 %5765 }
 0x931   : > { %v5767_v32 = vunpack.i.l.bf16 %v5766_v62  ;;  %v5768_v45 = vunpack.i.h.bf16 %v5766_v62 }
 0x933   : > { %4006 = vmatpush.msra.mxu1 %v5767_v32 }
 0x935   : > { %4007 = vmatpush.msra.mxu1 %v5768_v45  ;;  %v9161_v45 = vpop.f32.mrf.mxu2 }
 0x936   : > { %3007 = vadd.xlane.f32.xlu0 %v9068_v3  ;;  %3003 = vadd.xlane.f32.xlu2 %v9053_v44  ;;  %v3811_v44 = vsub.f32 %v8357_v61, %v3734_v55  ;;  %v2964_v61 = vld [vmem:[#allocation4 + $0x128] sm:$0xff] }
 0x937   : > { %4008 = vmatpush.msra.mxu1 %v5772_v18  ;;  %v2980_v62 = vmul.f32 %v8957_v10, %v2964_v61 }
 0x938   : > { %v5776_v53 = vpop.permute.xlu0 %5775  ;;  %v3827_v26 = vmul.f32 1.442695, %v3811_v44 }
 0x939   : > { %v5777_v14 = vunpack.i.l.bf16 %v5776_v53  ;;  %4009 = vmatpush.msra.mxu1 %v5773_v7  ;;  %v5778_v48 = vunpack.i.h.bf16 %v5776_v53 }
 0x93a   : > { %5991 = vpow2.f32 %v3827_v26 }
 0x93b   : > { %4010 = vmatpush.msra.mxu1 %v5777_v14  ;;  %v2966_v14 = vld [vmem:[#allocation4 + $0x138] sm:$0xff] }
 0x93c   : > { %v2982_v8 = vmul.f32 %v8920_v59, %v2966_v14 }
 0x93d   : > { %4011 = vmatpush.msra.mxu1 %v5778_v48  ;;  %v3126_v18 = vpop.f32.mrf.mxu2 }
 0x93e   : > { %3009 = vadd.xlane.f32.xlu2 %v9078_v9 }
 0x93f   : > { %4012 = vmatpush.msra.mxu1 %v5782_v43 }
 0x940   : > { %v5992_v9 = vpop.eup %5991 }
 0x941   : > { %4013 = vmatpush.msra.mxu1 %v5783_v27 }
 0x943   : > { %v5786_v31 = vpop.permute.xlu1 %5785 }
 0x944   : > { %v5787_v13 = vunpack.i.l.bf16 %v5786_v31  ;;  %v5788_v3 = vunpack.i.h.bf16 %v5786_v31 }
 0x946   : > { %3011 = vadd.xlane.f32.xlu1 %v9090_v11  ;;  %3015 = vadd.xlane.f32.xlu2 %v9112_v40  ;;  %v2962_v11 = vld [vmem:[#allocation4 + $0x118] sm:$0xff] }
 0x947   : > { %4014 = vmatpush.msra.mxu1 %v5787_v13  ;;  %v2978_v40 = vmul.f32 %v8984_v52, %v2962_v11 }
 0x949   : > { %4015 = vmatpush.msra.mxu1 %v5788_v3 }
 0x94a   : > { %3758 = vperm.xlu0 %5758, %v8612_v21  }
 0x94b   : > { %v5796_v7 = vpop.permute.xlu1 %5795 }
 0x94c   : > { %v5797_v26 = vunpack.i.l.bf16 %v5796_v7 }
 0x94e   : > { %3017 = vadd.xlane.f32.xlu1 %v9116_v19  ;;  %3021 = vadd.xlane.f32.xlu2 %v9125_v24 }
 0x952   : > { %3773 = vperm.xlu0 %5758, %v8635_v29  }
 0x956   : > { %3892 = vadd.xlane.f32.xlu1 %v5992_v9 }
 0x960   : > { %v2998_v55 = vpop.xlane.xlu2 %2997 }
 0x961   : > { %v3026_v34 = vadd.f32 %v2998_v55, %v2978_v40 }
 0x963   : > { %3042 = vst.msk [vmem:[#allocation4 + $0x118] sm:$0xff] %vm1333_vm2, %v3026_v34  ;;  %v3002_v32 = vpop.xlane.xlu0 %3001 }
 0x964   : > { %v3028_v19 = vadd.f32 %v3002_v32, %v2980_v62  ;;  %v9946_v62 = vld [vmem:[#allocation67_spill] sm:$0xff] }
 0x966   : > { %3044 = vst.msk [vmem:[#allocation4 + $0x128] sm:$0xff] %vm1333_vm2, %v3028_v19  ;;  %3296 = vrot.lane.b32.xlu2 %v3120_v50, %s6499_s11  ;;  %v9945_v50 = vld [vmem:[#allocation53_spill] sm:$0xff] }
 0x968   : > { %v3739_v24 = vpop.permute.xlu2 %3738 }
 0x969   : > { %v3812_v13 = vsub.f32 %v8369_v4, %v3739_v24  ;;  %v9948_v24 = vld [vmem:[#allocation76_spill] sm:$0xff] }
 0x96b   : > { %v3829_v11 = vmul.f32 1.442695, %v3812_v13 }
 0x96e   : > { %3300 = vrot.lane.b32.xlu2 %v3126_v18, %s6499_s11  ;;  %v2965_v18 = vld [vmem:[#allocation4 + $0x130] sm:$0xff] }
 0x970   : > { %v3749_v52 = vpop.permute.xlu2 %3748 }
 0x971   : > { %v3814_v53 = vsub.f32 %v8386_v35, %v3749_v52  ;;  %v5798_v35 = vunpack.i.h.bf16 %v5796_v7  ;;  %v2967_v7 = vld [vmem:[#allocation4 + $0x140] sm:$0xff]  ;;  %v2981_v52 = vmul.f32 %v9002_v38, %v2965_v18  ;;  %v9949_v38 = vld [vmem:[#allocation49_spill] sm:$0xff] }
 0x973   : > { %v3833_v10 = vmul.f32 1.442695, %v3814_v53  ;;  %v2983_v53 = vmul.f32 %v8966_v6, %v2967_v7  ;;  %v3683_v6 = vsub.f32 %v9949_v38, %v8516_v1 }
 0x975   : > { %5993 = vpow2.f32 %v3833_v10 }
 0x976   : > { %v3006_v48 = vpop.xlane.xlu1 %3005  ;;  %v5791_v43 = vpop.permute.xlu0 %5790  ;;  %5995 = vpow2.f32 %v3829_v11 }
 0x977   : > { %v3030_v27 = vadd.f32 %v3006_v48, %v2982_v8  ;;  %v5792_v31 = vunpack.i.l.bf16 %v5791_v43  ;;  %v5793_v44 = vunpack.i.h.bf16 %v5791_v43  ;;  %v2968_v43 = vld [vmem:[#allocation4 + $0x148] sm:$0xff] }
 0x979   : > { %3046 = vst.msk [vmem:[#allocation4 + $0x138] sm:$0xff] %vm1333_vm2, %v3030_v27  ;;  %4016 = vmatpush.msra.mxu1 %v5792_v31  ;;  %v2984_v27 = vmul.f32 %v8992_v51, %v2968_v43 }
 0x97b   : > { %v5994_v3 = vpop.eup %5993  ;;  %4017 = vmatpush.msra.mxu1 %v5793_v44  ;;  %v2969_v44 = vld [vmem:[#allocation4 + $0x150] sm:$0xff] }
 0x97c   : > { %3013 = vadd.xlane.f32.xlu0 %v9095_v33  ;;  %3898 = vadd.xlane.f32.xlu1 %v5994_v3  ;;  %v9172_v61 = vpop.eup %5995  ;;  %v9947_v33 = vld [vmem:[#allocation55_spill] sm:$0xff] }
 0x97d   : > { %4018 = vmatpush.msra.mxu1 %v5797_v26  ;;  %v2985_v26 = vmul.f32 %v8994_v60, %v2969_v44 }
 0x97e   : > { %v3744_v59 = vpop.permute.xlu0 %3743 }
 0x97f   : > { %4019 = vmatpush.msra.mxu1 %v5798_v35  ;;  %v3813_v40 = vsub.f32 %v9945_v50, %v3744_v59 }
 0x980   : > { %4020 = vmatmul.f32.vlgmr.msra.gmra.mxu1 %v5992_v9 }
 0x981   : > { %v3831_v4 = vmul.f32 1.442695, %v3813_v40 }
 0x983   : > { %5997 = vpow2.f32 %v3831_v4  ;;  %v3699_v4 = vmul.f32 1.442695, %v3683_v6  ;;  %v3129_v6 = vpop.f32.mrf.mxu2 }
 0x988   : > { %4023 = vmatmul.f32.gmra.mxu1 %v9172_v61 }
 0x989   : > { %v5998_v34 = vpop.eup %5997 }
 0x98e   : > { %v3754_v55 = vpop.permute.xlu1 %3753 }
 0x98f   : > { %v3815_v32 = vsub.f32 %v9947_v33, %v3754_v55  ;;  %v9950_v55 = vld [vmem:[#allocation43_spill] sm:$0xff]  ;;  %v2972_v33 = vld [vmem:[#allocation4 + $0x168] sm:$0xff] }
 0x990   : > { %3788 = vperm.xlu0 %5758, %v9946_v62   ;;  %4026 = vmatmul.f32.gmra.mxu1 %v5998_v34  ;;  %v2988_v60 = vmul.f32 %v9005_v16, %v2972_v33  ;;  %v9954_v33 = vld [vmem:[#allocation57_spill] sm:$0xff] }
 0x991   : > { %v3835_v19 = vmul.f32 1.442695, %v3815_v32  ;;  %v2974_v32 = vld [vmem:[#allocation4 + $0x178] sm:$0xff] }
 0x993   : > { %5999 = vpow2.f32 %v3835_v19 }
 0x994   : > { %6001 = vpow2.f32 %v3699_v4 }
 0x997   : > { %3896 = vadd.xlane.f32.xlu2 %v5998_v34 }
 0x998   : > { %3803 = vperm.xlu0 %5758, %v9948_v24   ;;  %4029 = vmatmul.f32.gmra.mxu1 %v5994_v3  ;;  %v2971_v3 = vld [vmem:[#allocation4 + $0x160] sm:$0xff] }
 0x999   : > { %v9178_v9 = vpop.eup %5999  ;;  %v2987_v35 = vmul.f32 %v9016_v12, %v2971_v3  ;;  %v2990_v12 = vmul.f32 %v9065_v5, %v2974_v32  ;;  %v3132_v32 = vpop.f32.mrf.mxu2 }
 0x9a0   : > { %4032 = vmatmul.f32.gmra.mxu1 %v9178_v9 }
 0x9a9   : > { %v3004_v14 = vpop.xlane.xlu2 %3003  ;;  %v3008_v10 = vpop.xlane.xlu0 %3007 }
 0x9aa   : > { %v3029_v8 = vadd.f32 %v3004_v14, %v2981_v52  ;;  %v3031_v48 = vadd.f32 %v3008_v10, %v2983_v53  ;;  %v9198_v53 = vpop.eup %6001  ;;  %v3860_v14 = vld [vmem:[#allocation4 + $0x180] sm:$0xff] }
 0x9ab   : > { %v3876_v5 = vmul.f32 %v9198_v53, %v3860_v14 }
 0x9ac   : > { %3045 = vst.msk [vmem:[#allocation4 + $0x130] sm:$0xff] %vm1333_vm2, %v3029_v8  ;;  %v3168_v8 = vld [vmem:[#allocation5] sm:$0xff] }
 0x9ad   : > { %3047 = vst.msk [vmem:[#allocation4 + $0x140] sm:$0xff] %vm1333_vm2, %v3031_v48  ;;  %v3264_v16 = vmul.f32 %v9019_v63, %v3168_v8  ;;  %v9951_v63 = vld [vmem:[#allocation63_spill] sm:$0xff] }
 0x9ae   : > { %v3686_v38 = vsub.f32 %v9951_v63, %v8526_v2  ;;  %v9957_v8 = vld [vmem:[#allocation75_spill] sm:$0xff] }
 0x9b1   : > { %v3010_v31 = vpop.xlane.xlu2 %3009 }
 0x9b2   : > { %v3032_v13 = vadd.f32 %v3010_v31, %v2984_v27  ;;  %v3170_v31 = vld [vmem:[#allocation5 + $0x10] sm:$0xff] }
 0x9b4   : > { %3048 = vst.msk [vmem:[#allocation4 + $0x148] sm:$0xff] %vm1333_vm2, %v3032_v13  ;;  %v3266_v13 = vmul.f32 %v9028_v39, %v3170_v31 }
 0x9b9   : > { %v3012_v11 = vpop.xlane.xlu1 %3011  ;;  %v3016_v59 = vpop.xlane.xlu2 %3015 }
 0x9ba   : > { %v3033_v50 = vadd.f32 %v3012_v11, %v2985_v26  ;;  %v3035_v40 = vadd.f32 %v3016_v59, %v2987_v35  ;;  %v9952_v26 = vld [vmem:[#allocation52_spill] sm:$0xff]  ;;  %v3705_v35 = vmul.f32 1.442695, %v3686_v38  ;;  %v3865_v38 = vld [vmem:[#allocation4 + $0x1a8] sm:$0xff] }
 0x9bb   : > { %v9953_v59 = vld [vmem:[#allocation64_spill] sm:$0xff] }
 0x9bc   : > { %3049 = vst.msk [vmem:[#allocation4 + $0x150] sm:$0xff] %vm1333_vm2, %v3033_v50  ;;  %v3759_v51 = vpop.permute.xlu0 %3758  ;;  %v3863_v50 = vld [vmem:[#allocation4 + $0x198] sm:$0xff] }
 0x9bd   : > { %3051 = vst.msk [vmem:[#allocation4 + $0x160] sm:$0xff] %vm1333_vm2, %v3035_v40  ;;  %v3816_v34 = vsub.f32 %v9950_v55, %v3759_v51  ;;  %v2970_v40 = vld [vmem:[#allocation4 + $0x158] sm:$0xff] }
 0x9bf   : > { %v3837_v1 = vmul.f32 1.442695, %v3816_v34 }
 0x9c1   : > { %6003 = vpow2.f32 %v3837_v1  ;;  %v3018_v19 = vpop.xlane.xlu1 %3017  ;;  %v3022_v18 = vpop.xlane.xlu2 %3021  ;;  %v9955_v1 = vld [vmem:[#allocation83_spill] sm:$0xff] }
 0x9c2   : > { %v3036_v7 = vadd.f32 %v3018_v19, %v2988_v60  ;;  %v3038_v52 = vadd.f32 %v3022_v18, %v2990_v12  ;;  %3019 = vadd.xlane.f32.xlu0 %v9122_v42  ;;  %6005 = vpow2.f32 %v3705_v35  ;;  %v3685_v60 = vsub.f32 %v9955_v1, %v8605_v49  ;;  %v9224_v19 = vpop.f32.mrf.mxu2 }
 0x9c4   : > { %3052 = vst.msk [vmem:[#allocation4 + $0x168] sm:$0xff] %vm1333_vm2, %v3036_v7  ;;  %v3774_v11 = vpop.permute.xlu0 %3773  ;;  %v3703_v12 = vmul.f32 1.442695, %v3685_v60  ;;  %v3862_v7 = vld [vmem:[#allocation4 + $0x190] sm:$0xff]  ;;  %v3171_v60 = vld [vmem:[#allocation5 + $0x18] sm:$0xff] }
 0x9c5   : > { %3054 = vst.msk [vmem:[#allocation4 + $0x178] sm:$0xff] %vm1333_vm2, %v3038_v52 }
 0x9c6   : > { %6007 = vpow2.f32 %v3703_v12  ;;  %v3267_v12 = vmul.f32 %v9041_v56, %v3171_v60 }
 0x9c7   : > { %v6004_v10 = vpop.eup %6003 }
 0x9c8   : > { %3902 = vadd.xlane.f32.xlu2 %v6004_v10  ;;  %4035 = vmatmul.f32.gmra.mxu1 %v6004_v10  ;;  %v9214_v39 = vpop.eup %6005 }
 0x9c9   : > { %v3893_v48 = vpop.xlane.xlu1 %3892  ;;  %v3297_v43 = vpop.permute.xlu2 %3296  ;;  %v3879_v4 = vmul.f32 %v9214_v39, %v3863_v50 }
 0x9ca   : > { %v3924_v27 = vadd.f32 %v3893_v48, %v3876_v5  ;;  %v3344_v42 = vadd.f32 %v3297_v43, %v3264_v16  ;;  %v3138_v52 = vpop.f32.mrf.mxu2  ;;  %v3819_v16 = vsub.f32 %v9957_v8, %v3774_v11  ;;  %v9958_v43 = vld [vmem:[#allocation66_spill] sm:$0xff] }
 0x9cc   : > { %3940 = vst.msk [vmem:[#allocation4 + $0x180] sm:$0xff] %vm1333_vm2, %v3924_v27  ;;  %v9227_v18 = vpop.eup %6007  ;;  %v3843_v48 = vmul.f32 1.442695, %v3819_v16  ;;  %v3688_v27 = vsub.f32 %v9958_v43, %v8612_v21  ;;  %v9960_v16 = vld [vmem:[#allocation48_spill] sm:$0xff] }
 0x9cd   : > { %3361 = vst.msk [vmem:[#allocation5] sm:$0xff] %vm3360_vm4, %v3344_v42  ;;  %v3878_v14 = vmul.f32 %v9227_v18, %v3862_v7 }
 0x9ce   : > { %6009 = vpow2.f32 %v3843_v48  ;;  %v3709_v42 = vmul.f32 1.442695, %v3688_v27 }
 0x9d0   : > { %6011 = vpow2.f32 %v3709_v42  ;;  %v9961_v42 = vld [vmem:[#allocation78_spill] sm:$0xff] }
 0x9d1   : > { %v3301_v44 = vpop.permute.xlu2 %3300 }
 0x9d2   : > { %v3346_v3 = vadd.f32 %v3301_v44, %v3266_v13  ;;  %v2973_v13 = vld [vmem:[#allocation4 + $0x170] sm:$0xff]  ;;  %v9245_v11 = vpop.f32.mrf.mxu2 }
 0x9d3   : > { %v2989_v44 = vmul.f32 %v9024_v25, %v2973_v13  ;;  %v9962_v13 = vld [vmem:[#allocation80_spill] sm:$0xff] }
 0x9d4   : > { %3363 = vst.msk [vmem:[#allocation5 + $0x10] sm:$0xff] %vm3360_vm4, %v3346_v3  ;;  %v9237_v31 = vpop.eup %6009 }
 0x9d6   : > { %3298 = vrot.lane.b32.xlu0 %v9161_v45, %s6499_s11  ;;  %v2986_v45 = vmul.f32 %v9012_v46, %v2970_v40  ;;  %v9956_v46 = vld [vmem:[#allocation86_spill] sm:$0xff]  ;;  %v9241_v63 = vpop.eup %6011 }
 0x9d7   : > { %v3881_v21 = vmul.f32 %v9241_v63, %v3865_v38  ;;  %v9959_v40 = vld [vmem:[#allocation58_spill] sm:$0xff] }
 0x9de   : > { %3302 = vrot.lane.b32.xlu0 %v3129_v6, %s6499_s11 }
 0x9e0   : > { %3763 = vperm.xlu2 %5757, %v9952_v26  }
 0x9e8   : > { %3778 = vperm.xlu2 %5757, %v9953_v59  }
 0x9ef   : > { %v3899_v51 = vpop.xlane.xlu1 %3898  ;;  %v3014_v2 = vpop.xlane.xlu0 %3013 }
 0x9f0   : > { %v3927_v55 = vadd.f32 %v3899_v51, %v3879_v4  ;;  %v3034_v34 = vadd.f32 %v3014_v2, %v2986_v45  ;;  %3793 = vperm.xlu2 %5757, %v9954_v33   ;;  %v3169_v45 = vld [vmem:[#allocation5 + $0x8] sm:$0xff]  ;;  %v3144_v2 = vpop.f32.mrf.mxu2 }
 0x9f1   : > { %v3265_v51 = vmul.f32 %v9021_v54, %v3169_v45  ;;  %v3861_v45 = vld [vmem:[#allocation4 + $0x188] sm:$0xff] }
 0x9f2   : > { %3943 = vst.msk [vmem:[#allocation4 + $0x198] sm:$0xff] %vm1333_vm2, %v3927_v55 }
 0x9f3   : > { %3050 = vst.msk [vmem:[#allocation4 + $0x158] sm:$0xff] %vm1333_vm2, %v3034_v34 }
 0x9f8   : > { %3304 = vrot.lane.b32.xlu2 %v3132_v32, %s6499_s11  ;;  %v9261_v56 = vpop.f32.mrf.mxu2 }
 0xa00   : > { %3808 = vperm.xlu2 %5757, %v9956_v46  }
 0xa02   : > { %v3789_v5 = vpop.permute.xlu0 %3788 }
 0xa03   : > { %v3822_v48 = vsub.f32 %v9960_v16, %v3789_v5 }
 0xa05   : > { %v3849_v27 = vmul.f32 1.442695, %v3822_v48 }
 0xa08   : > { %3894 = vadd.xlane.f32.xlu0 %v9172_v61  ;;  %3308 = vrot.lane.b32.xlu2 %v3138_v52, %s6499_s11 }
 0xa0a   : > { %v3897_v10 = vpop.xlane.xlu2 %3896  ;;  %v3804_v61 = vpop.permute.xlu0 %3803 }
 0xa0b   : > { %v3926_v49 = vadd.f32 %v3897_v10, %v3878_v14  ;;  %v3172_v14 = vld [vmem:[#allocation5 + $0x20] sm:$0xff] }
 0xa0c   : > { %v3268_v10 = vmul.f32 %v9035_v23, %v3172_v14  ;;  %v9963_v23 = vld [vmem:[#allocation73_spill] sm:$0xff] }
 0xa0d   : > { %3942 = vst.msk [vmem:[#allocation4 + $0x190] sm:$0xff] %vm1333_vm2, %v3926_v49  ;;  %v3825_v38 = vsub.f32 %v9963_v23, %v3804_v61 }
 0xa0f   : > { %v3855_v5 = vmul.f32 1.442695, %v3825_v38  ;;  %v3868_v38 = vld [vmem:[#allocation4 + $0x1c0] sm:$0xff] }
 0xa10   : > { %3900 = vadd.xlane.f32.xlu0 %v9178_v9 }
 0xa31   : > { %3908 = vadd.xlane.f32.xlu2 %v9237_v31 }
 0xa35   : > { %v3020_v3 = vpop.xlane.xlu0 %3019 }
 0xa36   : > { %v3037_v9 = vadd.f32 %v3020_v3, %v2989_v44  ;;  %v3684_v44 = vsub.f32 %v9962_v13, %v8675_v15  ;;  %v3174_v3 = vld [vmem:[#allocation5 + $0x30] sm:$0xff]  ;;  %v9964_v15 = vld [vmem:[#allocation61_spill] sm:$0xff] }
 0xa38   : > { %3053 = vst.msk [vmem:[#allocation4 + $0x170] sm:$0xff] %vm1333_vm2, %v3037_v9  ;;  %v3270_v9 = vmul.f32 %v9057_v0, %v3174_v3 }
 0xa3b   : > { %v3903_v6 = vpop.xlane.xlu2 %3902 }
 0xa3c   : > { %v3929_v35 = vadd.f32 %v3903_v6, %v3881_v21 }
 0xa3e   : > { %3945 = vst.msk [vmem:[#allocation4 + $0x1a8] sm:$0xff] %vm1333_vm2, %v3929_v35  ;;  %v3701_v35 = vmul.f32 1.442695, %v3684_v44  ;;  %v4021_v44 = vpop.f32.mrf.mxu1 }
 0xa43   : > { %v3764_v50 = vpop.permute.xlu2 %3763 }
 0xa44   : > { %v3817_v4 = vsub.f32 %v9959_v40, %v3764_v50  ;;  %v3687_v40 = vsub.f32 %v9964_v15, %v8685_v30 }
 0xa46   : > { %v3839_v25 = vmul.f32 1.442695, %v3817_v4  ;;  %v9275_v4 = vpop.f32.mrf.mxu2  ;;  %v3707_v0 = vmul.f32 1.442695, %v3687_v40 }
 0xa48   : > { %6013 = vpow2.f32 %v3839_v25  ;;  %v3299_v55 = vpop.permute.xlu0 %3298 }
 0xa49   : > { %v3345_v34 = vadd.f32 %v3299_v55, %v3265_v51  ;;  %3312 = vrot.lane.b32.xlu2 %v3144_v2, %s6499_s11  ;;  %6015 = vpow2.f32 %v3849_v27 }
 0xa4a   : > { %6017 = vpow2.f32 %v3701_v35 }
 0xa4b   : > { %3362 = vst.msk [vmem:[#allocation5 + $0x8] sm:$0xff] %vm3360_vm4, %v3345_v34  ;;  %v3779_v32 = vpop.permute.xlu2 %3778  ;;  %6019 = vpow2.f32 %v3855_v5  ;;  %v3864_v34 = vld [vmem:[#allocation4 + $0x1a0] sm:$0xff]  ;;  %v9304_v5 = vpop.f32.mrf.mxu1 }
 0xa4c   : > { %6021 = vpow2.f32 %v3707_v0 }
 0xa4e   : > { %v6014_v1 = vpop.eup %6013  ;;  %v9281_v51 = vpop.f32.mrf.mxu2 }
 0xa4f   : > { %3904 = vadd.xlane.f32.xlu1 %v6014_v1  ;;  %4038 = vmatmul.f32.gmra.mxu1 %v6014_v1  ;;  %v9271_v50 = vpop.eup %6015 }
 0xa50   : > { %v3303_v7 = vpop.permute.xlu0 %3302  ;;  %v6018_v61 = vpop.eup %6017 }
 0xa51   : > { %v3347_v52 = vadd.f32 %v3303_v7, %v3267_v12  ;;  %v9278_v25 = vpop.eup %6019 }
 0xa52   : > { %v6022_v30 = vpop.eup %6021 }
 0xa53   : > { %3364 = vst.msk [vmem:[#allocation5 + $0x18] sm:$0xff] %vm3360_vm4, %v3347_v52  ;;  %v9254_v54 = vpop.permute.xlu2 %3793  ;;  %v3880_v1 = vmul.f32 %v6022_v30, %v3864_v34  ;;  %v9965_v52 = vld [vmem:[#allocation59_spill] sm:$0xff] }
 0xa54   : > { %v3820_v14 = vsub.f32 %v9965_v52, %v3779_v32  ;;  %v9967_v32 = vld [vmem:[#allocation68_spill] sm:$0xff]  ;;  %v9972_v52 = vld [vmem:[#allocation71_spill] sm:$0xff] }
 0xa55   : > { %v3690_v3 = vsub.f32 %v9967_v32, %v9961_v42  ;;  %v3866_v32 = vld [vmem:[#allocation4 + $0x1b0] sm:$0xff] }
 0xa56   : > { %v9284_v60 = vpop.f32.mrf.mxu2 }
 0xa5b   : > { %v3305_v49 = vpop.permute.xlu2 %3304 }
 0xa5c   : > { %v3348_v8 = vadd.f32 %v3305_v49, %v3268_v10  ;;  %v3845_v49 = vmul.f32 1.442695, %v3820_v14  ;;  %v3689_v14 = vsub.f32 %v9972_v52, %v9952_v26 }
 0xa5e   : > { %3365 = vst.msk [vmem:[#allocation5 + $0x20] sm:$0xff] %vm3360_vm4, %v3348_v8  ;;  %v9288_v10 = vpop.f32.mrf.mxu2  ;;  %v9966_v8 = vld [vmem:[#allocation39_spill] sm:$0xff]  ;;  %6023 = vpow2.f32 %v3845_v49 }
 0xa5f   : > { %v3691_v16 = vsub.f32 %v9966_v8, %v8635_v29  ;;  %v3711_v8 = vmul.f32 1.442695, %v3689_v14 }
 0xa61   : > { %v3715_v48 = vmul.f32 1.442695, %v3691_v16 }
 0xa63   : > { %v9259_v43 = vpop.permute.xlu2 %3808  ;;  %6025 = vpow2.f32 %v3715_v48 }
 0xa64   : > { %v9294_v13 = vpop.eup %6023 }
 0xa66   : > { %v9292_v27 = vpop.f32.mrf.mxu2 }
 0xa68   : > { %3768 = vperm.xlu1 %5756, %v9961_v42  }
 0xa69   : > { %v9299_v23 = vpop.eup %6025 }
 0xa6a   : > { %v3884_v15 = vmul.f32 %v9299_v23, %v3868_v38 }
 0xa6b   : > { %v3309_v21 = vpop.permute.xlu2 %3308 }
 0xa6c   : > { %v3350_v6 = vadd.f32 %v3309_v21, %v3270_v9  ;;  %v3713_v9 = vmul.f32 1.442695, %v3690_v3  ;;  %v9968_v21 = vld [vmem:[#allocation70_spill] sm:$0xff] }
 0xa6e   : > { %3367 = vst.msk [vmem:[#allocation5 + $0x30] sm:$0xff] %vm3360_vm4, %v3350_v6  ;;  %v3165_v29 = vpop.f32.mrf.mxu2  ;;  %6027 = vpow2.f32 %v3713_v9  ;;  %v9969_v6 = vld [vmem:[#allocation82_spill] sm:$0xff] }
 0xa6f   : > { %v3693_v35 = vsub.f32 %v9969_v6, %v9968_v21  ;;  %v9973_v6 = vld [vmem:[#allocation72_spill] sm:$0xff] }
 0xa70   : > { %3306 = vrot.lane.b32.xlu1 %v9224_v19, %s6499_s11  ;;  %v3877_v19 = vmul.f32 %v6018_v61, %v3861_v45  ;;  %v3176_v45 = vld [vmem:[#allocation5 + $0x40] sm:$0xff] }
 0xa72   : > { %3914 = vadd.xlane.f32.xlu2 %v9271_v50 }
 0xa74   : > { %v9308_v42 = vpop.eup %6027 }
 0xa7a   : > { %3920 = vadd.xlane.f32.xlu2 %v9278_v25 }
 0xa7b   : > { %v3895_v2 = vpop.xlane.xlu0 %3894 }
 0xa7c   : > { %v3925_v55 = vadd.f32 %v3895_v2, %v3877_v19  ;;  %v9970_v19 = vld [vmem:[#allocation84_spill] sm:$0xff]  ;;  %v9971_v2 = vld [vmem:[#allocation87_spill] sm:$0xff] }
 0xa7e   : > { %3941 = vst.msk [vmem:[#allocation4 + $0x188] sm:$0xff] %vm1333_vm2, %v3925_v55  ;;  %v3696_v55 = vsub.f32 %v9971_v2, %v9970_v19 }
 0xa83   : > { %v3901_v12 = vpop.xlane.xlu0 %3900 }
 0xa84   : > { %v3928_v7 = vadd.f32 %v3901_v12, %v3880_v1  ;;  %v9314_v1 = vpop.f32.mrf.mxu1 }
 0xa86   : > { %3944 = vst.msk [vmem:[#allocation4 + $0x1a0] sm:$0xff] %vm1333_vm2, %v3928_v7  ;;  %v3725_v7 = vmul.f32 1.442695, %v3696_v55 }
 0xa8c   : > { %v4030_v16 = vpop.f32.mrf.mxu1 }
 0xa92   : > { %4092 = vperm.xlu2 %5757, %v6018_v61   ;;  %v3719_v61 = vmul.f32 1.442695, %v3693_v35  ;;  %v3694_v35 = vsub.f32 %v9973_v6, %v9946_v62  ;;  %v3871_v62 = vld [vmem:[#allocation4 + $0x1d8] sm:$0xff] }
 0xa94   : > { %6029 = vpow2.f32 %v3719_v61  ;;  %v9329_v26 = vpop.f32.mrf.mxu1  ;;  %v9975_v61 = vld [vmem:[#allocation45_spill] sm:$0xff] }
 0xa95   : > { %6031 = vpow2.f32 %v3725_v7 }
 0xa96   : > { %6033 = vpow2.f32 %v3711_v8 }
 0xa9a   : > { %3910 = vadd.xlane.f32.xlu1 %v9294_v13  ;;  %4107 = vperm.xlu2 %5757, %v6022_v30   ;;  %v3272_v30 = vmul.f32 %v9062_v22, %v3176_v45  ;;  %v9319_v49 = vpop.eup %6029 }
 0xa9b   : > { %v9323_v22 = vpop.eup %6031 }
 0xa9c   : > { %v9327_v48 = vpop.eup %6033 }
 0xa9d   : > { %v3882_v3 = vmul.f32 %v9327_v48, %v3866_v32 }
 0xaa2   : > { %3326 = vrot.lane.b32.xlu2 %v3165_v29, %s6499_s11  ;;  %v9336_v29 = vpop.f32.mrf.mxu1 }
 0xaa4   : > { %v3909_v40 = vpop.xlane.xlu2 %3908 }
 0xaa5   : > { %v3932_v0 = vadd.f32 %v3909_v40, %v3884_v15  ;;  %v3721_v15 = vmul.f32 1.442695, %v3694_v35  ;;  %v9977_v35 = vld [vmem:[#allocation74_spill] sm:$0xff] }
 0xaa7   : > { %3948 = vst.msk [vmem:[#allocation4 + $0x1c0] sm:$0xff] %vm1333_vm2, %v3932_v0  ;;  %6035 = vpow2.f32 %v3721_v15  ;;  %v3692_v15 = vsub.f32 %v9977_v35, %v9953_v59  ;;  %v9978_v59 = vld [vmem:[#allocation79_spill] sm:$0xff]  ;;  %v9981_v35 = vld [vmem:[#allocation65_spill] sm:$0xff] }
 0xaaa   : > { %4122 = vperm.xlu2 %5757, %v9308_v42  }
 0xaac   : > { %v3313_v34 = vpop.permute.xlu2 %3312 }
 0xaad   : > { %v3352_v12 = vadd.f32 %v3313_v34, %v3272_v30  ;;  %v3173_v30 = vld [vmem:[#allocation5 + $0x28] sm:$0xff]  ;;  %v9347_v34 = vpop.eup %6035 }
 0xaaf   : > { %3369 = vst.msk [vmem:[#allocation5 + $0x40] sm:$0xff] %vm3360_vm4, %v3352_v12  ;;  %v3269_v12 = vmul.f32 %v9045_v37, %v3173_v30  ;;  %v3874_v37 = vld [vmem:[#allocation4 + $0x1f0] sm:$0xff]  ;;  %v3826_v30 = vsub.f32 %v9978_v59, %v9259_v43 }
 0xab2   : > { %4137 = vperm.xlu2 %5757, %v9319_v49  }
 0xab3   : > { %3783 = vperm.xlu1 %5756, %v9968_v21  }
 0xaba   : > { %4152 = vperm.xlu2 %5757, %v9323_v22  }
 0xabb   : > { %3798 = vperm.xlu1 %5756, %v9970_v19   ;;  %v9976_v19 = vld [vmem:[#allocation62_spill] sm:$0xff] }
 0xabc   : > { %v3823_v2 = vsub.f32 %v9976_v19, %v9254_v54  ;;  %v3869_v19 = vld [vmem:[#allocation4 + $0x1c8] sm:$0xff] }
 0xabe   : > { %v3851_v7 = vmul.f32 1.442695, %v3823_v2 }
 0xac2   : > { %v3905_v9 = vpop.xlane.xlu1 %3904  ;;  %4197 = vrot.lane.b32.xlu2 %v4021_v44, %s6498_s10  ;;  %v9974_v44 = vld [vmem:[#allocation81_spill] sm:$0xff] }
 0xac3   : > { %v3930_v38 = vadd.f32 %v3905_v9, %v3882_v3  ;;  %3310 = vrot.lane.b32.xlu1 %v9245_v11, %s6499_s11  ;;  %v3697_v0 = vsub.f32 %v9974_v44, %v9948_v24  ;;  %v3887_v24 = vmul.f32 %v9347_v34, %v3871_v62  ;;  %v3717_v44 = vmul.f32 1.442695, %v3692_v15 }
 0xac4   : > { %v3695_v15 = vsub.f32 %v9981_v35, %v9954_v33  ;;  %v3872_v33 = vld [vmem:[#allocation4 + $0x1e0] sm:$0xff] }
 0xac5   : > { %3946 = vst.msk [vmem:[#allocation4 + $0x1b0] sm:$0xff] %vm1333_vm2, %v3930_v38  ;;  %v3727_v55 = vmul.f32 1.442695, %v3697_v0  ;;  %v3183_v0 = vld [vmem:[#allocation5 + $0x78] sm:$0xff] }
 0xaca   : > { %4203 = vrot.lane.b32.xlu2 %v4030_v16, %s6498_s10 }
 0xacc   : > { %v4039_v21 = vpop.f32.mrf.mxu1 }
 0xad2   : > { %4209 = vrot.lane.b32.xlu2 %v4039_v21, %s6498_s10 }
 0xada   : > { %v3769_v40 = vpop.permute.xlu1 %3768 }
 0xadb   : > { %v3818_v11 = vsub.f32 %v9975_v61, %v3769_v40  ;;  %v3279_v61 = vmul.f32 %v9141_v57, %v3183_v0  ;;  %v9979_v57 = vld [vmem:[#allocation50_spill] sm:$0xff] }
 0xadd   : > { %v3841_v45 = vmul.f32 1.442695, %v3818_v11 }
 0xadf   : > { %6037 = vpow2.f32 %v3841_v45 }
 0xae0   : > { %6039 = vpow2.f32 %v3727_v55 }
 0xae1   : > { %6041 = vpow2.f32 %v3851_v7 }
 0xae2   : > { %v3307_v52 = vpop.permute.xlu1 %3306  ;;  %6043 = vpow2.f32 %v3717_v44 }
 0xae3   : > { %v3349_v14 = vadd.f32 %v3307_v52, %v3269_v12  ;;  %v3857_v12 = vmul.f32 1.442695, %v3826_v30 }
 0xae5   : > { %v6038_v8 = vpop.eup %6037  ;;  %3366 = vst.msk [vmem:[#allocation5 + $0x28] sm:$0xff] %vm3360_vm4, %v3349_v14  ;;  %v3915_v16 = vpop.xlane.xlu2 %3914  ;;  %6045 = vpow2.f32 %v3857_v12  ;;  %v9980_v14 = vld [vmem:[#allocation77_spill] sm:$0xff]  ;;  %v3179_v12 = vld [vmem:[#allocation5 + $0x58] sm:$0xff] }
 0xae6   : > { %v3935_v54 = vadd.f32 %v3915_v16, %v3887_v24  ;;  %3906 = vadd.xlane.f32.xlu0 %v6038_v8  ;;  %4041 = vmatmul.f32.gmra.mxu1 %v6038_v8  ;;  %v9353_v32 = vpop.eup %6039 }
 0xae7   : > { %v6042_v3 = vpop.eup %6041  ;;  %v3890_v9 = vmul.f32 %v9353_v32, %v3874_v37  ;;  %v3175_v37 = vld [vmem:[#allocation5 + $0x38] sm:$0xff] }
 0xae8   : > { %3951 = vst.msk [vmem:[#allocation4 + $0x1d8] sm:$0xff] %vm1333_vm2, %v3935_v54  ;;  %v3271_v43 = vmul.f32 %v9051_v41, %v3175_v37  ;;  %v3723_v41 = vmul.f32 1.442695, %v3695_v15 }
 0xaed   : > { %3916 = vadd.xlane.f32.xlu1 %v6042_v3  ;;  %v3921_v38 = vpop.xlane.xlu2 %3920 }
 0xaee   : > { %v3938_v21 = vadd.f32 %v3921_v38, %v3890_v9  ;;  %4044 = vmatmul.f32.gmra.mxu1 %v9237_v31  ;;  %v6044_v31 = vpop.eup %6043 }
 0xaef   : > { %v6046_v8 = vpop.eup %6045 }
 0xaf0   : > { %3954 = vst.msk [vmem:[#allocation4 + $0x1f0] sm:$0xff] %vm1333_vm2, %v3938_v21 }
 0xaf5   : > { %v9358_v6 = vpop.permute.xlu2 %4092 }
 0xaf6   : > { %4047 = vmatmul.f32.gmra.mxu1 %v9294_v13  ;;  %v3885_v13 = vmul.f32 %v6044_v31, %v3869_v19 }
 0xafd   : > { %v9363_v40 = vpop.permute.xlu2 %4107 }
 0xb05   : > { %v3327_v11 = vpop.permute.xlu2 %3326 }
 0xb06   : > { %v3359_v45 = vadd.f32 %v3327_v11, %v3279_v61  ;;  %3314 = vrot.lane.b32.xlu1 %v9261_v56, %s6499_s11 }
 0xb08   : > { %3376 = vst.msk [vmem:[#allocation5 + $0x78] sm:$0xff] %vm3360_vm4, %v3359_v45 }
 0xb0d   : > { %v3911_v2 = vpop.xlane.xlu1 %3910 }
 0xb0e   : > { %v3933_v55 = vadd.f32 %v3911_v2, %v3885_v13 }
 0xb10   : > { %3949 = vst.msk [vmem:[#allocation4 + $0x1c8] sm:$0xff] %vm1333_vm2, %v3933_v55 }
 0xb25   : > { %v3784_v62 = vpop.permute.xlu1 %3783 }
 0xb26   : > { %v3821_v7 = vsub.f32 %v9979_v57, %v3784_v62  ;;  %v3275_v62 = vmul.f32 %v9109_v20, %v3179_v12  ;;  %v4077_v12 = vld [vmem:[#allocation5 + $0x40] sm:$0xff] }
 0xb28   : > { %v3847_v52 = vmul.f32 1.442695, %v3821_v7 }
 0xb2a   : > { %6047 = vpow2.f32 %v3847_v52 }
 0xb2d   : > { %v3799_v56 = vpop.permute.xlu1 %3798 }
 0xb2e   : > { %v3824_v24 = vsub.f32 %v9980_v14, %v3799_v56 }
 0xb30   : > { %v6048_v16 = vpop.eup %6047  ;;  %v3853_v54 = vmul.f32 1.442695, %v3824_v24  ;;  %3922 = vadd.xlane.f32.xlu1 %v6046_v8 }
 0xb31   : > { %3912 = vadd.xlane.f32.xlu0 %v6048_v16  ;;  %4050 = vmatmul.f32.gmra.mxu1 %v6048_v16 }
 0xb32   : > { %6049 = vpow2.f32 %v3853_v54 }
 0xb33   : > { %6051 = vpow2.f32 %v3723_v41 }
 0xb35   : > { %v3311_v9 = vpop.permute.xlu1 %3310 }
 0xb36   : > { %v3351_v38 = vadd.f32 %v3311_v9, %v3271_v43  ;;  %v3180_v43 = vld [vmem:[#allocation5 + $0x60] sm:$0xff] }
 0xb37   : > { %v3276_v9 = vmul.f32 %v9133_v28, %v3180_v43 }
 0xb38   : > { %v6050_v21 = vpop.eup %6049  ;;  %3368 = vst.msk [vmem:[#allocation5 + $0x38] sm:$0xff] %vm3360_vm4, %v3351_v38 }
 0xb39   : > { %3918 = vadd.xlane.f32.xlu0 %v6050_v21  ;;  %4053 = vmatmul.f32.gmra.mxu1 %v9271_v50  ;;  %v3867_v50 = vld [vmem:[#allocation4 + $0x1b8] sm:$0xff]  ;;  %v6052_v44 = vpop.eup %6051 }
 0xb41   : > { %4056 = vmatmul.f32.gmra.mxu1 %v6042_v3 }
 0xb49   : > { %3318 = vrot.lane.b32.xlu1 %v9281_v51, %s6499_s11  ;;  %4059 = vmatmul.f32.gmra.mxu1 %v6050_v21  ;;  %v3883_v51 = vmul.f32 %v9308_v42, %v3867_v50 }
 0xb4d   : > { %3316 = vrot.lane.b32.xlu0 %v9275_v4, %s6499_s11 }
 0xb51   : > { %3322 = vrot.lane.b32.xlu1 %v9288_v10, %s6499_s11  ;;  %4062 = vmatmul.f32.gmra.mxu1 %v9278_v25  ;;  %v3888_v25 = vmul.f32 %v6052_v44, %v3872_v33  ;;  %v3182_v33 = vld [vmem:[#allocation5 + $0x70] sm:$0xff] }
 0xb55   : > { %3320 = vrot.lane.b32.xlu0 %v9284_v60, %s6499_s11 }
 0xb59   : > { %4097 = vperm.xlu1 %5756, %v9227_v18   ;;  %v3907_v3 = vpop.xlane.xlu0 %3906  ;;  %4065 = vmatmul.f32.gmra.mxu1 %v6046_v8  ;;  %v9982_v18 = vld [vmem:[#allocation69_spill] sm:$0xff] }
 0xb5a   : > { %v3931_v4 = vadd.f32 %v3907_v3, %v3883_v51  ;;  %v3698_v42 = vsub.f32 %v9982_v18, %v9956_v46  ;;  %v3181_v8 = vld [vmem:[#allocation5 + $0x68] sm:$0xff] }
 0xb5b   : > { %v3277_v54 = vmul.f32 %v9103_v17, %v3181_v8  ;;  %v4069_v17 = vld [vmem:[#allocation5] sm:$0xff] }
 0xb5c   : > { %3947 = vst.msk [vmem:[#allocation4 + $0x1b8] sm:$0xff] %vm1333_vm2, %v3931_v4  ;;  %v3729_v11 = vmul.f32 1.442695, %v3698_v42  ;;  %v4075_v4 = vld [vmem:[#allocation5 + $0x30] sm:$0xff] }
 0xb5d   : > { %4087 = vperm.xlu0 %5758, %v9198_v53  }
 0xb5e   : > { %6053 = vpow2.f32 %v3729_v11 }
 0xb60   : > { %v3917_v10 = vpop.xlane.xlu1 %3916 }
 0xb61   : > { %v3936_v0 = vadd.f32 %v3917_v10, %v3888_v25  ;;  %4117 = vperm.xlu1 %5756, %v9327_v48   ;;  %v3177_v48 = vld [vmem:[#allocation5 + $0x48] sm:$0xff]  ;;  %v3278_v10 = vmul.f32 %v9139_v36, %v3182_v33 }
 0xb62   : > { %v3273_v45 = vmul.f32 %v9099_v58, %v3177_v48  ;;  %v3875_v58 = vld [vmem:[#allocation4 + $0x1f8] sm:$0xff] }
 0xb63   : > { %3952 = vst.msk [vmem:[#allocation4 + $0x1e0] sm:$0xff] %vm1333_vm2, %v3936_v0  ;;  %v4042_v60 = vpop.f32.mrf.mxu1 }
 0xb64   : > { %v6054_v19 = vpop.eup %6053 }
 0xb65   : > { %3324 = vrot.lane.b32.xlu0 %v9292_v27, %s6499_s11  ;;  %v3891_v46 = vmul.f32 %v6054_v19, %v3875_v58 }
 0xb69   : > { %4132 = vperm.xlu1 %5756, %v6044_v31  }
 0xb6b   : > { %v4045_v61 = vpop.f32.mrf.mxu1 }
 0xb6d   : > { %4102 = vperm.xlu0 %5758, %v9214_v39   ;;  %v3870_v39 = vld [vmem:[#allocation4 + $0x1d0] sm:$0xff] }
 0xb71   : > { %4147 = vperm.xlu1 %5756, %v6052_v44  }
 0xb73   : > { %v4048_v53 = vpop.f32.mrf.mxu1 }
 0xb74   : > { %4215 = vrot.lane.b32.xlu2 %v4048_v53, %s6498_s10 }
 0xb75   : > { %4112 = vperm.xlu0 %5758, %v9241_v63   ;;  %v9415_v63 = vpop.permute.xlu2 %4122 }
 0xb78   : > { %v3315_v27 = vpop.permute.xlu1 %3314 }
 0xb79   : > { %v3353_v31 = vadd.f32 %v3315_v27, %v3273_v45  ;;  %4162 = vperm.xlu1 %5756, %v6054_v19   ;;  %v4072_v19 = vld [vmem:[#allocation5 + $0x18] sm:$0xff] }
 0xb7b   : > { %3370 = vst.msk [vmem:[#allocation5 + $0x48] sm:$0xff] %vm3360_vm4, %v3353_v31 }
 0xb7d   : > { %4127 = vperm.xlu0 %5758, %v9299_v23   ;;  %v9422_v2 = vpop.permute.xlu2 %4137 }
 0xb81   : > { %4201 = vrot.lane.b32.xlu1 %v9314_v1, %s6498_s10  ;;  %v3886_v1 = vmul.f32 %v9319_v49, %v3870_v39 }
 0xb85   : > { %4142 = vperm.xlu0 %5758, %v9347_v34   ;;  %v9426_v30 = vpop.permute.xlu2 %4152 }
 0xb89   : > { %4207 = vrot.lane.b32.xlu1 %v9336_v29, %s6498_s10 }
 0xb8d   : > { %4157 = vperm.xlu0 %5758, %v9353_v32   ;;  %v4198_v16 = vpop.permute.xlu2 %4197 }
 0xb91   : > { %4213 = vrot.lane.b32.xlu1 %v4045_v61, %s6498_s10  ;;  %v4078_v61 = vld [vmem:[#allocation5 + $0x48] sm:$0xff] }
 0xb95   : > { %4199 = vrot.lane.b32.xlu0 %v9304_v5, %s6498_s10  ;;  %v3873_v5 = vld [vmem:[#allocation4 + $0x1e8] sm:$0xff]  ;;  %v4204_v35 = vpop.permute.xlu2 %4203 }
 0xb9d   : > { %4205 = vrot.lane.b32.xlu0 %v9329_v26, %s6498_s10  ;;  %v3889_v26 = vmul.f32 %v9323_v22, %v3873_v5  ;;  %v3178_v22 = vld [vmem:[#allocation5 + $0x50] sm:$0xff]  ;;  %v4210_v25 = vpop.permute.xlu2 %4209 }
 0xb9e   : > { %v3274_v52 = vmul.f32 %v9084_v47, %v3178_v22  ;;  %v4070_v22 = vld [vmem:[#allocation5 + $0x8] sm:$0xff] }
 0xba3   : > { %v3923_v23 = vpop.xlane.xlu1 %3922 }
 0xba4   : > { %v3939_v34 = vadd.f32 %v3923_v23, %v3891_v46  ;;  %v3913_v29 = vpop.xlane.xlu0 %3912 }
 0xba5   : > { %v3934_v13 = vadd.f32 %v3913_v29, %v3886_v1  ;;  %4211 = vrot.lane.b32.xlu0 %v4042_v60, %s6498_s10  ;;  %v4071_v1 = vld [vmem:[#allocation5 + $0x10] sm:$0xff] }
 0xba6   : > { %3955 = vst.msk [vmem:[#allocation4 + $0x1f8] sm:$0xff] %vm1333_vm2, %v3939_v34 }
 0xba7   : > { %3950 = vst.msk [vmem:[#allocation4 + $0x1d0] sm:$0xff] %vm1333_vm2, %v3934_v13 }
 0xbac   : > { %v3919_v32 = vpop.xlane.xlu0 %3918 }
 0xbad   : > { %v3937_v55 = vadd.f32 %v3919_v32, %v3889_v26  ;;  %v4074_v26 = vld [vmem:[#allocation5 + $0x28] sm:$0xff] }
 0xbae   : > { %v4051_v59 = vpop.f32.mrf.mxu1 }
 0xbaf   : > { %3953 = vst.msk [vmem:[#allocation4 + $0x1e8] sm:$0xff] %vm1333_vm2, %v3937_v55  ;;  %4217 = vrot.lane.b32.xlu0 %v4051_v59, %s6498_s10 }
 0xbb6   : > { %v4054_v49 = vpop.f32.mrf.mxu1 }
 0xbb7   : > { %4219 = vrot.lane.b32.xlu1 %v4054_v49, %s6498_s10 }
 0xbbb   : > { %v3319_v57 = vpop.permute.xlu1 %3318 }
 0xbbc   : > { %v3355_v7 = vadd.f32 %v3319_v57, %v3275_v62 }
 0xbbe   : > { %3372 = vst.msk [vmem:[#allocation5 + $0x58] sm:$0xff] %vm3360_vm4, %v3355_v7  ;;  %v4057_v56 = vpop.f32.mrf.mxu1 }
 0xbbf   : > { %v3317_v14 = vpop.permute.xlu0 %3316  ;;  %4221 = vrot.lane.b32.xlu2 %v4057_v56, %s6498_s10 }
 0xbc0   : > { %v3354_v24 = vadd.f32 %v3317_v14, %v3274_v52  ;;  %v4166_v52 = vmul.f32 %v9358_v6, %v4070_v22 }
 0xbc2   : > { %3371 = vst.msk [vmem:[#allocation5 + $0x50] sm:$0xff] %vm3360_vm4, %v3354_v24  ;;  %v4073_v24 = vld [vmem:[#allocation5 + $0x20] sm:$0xff] }
 0xbc3   : > { %v3323_v37 = vpop.permute.xlu1 %3322  ;;  %v4169_v8 = vmul.f32 %v9363_v40, %v4073_v24 }
 0xbc4   : > { %v3357_v20 = vadd.f32 %v3323_v37, %v3277_v54  ;;  %v4076_v37 = vld [vmem:[#allocation5 + $0x38] sm:$0xff] }
 0xbc6   : > { %3374 = vst.msk [vmem:[#allocation5 + $0x68] sm:$0xff] %vm3360_vm4, %v3357_v20  ;;  %v4060_v47 = vpop.f32.mrf.mxu1  ;;  %v4172_v20 = vmul.f32 %v9415_v63, %v4076_v37 }
 0xbc7   : > { %v3321_v38 = vpop.permute.xlu0 %3320  ;;  %4223 = vrot.lane.b32.xlu0 %v4060_v47, %s6498_s10 }
 0xbc8   : > { %v3356_v21 = vadd.f32 %v3321_v38, %v3276_v9 }
 0xbca   : > { %3373 = vst.msk [vmem:[#allocation5 + $0x60] sm:$0xff] %vm3360_vm4, %v3356_v21 }
 0xbcb   : > { %v4098_v15 = vpop.permute.xlu1 %4097 }
 0xbcc   : > { %v4167_v34 = vmul.f32 %v4098_v15, %v4071_v1 }
 0xbcd   : > { %v4082_v33 = vld [vmem:[#allocation5 + $0x68] sm:$0xff] }
 0xbce   : > { %v4063_v41 = vpop.f32.mrf.mxu1  ;;  %v4216_v48 = vpop.permute.xlu2 %4215 }
 0xbcf   : > { %v4088_v50 = vpop.permute.xlu0 %4087  ;;  %4225 = vrot.lane.b32.xlu1 %v4063_v41, %s6498_s10 }
 0xbd0   : > { %v4165_v51 = vmul.f32 %v4088_v50, %v4069_v17  ;;  %v4080_v17 = vld [vmem:[#allocation5 + $0x58] sm:$0xff] }
 0xbd1   : > { %v4081_v43 = vld [vmem:[#allocation5 + $0x60] sm:$0xff] }
 0xbd2   : > { %v4245_v3 = vadd.f32 %v4198_v16, %v4165_v51 }
 0xbd3   : > { %v4118_v28 = vpop.permute.xlu1 %4117 }
 0xbd4   : > { %4262 = vst.msk [vmem:[#allocation5] sm:$0xff] %vm4261_vm5, %v4245_v3  ;;  %v4171_v44 = vmul.f32 %v4118_v28, %v4075_v4  ;;  %v4084_v3 = vld [vmem:[#allocation5 + $0x78] sm:$0xff] }
 0xbd6   : > { %v4251_v0 = vadd.f32 %v4210_v25, %v4171_v44  ;;  %v4066_v60 = vpop.f32.mrf.mxu1  ;;  %v4178_v25 = vmul.f32 %v9426_v30, %v4082_v33 }
 0xbd7   : > { %v3325_v18 = vpop.permute.xlu0 %3324  ;;  %4227 = vrot.lane.b32.xlu2 %v4066_v60, %s6498_s10 }
 0xbd8   : > { %4268 = vst.msk [vmem:[#allocation5 + $0x30] sm:$0xff] %vm4261_vm5, %v4251_v0  ;;  %v3358_v42 = vadd.f32 %v3325_v18, %v3278_v10 }
 0xbda   : > { %3375 = vst.msk [vmem:[#allocation5 + $0x70] sm:$0xff] %vm3360_vm4, %v3358_v42 }
 0xbdb   : > { %v4133_v11 = vpop.permute.xlu1 %4132 }
 0xbdc   : > { %v4174_v53 = vmul.f32 %v4133_v11, %v4078_v61 }
 0xbde   : > { %v4254_v45 = vadd.f32 %v4216_v48, %v4174_v53 }
 0xbdf   : > { %v4103_v27 = vpop.permute.xlu0 %4102 }
 0xbe0   : > { %4271 = vst.msk [vmem:[#allocation5 + $0x48] sm:$0xff] %vm4261_vm5, %v4254_v45  ;;  %v4168_v36 = vmul.f32 %v4103_v27, %v4072_v19 }
 0xbe1   : > { %v4083_v0 = vld [vmem:[#allocation5 + $0x70] sm:$0xff] }
 0xbe2   : > { %v4248_v31 = vadd.f32 %v4204_v35, %v4168_v36  ;;  %v4079_v35 = vld [vmem:[#allocation5 + $0x50] sm:$0xff] }
 0xbe3   : > { %v4148_v58 = vpop.permute.xlu1 %4147  ;;  %v4175_v40 = vmul.f32 %v9422_v2, %v4079_v35 }
 0xbe4   : > { %4265 = vst.msk [vmem:[#allocation5 + $0x18] sm:$0xff] %vm4261_vm5, %v4248_v31  ;;  %v4177_v47 = vmul.f32 %v4148_v58, %v4081_v43 }
 0xbe7   : > { %v4113_v39 = vpop.permute.xlu0 %4112 }
 0xbe8   : > { %v4170_v32 = vmul.f32 %v4113_v39, %v4074_v26 }
 0xbeb   : > { %v4163_v46 = vpop.permute.xlu1 %4162 }
 0xbec   : > { %v4180_v28 = vmul.f32 %v4163_v46, %v4084_v3 }
 0xbef   : > { %v4128_v23 = vpop.permute.xlu0 %4127 }
 0xbf0   : > { %v4173_v62 = vmul.f32 %v4128_v23, %v4077_v12 }
 0xbf3   : > { %v4202_v29 = vpop.permute.xlu1 %4201 }
 0xbf4   : > { %v4247_v13 = vadd.f32 %v4202_v29, %v4167_v34 }
 0xbf6   : > { %4264 = vst.msk [vmem:[#allocation5 + $0x10] sm:$0xff] %vm4261_vm5, %v4247_v13 }
 0xbf7   : > { %v4143_v5 = vpop.permute.xlu0 %4142 }
 0xbf8   : > { %v4176_v50 = vmul.f32 %v4143_v5, %v4080_v17 }
 0xbfb   : > { %v4208_v55 = vpop.permute.xlu1 %4207 }
 0xbfc   : > { %v4250_v59 = vadd.f32 %v4208_v55, %v4170_v32 }
 0xbfe   : > { %4267 = vst.msk [vmem:[#allocation5 + $0x28] sm:$0xff] %vm4261_vm5, %v4250_v59 }
 0xbff   : > { %v4158_v49 = vpop.permute.xlu0 %4157 }
 0xc00   : > { %v4179_v60 = vmul.f32 %v4158_v49, %v4083_v0 }
 0xc03   : > { %v4214_v57 = vpop.permute.xlu1 %4213 }
 0xc04   : > { %v4253_v7 = vadd.f32 %v4214_v57, %v4173_v62 }
 0xc06   : > { %4270 = vst.msk [vmem:[#allocation5 + $0x40] sm:$0xff] %vm4261_vm5, %v4253_v7 }
 0xc07   : > { %v4200_v56 = vpop.permute.xlu0 %4199 }
 0xc08   : > { %v4246_v14 = vadd.f32 %v4200_v56, %v4166_v52 }
 0xc0a   : > { %4263 = vst.msk [vmem:[#allocation5 + $0x8] sm:$0xff] %vm4261_vm5, %v4246_v14 }
 0xc0f   : > { %v4206_v16 = vpop.permute.xlu0 %4205 }
 0xc10   : > { %v4249_v54 = vadd.f32 %v4206_v16, %v4169_v8 }
 0xc12   : > { %4266 = vst.msk [vmem:[#allocation5 + $0x20] sm:$0xff] %vm4261_vm5, %v4249_v54 }
 0xc17   : > { %v4212_v9 = vpop.permute.xlu0 %4211 }
 0xc18   : > { %v4252_v6 = vadd.f32 %v4212_v9, %v4172_v20 }
 0xc19   : > { %v4222_v38 = vpop.permute.xlu2 %4221 }
 0xc1a   : > { %4269 = vst.msk [vmem:[#allocation5 + $0x38] sm:$0xff] %vm4261_vm5, %v4252_v6  ;;  %v4257_v21 = vadd.f32 %v4222_v38, %v4177_v47 }
 0xc1c   : > { %4274 = vst.msk [vmem:[#allocation5 + $0x60] sm:$0xff] %vm4261_vm5, %v4257_v21 }
 0xc21   : > { %v4218_v15 = vpop.permute.xlu0 %4217 }
 0xc22   : > { %v4255_v41 = vadd.f32 %v4218_v15, %v4175_v40 }
 0xc24   : > { %4272 = vst.msk [vmem:[#allocation5 + $0x50] sm:$0xff] %vm4261_vm5, %v4255_v41 }
 0xc29   : > { %v4220_v63 = vpop.permute.xlu1 %4219 }
 0xc2a   : > { %v4256_v51 = vadd.f32 %v4220_v63, %v4176_v50 }
 0xc2c   : > { %4273 = vst.msk [vmem:[#allocation5 + $0x58] sm:$0xff] %vm4261_vm5, %v4256_v51 }
 0xc31   : > { %v4228_v4 = vpop.permute.xlu2 %4227 }
 0xc32   : > { %v4260_v44 = vadd.f32 %v4228_v4, %v4180_v28 }
 0xc34   : > { %4277 = vst.msk [vmem:[#allocation5 + $0x78] sm:$0xff] %vm4261_vm5, %v4260_v44 }
 0xc39   : > { %v4224_v2 = vpop.permute.xlu0 %4223 }
 0xc3a   : > { %v4258_v10 = vadd.f32 %v4224_v2, %v4178_v25 }
 0xc3c   : > { %4275 = vst.msk [vmem:[#allocation5 + $0x68] sm:$0xff] %vm4261_vm5, %v4258_v10 }
 0xc40   : > { %4297 = sbr.rel (%p5374_p1) target bundleno = 3573 (0xdf5), region = 72 }
 0xc41   : > { %v4226_v18 = vpop.permute.xlu1 %4225 }
 0xc42   : > { %v4259_v42 = vadd.f32 %v4226_v18, %v4179_v60 }
 0xc44   : > { %4276 = vst.msk [vmem:[#allocation5 + $0x70] sm:$0xff] %vm4261_vm5, %v4259_v42 }
 0xc45   : > { %v4302_v61 = vld [vmem:[#allocation4 + $0x20] sm:$0xff]  ;;  %v4300_v11 = vld [vmem:[#allocation4 + $0x10] sm:$0xff]  ;;  %v6502_v48 = vmov 0   ;;  %v4303_v30 = vld [vmem:[#allocation4 + $0x28] sm:$0xff] }
 0xc46   : > { %v4298_v53 = vld [vmem:[#allocation4] sm:$0xff]  ;;  %6057 = vset.pattern.permute.xlu2 %v6502_v48  ;;  %6056 = vset.pattern.permute.xlu1 %v6502_v48  ;;  %6059 = vrcp.f32 %v4302_v61  ;;  %v4301_v45 = vld [vmem:[#allocation4 + $0x18] sm:$0xff]  ;;  %v4299_v19 = vld [vmem:[#allocation4 + $0x8] sm:$0xff] }
 0xc47   : > { %6055 = vset.pattern.permute.xlu0 %v6502_v48  ;;  %6061 = vrcp.f32 %v4300_v11  ;;  %v4306_v58 = vld [vmem:[#allocation4 + $0x40] sm:$0xff]  ;;  %v4305_v46 = vld [vmem:[#allocation4 + $0x38] sm:$0xff]  ;;  %v4304_v1 = vld [vmem:[#allocation4 + $0x30] sm:$0xff] }
 0xc48   : > { %6063 = vrcp.f32 %v4298_v53  ;;  %v4309_v29 = vld [vmem:[#allocation4 + $0x58] sm:$0xff]  ;;  %v4308_v5 = vld [vmem:[#allocation4 + $0x50] sm:$0xff]  ;;  %v4307_v32 = vld [vmem:[#allocation4 + $0x48] sm:$0xff] }
 0xc49   : > { %6065 = vrcp.f32 %v4303_v30  ;;  %v4312_v59 = vld [vmem:[#allocation4 + $0x70] sm:$0xff]  ;;  %v4311_v12 = vld [vmem:[#allocation4 + $0x68] sm:$0xff]  ;;  %v4310_v57 = vld [vmem:[#allocation4 + $0x60] sm:$0xff] }
 0xc4a   : > { %6067 = vrcp.f32 %v4301_v45  ;;  %v4459_v22 = vld [vmem:[#allocation4 + $0x88] sm:$0xff]  ;;  %v4458_v56 = vld [vmem:[#allocation4 + $0x80] sm:$0xff]  ;;  %v4313_v24 = vld [vmem:[#allocation4 + $0x78] sm:$0xff] }
 0xc4b   : > { %6069 = vrcp.f32 %v4299_v19  ;;  %v4462_v16 = vld [vmem:[#allocation4 + $0xa0] sm:$0xff]  ;;  %v4461_v37 = vld [vmem:[#allocation4 + $0x98] sm:$0xff]  ;;  %v4460_v43 = vld [vmem:[#allocation4 + $0x90] sm:$0xff] }
 0xc4c   : > { %v6060_v27 = vpop.eup %6059  ;;  %6071 = vrcp.f32 %v4306_v58  ;;  %v4465_v47 = vld [vmem:[#allocation4 + $0xb8] sm:$0xff]  ;;  %v4464_v38 = vld [vmem:[#allocation4 + $0xb0] sm:$0xff]  ;;  %v4463_v35 = vld [vmem:[#allocation4 + $0xa8] sm:$0xff] }
 0xc4d   : > { %v6062_v36 = vpop.eup %6061  ;;  %4368 = vperm.xlu2 %6057, %v6060_v27   ;;  %6073 = vrcp.f32 %v4305_v46  ;;  %v4468_v15 = vld [vmem:[#allocation4 + $0xd0] sm:$0xff]  ;;  %v4467_v17 = vld [vmem:[#allocation4 + $0xc8] sm:$0xff]  ;;  %v4466_v63 = vld [vmem:[#allocation4 + $0xc0] sm:$0xff] }
 0xc4e   : > { %v6064_v31 = vpop.eup %6063  ;;  %4358 = vperm.xlu1 %6056, %v6062_v36   ;;  %6075 = vrcp.f32 %v4304_v1  ;;  %v4626_v3 = vld [vmem:[#allocation4 + $0x140] sm:$0xff]  ;;  %v4471_v4 = vld [vmem:[#allocation4 + $0xe8] sm:$0xff]  ;;  %v4472_v0 = vld [vmem:[#allocation4 + $0xf0] sm:$0xff] }
 0xc4f   : > { %4348 = vperm.xlu0 %6055, %v6064_v31   ;;  %v6066_v39 = vpop.eup %6065  ;;  %6077 = vrcp.f32 %v4309_v29  ;;  %v4470_v33 = vld [vmem:[#allocation4 + $0xe0] sm:$0xff]  ;;  %v4631_v61 = vld [vmem:[#allocation4 + $0x168] sm:$0xff]  ;;  %v4469_v19 = vld [vmem:[#allocation4 + $0xd8] sm:$0xff] }
 0xc50   : > { %v6068_v23 = vpop.eup %6067  ;;  %6079 = vrcp.f32 %v4308_v5  ;;  %v4618_v2 = vld [vmem:[#allocation4 + $0x100] sm:$0xff]  ;;  %v4627_v53 = vld [vmem:[#allocation4 + $0x148] sm:$0xff] }
 0xc51   : > { %v6070_v34 = vpop.eup %6069  ;;  %6081 = vrcp.f32 %v4307_v32  ;;  %v4630_v18 = vld [vmem:[#allocation4 + $0x160] sm:$0xff] }
 0xc52   : > { %v6072_v13 = vpop.eup %6071  ;;  %6083 = vrcp.f32 %v4312_v59  ;;  %v4622_v30 = vld [vmem:[#allocation4 + $0x120] sm:$0xff] }
 0xc53   : > { %v6074_v26 = vpop.eup %6073  ;;  %6085 = vrcp.f32 %v4311_v12  ;;  %v4790_v36 = vld [vmem:[#allocation4 + $0x1e0] sm:$0xff] }
 0xc54   : > { %v6076_v55 = vpop.eup %6075  ;;  %6087 = vrcp.f32 %v4310_v57  ;;  %v4786_v58 = vld [vmem:[#allocation4 + $0x1c0] sm:$0xff]  ;;  %v4632_v57 = vld [vmem:[#allocation4 + $0x170] sm:$0xff] }
 0xc55   : > { %4373 = vperm.xlu2 %6057, %v6066_v39   ;;  %v6078_v49 = vpop.eup %6077  ;;  %6089 = vrcp.f32 %v4459_v22  ;;  %v4334_v46 = vld [vmem:[#allocation5 + $0x20] sm:$0xff]  ;;  %v4628_v22 = vld [vmem:[#allocation4 + $0x150] sm:$0xff] }
 0xc56   : > { %4363 = vperm.xlu1 %6056, %v6068_v23   ;;  %v6080_v62 = vpop.eup %6079  ;;  %6091 = vrcp.f32 %v4458_v56  ;;  %v4778_v12 = vld [vmem:[#allocation4 + $0x180] sm:$0xff] }
 0xc57   : > { %4353 = vperm.xlu0 %6055, %v6070_v34   ;;  %v6082_v7 = vpop.eup %6081  ;;  %6093 = vrcp.f32 %v4313_v24  ;;  %v4623_v34 = vld [vmem:[#allocation4 + $0x128] sm:$0xff]  ;;  %v4338_v56 = vld [vmem:[#allocation5 + $0x40] sm:$0xff] }
 0xc58   : > { %v6084_v52 = vpop.eup %6083  ;;  %6095 = vrcp.f32 %v4462_v16 }
 0xc59   : > { %v6086_v14 = vpop.eup %6085  ;;  %6097 = vrcp.f32 %v4461_v37 }
 0xc5a   : > { %v6088_v8 = vpop.eup %6087  ;;  %6099 = vrcp.f32 %v4460_v43 }
 0xc5b   : > { %v6090_v54 = vpop.eup %6089  ;;  %6101 = vrcp.f32 %v4465_v47  ;;  %v4332_v47 = vld [vmem:[#allocation5 + $0x10] sm:$0xff] }
 0xc5c   : > { %v6092_v20 = vpop.eup %6091  ;;  %6103 = vrcp.f32 %v4464_v38  ;;  %v4330_v38 = vld [vmem:[#allocation5] sm:$0xff] }
 0xc5d   : > { %4388 = vperm.xlu2 %6057, %v6072_v13   ;;  %v6094_v9 = vpop.eup %6093  ;;  %6105 = vrcp.f32 %v4463_v35  ;;  %v4619_v13 = vld [vmem:[#allocation4 + $0x108] sm:$0xff] }
 0xc5e   : > { %4383 = vperm.xlu1 %6056, %v6074_v26   ;;  %v6096_v6 = vpop.eup %6095  ;;  %6107 = vrcp.f32 %v4468_v15  ;;  %v4473_v26 = vld [vmem:[#allocation4 + $0xf8] sm:$0xff] }
 0xc5f   : > { %4378 = vperm.xlu0 %6055, %v6076_v55   ;;  %v6098_v21 = vpop.eup %6097  ;;  %6109 = vrcp.f32 %v4467_v17  ;;  %v4335_v55 = vld [vmem:[#allocation5 + $0x28] sm:$0xff] }
 0xc60   : > { %v6100_v40 = vpop.eup %6099  ;;  %6111 = vrcp.f32 %v4466_v63  ;;  %v4624_v63 = vld [vmem:[#allocation4 + $0x130] sm:$0xff] }
 0xc61   : > { %v6102_v41 = vpop.eup %6101  ;;  %6113 = vrcp.f32 %v4626_v3  ;;  %v4620_v3 = vld [vmem:[#allocation4 + $0x110] sm:$0xff] }
 0xc62   : > { %v6104_v50 = vpop.eup %6103  ;;  %6115 = vrcp.f32 %v4471_v4  ;;  %v4344_v4 = vld [vmem:[#allocation5 + $0x70] sm:$0xff] }
 0xc63   : > { %v6106_v51 = vpop.eup %6105  ;;  %6117 = vrcp.f32 %v4470_v33 }
 0xc64   : > { %v6108_v28 = vpop.eup %6107  ;;  %6119 = vrcp.f32 %v4618_v2 }
 0xc65   : > { %4403 = vperm.xlu2 %6057, %v6078_v49   ;;  %v6110_v44 = vpop.eup %6109  ;;  %6121 = vrcp.f32 %v4472_v0 }
 0xc66   : > { %4398 = vperm.xlu1 %6056, %v6080_v62   ;;  %v6112_v25 = vpop.eup %6111  ;;  %6123 = vrcp.f32 %v4630_v18  ;;  %v4783_v18 = vld [vmem:[#allocation4 + $0x1a8] sm:$0xff] }
 0xc67   : > { %4393 = vperm.xlu0 %6055, %v6082_v7   ;;  %v6114_v10 = vpop.eup %6113  ;;  %6125 = vrcp.f32 %v4631_v61 }
 0xc68   : > { %v6116_v60 = vpop.eup %6115  ;;  %6127 = vrcp.f32 %v4627_v53 }
 0xc69   : > { %v6118_v42 = vpop.eup %6117  ;;  %6129 = vrcp.f32 %v4622_v30 }
 0xc6a   : > { %v6120_v11 = vpop.eup %6119  ;;  %6131 = vrcp.f32 %v4469_v19 }
 0xc6b   : > { %v6122_v48 = vpop.eup %6121  ;;  %6133 = vrcp.f32 %v4790_v36 }
 0xc6c   : > { %v6124_v45 = vpop.eup %6123  ;;  %6135 = vrcp.f32 %v4786_v58 }
 0xc6d   : > { %4418 = vperm.xlu2 %6057, %v6084_v52   ;;  %v6126_v27 = vpop.eup %6125  ;;  %6137 = vrcp.f32 %v4623_v34 }
 0xc6e   : > { %4413 = vperm.xlu1 %6056, %v6086_v14   ;;  %v6128_v31 = vpop.eup %6127  ;;  %6139 = vrcp.f32 %v4619_v13  ;;  %v4788_v13 = vld [vmem:[#allocation4 + $0x1d0] sm:$0xff] }
 0xc6f   : > { %4408 = vperm.xlu0 %6055, %v6088_v8   ;;  %v6130_v39 = vpop.eup %6129  ;;  %6141 = vrcp.f32 %v4473_v26  ;;  %v4791_v8 = vld [vmem:[#allocation4 + $0x1e8] sm:$0xff] }
 0xc70   : > { %v6132_v29 = vpop.eup %6131  ;;  %6143 = vrcp.f32 %v4778_v12 }
 0xc71   : > { %v6134_v5 = vpop.eup %6133  ;;  %6145 = vrcp.f32 %v4632_v57 }
 0xc72   : > { %v6136_v32 = vpop.eup %6135  ;;  %6147 = vrcp.f32 %v4628_v22  ;;  %v4784_v22 = vld [vmem:[#allocation4 + $0x1b0] sm:$0xff] }
 0xc73   : > { %v6138_v62 = vpop.eup %6137  ;;  %6149 = vrcp.f32 %v4791_v8  ;;  %v4625_v8 = vld [vmem:[#allocation4 + $0x138] sm:$0xff] }
 0xc74   : > { %v6140_v7 = vpop.eup %6139 }
 0xc75   : > { %4513 = vperm.xlu2 %6057, %v6090_v54   ;;  %v6142_v52 = vpop.eup %6141  ;;  %v4787_v54 = vld [vmem:[#allocation4 + $0x1c8] sm:$0xff] }
 0xc76   : > { %4508 = vperm.xlu1 %6056, %v6092_v20   ;;  %v6144_v16 = vpop.eup %6143  ;;  %v4782_v20 = vld [vmem:[#allocation4 + $0x1a0] sm:$0xff]  ;;  %6151 = vrcp.f32 %v4787_v54  ;;  %v4343_v54 = vld [vmem:[#allocation5 + $0x68] sm:$0xff] }
 0xc77   : > { %4423 = vperm.xlu0 %6055, %v6094_v9   ;;  %v6146_v37 = vpop.eup %6145  ;;  %v4341_v9 = vld [vmem:[#allocation5 + $0x58] sm:$0xff]  ;;  %6153 = vrcp.f32 %v4782_v20 }
 0xc78   : > { %v6148_v43 = vpop.eup %6147 }
 0xc79   : > { %v6150_v17 = vpop.eup %6149 }
 0xc7d   : > { %4528 = vperm.xlu2 %6057, %v6096_v6  }
 0xc7e   : > { %4523 = vperm.xlu1 %6056, %v6098_v21  }
 0xc7f   : > { %4518 = vperm.xlu0 %6055, %v6100_v40  }
 0xc85   : > { %4543 = vperm.xlu2 %6057, %v6102_v41   ;;  %v4629_v41 = vld [vmem:[#allocation4 + $0x158] sm:$0xff] }
 0xc86   : > { %4538 = vperm.xlu1 %6056, %v6104_v50   ;;  %6155 = vrcp.f32 %v4629_v41 }
 0xc87   : > { %4533 = vperm.xlu0 %6055, %v6106_v51   ;;  %v6152_v51 = vpop.eup %6151  ;;  %6157 = vrcp.f32 %v4624_v63  ;;  %v4969_v63 = vld [vmem:[#allocation14 + $0x78] sm:$0xff] }
 0xc88   : > { %6159 = vrcp.f32 %v4620_v3  ;;  %4974 = vmatpush.msra.mxu0 %v4969_v63  ;;  %v4967_v3 = vld [vmem:[#allocation14 + $0x68] sm:$0xff]  ;;  %5462 = vmatpush.msra.mxu2 %v4969_v63 }
 0xc89   : > { %6161 = vrcp.f32 %v4783_v18  ;;  %5463 = vmatpush.msra.mxu3 %v4969_v63  ;;  %5461 = vmatpush.msra.mxu1 %v4969_v63 }
 0xc8d   : > { %4558 = vperm.xlu2 %6057, %v6108_v28   ;;  %v6154_v28 = vpop.eup %6153 }
 0xc8e   : > { %4553 = vperm.xlu1 %6056, %v6110_v44   ;;  %v4333_v44 = vld [vmem:[#allocation5 + $0x18] sm:$0xff] }
 0xc8f   : > { %4548 = vperm.xlu0 %6055, %v6112_v25   ;;  %v4331_v25 = vld [vmem:[#allocation5 + $0x8] sm:$0xff] }
 0xc95   : > { %4708 = vperm.xlu2 %6057, %v6114_v10  }
 0xc96   : > { %4573 = vperm.xlu1 %6056, %v6116_v60  }
 0xc97   : > { %4568 = vperm.xlu0 %6055, %v6118_v42   ;;  %v6156_v42 = vpop.eup %6155 }
 0xc98   : > { %v6158_v53 = vpop.eup %6157 }
 0xc99   : > { %v6160_v30 = vpop.eup %6159 }
 0xc9d   : > { %4668 = vperm.xlu2 %6057, %v6120_v11   ;;  %v4779_v11 = vld [vmem:[#allocation4 + $0x188] sm:$0xff] }
 0xc9e   : > { %4578 = vperm.xlu1 %6056, %v6122_v48   ;;  %v4633_v48 = vld [vmem:[#allocation4 + $0x178] sm:$0xff]  ;;  %6163 = vrcp.f32 %v4779_v11 }
 0xc9f   : > { %4728 = vperm.xlu0 %6055, %v6124_v45   ;;  %v4337_v45 = vld [vmem:[#allocation5 + $0x38] sm:$0xff]  ;;  %6165 = vrcp.f32 %v4633_v48 }
 0xca0   : > { %v4785_v11 = vld [vmem:[#allocation4 + $0x1b8] sm:$0xff] }
 0xca1   : > { %v4965_v48 = vld [vmem:[#allocation14 + $0x58] sm:$0xff] }
 0xca5   : > { %4733 = vperm.xlu2 %6057, %v6126_v27   ;;  %v4336_v27 = vld [vmem:[#allocation5 + $0x30] sm:$0xff] }
 0xca6   : > { %4713 = vperm.xlu1 %6056, %v6128_v31  }
 0xca7   : > { %4688 = vperm.xlu0 %6055, %v6130_v39   ;;  %v4369_v23 = vpop.permute.xlu2 %4368  ;;  %v4621_v39 = vld [vmem:[#allocation4 + $0x118] sm:$0xff] }
 0xca8   : > { %v4430_v1 = vmul.f32 %v4369_v23, %v4334_v46  ;;  %v6162_v46 = vpop.eup %6161  ;;  %6167 = vrcp.f32 %v4621_v39 }
 0xca9   : > { %v6164_v34 = vpop.eup %6163 }
 0xcaa   : > { %4446 = vst.msk [vmem:[#allocation5 + $0x20] sm:$0xff] %vm851_vm1, %v4430_v1  ;;  %v4792_v1 = vld [vmem:[#allocation4 + $0x1f0] sm:$0xff] }
 0xcab   : > { %6169 = vrcp.f32 %v4792_v1 }
 0xcac   : > { %6171 = vrcp.f32 %v4788_v13  ;;  %v4959_v13 = vld [vmem:[#allocation14 + $0x28] sm:$0xff] }
 0xcad   : > { %4563 = vperm.xlu2 %6057, %v6132_v29   ;;  %6173 = vrcp.f32 %v4784_v22  ;;  %v4957_v22 = vld [vmem:[#allocation14 + $0x18] sm:$0xff] }
 0xcae   : > { %4888 = vperm.xlu1 %6056, %v6134_v5   ;;  %v6166_v5 = vpop.eup %6165 }
 0xcaf   : > { %4868 = vperm.xlu0 %6055, %v6136_v32   ;;  %v4374_v59 = vpop.permute.xlu2 %4373  ;;  %v4340_v32 = vld [vmem:[#allocation5 + $0x50] sm:$0xff] }
 0xcb0   : > { %v4431_v49 = vmul.f32 %v4374_v59, %v4335_v55 }
 0xcb1   : > { %v4494_v55 = vld [vmem:[#allocation5 + $0x20] sm:$0xff] }
 0xcb2   : > { %4447 = vst.msk [vmem:[#allocation5 + $0x28] sm:$0xff] %vm851_vm1, %v4431_v49  ;;  %v4339_v49 = vld [vmem:[#allocation5 + $0x48] sm:$0xff] }
 0xcb5   : > { %4693 = vperm.xlu2 %6057, %v6138_v62  }
 0xcb6   : > { %4673 = vperm.xlu1 %6056, %v6140_v7  }
 0xcb7   : > { %4583 = vperm.xlu0 %6055, %v6142_v52   ;;  %v4389_v14 = vpop.permute.xlu2 %4388  ;;  %v6168_v52 = vpop.eup %6167 }
 0xcb8   : > { %v4434_v24 = vmul.f32 %v4389_v14, %v4338_v56  ;;  %v4780_v14 = vld [vmem:[#allocation4 + $0x190] sm:$0xff] }
 0xcb9   : > { %6175 = vrcp.f32 %v4780_v14 }
 0xcba   : > { %4450 = vst.msk [vmem:[#allocation5 + $0x40] sm:$0xff] %vm851_vm1, %v4434_v24  ;;  %v6170_v24 = vpop.eup %6169  ;;  %6177 = vrcp.f32 %v4625_v8 }
 0xcbd   : > { %4828 = vperm.xlu2 %6057, %v6144_v16   ;;  %v6172_v16 = vpop.eup %6171 }
 0xcbe   : > { %4738 = vperm.xlu1 %6056, %v6146_v37  }
 0xcbf   : > { %4718 = vperm.xlu0 %6055, %v6148_v43   ;;  %v4404_v6 = vpop.permute.xlu2 %4403  ;;  %v4342_v43 = vld [vmem:[#allocation5 + $0x60] sm:$0xff] }
 0xcc0   : > { %v4437_v21 = vmul.f32 %v4404_v6, %v4341_v9  ;;  %v4359_v35 = vpop.permute.xlu1 %4358 }
 0xcc1   : > { %v4428_v40 = vmul.f32 %v4359_v35, %v4332_v47  ;;  %v4349_v15 = vpop.permute.xlu0 %4348  ;;  %v6174_v35 = vpop.eup %6173 }
 0xcc2   : > { %4453 = vst.msk [vmem:[#allocation5 + $0x58] sm:$0xff] %vm851_vm1, %v4437_v21  ;;  %v4426_v50 = vmul.f32 %v4349_v15, %v4330_v38  ;;  %v4781_v21 = vld [vmem:[#allocation4 + $0x198] sm:$0xff]  ;;  %v6176_v41 = vpop.eup %6175 }
 0xcc3   : > { %4444 = vst.msk [vmem:[#allocation5 + $0x10] sm:$0xff] %vm851_vm1, %v4428_v40  ;;  %v4793_v15 = vld [vmem:[#allocation4 + $0x1f8] sm:$0xff]  ;;  %6179 = vrcp.f32 %v4781_v21 }
 0xcc4   : > { %4442 = vst.msk [vmem:[#allocation5] sm:$0xff] %vm851_vm1, %v4426_v50  ;;  %v6178_v50 = vpop.eup %6177  ;;  %6181 = vrcp.f32 %v4793_v15 }
 0xcc5   : > { %4893 = vperm.xlu2 %6057, %v6150_v17   ;;  %v4789_v17 = vld [vmem:[#allocation4 + $0x1d8] sm:$0xff] }
 0xcc6   : > { %4873 = vperm.xlu1 %6056, %v6152_v51   ;;  %v4968_v51 = vld [vmem:[#allocation14 + $0x70] sm:$0xff]  ;;  %6183 = vrcp.f32 %v4789_v17 }
 0xcc7   : > { %4848 = vperm.xlu0 %6055, %v6154_v28   ;;  %v4419_v33 = vpop.permute.xlu2 %4418  ;;  %4975 = vmatpush.msra.mxu0 %v4968_v51  ;;  %6185 = vrcp.f32 %v4785_v11 }
 0xcc8   : > { %v4440_v2 = vmul.f32 %v4419_v33, %v4344_v4  ;;  %v4364_v10 = vpop.permute.xlu1 %4363  ;;  %5465 = vmatpush.msra.mxu2 %v4968_v51  ;;  %5466 = vmatpush.msra.mxu3 %v4968_v51 }
 0xcc9   : > { %v4429_v0 = vmul.f32 %v4364_v10, %v4333_v44  ;;  %v4354_v60 = vpop.permute.xlu0 %4353  ;;  %v4345_v44 = vld [vmem:[#allocation5 + $0x78] sm:$0xff]  ;;  %4976 = vmatpush.msra.mxu0 %v4967_v3  ;;  %5464 = vmatpush.msra.mxu1 %v4968_v51 }
 0xcca   : > { %4456 = vst.msk [vmem:[#allocation5 + $0x70] sm:$0xff] %vm851_vm1, %v4440_v2  ;;  %v4427_v61 = vmul.f32 %v4354_v60, %v4331_v25  ;;  %v6180_v60 = vpop.eup %6179  ;;  %5468 = vmatpush.msra.mxu2 %v4967_v3  ;;  %5469 = vmatpush.msra.mxu3 %v4967_v3 }
 0xccb   : > { %4445 = vst.msk [vmem:[#allocation5 + $0x18] sm:$0xff] %vm851_vm1, %v4429_v0  ;;  %v4490_v2 = vld [vmem:[#allocation5] sm:$0xff]  ;;  %5467 = vmatpush.msra.mxu1 %v4967_v3 }
 0xccc   : > { %4443 = vst.msk [vmem:[#allocation5 + $0x8] sm:$0xff] %vm851_vm1, %v4427_v61  ;;  %v6182_v61 = vpop.eup %6181 }
 0xccd   : > { %4723 = vperm.xlu2 %6057, %v6156_v42   ;;  %v4966_v42 = vld [vmem:[#allocation14 + $0x60] sm:$0xff] }
 0xcce   : > { %4698 = vperm.xlu1 %6056, %v6158_v53   ;;  %4977 = vmatpush.msra.mxu0 %v4966_v42  ;;  %v6184_v53 = vpop.eup %6183 }
 0xccf   : > { %4678 = vperm.xlu0 %6055, %v6160_v30   ;;  %v4514_v19 = vpop.permute.xlu2 %4513  ;;  %v4964_v30 = vld [vmem:[#allocation14 + $0x50] sm:$0xff]  ;;  %5471 = vmatpush.msra.mxu2 %v4966_v42  ;;  %v6186_v1 = vpop.eup %6185 }
 0xcd0   : > { %v4384_v36 = vpop.permute.xlu1 %4383  ;;  %4978 = vmatpush.msra.mxu0 %v4965_v48  ;;  %5472 = vmatpush.msra.mxu3 %v4966_v42 }
 0xcd1   : > { %v4433_v31 = vmul.f32 %v4384_v36, %v4337_v45  ;;  %v4379_v58 = vpop.permute.xlu0 %4378  ;;  %v4963_v45 = vld [vmem:[#allocation14 + $0x48] sm:$0xff]  ;;  %5474 = vmatpush.msra.mxu2 %v4965_v48  ;;  %5470 = vmatpush.msra.mxu1 %v4966_v42 }
 0xcd2   : > { %v4432_v23 = vmul.f32 %v4379_v58, %v4336_v27  ;;  %4979 = vmatpush.msra.mxu0 %v4964_v30  ;;  %v4493_v27 = vld [vmem:[#allocation5 + $0x18] sm:$0xff]  ;;  %5475 = vmatpush.msra.mxu3 %v4965_v48  ;;  %v4492_v58 = vld [vmem:[#allocation5 + $0x10] sm:$0xff] }
 0xcd3   : > { %v4491_v29 = vld [vmem:[#allocation5 + $0x8] sm:$0xff]  ;;  %4449 = vst.msk [vmem:[#allocation5 + $0x38] sm:$0xff] %vm851_vm1, %v4433_v31  ;;  %5477 = vmatpush.msra.mxu2 %v4964_v30  ;;  %5473 = vmatpush.msra.mxu1 %v4965_v48 }
 0xcd4   : > { %v4587_v26 = vmul.f32 %v4514_v19, %v4491_v29  ;;  %4448 = vst.msk [vmem:[#allocation5 + $0x30] sm:$0xff] %vm851_vm1, %v4432_v23  ;;  %4980 = vmatpush.msra.mxu0 %v4963_v45  ;;  %v4962_v23 = vld [vmem:[#allocation14 + $0x40] sm:$0xff]  ;;  %5478 = vmatpush.msra.mxu3 %v4964_v30  ;;  %v4960_v29 = vld [vmem:[#allocation14 + $0x30] sm:$0xff] }
 0xcd5   : > { %4853 = vperm.xlu2 %6057, %v6162_v46   ;;  %5480 = vmatpush.msra.mxu2 %v4963_v45 }
 0xcd6   : > { %4603 = vst.msk [vmem:[#allocation5 + $0x8] sm:$0xff] %vm2459_vm3, %v4587_v26  ;;  %4833 = vperm.xlu1 %6056, %v6164_v34   ;;  %4981 = vmatpush.msra.mxu0 %v4962_v23  ;;  %v4961_v34 = vld [vmem:[#allocation14 + $0x38] sm:$0xff] }
 0xcd7   : > { %4743 = vperm.xlu0 %6055, %v6166_v5   ;;  %v4529_v59 = vpop.permute.xlu2 %4528  ;;  %5481 = vmatpush.msra.mxu3 %v4963_v45 }
 0xcd8   : > { %v4590_v12 = vmul.f32 %v4529_v59, %v4494_v55  ;;  %v4399_v62 = vpop.permute.xlu1 %4398  ;;  %4982 = vmatpush.msra.mxu0 %v4961_v34  ;;  %5483 = vmatpush.msra.mxu2 %v4962_v23 }
 0xcd9   : > { %v4436_v57 = vmul.f32 %v4399_v62, %v4340_v32  ;;  %v4394_v7 = vpop.permute.xlu0 %4393  ;;  %5484 = vmatpush.msra.mxu3 %v4962_v23  ;;  %5476 = vmatpush.msra.mxu1 %v4964_v30 }
 0xcda   : > { %4606 = vst.msk [vmem:[#allocation5 + $0x20] sm:$0xff] %vm2459_vm3, %v4590_v12  ;;  %v4435_v56 = vmul.f32 %v4394_v7, %v4339_v49  ;;  %v4497_v20 = vld [vmem:[#allocation5 + $0x38] sm:$0xff]  ;;  %4983 = vmatpush.msra.mxu0 %v4960_v29  ;;  %5486 = vmatpush.msra.mxu2 %v4961_v34  ;;  %v4495_v12 = vld [vmem:[#allocation5 + $0x28] sm:$0xff]  ;;  %v4958_v7 = vld [vmem:[#allocation14 + $0x20] sm:$0xff] }
 0xcdb   : > { %4452 = vst.msk [vmem:[#allocation5 + $0x50] sm:$0xff] %vm851_vm1, %v4436_v57  ;;  %v4496_v59 = vld [vmem:[#allocation5 + $0x30] sm:$0xff]  ;;  %5487 = vmatpush.msra.mxu3 %v4961_v34  ;;  %5479 = vmatpush.msra.mxu1 %v4963_v45 }
 0xcdc   : > { %4451 = vst.msk [vmem:[#allocation5 + $0x48] sm:$0xff] %vm851_vm1, %v4435_v56  ;;  %4984 = vmatpush.msra.mxu0 %v4959_v13  ;;  %5489 = vmatpush.msra.mxu2 %v4960_v29  ;;  %v4955_v56 = vld [vmem:[#allocation14 + $0x8] sm:$0xff] }
 0xcdd   : > { %4683 = vperm.xlu2 %6057, %v6168_v52   ;;  %5490 = vmatpush.msra.mxu3 %v4960_v29  ;;  %v4956_v52 = vld [vmem:[#allocation14 + $0x10] sm:$0xff] }
 0xcde   : > { %4898 = vperm.xlu1 %6056, %v6170_v24   ;;  %4985 = vmatpush.msra.mxu0 %v4958_v7 }
 0xcdf   : > { %4878 = vperm.xlu0 %6055, %v6172_v16   ;;  %v4544_v37 = vpop.permute.xlu2 %4543  ;;  %5492 = vmatpush.msra.mxu2 %v4959_v13 }
 0xce0   : > { %v4593_v9 = vmul.f32 %v4544_v37, %v4497_v20  ;;  %v4414_v47 = vpop.permute.xlu1 %4413  ;;  %5493 = vmatpush.msra.mxu3 %v4959_v13  ;;  %4986 = vmatpush.msra.mxu0 %v4957_v22 }
 0xce1   : > { %v4439_v6 = vmul.f32 %v4414_v47, %v4343_v54  ;;  %v4409_v38 = vpop.permute.xlu0 %4408  ;;  %5482 = vmatpush.msra.mxu1 %v4962_v23  ;;  %5495 = vmatpush.msra.mxu2 %v4958_v7  ;;  %v4498_v54 = vld [vmem:[#allocation5 + $0x40] sm:$0xff] }
 0xce2   : > { %4609 = vst.msk [vmem:[#allocation5 + $0x38] sm:$0xff] %vm2459_vm3, %v4593_v9  ;;  %v4438_v40 = vmul.f32 %v4409_v38, %v4342_v43  ;;  %v4500_v4 = vld [vmem:[#allocation5 + $0x50] sm:$0xff]  ;;  %5496 = vmatpush.msra.mxu3 %v4958_v7  ;;  %4987 = vmatpush.msra.mxu0 %v4956_v52  ;;  %v4954_v43 = vld [vmem:[#allocation14] sm:$0xff]  ;;  %v4501_v9 = vld [vmem:[#allocation5 + $0x58] sm:$0xff] }
 0xce3   : > { %4455 = vst.msk [vmem:[#allocation5 + $0x68] sm:$0xff] %vm851_vm1, %v4439_v6  ;;  %5485 = vmatpush.msra.mxu1 %v4961_v34  ;;  %v4499_v8 = vld [vmem:[#allocation5 + $0x48] sm:$0xff]  ;;  %5498 = vmatpush.msra.mxu2 %v4957_v22  ;;  %v4654_v48 = vld [vmem:[#allocation5 + $0x20] sm:$0xff] }
 0xce4   : > { %4454 = vst.msk [vmem:[#allocation5 + $0x60] sm:$0xff] %vm851_vm1, %v4438_v40  ;;  %5499 = vmatpush.msra.mxu3 %v4957_v22  ;;  %4988 = vmatpush.msra.mxu0 %v4955_v56 }
 0xce5   : > { %4858 = vperm.xlu2 %6057, %v6174_v35   ;;  %5488 = vmatpush.msra.mxu1 %v4960_v29 }
 0xce6   : > { %4838 = vperm.xlu1 %6056, %v6176_v41   ;;  %5501 = vmatpush.msra.mxu2 %v4956_v52 }
 0xce7   : > { %4703 = vperm.xlu0 %6055, %v6178_v50   ;;  %v4559_v28 = vpop.permute.xlu2 %4558  ;;  %5502 = vmatpush.msra.mxu3 %v4956_v52 }
 0xce8   : > { %v4596_v33 = vmul.f32 %v4559_v28, %v4500_v4  ;;  %v4509_v25 = vpop.permute.xlu1 %4508  ;;  %4989 = vmatpush.msra.mxu0 %v4954_v43  ;;  %5491 = vmatpush.msra.mxu1 %v4959_v13  ;;  %v4504_v28 = vld [vmem:[#allocation5 + $0x70] sm:$0xff] }
 0xce9   : > { %v4586_v10 = vmul.f32 %v4509_v25, %v4490_v2  ;;  %v4424_v0 = vpop.permute.xlu0 %4423  ;;  %5504 = vmatpush.msra.mxu2 %v4955_v56  ;;  %5505 = vmatpush.msra.mxu3 %v4955_v56 }
 0xcea   : > { %4612 = vst.msk [vmem:[#allocation5 + $0x50] sm:$0xff] %vm2459_vm3, %v4596_v33  ;;  %v4441_v18 = vmul.f32 %v4424_v0, %v4345_v44  ;;  %5494 = vmatpush.msra.mxu1 %v4958_v7  ;;  %v4503_v38 = vld [vmem:[#allocation5 + $0x68] sm:$0xff] }
 0xceb   : > { %4602 = vst.msk [vmem:[#allocation5] sm:$0xff] %vm2459_vm3, %v4586_v10  ;;  %5507 = vmatpush.msra.mxu2 %v4954_v43  ;;  %5508 = vmatpush.msra.mxu3 %v4954_v43  ;;  %v4502_v40 = vld [vmem:[#allocation5 + $0x60] sm:$0xff] }
 0xcec   : > { %4457 = vst.msk [vmem:[#allocation5 + $0x78] sm:$0xff] %vm851_vm1, %v4441_v18  ;;  %5497 = vmatpush.msra.mxu1 %v4957_v22 }
 0xced   : > { %4843 = vperm.xlu2 %6057, %v6180_v60  }
 0xcee   : > { %4903 = vperm.xlu1 %6056, %v6182_v61   ;;  %5500 = vmatpush.msra.mxu1 %v4956_v52 }
 0xcef   : > { %4883 = vperm.xlu0 %6055, %v6184_v53   ;;  %v9486_v19 = vpop.permute.xlu2 %4708 }
 0xcf0   : > { %v4524_v36 = vpop.permute.xlu1 %4523  ;;  %5503 = vmatpush.msra.mxu1 %v4955_v56 }
 0xcf1   : > { %v4589_v31 = vmul.f32 %v4524_v36, %v4493_v27  ;;  %v4519_v39 = vpop.permute.xlu0 %4518 }
 0xcf2   : > { %v4588_v46 = vmul.f32 %v4519_v39, %v4492_v58  ;;  %v4650_v26 = vld [vmem:[#allocation5] sm:$0xff]  ;;  %5506 = vmatpush.msra.mxu1 %v4954_v43 }
 0xcf3   : > { %4605 = vst.msk [vmem:[#allocation5 + $0x18] sm:$0xff] %vm2459_vm3, %v4589_v31 }
 0xcf4   : > { %4604 = vst.msk [vmem:[#allocation5 + $0x10] sm:$0xff] %vm2459_vm3, %v4588_v46 }
 0xcf7   : > { %4863 = vperm.xlu0 %6055, %v6186_v1   ;;  %v4669_v5 = vpop.permute.xlu2 %4668 }
 0xcf8   : > { %v4746_v32 = vmul.f32 %v4669_v5, %v4650_v26  ;;  %v4539_v55 = vpop.permute.xlu1 %4538 }
 0xcf9   : > { %v4592_v49 = vmul.f32 %v4539_v55, %v4496_v59  ;;  %v4534_v62 = vpop.permute.xlu0 %4533  ;;  %v4505_v59 = vld [vmem:[#allocation5 + $0x78] sm:$0xff] }
 0xcfa   : > { %4762 = vst.msk [vmem:[#allocation5] sm:$0xff] %vm3360_vm4, %v4746_v32  ;;  %v4591_v57 = vmul.f32 %v4534_v62, %v4495_v12  ;;  %v4651_v32 = vld [vmem:[#allocation5 + $0x8] sm:$0xff]  ;;  %v4653_v43 = vld [vmem:[#allocation5 + $0x18] sm:$0xff] }
 0xcfb   : > { %4608 = vst.msk [vmem:[#allocation5 + $0x30] sm:$0xff] %vm2459_vm3, %v4592_v49 }
 0xcfc   : > { %4607 = vst.msk [vmem:[#allocation5 + $0x28] sm:$0xff] %vm2459_vm3, %v4591_v57 }
 0xcff   : > { %v4734_v14 = vpop.permute.xlu2 %4733 }
 0xd00   : > { %v4554_v24 = vpop.permute.xlu1 %4553 }
 0xd01   : > { %v4595_v16 = vmul.f32 %v4554_v24, %v4499_v8  ;;  %v4549_v37 = vpop.permute.xlu0 %4548  ;;  %v4810_v18 = vld [vmem:[#allocation5] sm:$0xff]  ;;  %v4660_v8 = vld [vmem:[#allocation5 + $0x50] sm:$0xff] }
 0xd02   : > { %v4594_v20 = vmul.f32 %v4549_v37, %v4498_v54 }
 0xd03   : > { %4611 = vst.msk [vmem:[#allocation5 + $0x48] sm:$0xff] %vm2459_vm3, %v4595_v16  ;;  %v4655_v51 = vld [vmem:[#allocation5 + $0x28] sm:$0xff] }
 0xd04   : > { %4610 = vst.msk [vmem:[#allocation5 + $0x40] sm:$0xff] %vm2459_vm3, %v4594_v20 }
 0xd07   : > { %v4564_v47 = vpop.permute.xlu2 %4563 }
 0xd08   : > { %v4597_v6 = vmul.f32 %v4564_v47, %v4501_v9  ;;  %v4574_v21 = vpop.permute.xlu1 %4573 }
 0xd09   : > { %v4599_v35 = vmul.f32 %v4574_v21, %v4503_v38  ;;  %v4569_v15 = vpop.permute.xlu0 %4568 }
 0xd0a   : > { %4613 = vst.msk [vmem:[#allocation5 + $0x58] sm:$0xff] %vm2459_vm3, %v4597_v6  ;;  %v4598_v41 = vmul.f32 %v4569_v15, %v4502_v40  ;;  %v4659_v11 = vld [vmem:[#allocation5 + $0x48] sm:$0xff] }
 0xd0b   : > { %4615 = vst.msk [vmem:[#allocation5 + $0x68] sm:$0xff] %vm2459_vm3, %v4599_v35  ;;  %v4658_v17 = vld [vmem:[#allocation5 + $0x40] sm:$0xff] }
 0xd0c   : > { %4614 = vst.msk [vmem:[#allocation5 + $0x60] sm:$0xff] %vm2459_vm3, %v4598_v41  ;;  %v4754_v50 = vmul.f32 %v9486_v19, %v4658_v17  ;;  %v4656_v17 = vld [vmem:[#allocation5 + $0x30] sm:$0xff] }
 0xd0e   : > { %4770 = vst.msk [vmem:[#allocation5 + $0x40] sm:$0xff] %vm3360_vm4, %v4754_v50 }
 0xd0f   : > { %v4694_v63 = vpop.permute.xlu2 %4693 }
 0xd10   : > { %v4751_v3 = vmul.f32 %v4694_v63, %v4655_v51  ;;  %v4579_v4 = vpop.permute.xlu1 %4578  ;;  %v4652_v63 = vld [vmem:[#allocation5 + $0x10] sm:$0xff] }
 0xd11   : > { %v4600_v44 = vmul.f32 %v4579_v4, %v4504_v28  ;;  %v4729_v33 = vpop.permute.xlu0 %4728  ;;  %v4661_v29 = vld [vmem:[#allocation5 + $0x58] sm:$0xff] }
 0xd12   : > { %4767 = vst.msk [vmem:[#allocation5 + $0x28] sm:$0xff] %vm3360_vm4, %v4751_v3  ;;  %v4663_v25 = vld [vmem:[#allocation5 + $0x68] sm:$0xff] }
 0xd13   : > { %4616 = vst.msk [vmem:[#allocation5 + $0x70] sm:$0xff] %vm2459_vm3, %v4600_v44  ;;  %v4662_v2 = vld [vmem:[#allocation5 + $0x60] sm:$0xff]  ;;  %v4759_v10 = vmul.f32 %v4734_v14, %v4663_v25 }
 0xd14   : > { %v4758_v0 = vmul.f32 %v4729_v33, %v4662_v2 }
 0xd15   : > { %4775 = vst.msk [vmem:[#allocation5 + $0x68] sm:$0xff] %vm3360_vm4, %v4759_v10  ;;  %v4818_v46 = vld [vmem:[#allocation5 + $0x40] sm:$0xff] }
 0xd16   : > { %4774 = vst.msk [vmem:[#allocation5 + $0x60] sm:$0xff] %vm3360_vm4, %v4758_v0 }
 0xd17   : > { %v4829_v60 = vpop.permute.xlu2 %4828 }
 0xd18   : > { %v4906_v42 = vmul.f32 %v4829_v60, %v4810_v18  ;;  %v4714_v61 = vpop.permute.xlu1 %4713 }
 0xd19   : > { %v4755_v53 = vmul.f32 %v4714_v61, %v4659_v11  ;;  %v4689_v30 = vpop.permute.xlu0 %4688  ;;  %v4815_v22 = vld [vmem:[#allocation5 + $0x28] sm:$0xff] }
 0xd1a   : > { %4922 = vst.msk [vmem:[#allocation5] sm:$0xff] %vm4261_vm5, %v4906_v42  ;;  %v4750_v45 = vmul.f32 %v4689_v30, %v4654_v48  ;;  %v4664_v56 = vld [vmem:[#allocation5 + $0x70] sm:$0xff] }
 0xd1b   : > { %4771 = vst.msk [vmem:[#allocation5 + $0x48] sm:$0xff] %vm3360_vm4, %v4755_v53 }
 0xd1c   : > { %4766 = vst.msk [vmem:[#allocation5 + $0x20] sm:$0xff] %vm3360_vm4, %v4750_v45  ;;  %v4823_v27 = vld [vmem:[#allocation5 + $0x68] sm:$0xff] }
 0xd1d   : > { %v4822_v58 = vld [vmem:[#allocation5 + $0x60] sm:$0xff] }
 0xd1f   : > { %v4894_v19 = vpop.permute.xlu2 %4893 }
 0xd20   : > { %v4919_v36 = vmul.f32 %v4894_v19, %v4823_v27  ;;  %v4889_v31 = vpop.permute.xlu1 %4888 }
 0xd21   : > { %v4918_v39 = vmul.f32 %v4889_v31, %v4822_v58  ;;  %v4869_v23 = vpop.permute.xlu0 %4868  ;;  %v4938_v1 = vld [vmem:[#allocation5] sm:$0xff] }
 0xd22   : > { %4935 = vst.msk [vmem:[#allocation5 + $0x68] sm:$0xff] %vm4261_vm5, %v4919_v36  ;;  %v4914_v34 = vmul.f32 %v4869_v23, %v4818_v46  ;;  %4990 = vmatmul.f32.vlgmr.msra.gmra.mxu0 %v4938_v1  ;;  %v4819_v6 = vld [vmem:[#allocation5 + $0x48] sm:$0xff]  ;;  %v4657_v1 = vld [vmem:[#allocation5 + $0x38] sm:$0xff] }
 0xd23   : > { %4934 = vst.msk [vmem:[#allocation5 + $0x60] sm:$0xff] %vm4261_vm5, %v4918_v39  ;;  %v4814_v21 = vld [vmem:[#allocation5 + $0x20] sm:$0xff] }
 0xd24   : > { %4930 = vst.msk [vmem:[#allocation5 + $0x40] sm:$0xff] %vm4261_vm5, %v4914_v34 }
 0xd27   : > { %v4724_v13 = vpop.permute.xlu2 %4723 }
 0xd28   : > { %v4757_v5 = vmul.f32 %v4724_v13, %v4661_v29  ;;  %v4674_v26 = vpop.permute.xlu1 %4673 }
 0xd29   : > { %v4747_v55 = vmul.f32 %v4674_v26, %v4651_v32  ;;  %v4584_v49 = vpop.permute.xlu0 %4583  ;;  %v4951_v37 = vld [vmem:[#allocation5 + $0x68] sm:$0xff] }
 0xd2a   : > { %4773 = vst.msk [vmem:[#allocation5 + $0x58] sm:$0xff] %vm3360_vm4, %v4757_v5  ;;  %v4601_v12 = vmul.f32 %v4584_v49, %v4505_v59  ;;  %v4950_v62 = vld [vmem:[#allocation5 + $0x60] sm:$0xff] }
 0xd2b   : > { %4763 = vst.msk [vmem:[#allocation5 + $0x8] sm:$0xff] %vm3360_vm4, %v4747_v55  ;;  %v4946_v57 = vld [vmem:[#allocation5 + $0x40] sm:$0xff]  ;;  %5026 = vmatmul.f32.vlgmr.msra.gmra.mxu3 %v4950_v62 }
 0xd2c   : > { %4617 = vst.msk [vmem:[#allocation5 + $0x78] sm:$0xff] %vm2459_vm3, %v4601_v12  ;;  %5014 = vmatmul.f32.vlgmr.msra.gmra.mxu2 %v4946_v57 }
 0xd2f   : > { %v4854_v7 = vpop.permute.xlu2 %4853 }
 0xd30   : > { %v4911_v52 = vmul.f32 %v4854_v7, %v4815_v22  ;;  %v4739_v14 = vpop.permute.xlu1 %4738 }
 0xd31   : > { %v4760_v24 = vmul.f32 %v4739_v14, %v4664_v56  ;;  %v4719_v16 = vpop.permute.xlu0 %4718  ;;  %v4821_v59 = vld [vmem:[#allocation5 + $0x58] sm:$0xff] }
 0xd32   : > { %4927 = vst.msk [vmem:[#allocation5 + $0x28] sm:$0xff] %vm4261_vm5, %v4911_v52  ;;  %v4756_v54 = vmul.f32 %v4719_v16, %v4660_v8  ;;  %v4811_v10 = vld [vmem:[#allocation5 + $0x8] sm:$0xff]  ;;  %v6058_v8 = vld [vmem:[%s9984_s4] ss:$0 sm:$0xff] }
 0xd33   : > { %4776 = vst.msk [vmem:[#allocation5 + $0x70] sm:$0xff] %vm3360_vm4, %v4760_v24  ;;  %5029 = vmatmul.f32.gmra.mxu3 %v4951_v37  ;;  %v4665_v60 = vld [vmem:[#allocation5 + $0x78] sm:$0xff] }
 0xd34   : > { %4772 = vst.msk [vmem:[#allocation5 + $0x50] sm:$0xff] %vm3360_vm4, %v4756_v54 }
 0xd37   : > { %v4684_v20 = vpop.permute.xlu2 %4683 }
 0xd38   : > { %v4749_v9 = vmul.f32 %v4684_v20, %v4653_v43  ;;  %v4874_v47 = vpop.permute.xlu1 %4873 }
 0xd39   : > { %v4915_v38 = vmul.f32 %v4874_v47, %v4819_v6  ;;  %v4849_v35 = vpop.permute.xlu0 %4848  ;;  %v4943_v53 = vld [vmem:[#allocation5 + $0x28] sm:$0xff] }
 0xd3a   : > { %4765 = vst.msk [vmem:[#allocation5 + $0x18] sm:$0xff] %vm3360_vm4, %v4749_v9  ;;  %v4910_v40 = vmul.f32 %v4849_v35, %v4814_v21  ;;  %v4824_v48 = vld [vmem:[#allocation5 + $0x70] sm:$0xff] }
 0xd3b   : > { %4931 = vst.msk [vmem:[#allocation5 + $0x48] sm:$0xff] %vm4261_vm5, %v4915_v38  ;;  %v4820_v19 = vld [vmem:[#allocation5 + $0x50] sm:$0xff] }
 0xd3c   : > { %4926 = vst.msk [vmem:[#allocation5 + $0x20] sm:$0xff] %vm4261_vm5, %v4910_v40 }
 0xd3f   : > { %v4859_v15 = vpop.permute.xlu2 %4858 }
 0xd40   : > { %v4699_v41 = vpop.permute.xlu1 %4698 }
 0xd41   : > { %v4752_v50 = vmul.f32 %v4699_v41, %v4656_v17  ;;  %v4679_v51 = vpop.permute.xlu0 %4678  ;;  %v4813_v33 = vld [vmem:[#allocation5 + $0x18] sm:$0xff] }
 0xd42   : > { %v4748_v3 = vmul.f32 %v4679_v51, %v4652_v63  ;;  %v4947_v28 = vld [vmem:[#allocation5 + $0x48] sm:$0xff] }
 0xd43   : > { %4768 = vst.msk [vmem:[#allocation5 + $0x30] sm:$0xff] %vm3360_vm4, %v4752_v50  ;;  %v4942_v4 = vld [vmem:[#allocation5 + $0x20] sm:$0xff]  ;;  %5017 = vmatmul.f32.gmra.mxu2 %v4947_v28 }
 0xd44   : > { %4764 = vst.msk [vmem:[#allocation5 + $0x10] sm:$0xff] %vm3360_vm4, %v4748_v3  ;;  %5002 = vmatmul.f32.vlgmr.msra.gmra.mxu1 %v4942_v4 }
 0xd47   : > { %v4844_v44 = vpop.permute.xlu2 %4843 }
 0xd48   : > { %v4909_v25 = vmul.f32 %v4844_v44, %v4813_v33  ;;  %v4834_v2 = vpop.permute.xlu1 %4833 }
 0xd49   : > { %v4907_v0 = vmul.f32 %v4834_v2, %v4811_v10  ;;  %v4744_v18 = vpop.permute.xlu0 %4743 }
 0xd4a   : > { %v4816_v42 = vld [vmem:[#allocation5 + $0x30] sm:$0xff]  ;;  %4925 = vst.msk [vmem:[#allocation5 + $0x18] sm:$0xff] %vm4261_vm5, %v4909_v25  ;;  %v4761_v61 = vmul.f32 %v4744_v18, %v4665_v60 }
 0xd4b   : > { %v4912_v11 = vmul.f32 %v4859_v15, %v4816_v42  ;;  %4923 = vst.msk [vmem:[#allocation5 + $0x8] sm:$0xff] %vm4261_vm5, %v4907_v0  ;;  %v4812_v46 = vld [vmem:[#allocation5 + $0x10] sm:$0xff] }
 0xd4c   : > { %4777 = vst.msk [vmem:[#allocation5 + $0x78] sm:$0xff] %vm3360_vm4, %v4761_v61  ;;  %5005 = vmatmul.f32.gmra.mxu1 %v4943_v53 }
 0xd4d   : > { %4928 = vst.msk [vmem:[#allocation5 + $0x30] sm:$0xff] %vm4261_vm5, %v4912_v11 }
 0xd50   : > { %v4899_v30 = vpop.permute.xlu1 %4898 }
 0xd51   : > { %v4920_v45 = vmul.f32 %v4899_v30, %v4824_v48  ;;  %v4879_v27 = vpop.permute.xlu0 %4878  ;;  %v4941_v52 = vld [vmem:[#allocation5 + $0x18] sm:$0xff] }
 0xd52   : > { %v4916_v36 = vmul.f32 %v4879_v27, %v4820_v19  ;;  %v4939_v31 = vld [vmem:[#allocation5 + $0x8] sm:$0xff] }
 0xd53   : > { %4936 = vst.msk [vmem:[#allocation5 + $0x70] sm:$0xff] %vm4261_vm5, %v4920_v45  ;;  %4993 = vmatmul.f32.gmra.mxu0 %v4939_v31  ;;  %v4825_v32 = vld [vmem:[#allocation5 + $0x78] sm:$0xff] }
 0xd54   : > { %4932 = vst.msk [vmem:[#allocation5 + $0x50] sm:$0xff] %vm4261_vm5, %v4916_v36  ;;  %v4944_v58 = vld [vmem:[#allocation5 + $0x30] sm:$0xff] }
 0xd55   : > { %5008 = vmatmul.f32.gmra.mxu1 %v4944_v58 }
 0xd58   : > { %v4839_v39 = vpop.permute.xlu1 %4838 }
 0xd59   : > { %v4908_v23 = vmul.f32 %v4839_v39, %v4812_v46  ;;  %v4704_v34 = vpop.permute.xlu0 %4703 }
 0xd5a   : > { %v4753_v29 = vmul.f32 %v4704_v34, %v4657_v1  ;;  %v4952_v13 = vld [vmem:[#allocation5 + $0x70] sm:$0xff] }
 0xd5b   : > { %4924 = vst.msk [vmem:[#allocation5 + $0x10] sm:$0xff] %vm4261_vm5, %v4908_v23  ;;  %v4948_v5 = vld [vmem:[#allocation5 + $0x50] sm:$0xff]  ;;  %5032 = vmatmul.f32.gmra.mxu3 %v4952_v13 }
 0xd5c   : > { %4769 = vst.msk [vmem:[#allocation5 + $0x38] sm:$0xff] %vm3360_vm4, %v4753_v29  ;;  %5020 = vmatmul.f32.gmra.mxu2 %v4948_v5 }
 0xd60   : > { %v4904_v26 = vpop.permute.xlu1 %4903 }
 0xd61   : > { %v4921_v55 = vmul.f32 %v4904_v26, %v4825_v32  ;;  %v4884_v49 = vpop.permute.xlu0 %4883 }
 0xd62   : > { %v4917_v12 = vmul.f32 %v4884_v49, %v4821_v59  ;;  %v4940_v62 = vld [vmem:[#allocation5 + $0x10] sm:$0xff] }
 0xd63   : > { %4937 = vst.msk [vmem:[#allocation5 + $0x78] sm:$0xff] %vm4261_vm5, %v4921_v55  ;;  %4996 = vmatmul.f32.gmra.mxu0 %v4940_v62  ;;  %v4817_v57 = vld [vmem:[#allocation5 + $0x38] sm:$0xff] }
 0xd64   : > { %4933 = vst.msk [vmem:[#allocation5 + $0x58] sm:$0xff] %vm4261_vm5, %v4917_v12 }
 0xd69   : > { %v4864_v7 = vpop.permute.xlu0 %4863 }
 0xd6a   : > { %v4913_v22 = vmul.f32 %v4864_v7, %v4817_v57  ;;  %v4953_v56 = vld [vmem:[#allocation5 + $0x78] sm:$0xff] }
 0xd6b   : > { %4999 = vmatmul.f32.gmra.mxu0 %v4941_v52  ;;  %v4949_v14 = vld [vmem:[#allocation5 + $0x58] sm:$0xff]  ;;  %5035 = vmatmul.f32.gmra.mxu3 %v4953_v56 }
 0xd6c   : > { %4929 = vst.msk [vmem:[#allocation5 + $0x38] sm:$0xff] %vm4261_vm5, %v4913_v22  ;;  %5023 = vmatmul.f32.gmra.mxu2 %v4949_v14 }
 0xd73   : > { %v4945_v24 = vld [vmem:[#allocation5 + $0x38] sm:$0xff] }
 0xd74   : > { %5011 = vmatmul.f32.gmra.mxu1 %v4945_v24 }
 0xd9f   : > { %v4991_v16 = vpop.f32.mrf.mxu0 }
 0xda0   : > { %v4992_v54 = vadd.f32 %v6058_v8, %v4991_v16 }
 0xda2   : > { %5039 = vst [vmem:[%s6762_s20] sm:$0xff] %v4992_v54 }
 0xdae   : > { %v5027_v37 = vpop.f32.mrf.mxu3 }
 0xdaf   : > { %v5015_v20 = vpop.f32.mrf.mxu2  ;;  %v5028_v43 = vadd.f32 %v6058_v8, %v5027_v37 }
 0xdb0   : > { %v5016_v9 = vadd.f32 %v6058_v8, %v5015_v20 }
 0xdb1   : > { %5051 = vst [vmem:[%s6762_s20 + $0x60] sm:$0xff] %v5028_v43 }
 0xdb2   : > { %5047 = vst [vmem:[%s6762_s20 + $0x40] sm:$0xff] %v5016_v9 }
 0xdb6   : > { %v5030_v47 = vpop.f32.mrf.mxu3 }
 0xdb7   : > { %v5031_v6 = vadd.f32 %v6058_v8, %v5030_v47 }
 0xdb9   : > { %5052 = vst [vmem:[%s6762_s20 + $0x68] sm:$0xff] %v5031_v6 }
 0xdc1   : > { %v5003_v38 = vpop.f32.mrf.mxu1 }
 0xdc2   : > { %v5004_v21 = vadd.f32 %v6058_v8, %v5003_v38 }
 0xdc4   : > { %5043 = vst [vmem:[%s6762_s20 + $0x20] sm:$0xff] %v5004_v21 }
 0xdc6   : > { %v5018_v35 = vpop.f32.mrf.mxu2 }
 0xdc7   : > { %v5019_v40 = vadd.f32 %v6058_v8, %v5018_v35 }
 0xdc9   : > { %5048 = vst [vmem:[%s6762_s20 + $0x48] sm:$0xff] %v5019_v40  ;;  %v5006_v15 = vpop.f32.mrf.mxu1 }
 0xdca   : > { %v5007_v41 = vadd.f32 %v6058_v8, %v5006_v15 }
 0xdcc   : > { %5044 = vst [vmem:[%s6762_s20 + $0x28] sm:$0xff] %v5007_v41 }
 0xdd0   : > { %v4994_v17 = vpop.f32.mrf.mxu0 }
 0xdd1   : > { %v4995_v50 = vadd.f32 %v6058_v8, %v4994_v17 }
 0xdd2   : > { %v5009_v63 = vpop.f32.mrf.mxu1 }
 0xdd3   : > { %5040 = vst [vmem:[%s6762_s20 + $0x8] sm:$0xff] %v4995_v50  ;;  %v5010_v51 = vadd.f32 %v6058_v8, %v5009_v63 }
 0xdd5   : > { %5045 = vst [vmem:[%s6762_s20 + $0x30] sm:$0xff] %v5010_v51 }
 0xdde   : > { %v5033_v3 = vpop.f32.mrf.mxu3 }
 0xddf   : > { %v5021_v28 = vpop.f32.mrf.mxu2  ;;  %v5034_v4 = vadd.f32 %v6058_v8, %v5033_v3 }
 0xde0   : > { %v5022_v44 = vadd.f32 %v6058_v8, %v5021_v28  ;;  %v4997_v33 = vpop.f32.mrf.mxu0 }
 0xde1   : > { %5053 = vst [vmem:[%s6762_s20 + $0x70] sm:$0xff] %v5034_v4  ;;  %v4998_v25 = vadd.f32 %v6058_v8, %v4997_v33 }
 0xde2   : > { %5049 = vst [vmem:[%s6762_s20 + $0x50] sm:$0xff] %v5022_v44 }
 0xde3   : > { %5041 = vst [vmem:[%s6762_s20 + $0x10] sm:$0xff] %v4998_v25 }
 0xde8   : > { %v5000_v2 = vpop.f32.mrf.mxu0 }
 0xde9   : > { %v5001_v10 = vadd.f32 %v6058_v8, %v5000_v2 }
 0xdeb   : > { %5042 = vst [vmem:[%s6762_s20 + $0x18] sm:$0xff] %v5001_v10 }
 0xdee   : > { %v5036_v0 = vpop.f32.mrf.mxu3 }
 0xdef   : > { %v5024_v60 = vpop.f32.mrf.mxu2  ;;  %v5037_v18 = vadd.f32 %v6058_v8, %v5036_v0 }
 0xdf0   : > { %v5025_v42 = vadd.f32 %v6058_v8, %v5024_v60 }
 0xdf1   : > { %5054 = vst [vmem:[%s6762_s20 + $0x78] sm:$0xff] %v5037_v18  ;;  %v5012_v61 = vpop.f32.mrf.mxu1 }
 0xdf2   : > { %5050 = vst [vmem:[%s6762_s20 + $0x58] sm:$0xff] %v5025_v42  ;;  %v5013_v11 = vadd.f32 %v6058_v8, %v5012_v61 }
 0xdf4   : > { %5046 = vst [vmem:[%s6762_s20 + $0x38] sm:$0xff] %v5013_v11 }
 0xdf5 PF: > { %s9985_s13 = sld [smem:[#allocation23_spill]]  ;;  %s5070_s2 = sshll.u32 %s6762_s20, 4  ;;  %s5071_s2 = int_to_ptr.vmem [resolvable:$true] %s5070_s2 }
 0xdf6   : > { %s9986_s17 = sld [smem:[#allocation24_spill]]  ;;  %s5056_s11 = scalar_lea.sflag [#allocation8], %s6736_s7 }
 0xdf7   : > { %s9988_s24 = sld [smem:[#allocation101_spill]] }
 0xdfb   : > { %s5376_s15 = sshll.u32 %s9985_s13, 4 }
 0xdfc   : > { %s5377_s8 = sshll.u32 %s9986_s17, 5 }
 0xdfd   : > { %s5067_s18 = sadd.s32 %s5377_s8, %s5376_s15  ;;  %s9989_s19 = smov %s9988_s24 }
 0xdfe   : > { %s5378_s0 = sshll.u32 %s5067_s18, 3  ;;  %s6357_s20 = scalar_lea.hbm %s9989_s19, 512 }
 0xdff   : > { %s5069_s5 = scalar_lea.hbm %s9988_s24, %s5378_s0 }
 0xe00   : > { %s5072_s10 = sshll.u32 %s5069_s5, 4  ;;  %s5073_s10 = int_to_ptr.hbm [resolvable:$true] %s5072_s10 }
 0xe01   : > { %s6351_s28 = sshra.s32 %s5073_s10, 4  ;;  %s6352_s28 = int_to_ptr.hbm [resolvable:$true] %s6351_s28 }
 0xe02   : > { %s6353_s21 = scalar_lea.hbm %s6352_s28, 128  ;;  %p6358_p9 = scmp.lt.s32.totalorder %s6352_s28, %s9989_s19 }
 0xe03   : > { %p6354_p5 = scmp.ne.s32.totalorder %s6352_s28, %s6353_s21  ;;  %p6359_p2 = scmp.lt.s32.totalorder %s6357_s20, %s6353_s21 }
 0xe05   : > { %p6355_p11 = pnand %p6354_p5, %p6684_p7  ;;  %p6360_p10 = por %p6359_p2, %p6358_p9 }
 0xe07   : > { %p6356_p3 = pneg %p6355_p11 }
 0xe09   : > { %p6361_p13 = pnand %p6360_p10, %p6356_p3 }
 0xe0b   : > { %6364 = shalt.err (!%p6361_p13)
}
 0xe0c   : > { %s6503_s7 = smov 128   ;;  %s6504_s17 = smov 8  }
 0xe0d   : > { %5525 = dma.vmem_to_hbm [thread:$0]  (%p6684_p7), %s5071_s2, 2048, %s5073_s10, %s5056_s11, %s6503_s7, %s6503_s7, %s6504_s17  }
 0xe0e PF: > { %s9990_s15 = sld [smem:[#allocation21_spill]]  ;;  %p5555_p0 = scmp.ge.s32.totalorder %s6487_s9, 2 }
 0xe10   : > { %p5545_p4 = pnand %p5555_p0, %p6691_p12 }
 0xe12   : > { %p5546_p8 = pneg %p5545_p4 }
 0xe14   : > { %s5087_s18 = sand.u32 1, %s9990_s15  }
 0xe15   : > { %s5088_s0 = scalar_lea.sflag [#allocation8], %s5087_s18 }
 0xe16   : > { %6434 = dma.done.wait (%p5546_p8), %s5088_s0, 2048  }
 0xe17   : > { %6436 = vsyncadd (%p5546_p8), %s5088_s0, 4294965248  ;;  %s26_s9 = sadd.s32 1, %s6487_s9   ;;  %s9993_s28 = sld [smem:[#allocation25_spill]] }
 0xe18   : > { %p9573_p6 = scmp.ge.s32.totalorder %s26_s9, 10   ;;  %s9994_s29 = sld [smem:[#allocation26_spill]] }
 0xe19   : > { %s9995_s2 = sld [smem:[#allocation27_spill]]  ;;  %s9998_s21 = smov %s6443_s22 }
 0xe1a   : > { %s9996_s7 = sld [smem:[#allocation28_spill]]  ;;  %s9999_s22 = smov %s6447_s23 }
 0xe1b   : > { %s9997_s8 = sld [smem:[#allocation30_spill]]  ;;  %s10000_s23 = smov %s6720_s27 }
 0xe1c   : > { %s10001_s24 = smov %s6455_s25  ;;  %s10002_s25 = smov %s6459_s26 }
 0xe1d   : > { %s10003_s26 = smov %s6700_s16  ;;  %s10004_s27 = smov %s6475_s30 }
 0xe1e   :  { %25 = sbr.rel (!%p9573_p6) target bundleno = 20 (0x14), region = 128 }
 0xe1f   : > { %s10005_s30 = smov %s9995_s2 }
 0xe23   :  { %5094 = vsyncpa [#allocation7], 1 }
 0xe24   :  { %5096 = vsyncpa [#allocation7 + $0x1], 1 }
 0xe25   :  { %5097 = vsyncpa [#allocation10], 1 }
 0xe26   :  { %5099 = vsyncpa [#allocation10 + $0x1], 1 }
 0xe27   :  { %5100 = vsyncpa [#allocation13], 1 }
 0xe28   :  { %5101 = vsyncpa [#allocation8], 1 }
 0xe29   :  { %5103 = vsyncpa [#allocation8 + $0x1], 1 }

</bundles_post_ra>
